<compile_context>
chip_gen: v7x
topology: tpu7x:2x2x1
jax: 0.10.0
libtpu: 0.0.40
codegen_flags: <defaults>
</compile_context>

<pallas_src>
import functools

import numpy as np

import jax
import jax.numpy as jnp
from jax.experimental import pallas as pl
from jax.experimental.pallas import tpu as pltpu


# ----------------------------------------------------------------------------
# Kernel: one (batch, kv-tile) grid step; heads handled as a static loop over
# leading-dim weight slabs (no lane relayouts).
# ----------------------------------------------------------------------------
def _cross_attn_kernel(ct_ref, x_ref, wq_ref, bq_ref, wk_ref, bk_ref,
                       wv_ref, bv_ref, wp_ref, bp_ref, o_ref,
                       q_scr, m_scr, l_scr, acc_scr,
                       *, num_heads, bf16_probs, approx_recip):
    kv = pl.program_id(1)
    cdt = x_ref.dtype                      # MXU-operand dtype (bf16 on fast path)

    # ---- first KV tile of this batch element: q projection + stats init ----
    @pl.when(kv == 0)
    def _init():
        ct = ct_ref[...]                                             # (Nr, C)
        for h in range(num_heads):                                   # static, small
            qh = jnp.dot(ct, wq_ref[h],                              # (Nr, hd) f32
                         preferred_element_type=jnp.float32) + bq_ref[h]
            q_scr[h] = qh.astype(q_scr.dtype)     # wq/bq already carry 1/head_dim
        m_scr[...] = jnp.full_like(m_scr, -jnp.inf)
        l_scr[...] = jnp.zeros_like(l_scr)
        acc_scr[...] = jnp.zeros_like(acc_scr)

    # ---- every KV tile: k/v projection + online-softmax update, per head ----
    x_t = x_ref[...]                                                 # (TKV, C)
    for h in range(num_heads):
        kh = (jnp.dot(x_t, wk_ref[h], preferred_element_type=jnp.float32)
              + bk_ref[h]).astype(cdt)                               # (TKV, hd)
        vh = (jnp.dot(x_t, wv_ref[h], preferred_element_type=jnp.float32)
              + bv_ref[h]).astype(cdt)                               # (TKV, hd)

        # scores: q @ k^T (rhs contracted on its last dim); scale is in wq/bq.
        s = jnp.einsum('qd,kd->qk', q_scr[h], kh,
                       preferred_element_type=jnp.float32)           # (Nr, TKV) f32

        m_prev = m_scr[h]                                            # (Nr, 1) f32
        m_new = jnp.maximum(m_prev, jnp.max(s, axis=-1, keepdims=True))
        alpha = jnp.exp(m_prev - m_new)                              # (Nr, 1) f32
        if bf16_probs:
            # bf16 probabilities (v6e/v7x): halves vreg/VMEM traffic of the largest
            # intermediate; stats / accumulation stay f32.
            p = jnp.exp((s - m_new).astype(cdt))
            row_sum = jnp.sum(p, axis=-1, keepdims=True, dtype=jnp.float32)
        else:
            # f32 element-wise path (required on v5e: no bf16 VPU/EUP).
            p32 = jnp.exp(s - m_new)
            row_sum = jnp.sum(p32, axis=-1, keepdims=True)
            p = p32.astype(cdt)

        l_scr[h] = alpha * l_scr[h] + row_sum
        acc_scr[h] = alpha * acc_scr[h] + jnp.dot(
            p, vh, preferred_element_type=jnp.float32)               # (Nr, hd) f32
        m_scr[h] = m_new

    # ---- last KV tile: normalize, fused head-merge + out-projection ---------
    @pl.when(kv == pl.num_programs(1) - 1)
    def _finalize():
        out = jnp.broadcast_to(bp_ref[...], o_ref.shape).astype(jnp.float32)
        for h in range(num_heads):
            inv_l = pl.reciprocal(l_scr[h], approx=approx_recip)     # (Nr, 1)
            oh = (acc_scr[h] * inv_l).astype(cdt)                    # (Nr, hd)
            out = out + jnp.dot(oh, wp_ref[h],                       # (Nr, C) f32
                                preferred_element_type=jnp.float32)
        o_ref[...] = out.astype(o_ref.dtype)
    # attn_drop / proj_drop with p=0.0 are the identity.


def _pick_kv_tile(n):
    # Largest "nice" KV tile that divides N; fall back to the full sequence.
    for t in (512, 256, 128):
        if n % t == 0:
            return t
    return n
    # TODO(synk): for real ViT N that is not a multiple of the tile, pad x to a
    # 128-multiple in the wrapper and mask the padded keys' scores to -inf.


# ----------------------------------------------------------------------------
# Wrapper: parameter prep (scale folding, per-head weight slabs) + pallas_call.
# ----------------------------------------------------------------------------
def cross_attention(params, x, compressed_tokens, *, num_heads,
                    compute_dtype=None, bf16_probs=None, kv_tile=None):
    """Fused CrossAttention forward. Returns (out, None) like the module."""
    B, N, C = x.shape
    Br, Nr, Cr = compressed_tokens.shape
    assert Br == B and Cr == C, "compressed_tokens must be (B, Nr, C)"
    assert C % num_heads == 0, "C must be divisible by num_heads"
    hd = C // num_heads
    H = num_heads
    out_dtype = x.dtype

    cdt = np.dtype(compute_dtype if compute_dtype is not None else x.dtype)
    is_bf16 = cdt == np.dtype(jnp.bfloat16)
    if bf16_probs is None:
        bf16_probs = is_bf16          # set False explicitly on v5e
    approx_recip = is_bf16            # exact 1/l on the f32 path

    tkv = kv_tile if kv_tile is not None else _pick_kv_tile(N)
    assert N % tkv == 0, "kv tile must divide N (pad N or pass kv_tile)"
    n_kv = N // tkv

    # Fold the effective score scale (module hd**-0.5 * sdpa default hd**-0.5 =
    # 1/hd) into the q projection once, and split every projection weight per
    # head so the kernel never reshapes/transposes the lane dim.
    scale = 1.0 / hd

    def split_out_heads(w):           # (C, C) -> (H, C, hd): heads group out cols
        return jnp.transpose(w.reshape(C, H, hd), (1, 0, 2))

    wq = split_out_heads(params["wq"] * scale).astype(cdt)
    wk = split_out_heads(params["wkv"][:, :C]).astype(cdt)
    wv = split_out_heads(params["wkv"][:, C:]).astype(cdt)
    wp = params["wp"].reshape(H, hd, C).astype(cdt)        # heads group in rows
    bq = (params["bq"] * scale).reshape(H, 1, hd).astype(jnp.float32)
    bk = params["bkv"][:C].reshape(H, 1, hd).astype(jnp.float32)
    bv = params["bkv"][C:].reshape(H, 1, hd).astype(jnp.float32)
    bp = params["bp"].reshape(1, C).astype(jnp.float32)

    xc = x.astype(cdt)
    ctc = compressed_tokens.astype(cdt)

    # Explicit VMEM budget (weights single-buffered, activations double-buffered,
    # scratch) with headroom; clipped so it is safe on v5e/v6e/v7x alike.
    csz = cdt.itemsize
    weight_bytes = (3 * H * C * hd + H * hd * C) * csz + (3 * H * hd + C) * 4
    act_bytes = 2 * (Nr * C + tkv * C) * csz + 2 * Nr * C * np.dtype(out_dtype).itemsize
    scratch_bytes = H * Nr * hd * csz + (2 * H * Nr + H * Nr * hd) * 4
    vmem_limit = int(min(max(2 * (weight_bytes + act_bytes + scratch_bytes)
                             + (4 << 20), 16 << 20), 48 << 20))

    def const_spec(shape, single_buffer):
        idx = lambda b, kv: (0,) * len(shape)
        if single_buffer:
            try:      # constant block index -> one VMEM copy, no double buffering
                return pl.BlockSpec(shape, idx,
                                    pipeline_mode=pl.Buffered(buffer_count=1))
            except (TypeError, AttributeError):
                pass
        return pl.BlockSpec(shape, idx)

    kernel = functools.partial(_cross_attn_kernel, num_heads=H,
                               bf16_probs=bool(bf16_probs),
                               approx_recip=bool(approx_recip))

    def run(single_buffer_weights):
        w = lambda s: const_spec(s, single_buffer_weights)
        return pl.pallas_call(
            kernel,
            out_shape=jax.ShapeDtypeStruct((B, Nr, C), out_dtype),
            grid=(B, n_kv),
            in_specs=[
                pl.BlockSpec((None, Nr, C), lambda b, kv: (b, 0, 0)),    # tokens
                pl.BlockSpec((None, tkv, C), lambda b, kv: (b, kv, 0)),  # x (KV-tiled)
                w((H, C, hd)), w((H, 1, hd)),                            # wq, bq (pre-scaled)
                w((H, C, hd)), w((H, 1, hd)),                            # wk, bk
                w((H, C, hd)), w((H, 1, hd)),                            # wv, bv
                w((H, hd, C)), w((1, C)),                                # wp, bp
            ],
            out_specs=pl.BlockSpec((None, Nr, C), lambda b, kv: (b, 0, 0)),
            scratch_shapes=[
                pltpu.VMEM((H, Nr, hd), cdt),          # per-head q, kv-resident
                pltpu.VMEM((H, Nr, 1), jnp.float32),   # m (running max)
                pltpu.VMEM((H, Nr, 1), jnp.float32),   # l (running denom)
                pltpu.VMEM((H, Nr, hd), jnp.float32),  # acc (running PV)
            ],
            compiler_params=pltpu.CompilerParams(
                # Batch axis is megacore-parallel (v7x has 2 TCs). Heads cannot be
                # a parallel grid axis because the fused out-projection accumulates
                # across heads into a single output tile.
                dimension_semantics=("parallel", "arbitrary"),
                vmem_limit_bytes=vmem_limit),
        )(ctc, xc, wq, bq, wk, bk, wv, bv, wp, bp)

    try:
        out = run(True)
    except Exception:   # older jax without BlockSpec pipeline_mode support
        out = run(False)
    return out, None


# ----------------------------------------------------------------------------
# Pure-JAX reference (numerical verification against the PyTorch semantics).
# ----------------------------------------------------------------------------
def cross_attention_ref(params, x, compressed_tokens, *, num_heads):
    B, N, C = x.shape
    Br, Nr, Cr = compressed_tokens.shape
    hd = C // num_heads
    scale = hd ** (-0.5)

    q = compressed_tokens @ params["wq"] + params["bq"]
    kv = x @ params["wkv"] + params["bkv"]
    k, v = kv[..., :C], kv[..., C:]
    q = q.reshape(Br, Nr, num_heads, hd).transpose(0, 2, 1, 3) * scale
    k = k.reshape(B, N, num_heads, hd).transpose(0, 2, 1, 3)
    v = v.reshape(B, N, num_heads, hd).transpose(0, 2, 1, 3)
    s = jnp.einsum("bhqd,bhkd->bhqk", q, k) * (hd ** (-0.5))
    p = jax.nn.softmax(s, axis=-1)
    o = jnp.einsum("bhqk,bhkd->bhqd", p, v)
    o = o.transpose(0, 2, 1, 3).reshape(B, Nr, Cr)
    return o @ params["wp"] + params["bp"]


if __name__ == "__main__":
    # Small shapes consistent with the module.
    B, N, C = 2, 16, 32        # x: (B, N, C)
    Nr = 8                     # compressed_tokens: (B, Nr, C)
    num_heads = 8              # head_dim = 4

    key = jax.random.PRNGKey(0)
    kx, kc, kq, kkv, kp, kpb = jax.random.split(key, 6)

    x = jax.random.normal(kx, (B, N, C), dtype=jnp.float32)
    compressed_tokens = jax.random.normal(kc, (B, Nr, C), dtype=jnp.float32)

    # Weights stored as (in, out) = W^T of torch. qkv_bias=False, proj_bias=True.
    params = {
        "wq":  0.02 * jax.random.normal(kq,  (C, C),     dtype=jnp.float32),
        "bq":  jnp.zeros((C,), dtype=jnp.float32),
        "wkv": 0.02 * jax.random.normal(kkv, (C, 2 * C), dtype=jnp.float32),
        "bkv": jnp.zeros((2 * C,), dtype=jnp.float32),
        "wp":  0.02 * jax.random.normal(kp,  (C, C),     dtype=jnp.float32),
        "bp":  0.02 * jax.random.normal(kpb, (C,),       dtype=jnp.float32),
    }

    ref = cross_attention_ref(params, x, compressed_tokens, num_heads=num_heads)

    # f32 path (exact softmax math, exact 1/l).
    out, attn = cross_attention(params, x, compressed_tokens, num_heads=num_heads)
    out = jax.block_until_ready(out)
    assert out.shape == (B, Nr, C)
    assert attn is None
    assert jnp.allclose(out, ref, atol=1e-3, rtol=1e-3), \
        "Pallas f32 output mismatch vs reference"

    # bf16 MXU-operand + bf16-probability fast path (v6e/v7x style); f32 stats.
    out_bf16, _ = cross_attention(params, x, compressed_tokens,
                                  num_heads=num_heads,
                                  compute_dtype=jnp.bfloat16)
    out_bf16 = jax.block_until_ready(out_bf16)
    assert out_bf16.shape == (B, Nr, C)
    assert out_bf16.dtype == jnp.float32
    assert jnp.allclose(out_bf16, ref, atol=5e-2, rtol=5e-2), \
        "Pallas bf16 output mismatch vs reference"

    print("KERNEL_OK")
</pallas_src>

<mosaic_0001>
module attributes {stable_mosaic.version = 11 : i64} {
  func.func @_cross_attn_kernel(%arg0: i32, %arg1: i32, %arg2: memref<1x8x32xf32, #tpu.memory_space<vmem>>, %arg3: memref<1x16x32xf32, #tpu.memory_space<vmem>>, %arg4: memref<8x32x4xf32, #tpu.memory_space<vmem>>, %arg5: memref<8x1x4xf32, #tpu.memory_space<vmem>>, %arg6: memref<8x32x4xf32, #tpu.memory_space<vmem>>, %arg7: memref<8x1x4xf32, #tpu.memory_space<vmem>>, %arg8: memref<8x32x4xf32, #tpu.memory_space<vmem>>, %arg9: memref<8x1x4xf32, #tpu.memory_space<vmem>>, %arg10: memref<8x4x32xf32, #tpu.memory_space<vmem>>, %arg11: memref<1x32xf32, #tpu.memory_space<vmem>>, %arg12: memref<1x8x32xf32, #tpu.memory_space<vmem>>, %arg13: memref<8x8x4xf32, #tpu.memory_space<vmem>>, %arg14: memref<8x8x1xf32, #tpu.memory_space<vmem>>, %arg15: memref<8x8x1xf32, #tpu.memory_space<vmem>>, %arg16: memref<8x8x4xf32, #tpu.memory_space<vmem>>) attributes {dimension_semantics = [#tpu.dimension_semantics<parallel>, #tpu.dimension_semantics<arbitrary>], iteration_bounds = array<i64: 2, 1>, scalar_prefetch = 0 : i64, scratch_operands = 4 : i64, tpu.core_type = #tpu.core_type<tc>, window_params = [{transform_indices = @transform_0, window_bounds = array<i64: 1, 8, 32>}, {transform_indices = @transform_1, window_bounds = array<i64: 1, 16, 32>}, {pipeline_mode = #tpu.pipeline_mode<synchronous>, transform_indices = @transform_2, window_bounds = array<i64: 8, 32, 4>}, {pipeline_mode = #tpu.pipeline_mode<synchronous>, transform_indices = @transform_3, window_bounds = array<i64: 8, 1, 4>}, {pipeline_mode = #tpu.pipeline_mode<synchronous>, transform_indices = @transform_4, window_bounds = array<i64: 8, 32, 4>}, {pipeline_mode = #tpu.pipeline_mode<synchronous>, transform_indices = @transform_5, window_bounds = array<i64: 8, 1, 4>}, {pipeline_mode = #tpu.pipeline_mode<synchronous>, transform_indices = @transform_6, window_bounds = array<i64: 8, 32, 4>}, {pipeline_mode = #tpu.pipeline_mode<synchronous>, transform_indices = @transform_7, window_bounds = array<i64: 8, 1, 4>}, {pipeline_mode = #tpu.pipeline_mode<synchronous>, transform_indices = @transform_8, window_bounds = array<i64: 8, 4, 32>}, {pipeline_mode = #tpu.pipeline_mode<synchronous>, transform_indices = @transform_9, window_bounds = array<i64: 1, 32>}, {transform_indices = @transform_10, window_bounds = array<i64: 1, 8, 32>}]} {
    %c0_i32 = arith.constant 0 : i32
    %0 = arith.cmpi eq, %arg1, %c0_i32 : i32
    %1 = arith.extui %0 : i1 to i32
    %c0_i32_0 = arith.constant 0 : i32
    %2 = arith.cmpi ne, %1, %c0_i32_0 : i32
    scf.if %2 {
      %c0_309 = arith.constant 0 : index
      %c0_310 = arith.constant 0 : index
      %c0_311 = arith.constant 0 : index
      %392 = vector.load %arg2[%c0_309, %c0_310, %c0_311] : memref<1x8x32xf32, #tpu.memory_space<vmem>>, vector<1x8x32xf32>
      %393 = vector.shape_cast %392 : vector<1x8x32xf32> to vector<8x32xf32>
      %c0_312 = arith.constant 0 : index
      %c0_313 = arith.constant 0 : index
      %c0_314 = arith.constant 0 : index
      %394 = vector.load %arg4[%c0_312, %c0_313, %c0_314] : memref<8x32x4xf32, #tpu.memory_space<vmem>>, vector<1x32x4xf32>
      %395 = vector.shape_cast %394 : vector<1x32x4xf32> to vector<32x4xf32>
      %cst_315 = arith.constant dense<0.000000e+00> : vector<8x4xf32>
      %396 = tpu.matmul %393, %395, %cst_315 {dimension_numbers = #tpu.dot_dimension_numbers<[1], [0], [0], [1], [0, 0, 1, 1], [], []>} : vector<8x32xf32>, vector<32x4xf32>, vector<8x4xf32> -> vector<8x4xf32>
      %c0_316 = arith.constant 0 : index
      %c0_317 = arith.constant 0 : index
      %c0_318 = arith.constant 0 : index
      %397 = vector.load %arg5[%c0_316, %c0_317, %c0_318] : memref<8x1x4xf32, #tpu.memory_space<vmem>>, vector<1x1x4xf32>
      %398 = vector.shape_cast %397 : vector<1x1x4xf32> to vector<1x4xf32>
      %399 = vector.broadcast %398 : vector<1x4xf32> to vector<8x4xf32>
      %400 = arith.addf %396, %399 : vector<8x4xf32>
      %c0_319 = arith.constant 0 : index
      %c0_320 = arith.constant 0 : index
      %c0_321 = arith.constant 0 : index
      %401 = vector.load %arg13[%c0_319, %c0_320, %c0_321] : memref<8x8x4xf32, #tpu.memory_space<vmem>>, vector<1x8x4xf32>
      %402 = vector.shape_cast %401 : vector<1x8x4xf32> to vector<8x4xf32>
      %403 = vector.shape_cast %400 : vector<8x4xf32> to vector<1x8x4xf32>
      tpu.vector_store %arg13[%c0_319, %c0_320, %c0_321], %403 {strides = array<i32>} : memref<8x8x4xf32, #tpu.memory_space<vmem>>, vector<1x8x4xf32>,
      %c1_322 = arith.constant 1 : index
      %c0_323 = arith.constant 0 : index
      %c0_324 = arith.constant 0 : index
      %404 = vector.load %arg4[%c1_322, %c0_323, %c0_324] : memref<8x32x4xf32, #tpu.memory_space<vmem>>, vector<1x32x4xf32>
      %405 = vector.shape_cast %404 : vector<1x32x4xf32> to vector<32x4xf32>
      %cst_325 = arith.constant dense<0.000000e+00> : vector<8x4xf32>
      %406 = tpu.matmul %393, %405, %cst_325 {dimension_numbers = #tpu.dot_dimension_numbers<[1], [0], [0], [1], [0, 0, 1, 1], [], []>} : vector<8x32xf32>, vector<32x4xf32>, vector<8x4xf32> -> vector<8x4xf32>
      %c1_326 = arith.constant 1 : index
      %c0_327 = arith.constant 0 : index
      %c0_328 = arith.constant 0 : index
      %407 = vector.load %arg5[%c1_326, %c0_327, %c0_328] : memref<8x1x4xf32, #tpu.memory_space<vmem>>, vector<1x1x4xf32>
      %408 = vector.shape_cast %407 : vector<1x1x4xf32> to vector<1x4xf32>
      %409 = vector.broadcast %408 : vector<1x4xf32> to vector<8x4xf32>
      %410 = arith.addf %406, %409 : vector<8x4xf32>
      %c1_329 = arith.constant 1 : index
      %c0_330 = arith.constant 0 : index
      %c0_331 = arith.constant 0 : index
      %411 = vector.load %arg13[%c1_329, %c0_330, %c0_331] : memref<8x8x4xf32, #tpu.memory_space<vmem>>, vector<1x8x4xf32>
      %412 = vector.shape_cast %411 : vector<1x8x4xf32> to vector<8x4xf32>
      %413 = vector.shape_cast %410 : vector<8x4xf32> to vector<1x8x4xf32>
      tpu.vector_store %arg13[%c1_329, %c0_330, %c0_331], %413 {strides = array<i32>} : memref<8x8x4xf32, #tpu.memory_space<vmem>>, vector<1x8x4xf32>,
      %c2_332 = arith.constant 2 : index
      %c0_333 = arith.constant 0 : index
      %c0_334 = arith.constant 0 : index
      %414 = vector.load %arg4[%c2_332, %c0_333, %c0_334] : memref<8x32x4xf32, #tpu.memory_space<vmem>>, vector<1x32x4xf32>
      %415 = vector.shape_cast %414 : vector<1x32x4xf32> to vector<32x4xf32>
      %cst_335 = arith.constant dense<0.000000e+00> : vector<8x4xf32>
      %416 = tpu.matmul %393, %415, %cst_335 {dimension_numbers = #tpu.dot_dimension_numbers<[1], [0], [0], [1], [0, 0, 1, 1], [], []>} : vector<8x32xf32>, vector<32x4xf32>, vector<8x4xf32> -> vector<8x4xf32>
      %c2_336 = arith.constant 2 : index
      %c0_337 = arith.constant 0 : index
      %c0_338 = arith.constant 0 : index
      %417 = vector.load %arg5[%c2_336, %c0_337, %c0_338] : memref<8x1x4xf32, #tpu.memory_space<vmem>>, vector<1x1x4xf32>
      %418 = vector.shape_cast %417 : vector<1x1x4xf32> to vector<1x4xf32>
      %419 = vector.broadcast %418 : vector<1x4xf32> to vector<8x4xf32>
      %420 = arith.addf %416, %419 : vector<8x4xf32>
      %c2_339 = arith.constant 2 : index
      %c0_340 = arith.constant 0 : index
      %c0_341 = arith.constant 0 : index
      %421 = vector.load %arg13[%c2_339, %c0_340, %c0_341] : memref<8x8x4xf32, #tpu.memory_space<vmem>>, vector<1x8x4xf32>
      %422 = vector.shape_cast %421 : vector<1x8x4xf32> to vector<8x4xf32>
      %423 = vector.shape_cast %420 : vector<8x4xf32> to vector<1x8x4xf32>
      tpu.vector_store %arg13[%c2_339, %c0_340, %c0_341], %423 {strides = array<i32>} : memref<8x8x4xf32, #tpu.memory_space<vmem>>, vector<1x8x4xf32>,
      %c3_342 = arith.constant 3 : index
      %c0_343 = arith.constant 0 : index
      %c0_344 = arith.constant 0 : index
      %424 = vector.load %arg4[%c3_342, %c0_343, %c0_344] : memref<8x32x4xf32, #tpu.memory_space<vmem>>, vector<1x32x4xf32>
      %425 = vector.shape_cast %424 : vector<1x32x4xf32> to vector<32x4xf32>
      %cst_345 = arith.constant dense<0.000000e+00> : vector<8x4xf32>
      %426 = tpu.matmul %393, %425, %cst_345 {dimension_numbers = #tpu.dot_dimension_numbers<[1], [0], [0], [1], [0, 0, 1, 1], [], []>} : vector<8x32xf32>, vector<32x4xf32>, vector<8x4xf32> -> vector<8x4xf32>
      %c3_346 = arith.constant 3 : index
      %c0_347 = arith.constant 0 : index
      %c0_348 = arith.constant 0 : index
      %427 = vector.load %arg5[%c3_346, %c0_347, %c0_348] : memref<8x1x4xf32, #tpu.memory_space<vmem>>, vector<1x1x4xf32>
      %428 = vector.shape_cast %427 : vector<1x1x4xf32> to vector<1x4xf32>
      %429 = vector.broadcast %428 : vector<1x4xf32> to vector<8x4xf32>
      %430 = arith.addf %426, %429 : vector<8x4xf32>
      %c3_349 = arith.constant 3 : index
      %c0_350 = arith.constant 0 : index
      %c0_351 = arith.constant 0 : index
      %431 = vector.load %arg13[%c3_349, %c0_350, %c0_351] : memref<8x8x4xf32, #tpu.memory_space<vmem>>, vector<1x8x4xf32>
      %432 = vector.shape_cast %431 : vector<1x8x4xf32> to vector<8x4xf32>
      %433 = vector.shape_cast %430 : vector<8x4xf32> to vector<1x8x4xf32>
      tpu.vector_store %arg13[%c3_349, %c0_350, %c0_351], %433 {strides = array<i32>} : memref<8x8x4xf32, #tpu.memory_space<vmem>>, vector<1x8x4xf32>,
      %c4_352 = arith.constant 4 : index
      %c0_353 = arith.constant 0 : index
      %c0_354 = arith.constant 0 : index
      %434 = vector.load %arg4[%c4_352, %c0_353, %c0_354] : memref<8x32x4xf32, #tpu.memory_space<vmem>>, vector<1x32x4xf32>
      %435 = vector.shape_cast %434 : vector<1x32x4xf32> to vector<32x4xf32>
      %cst_355 = arith.constant dense<0.000000e+00> : vector<8x4xf32>
      %436 = tpu.matmul %393, %435, %cst_355 {dimension_numbers = #tpu.dot_dimension_numbers<[1], [0], [0], [1], [0, 0, 1, 1], [], []>} : vector<8x32xf32>, vector<32x4xf32>, vector<8x4xf32> -> vector<8x4xf32>
      %c4_356 = arith.constant 4 : index
      %c0_357 = arith.constant 0 : index
      %c0_358 = arith.constant 0 : index
      %437 = vector.load %arg5[%c4_356, %c0_357, %c0_358] : memref<8x1x4xf32, #tpu.memory_space<vmem>>, vector<1x1x4xf32>
      %438 = vector.shape_cast %437 : vector<1x1x4xf32> to vector<1x4xf32>
      %439 = vector.broadcast %438 : vector<1x4xf32> to vector<8x4xf32>
      %440 = arith.addf %436, %439 : vector<8x4xf32>
      %c4_359 = arith.constant 4 : index
      %c0_360 = arith.constant 0 : index
      %c0_361 = arith.constant 0 : index
      %441 = vector.load %arg13[%c4_359, %c0_360, %c0_361] : memref<8x8x4xf32, #tpu.memory_space<vmem>>, vector<1x8x4xf32>
      %442 = vector.shape_cast %441 : vector<1x8x4xf32> to vector<8x4xf32>
      %443 = vector.shape_cast %440 : vector<8x4xf32> to vector<1x8x4xf32>
      tpu.vector_store %arg13[%c4_359, %c0_360, %c0_361], %443 {strides = array<i32>} : memref<8x8x4xf32, #tpu.memory_space<vmem>>, vector<1x8x4xf32>,
      %c5_362 = arith.constant 5 : index
      %c0_363 = arith.constant 0 : index
      %c0_364 = arith.constant 0 : index
      %444 = vector.load %arg4[%c5_362, %c0_363, %c0_364] : memref<8x32x4xf32, #tpu.memory_space<vmem>>, vector<1x32x4xf32>
      %445 = vector.shape_cast %444 : vector<1x32x4xf32> to vector<32x4xf32>
      %cst_365 = arith.constant dense<0.000000e+00> : vector<8x4xf32>
      %446 = tpu.matmul %393, %445, %cst_365 {dimension_numbers = #tpu.dot_dimension_numbers<[1], [0], [0], [1], [0, 0, 1, 1], [], []>} : vector<8x32xf32>, vector<32x4xf32>, vector<8x4xf32> -> vector<8x4xf32>
      %c5_366 = arith.constant 5 : index
      %c0_367 = arith.constant 0 : index
      %c0_368 = arith.constant 0 : index
      %447 = vector.load %arg5[%c5_366, %c0_367, %c0_368] : memref<8x1x4xf32, #tpu.memory_space<vmem>>, vector<1x1x4xf32>
      %448 = vector.shape_cast %447 : vector<1x1x4xf32> to vector<1x4xf32>
      %449 = vector.broadcast %448 : vector<1x4xf32> to vector<8x4xf32>
      %450 = arith.addf %446, %449 : vector<8x4xf32>
      %c5_369 = arith.constant 5 : index
      %c0_370 = arith.constant 0 : index
      %c0_371 = arith.constant 0 : index
      %451 = vector.load %arg13[%c5_369, %c0_370, %c0_371] : memref<8x8x4xf32, #tpu.memory_space<vmem>>, vector<1x8x4xf32>
      %452 = vector.shape_cast %451 : vector<1x8x4xf32> to vector<8x4xf32>
      %453 = vector.shape_cast %450 : vector<8x4xf32> to vector<1x8x4xf32>
      tpu.vector_store %arg13[%c5_369, %c0_370, %c0_371], %453 {strides = array<i32>} : memref<8x8x4xf32, #tpu.memory_space<vmem>>, vector<1x8x4xf32>,
      %c6_372 = arith.constant 6 : index
      %c0_373 = arith.constant 0 : index
      %c0_374 = arith.constant 0 : index
      %454 = vector.load %arg4[%c6_372, %c0_373, %c0_374] : memref<8x32x4xf32, #tpu.memory_space<vmem>>, vector<1x32x4xf32>
      %455 = vector.shape_cast %454 : vector<1x32x4xf32> to vector<32x4xf32>
      %cst_375 = arith.constant dense<0.000000e+00> : vector<8x4xf32>
      %456 = tpu.matmul %393, %455, %cst_375 {dimension_numbers = #tpu.dot_dimension_numbers<[1], [0], [0], [1], [0, 0, 1, 1], [], []>} : vector<8x32xf32>, vector<32x4xf32>, vector<8x4xf32> -> vector<8x4xf32>
      %c6_376 = arith.constant 6 : index
      %c0_377 = arith.constant 0 : index
      %c0_378 = arith.constant 0 : index
      %457 = vector.load %arg5[%c6_376, %c0_377, %c0_378] : memref<8x1x4xf32, #tpu.memory_space<vmem>>, vector<1x1x4xf32>
      %458 = vector.shape_cast %457 : vector<1x1x4xf32> to vector<1x4xf32>
      %459 = vector.broadcast %458 : vector<1x4xf32> to vector<8x4xf32>
      %460 = arith.addf %456, %459 : vector<8x4xf32>
      %c6_379 = arith.constant 6 : index
      %c0_380 = arith.constant 0 : index
      %c0_381 = arith.constant 0 : index
      %461 = vector.load %arg13[%c6_379, %c0_380, %c0_381] : memref<8x8x4xf32, #tpu.memory_space<vmem>>, vector<1x8x4xf32>
      %462 = vector.shape_cast %461 : vector<1x8x4xf32> to vector<8x4xf32>
      %463 = vector.shape_cast %460 : vector<8x4xf32> to vector<1x8x4xf32>
      tpu.vector_store %arg13[%c6_379, %c0_380, %c0_381], %463 {strides = array<i32>} : memref<8x8x4xf32, #tpu.memory_space<vmem>>, vector<1x8x4xf32>,
      %c7_382 = arith.constant 7 : index
      %c0_383 = arith.constant 0 : index
      %c0_384 = arith.constant 0 : index
      %464 = vector.load %arg4[%c7_382, %c0_383, %c0_384] : memref<8x32x4xf32, #tpu.memory_space<vmem>>, vector<1x32x4xf32>
      %465 = vector.shape_cast %464 : vector<1x32x4xf32> to vector<32x4xf32>
      %cst_385 = arith.constant dense<0.000000e+00> : vector<8x4xf32>
      %466 = tpu.matmul %393, %465, %cst_385 {dimension_numbers = #tpu.dot_dimension_numbers<[1], [0], [0], [1], [0, 0, 1, 1], [], []>} : vector<8x32xf32>, vector<32x4xf32>, vector<8x4xf32> -> vector<8x4xf32>
      %c7_386 = arith.constant 7 : index
      %c0_387 = arith.constant 0 : index
      %c0_388 = arith.constant 0 : index
      %467 = vector.load %arg5[%c7_386, %c0_387, %c0_388] : memref<8x1x4xf32, #tpu.memory_space<vmem>>, vector<1x1x4xf32>
      %468 = vector.shape_cast %467 : vector<1x1x4xf32> to vector<1x4xf32>
      %469 = vector.broadcast %468 : vector<1x4xf32> to vector<8x4xf32>
      %470 = arith.addf %466, %469 : vector<8x4xf32>
      %c7_389 = arith.constant 7 : index
      %c0_390 = arith.constant 0 : index
      %c0_391 = arith.constant 0 : index
      %471 = vector.load %arg13[%c7_389, %c0_390, %c0_391] : memref<8x8x4xf32, #tpu.memory_space<vmem>>, vector<1x8x4xf32>
      %472 = vector.shape_cast %471 : vector<1x8x4xf32> to vector<8x4xf32>
      %473 = vector.shape_cast %470 : vector<8x4xf32> to vector<1x8x4xf32>
      tpu.vector_store %arg13[%c7_389, %c0_390, %c0_391], %473 {strides = array<i32>} : memref<8x8x4xf32, #tpu.memory_space<vmem>>, vector<1x8x4xf32>,
      %cst_392 = arith.constant 0xFF800000 : f32
      %474 = vector.broadcast %cst_392 : f32 to vector<8x8x1xf32>
      %c0_393 = arith.constant 0 : index
      %c0_394 = arith.constant 0 : index
      %c0_395 = arith.constant 0 : index
      %475 = vector.load %arg14[%c0_393, %c0_394, %c0_395] : memref<8x8x1xf32, #tpu.memory_space<vmem>>, vector<8x8x1xf32>
      tpu.vector_store %arg14[%c0_393, %c0_394, %c0_395], %474 {strides = array<i32>} : memref<8x8x1xf32, #tpu.memory_space<vmem>>, vector<8x8x1xf32>,
      %cst_396 = arith.constant 0.000000e+00 : f32
      %476 = vector.broadcast %cst_396 : f32 to vector<8x8x1xf32>
      %c0_397 = arith.constant 0 : index
      %c0_398 = arith.constant 0 : index
      %c0_399 = arith.constant 0 : index
      %477 = vector.load %arg15[%c0_397, %c0_398, %c0_399] : memref<8x8x1xf32, #tpu.memory_space<vmem>>, vector<8x8x1xf32>
      tpu.vector_store %arg15[%c0_397, %c0_398, %c0_399], %476 {strides = array<i32>} : memref<8x8x1xf32, #tpu.memory_space<vmem>>, vector<8x8x1xf32>,
      %cst_400 = arith.constant 0.000000e+00 : f32
      %478 = vector.broadcast %cst_400 : f32 to vector<8x8x4xf32>
      %c0_401 = arith.constant 0 : index
      %c0_402 = arith.constant 0 : index
      %c0_403 = arith.constant 0 : index
      %479 = vector.load %arg16[%c0_401, %c0_402, %c0_403] : memref<8x8x4xf32, #tpu.memory_space<vmem>>, vector<8x8x4xf32>
      tpu.vector_store %arg16[%c0_401, %c0_402, %c0_403], %478 {strides = array<i32>} : memref<8x8x4xf32, #tpu.memory_space<vmem>>, vector<8x8x4xf32>,
    } else {
    }
    %c0 = arith.constant 0 : index
    %c0_1 = arith.constant 0 : index
    %c0_2 = arith.constant 0 : index
    %3 = vector.load %arg3[%c0, %c0_1, %c0_2] : memref<1x16x32xf32, #tpu.memory_space<vmem>>, vector<1x16x32xf32>
    %4 = vector.shape_cast %3 : vector<1x16x32xf32> to vector<16x32xf32>
    %c0_3 = arith.constant 0 : index
    %c0_4 = arith.constant 0 : index
    %c0_5 = arith.constant 0 : index
    %5 = vector.load %arg6[%c0_3, %c0_4, %c0_5] : memref<8x32x4xf32, #tpu.memory_space<vmem>>, vector<1x32x4xf32>
    %6 = vector.shape_cast %5 : vector<1x32x4xf32> to vector<32x4xf32>
    %cst = arith.constant dense<0.000000e+00> : vector<16x4xf32>
    %7 = tpu.matmul %4, %6, %cst {dimension_numbers = #tpu.dot_dimension_numbers<[1], [0], [0], [1], [0, 0, 1, 1], [], []>} : vector<16x32xf32>, vector<32x4xf32>, vector<16x4xf32> -> vector<16x4xf32>
    %c0_6 = arith.constant 0 : index
    %c0_7 = arith.constant 0 : index
    %c0_8 = arith.constant 0 : index
    %8 = vector.load %arg7[%c0_6, %c0_7, %c0_8] : memref<8x1x4xf32, #tpu.memory_space<vmem>>, vector<1x1x4xf32>
    %9 = vector.shape_cast %8 : vector<1x1x4xf32> to vector<1x4xf32>
    %10 = vector.broadcast %9 : vector<1x4xf32> to vector<16x4xf32>
    %11 = arith.addf %7, %10 : vector<16x4xf32>
    %c0_9 = arith.constant 0 : index
    %c0_10 = arith.constant 0 : index
    %c0_11 = arith.constant 0 : index
    %12 = vector.load %arg8[%c0_9, %c0_10, %c0_11] : memref<8x32x4xf32, #tpu.memory_space<vmem>>, vector<1x32x4xf32>
    %13 = vector.shape_cast %12 : vector<1x32x4xf32> to vector<32x4xf32>
    %cst_12 = arith.constant dense<0.000000e+00> : vector<16x4xf32>
    %14 = tpu.matmul %4, %13, %cst_12 {dimension_numbers = #tpu.dot_dimension_numbers<[1], [0], [0], [1], [0, 0, 1, 1], [], []>} : vector<16x32xf32>, vector<32x4xf32>, vector<16x4xf32> -> vector<16x4xf32>
    %c0_13 = arith.constant 0 : index
    %c0_14 = arith.constant 0 : index
    %c0_15 = arith.constant 0 : index
    %15 = vector.load %arg9[%c0_13, %c0_14, %c0_15] : memref<8x1x4xf32, #tpu.memory_space<vmem>>, vector<1x1x4xf32>
    %16 = vector.shape_cast %15 : vector<1x1x4xf32> to vector<1x4xf32>
    %17 = vector.broadcast %16 : vector<1x4xf32> to vector<16x4xf32>
    %18 = arith.addf %14, %17 : vector<16x4xf32>
    %c0_16 = arith.constant 0 : index
    %c0_17 = arith.constant 0 : index
    %c0_18 = arith.constant 0 : index
    %19 = vector.load %arg13[%c0_16, %c0_17, %c0_18] : memref<8x8x4xf32, #tpu.memory_space<vmem>>, vector<1x8x4xf32>
    %20 = vector.shape_cast %19 : vector<1x8x4xf32> to vector<8x4xf32>
    "tpu.trace_start"() <{level = 10 : i32, message = "qd,kd->qk"}> : () -> ()
    %cst_19 = arith.constant dense<0.000000e+00> : vector<8x16xf32>
    %21 = tpu.matmul %20, %11, %cst_19 {dimension_numbers = #tpu.dot_dimension_numbers<[1], [1], [0], [0], [0, 0, 1, 0], [], []>} : vector<8x4xf32>, vector<16x4xf32>, vector<8x16xf32> -> vector<8x16xf32>
    "tpu.trace_stop"() : () -> ()
    %c0_20 = arith.constant 0 : index
    %c0_21 = arith.constant 0 : index
    %c0_22 = arith.constant 0 : index
    %22 = vector.load %arg14[%c0_20, %c0_21, %c0_22] : memref<8x8x1xf32, #tpu.memory_space<vmem>>, vector<1x8x1xf32>
    %23 = vector.shape_cast %22 : vector<1x8x1xf32> to vector<8x1xf32>
    %cst_23 = arith.constant dense<0xFF800000> : vector<8xf32>
    %24 = vector.multi_reduction <maximumf>, %21, %cst_23 [1] : vector<8x16xf32> to vector<8xf32>
    %25 = vector.shape_cast %24 : vector<8xf32> to vector<8x1xf32>
    %26 = arith.maximumf %23, %25 : vector<8x1xf32>
    %27 = arith.subf %23, %26 : vector<8x1xf32>
    %28 = math.exp %27 : vector<8x1xf32>
    %29 = vector.broadcast %26 : vector<8x1xf32> to vector<8x16xf32>
    %30 = arith.subf %21, %29 : vector<8x16xf32>
    %31 = math.exp %30 : vector<8x16xf32>
    %cst_24 = arith.constant dense<0.000000e+00> : vector<8xf32>
    %32 = vector.multi_reduction <add>, %31, %cst_24 [1] : vector<8x16xf32> to vector<8xf32>
    %33 = vector.shape_cast %32 : vector<8xf32> to vector<8x1xf32>
    %c0_25 = arith.constant 0 : index
    %c0_26 = arith.constant 0 : index
    %c0_27 = arith.constant 0 : index
    %34 = vector.load %arg15[%c0_25, %c0_26, %c0_27] : memref<8x8x1xf32, #tpu.memory_space<vmem>>, vector<1x8x1xf32>
    %35 = vector.shape_cast %34 : vector<1x8x1xf32> to vector<8x1xf32>
    %36 = arith.mulf %28, %35 : vector<8x1xf32>
    %37 = arith.addf %36, %33 : vector<8x1xf32>
    %c0_28 = arith.constant 0 : index
    %c0_29 = arith.constant 0 : index
    %c0_30 = arith.constant 0 : index
    %38 = vector.load %arg15[%c0_28, %c0_29, %c0_30] : memref<8x8x1xf32, #tpu.memory_space<vmem>>, vector<1x8x1xf32>
    %39 = vector.shape_cast %38 : vector<1x8x1xf32> to vector<8x1xf32>
    %40 = vector.shape_cast %37 : vector<8x1xf32> to vector<1x8x1xf32>
    tpu.vector_store %arg15[%c0_28, %c0_29, %c0_30], %40 {strides = array<i32>} : memref<8x8x1xf32, #tpu.memory_space<vmem>>, vector<1x8x1xf32>,
    %c0_31 = arith.constant 0 : index
    %c0_32 = arith.constant 0 : index
    %c0_33 = arith.constant 0 : index
    %41 = vector.load %arg16[%c0_31, %c0_32, %c0_33] : memref<8x8x4xf32, #tpu.memory_space<vmem>>, vector<1x8x4xf32>
    %42 = vector.shape_cast %41 : vector<1x8x4xf32> to vector<8x4xf32>
    %43 = vector.broadcast %28 : vector<8x1xf32> to vector<8x4xf32>
    %44 = arith.mulf %43, %42 : vector<8x4xf32>
    %cst_34 = arith.constant dense<0.000000e+00> : vector<8x4xf32>
    %45 = tpu.matmul %31, %18, %cst_34 {dimension_numbers = #tpu.dot_dimension_numbers<[1], [0], [0], [1], [0, 0, 1, 1], [], []>} : vector<8x16xf32>, vector<16x4xf32>, vector<8x4xf32> -> vector<8x4xf32>
    %46 = arith.addf %44, %45 : vector<8x4xf32>
    %c0_35 = arith.constant 0 : index
    %c0_36 = arith.constant 0 : index
    %c0_37 = arith.constant 0 : index
    %47 = vector.load %arg16[%c0_35, %c0_36, %c0_37] : memref<8x8x4xf32, #tpu.memory_space<vmem>>, vector<1x8x4xf32>
    %48 = vector.shape_cast %47 : vector<1x8x4xf32> to vector<8x4xf32>
    %49 = vector.shape_cast %46 : vector<8x4xf32> to vector<1x8x4xf32>
    tpu.vector_store %arg16[%c0_35, %c0_36, %c0_37], %49 {strides = array<i32>} : memref<8x8x4xf32, #tpu.memory_space<vmem>>, vector<1x8x4xf32>,
    %c0_38 = arith.constant 0 : index
    %c0_39 = arith.constant 0 : index
    %c0_40 = arith.constant 0 : index
    %50 = vector.load %arg14[%c0_38, %c0_39, %c0_40] : memref<8x8x1xf32, #tpu.memory_space<vmem>>, vector<1x8x1xf32>
    %51 = vector.shape_cast %50 : vector<1x8x1xf32> to vector<8x1xf32>
    %52 = vector.shape_cast %26 : vector<8x1xf32> to vector<1x8x1xf32>
    tpu.vector_store %arg14[%c0_38, %c0_39, %c0_40], %52 {strides = array<i32>} : memref<8x8x1xf32, #tpu.memory_space<vmem>>, vector<1x8x1xf32>,
    %c1 = arith.constant 1 : index
    %c0_41 = arith.constant 0 : index
    %c0_42 = arith.constant 0 : index
    %53 = vector.load %arg6[%c1, %c0_41, %c0_42] : memref<8x32x4xf32, #tpu.memory_space<vmem>>, vector<1x32x4xf32>
    %54 = vector.shape_cast %53 : vector<1x32x4xf32> to vector<32x4xf32>
    %cst_43 = arith.constant dense<0.000000e+00> : vector<16x4xf32>
    %55 = tpu.matmul %4, %54, %cst_43 {dimension_numbers = #tpu.dot_dimension_numbers<[1], [0], [0], [1], [0, 0, 1, 1], [], []>} : vector<16x32xf32>, vector<32x4xf32>, vector<16x4xf32> -> vector<16x4xf32>
    %c1_44 = arith.constant 1 : index
    %c0_45 = arith.constant 0 : index
    %c0_46 = arith.constant 0 : index
    %56 = vector.load %arg7[%c1_44, %c0_45, %c0_46] : memref<8x1x4xf32, #tpu.memory_space<vmem>>, vector<1x1x4xf32>
    %57 = vector.shape_cast %56 : vector<1x1x4xf32> to vector<1x4xf32>
    %58 = vector.broadcast %57 : vector<1x4xf32> to vector<16x4xf32>
    %59 = arith.addf %55, %58 : vector<16x4xf32>
    %c1_47 = arith.constant 1 : index
    %c0_48 = arith.constant 0 : index
    %c0_49 = arith.constant 0 : index
    %60 = vector.load %arg8[%c1_47, %c0_48, %c0_49] : memref<8x32x4xf32, #tpu.memory_space<vmem>>, vector<1x32x4xf32>
    %61 = vector.shape_cast %60 : vector<1x32x4xf32> to vector<32x4xf32>
    %cst_50 = arith.constant dense<0.000000e+00> : vector<16x4xf32>
    %62 = tpu.matmul %4, %61, %cst_50 {dimension_numbers = #tpu.dot_dimension_numbers<[1], [0], [0], [1], [0, 0, 1, 1], [], []>} : vector<16x32xf32>, vector<32x4xf32>, vector<16x4xf32> -> vector<16x4xf32>
    %c1_51 = arith.constant 1 : index
    %c0_52 = arith.constant 0 : index
    %c0_53 = arith.constant 0 : index
    %63 = vector.load %arg9[%c1_51, %c0_52, %c0_53] : memref<8x1x4xf32, #tpu.memory_space<vmem>>, vector<1x1x4xf32>
    %64 = vector.shape_cast %63 : vector<1x1x4xf32> to vector<1x4xf32>
    %65 = vector.broadcast %64 : vector<1x4xf32> to vector<16x4xf32>
    %66 = arith.addf %62, %65 : vector<16x4xf32>
    %c1_54 = arith.constant 1 : index
    %c0_55 = arith.constant 0 : index
    %c0_56 = arith.constant 0 : index
    %67 = vector.load %arg13[%c1_54, %c0_55, %c0_56] : memref<8x8x4xf32, #tpu.memory_space<vmem>>, vector<1x8x4xf32>
    %68 = vector.shape_cast %67 : vector<1x8x4xf32> to vector<8x4xf32>
    "tpu.trace_start"() <{level = 10 : i32, message = "qd,kd->qk"}> : () -> ()
    %cst_57 = arith.constant dense<0.000000e+00> : vector<8x16xf32>
    %69 = tpu.matmul %68, %59, %cst_57 {dimension_numbers = #tpu.dot_dimension_numbers<[1], [1], [0], [0], [0, 0, 1, 0], [], []>} : vector<8x4xf32>, vector<16x4xf32>, vector<8x16xf32> -> vector<8x16xf32>
    "tpu.trace_stop"() : () -> ()
    %c1_58 = arith.constant 1 : index
    %c0_59 = arith.constant 0 : index
    %c0_60 = arith.constant 0 : index
    %70 = vector.load %arg14[%c1_58, %c0_59, %c0_60] : memref<8x8x1xf32, #tpu.memory_space<vmem>>, vector<1x8x1xf32>
    %71 = vector.shape_cast %70 : vector<1x8x1xf32> to vector<8x1xf32>
    %cst_61 = arith.constant dense<0xFF800000> : vector<8xf32>
    %72 = vector.multi_reduction <maximumf>, %69, %cst_61 [1] : vector<8x16xf32> to vector<8xf32>
    %73 = vector.shape_cast %72 : vector<8xf32> to vector<8x1xf32>
    %74 = arith.maximumf %71, %73 : vector<8x1xf32>
    %75 = arith.subf %71, %74 : vector<8x1xf32>
    %76 = math.exp %75 : vector<8x1xf32>
    %77 = vector.broadcast %74 : vector<8x1xf32> to vector<8x16xf32>
    %78 = arith.subf %69, %77 : vector<8x16xf32>
    %79 = math.exp %78 : vector<8x16xf32>
    %cst_62 = arith.constant dense<0.000000e+00> : vector<8xf32>
    %80 = vector.multi_reduction <add>, %79, %cst_62 [1] : vector<8x16xf32> to vector<8xf32>
    %81 = vector.shape_cast %80 : vector<8xf32> to vector<8x1xf32>
    %c1_63 = arith.constant 1 : index
    %c0_64 = arith.constant 0 : index
    %c0_65 = arith.constant 0 : index
    %82 = vector.load %arg15[%c1_63, %c0_64, %c0_65] : memref<8x8x1xf32, #tpu.memory_space<vmem>>, vector<1x8x1xf32>
    %83 = vector.shape_cast %82 : vector<1x8x1xf32> to vector<8x1xf32>
    %84 = arith.mulf %76, %83 : vector<8x1xf32>
    %85 = arith.addf %84, %81 : vector<8x1xf32>
    %c1_66 = arith.constant 1 : index
    %c0_67 = arith.constant 0 : index
    %c0_68 = arith.constant 0 : index
    %86 = vector.load %arg15[%c1_66, %c0_67, %c0_68] : memref<8x8x1xf32, #tpu.memory_space<vmem>>, vector<1x8x1xf32>
    %87 = vector.shape_cast %86 : vector<1x8x1xf32> to vector<8x1xf32>
    %88 = vector.shape_cast %85 : vector<8x1xf32> to vector<1x8x1xf32>
    tpu.vector_store %arg15[%c1_66, %c0_67, %c0_68], %88 {strides = array<i32>} : memref<8x8x1xf32, #tpu.memory_space<vmem>>, vector<1x8x1xf32>,
    %c1_69 = arith.constant 1 : index
    %c0_70 = arith.constant 0 : index
    %c0_71 = arith.constant 0 : index
    %89 = vector.load %arg16[%c1_69, %c0_70, %c0_71] : memref<8x8x4xf32, #tpu.memory_space<vmem>>, vector<1x8x4xf32>
    %90 = vector.shape_cast %89 : vector<1x8x4xf32> to vector<8x4xf32>
    %91 = vector.broadcast %76 : vector<8x1xf32> to vector<8x4xf32>
    %92 = arith.mulf %91, %90 : vector<8x4xf32>
    %cst_72 = arith.constant dense<0.000000e+00> : vector<8x4xf32>
    %93 = tpu.matmul %79, %66, %cst_72 {dimension_numbers = #tpu.dot_dimension_numbers<[1], [0], [0], [1], [0, 0, 1, 1], [], []>} : vector<8x16xf32>, vector<16x4xf32>, vector<8x4xf32> -> vector<8x4xf32>
    %94 = arith.addf %92, %93 : vector<8x4xf32>
    %c1_73 = arith.constant 1 : index
    %c0_74 = arith.constant 0 : index
    %c0_75 = arith.constant 0 : index
    %95 = vector.load %arg16[%c1_73, %c0_74, %c0_75] : memref<8x8x4xf32, #tpu.memory_space<vmem>>, vector<1x8x4xf32>
    %96 = vector.shape_cast %95 : vector<1x8x4xf32> to vector<8x4xf32>
    %97 = vector.shape_cast %94 : vector<8x4xf32> to vector<1x8x4xf32>
    tpu.vector_store %arg16[%c1_73, %c0_74, %c0_75], %97 {strides = array<i32>} : memref<8x8x4xf32, #tpu.memory_space<vmem>>, vector<1x8x4xf32>,
    %c1_76 = arith.constant 1 : index
    %c0_77 = arith.constant 0 : index
    %c0_78 = arith.constant 0 : index
    %98 = vector.load %arg14[%c1_76, %c0_77, %c0_78] : memref<8x8x1xf32, #tpu.memory_space<vmem>>, vector<1x8x1xf32>
    %99 = vector.shape_cast %98 : vector<1x8x1xf32> to vector<8x1xf32>
    %100 = vector.shape_cast %74 : vector<8x1xf32> to vector<1x8x1xf32>
    tpu.vector_store %arg14[%c1_76, %c0_77, %c0_78], %100 {strides = array<i32>} : memref<8x8x1xf32, #tpu.memory_space<vmem>>, vector<1x8x1xf32>,
    %c2 = arith.constant 2 : index
    %c0_79 = arith.constant 0 : index
    %c0_80 = arith.constant 0 : index
    %101 = vector.load %arg6[%c2, %c0_79, %c0_80] : memref<8x32x4xf32, #tpu.memory_space<vmem>>, vector<1x32x4xf32>
    %102 = vector.shape_cast %101 : vector<1x32x4xf32> to vector<32x4xf32>
    %cst_81 = arith.constant dense<0.000000e+00> : vector<16x4xf32>
    %103 = tpu.matmul %4, %102, %cst_81 {dimension_numbers = #tpu.dot_dimension_numbers<[1], [0], [0], [1], [0, 0, 1, 1], [], []>} : vector<16x32xf32>, vector<32x4xf32>, vector<16x4xf32> -> vector<16x4xf32>
    %c2_82 = arith.constant 2 : index
    %c0_83 = arith.constant 0 : index
    %c0_84 = arith.constant 0 : index
    %104 = vector.load %arg7[%c2_82, %c0_83, %c0_84] : memref<8x1x4xf32, #tpu.memory_space<vmem>>, vector<1x1x4xf32>
    %105 = vector.shape_cast %104 : vector<1x1x4xf32> to vector<1x4xf32>
    %106 = vector.broadcast %105 : vector<1x4xf32> to vector<16x4xf32>
    %107 = arith.addf %103, %106 : vector<16x4xf32>
    %c2_85 = arith.constant 2 : index
    %c0_86 = arith.constant 0 : index
    %c0_87 = arith.constant 0 : index
    %108 = vector.load %arg8[%c2_85, %c0_86, %c0_87] : memref<8x32x4xf32, #tpu.memory_space<vmem>>, vector<1x32x4xf32>
    %109 = vector.shape_cast %108 : vector<1x32x4xf32> to vector<32x4xf32>
    %cst_88 = arith.constant dense<0.000000e+00> : vector<16x4xf32>
    %110 = tpu.matmul %4, %109, %cst_88 {dimension_numbers = #tpu.dot_dimension_numbers<[1], [0], [0], [1], [0, 0, 1, 1], [], []>} : vector<16x32xf32>, vector<32x4xf32>, vector<16x4xf32> -> vector<16x4xf32>
    %c2_89 = arith.constant 2 : index
    %c0_90 = arith.constant 0 : index
    %c0_91 = arith.constant 0 : index
    %111 = vector.load %arg9[%c2_89, %c0_90, %c0_91] : memref<8x1x4xf32, #tpu.memory_space<vmem>>, vector<1x1x4xf32>
    %112 = vector.shape_cast %111 : vector<1x1x4xf32> to vector<1x4xf32>
    %113 = vector.broadcast %112 : vector<1x4xf32> to vector<16x4xf32>
    %114 = arith.addf %110, %113 : vector<16x4xf32>
    %c2_92 = arith.constant 2 : index
    %c0_93 = arith.constant 0 : index
    %c0_94 = arith.constant 0 : index
    %115 = vector.load %arg13[%c2_92, %c0_93, %c0_94] : memref<8x8x4xf32, #tpu.memory_space<vmem>>, vector<1x8x4xf32>
    %116 = vector.shape_cast %115 : vector<1x8x4xf32> to vector<8x4xf32>
    "tpu.trace_start"() <{level = 10 : i32, message = "qd,kd->qk"}> : () -> ()
    %cst_95 = arith.constant dense<0.000000e+00> : vector<8x16xf32>
    %117 = tpu.matmul %116, %107, %cst_95 {dimension_numbers = #tpu.dot_dimension_numbers<[1], [1], [0], [0], [0, 0, 1, 0], [], []>} : vector<8x4xf32>, vector<16x4xf32>, vector<8x16xf32> -> vector<8x16xf32>
    "tpu.trace_stop"() : () -> ()
    %c2_96 = arith.constant 2 : index
    %c0_97 = arith.constant 0 : index
    %c0_98 = arith.constant 0 : index
    %118 = vector.load %arg14[%c2_96, %c0_97, %c0_98] : memref<8x8x1xf32, #tpu.memory_space<vmem>>, vector<1x8x1xf32>
    %119 = vector.shape_cast %118 : vector<1x8x1xf32> to vector<8x1xf32>
    %cst_99 = arith.constant dense<0xFF800000> : vector<8xf32>
    %120 = vector.multi_reduction <maximumf>, %117, %cst_99 [1] : vector<8x16xf32> to vector<8xf32>
    %121 = vector.shape_cast %120 : vector<8xf32> to vector<8x1xf32>
    %122 = arith.maximumf %119, %121 : vector<8x1xf32>
    %123 = arith.subf %119, %122 : vector<8x1xf32>
    %124 = math.exp %123 : vector<8x1xf32>
    %125 = vector.broadcast %122 : vector<8x1xf32> to vector<8x16xf32>
    %126 = arith.subf %117, %125 : vector<8x16xf32>
    %127 = math.exp %126 : vector<8x16xf32>
    %cst_100 = arith.constant dense<0.000000e+00> : vector<8xf32>
    %128 = vector.multi_reduction <add>, %127, %cst_100 [1] : vector<8x16xf32> to vector<8xf32>
    %129 = vector.shape_cast %128 : vector<8xf32> to vector<8x1xf32>
    %c2_101 = arith.constant 2 : index
    %c0_102 = arith.constant 0 : index
    %c0_103 = arith.constant 0 : index
    %130 = vector.load %arg15[%c2_101, %c0_102, %c0_103] : memref<8x8x1xf32, #tpu.memory_space<vmem>>, vector<1x8x1xf32>
    %131 = vector.shape_cast %130 : vector<1x8x1xf32> to vector<8x1xf32>
    %132 = arith.mulf %124, %131 : vector<8x1xf32>
    %133 = arith.addf %132, %129 : vector<8x1xf32>
    %c2_104 = arith.constant 2 : index
    %c0_105 = arith.constant 0 : index
    %c0_106 = arith.constant 0 : index
    %134 = vector.load %arg15[%c2_104, %c0_105, %c0_106] : memref<8x8x1xf32, #tpu.memory_space<vmem>>, vector<1x8x1xf32>
    %135 = vector.shape_cast %134 : vector<1x8x1xf32> to vector<8x1xf32>
    %136 = vector.shape_cast %133 : vector<8x1xf32> to vector<1x8x1xf32>
    tpu.vector_store %arg15[%c2_104, %c0_105, %c0_106], %136 {strides = array<i32>} : memref<8x8x1xf32, #tpu.memory_space<vmem>>, vector<1x8x1xf32>,
    %c2_107 = arith.constant 2 : index
    %c0_108 = arith.constant 0 : index
    %c0_109 = arith.constant 0 : index
    %137 = vector.load %arg16[%c2_107, %c0_108, %c0_109] : memref<8x8x4xf32, #tpu.memory_space<vmem>>, vector<1x8x4xf32>
    %138 = vector.shape_cast %137 : vector<1x8x4xf32> to vector<8x4xf32>
    %139 = vector.broadcast %124 : vector<8x1xf32> to vector<8x4xf32>
    %140 = arith.mulf %139, %138 : vector<8x4xf32>
    %cst_110 = arith.constant dense<0.000000e+00> : vector<8x4xf32>
    %141 = tpu.matmul %127, %114, %cst_110 {dimension_numbers = #tpu.dot_dimension_numbers<[1], [0], [0], [1], [0, 0, 1, 1], [], []>} : vector<8x16xf32>, vector<16x4xf32>, vector<8x4xf32> -> vector<8x4xf32>
    %142 = arith.addf %140, %141 : vector<8x4xf32>
    %c2_111 = arith.constant 2 : index
    %c0_112 = arith.constant 0 : index
    %c0_113 = arith.constant 0 : index
    %143 = vector.load %arg16[%c2_111, %c0_112, %c0_113] : memref<8x8x4xf32, #tpu.memory_space<vmem>>, vector<1x8x4xf32>
    %144 = vector.shape_cast %143 : vector<1x8x4xf32> to vector<8x4xf32>
    %145 = vector.shape_cast %142 : vector<8x4xf32> to vector<1x8x4xf32>
    tpu.vector_store %arg16[%c2_111, %c0_112, %c0_113], %145 {strides = array<i32>} : memref<8x8x4xf32, #tpu.memory_space<vmem>>, vector<1x8x4xf32>,
    %c2_114 = arith.constant 2 : index
    %c0_115 = arith.constant 0 : index
    %c0_116 = arith.constant 0 : index
    %146 = vector.load %arg14[%c2_114, %c0_115, %c0_116] : memref<8x8x1xf32, #tpu.memory_space<vmem>>, vector<1x8x1xf32>
    %147 = vector.shape_cast %146 : vector<1x8x1xf32> to vector<8x1xf32>
    %148 = vector.shape_cast %122 : vector<8x1xf32> to vector<1x8x1xf32>
    tpu.vector_store %arg14[%c2_114, %c0_115, %c0_116], %148 {strides = array<i32>} : memref<8x8x1xf32, #tpu.memory_space<vmem>>, vector<1x8x1xf32>,
    %c3 = arith.constant 3 : index
    %c0_117 = arith.constant 0 : index
    %c0_118 = arith.constant 0 : index
    %149 = vector.load %arg6[%c3, %c0_117, %c0_118] : memref<8x32x4xf32, #tpu.memory_space<vmem>>, vector<1x32x4xf32>
    %150 = vector.shape_cast %149 : vector<1x32x4xf32> to vector<32x4xf32>
    %cst_119 = arith.constant dense<0.000000e+00> : vector<16x4xf32>
    %151 = tpu.matmul %4, %150, %cst_119 {dimension_numbers = #tpu.dot_dimension_numbers<[1], [0], [0], [1], [0, 0, 1, 1], [], []>} : vector<16x32xf32>, vector<32x4xf32>, vector<16x4xf32> -> vector<16x4xf32>
    %c3_120 = arith.constant 3 : index
    %c0_121 = arith.constant 0 : index
    %c0_122 = arith.constant 0 : index
    %152 = vector.load %arg7[%c3_120, %c0_121, %c0_122] : memref<8x1x4xf32, #tpu.memory_space<vmem>>, vector<1x1x4xf32>
    %153 = vector.shape_cast %152 : vector<1x1x4xf32> to vector<1x4xf32>
    %154 = vector.broadcast %153 : vector<1x4xf32> to vector<16x4xf32>
    %155 = arith.addf %151, %154 : vector<16x4xf32>
    %c3_123 = arith.constant 3 : index
    %c0_124 = arith.constant 0 : index
    %c0_125 = arith.constant 0 : index
    %156 = vector.load %arg8[%c3_123, %c0_124, %c0_125] : memref<8x32x4xf32, #tpu.memory_space<vmem>>, vector<1x32x4xf32>
    %157 = vector.shape_cast %156 : vector<1x32x4xf32> to vector<32x4xf32>
    %cst_126 = arith.constant dense<0.000000e+00> : vector<16x4xf32>
    %158 = tpu.matmul %4, %157, %cst_126 {dimension_numbers = #tpu.dot_dimension_numbers<[1], [0], [0], [1], [0, 0, 1, 1], [], []>} : vector<16x32xf32>, vector<32x4xf32>, vector<16x4xf32> -> vector<16x4xf32>
    %c3_127 = arith.constant 3 : index
    %c0_128 = arith.constant 0 : index
    %c0_129 = arith.constant 0 : index
    %159 = vector.load %arg9[%c3_127, %c0_128, %c0_129] : memref<8x1x4xf32, #tpu.memory_space<vmem>>, vector<1x1x4xf32>
    %160 = vector.shape_cast %159 : vector<1x1x4xf32> to vector<1x4xf32>
    %161 = vector.broadcast %160 : vector<1x4xf32> to vector<16x4xf32>
    %162 = arith.addf %158, %161 : vector<16x4xf32>
    %c3_130 = arith.constant 3 : index
    %c0_131 = arith.constant 0 : index
    %c0_132 = arith.constant 0 : index
    %163 = vector.load %arg13[%c3_130, %c0_131, %c0_132] : memref<8x8x4xf32, #tpu.memory_space<vmem>>, vector<1x8x4xf32>
    %164 = vector.shape_cast %163 : vector<1x8x4xf32> to vector<8x4xf32>
    "tpu.trace_start"() <{level = 10 : i32, message = "qd,kd->qk"}> : () -> ()
    %cst_133 = arith.constant dense<0.000000e+00> : vector<8x16xf32>
    %165 = tpu.matmul %164, %155, %cst_133 {dimension_numbers = #tpu.dot_dimension_numbers<[1], [1], [0], [0], [0, 0, 1, 0], [], []>} : vector<8x4xf32>, vector<16x4xf32>, vector<8x16xf32> -> vector<8x16xf32>
    "tpu.trace_stop"() : () -> ()
    %c3_134 = arith.constant 3 : index
    %c0_135 = arith.constant 0 : index
    %c0_136 = arith.constant 0 : index
    %166 = vector.load %arg14[%c3_134, %c0_135, %c0_136] : memref<8x8x1xf32, #tpu.memory_space<vmem>>, vector<1x8x1xf32>
    %167 = vector.shape_cast %166 : vector<1x8x1xf32> to vector<8x1xf32>
    %cst_137 = arith.constant dense<0xFF800000> : vector<8xf32>
    %168 = vector.multi_reduction <maximumf>, %165, %cst_137 [1] : vector<8x16xf32> to vector<8xf32>
    %169 = vector.shape_cast %168 : vector<8xf32> to vector<8x1xf32>
    %170 = arith.maximumf %167, %169 : vector<8x1xf32>
    %171 = arith.subf %167, %170 : vector<8x1xf32>
    %172 = math.exp %171 : vector<8x1xf32>
    %173 = vector.broadcast %170 : vector<8x1xf32> to vector<8x16xf32>
    %174 = arith.subf %165, %173 : vector<8x16xf32>
    %175 = math.exp %174 : vector<8x16xf32>
    %cst_138 = arith.constant dense<0.000000e+00> : vector<8xf32>
    %176 = vector.multi_reduction <add>, %175, %cst_138 [1] : vector<8x16xf32> to vector<8xf32>
    %177 = vector.shape_cast %176 : vector<8xf32> to vector<8x1xf32>
    %c3_139 = arith.constant 3 : index
    %c0_140 = arith.constant 0 : index
    %c0_141 = arith.constant 0 : index
    %178 = vector.load %arg15[%c3_139, %c0_140, %c0_141] : memref<8x8x1xf32, #tpu.memory_space<vmem>>, vector<1x8x1xf32>
    %179 = vector.shape_cast %178 : vector<1x8x1xf32> to vector<8x1xf32>
    %180 = arith.mulf %172, %179 : vector<8x1xf32>
    %181 = arith.addf %180, %177 : vector<8x1xf32>
    %c3_142 = arith.constant 3 : index
    %c0_143 = arith.constant 0 : index
    %c0_144 = arith.constant 0 : index
    %182 = vector.load %arg15[%c3_142, %c0_143, %c0_144] : memref<8x8x1xf32, #tpu.memory_space<vmem>>, vector<1x8x1xf32>
    %183 = vector.shape_cast %182 : vector<1x8x1xf32> to vector<8x1xf32>
    %184 = vector.shape_cast %181 : vector<8x1xf32> to vector<1x8x1xf32>
    tpu.vector_store %arg15[%c3_142, %c0_143, %c0_144], %184 {strides = array<i32>} : memref<8x8x1xf32, #tpu.memory_space<vmem>>, vector<1x8x1xf32>,
    %c3_145 = arith.constant 3 : index
    %c0_146 = arith.constant 0 : index
    %c0_147 = arith.constant 0 : index
    %185 = vector.load %arg16[%c3_145, %c0_146, %c0_147] : memref<8x8x4xf32, #tpu.memory_space<vmem>>, vector<1x8x4xf32>
    %186 = vector.shape_cast %185 : vector<1x8x4xf32> to vector<8x4xf32>
    %187 = vector.broadcast %172 : vector<8x1xf32> to vector<8x4xf32>
    %188 = arith.mulf %187, %186 : vector<8x4xf32>
    %cst_148 = arith.constant dense<0.000000e+00> : vector<8x4xf32>
    %189 = tpu.matmul %175, %162, %cst_148 {dimension_numbers = #tpu.dot_dimension_numbers<[1], [0], [0], [1], [0, 0, 1, 1], [], []>} : vector<8x16xf32>, vector<16x4xf32>, vector<8x4xf32> -> vector<8x4xf32>
    %190 = arith.addf %188, %189 : vector<8x4xf32>
    %c3_149 = arith.constant 3 : index
    %c0_150 = arith.constant 0 : index
    %c0_151 = arith.constant 0 : index
    %191 = vector.load %arg16[%c3_149, %c0_150, %c0_151] : memref<8x8x4xf32, #tpu.memory_space<vmem>>, vector<1x8x4xf32>
    %192 = vector.shape_cast %191 : vector<1x8x4xf32> to vector<8x4xf32>
    %193 = vector.shape_cast %190 : vector<8x4xf32> to vector<1x8x4xf32>
    tpu.vector_store %arg16[%c3_149, %c0_150, %c0_151], %193 {strides = array<i32>} : memref<8x8x4xf32, #tpu.memory_space<vmem>>, vector<1x8x4xf32>,
    %c3_152 = arith.constant 3 : index
    %c0_153 = arith.constant 0 : index
    %c0_154 = arith.constant 0 : index
    %194 = vector.load %arg14[%c3_152, %c0_153, %c0_154] : memref<8x8x1xf32, #tpu.memory_space<vmem>>, vector<1x8x1xf32>
    %195 = vector.shape_cast %194 : vector<1x8x1xf32> to vector<8x1xf32>
    %196 = vector.shape_cast %170 : vector<8x1xf32> to vector<1x8x1xf32>
    tpu.vector_store %arg14[%c3_152, %c0_153, %c0_154], %196 {strides = array<i32>} : memref<8x8x1xf32, #tpu.memory_space<vmem>>, vector<1x8x1xf32>,
    %c4 = arith.constant 4 : index
    %c0_155 = arith.constant 0 : index
    %c0_156 = arith.constant 0 : index
    %197 = vector.load %arg6[%c4, %c0_155, %c0_156] : memref<8x32x4xf32, #tpu.memory_space<vmem>>, vector<1x32x4xf32>
    %198 = vector.shape_cast %197 : vector<1x32x4xf32> to vector<32x4xf32>
    %cst_157 = arith.constant dense<0.000000e+00> : vector<16x4xf32>
    %199 = tpu.matmul %4, %198, %cst_157 {dimension_numbers = #tpu.dot_dimension_numbers<[1], [0], [0], [1], [0, 0, 1, 1], [], []>} : vector<16x32xf32>, vector<32x4xf32>, vector<16x4xf32> -> vector<16x4xf32>
    %c4_158 = arith.constant 4 : index
    %c0_159 = arith.constant 0 : index
    %c0_160 = arith.constant 0 : index
    %200 = vector.load %arg7[%c4_158, %c0_159, %c0_160] : memref<8x1x4xf32, #tpu.memory_space<vmem>>, vector<1x1x4xf32>
    %201 = vector.shape_cast %200 : vector<1x1x4xf32> to vector<1x4xf32>
    %202 = vector.broadcast %201 : vector<1x4xf32> to vector<16x4xf32>
    %203 = arith.addf %199, %202 : vector<16x4xf32>
    %c4_161 = arith.constant 4 : index
    %c0_162 = arith.constant 0 : index
    %c0_163 = arith.constant 0 : index
    %204 = vector.load %arg8[%c4_161, %c0_162, %c0_163] : memref<8x32x4xf32, #tpu.memory_space<vmem>>, vector<1x32x4xf32>
    %205 = vector.shape_cast %204 : vector<1x32x4xf32> to vector<32x4xf32>
    %cst_164 = arith.constant dense<0.000000e+00> : vector<16x4xf32>
    %206 = tpu.matmul %4, %205, %cst_164 {dimension_numbers = #tpu.dot_dimension_numbers<[1], [0], [0], [1], [0, 0, 1, 1], [], []>} : vector<16x32xf32>, vector<32x4xf32>, vector<16x4xf32> -> vector<16x4xf32>
    %c4_165 = arith.constant 4 : index
    %c0_166 = arith.constant 0 : index
    %c0_167 = arith.constant 0 : index
    %207 = vector.load %arg9[%c4_165, %c0_166, %c0_167] : memref<8x1x4xf32, #tpu.memory_space<vmem>>, vector<1x1x4xf32>
    %208 = vector.shape_cast %207 : vector<1x1x4xf32> to vector<1x4xf32>
    %209 = vector.broadcast %208 : vector<1x4xf32> to vector<16x4xf32>
    %210 = arith.addf %206, %209 : vector<16x4xf32>
    %c4_168 = arith.constant 4 : index
    %c0_169 = arith.constant 0 : index
    %c0_170 = arith.constant 0 : index
    %211 = vector.load %arg13[%c4_168, %c0_169, %c0_170] : memref<8x8x4xf32, #tpu.memory_space<vmem>>, vector<1x8x4xf32>
    %212 = vector.shape_cast %211 : vector<1x8x4xf32> to vector<8x4xf32>
    "tpu.trace_start"() <{level = 10 : i32, message = "qd,kd->qk"}> : () -> ()
    %cst_171 = arith.constant dense<0.000000e+00> : vector<8x16xf32>
    %213 = tpu.matmul %212, %203, %cst_171 {dimension_numbers = #tpu.dot_dimension_numbers<[1], [1], [0], [0], [0, 0, 1, 0], [], []>} : vector<8x4xf32>, vector<16x4xf32>, vector<8x16xf32> -> vector<8x16xf32>
    "tpu.trace_stop"() : () -> ()
    %c4_172 = arith.constant 4 : index
    %c0_173 = arith.constant 0 : index
    %c0_174 = arith.constant 0 : index
    %214 = vector.load %arg14[%c4_172, %c0_173, %c0_174] : memref<8x8x1xf32, #tpu.memory_space<vmem>>, vector<1x8x1xf32>
    %215 = vector.shape_cast %214 : vector<1x8x1xf32> to vector<8x1xf32>
    %cst_175 = arith.constant dense<0xFF800000> : vector<8xf32>
    %216 = vector.multi_reduction <maximumf>, %213, %cst_175 [1] : vector<8x16xf32> to vector<8xf32>
    %217 = vector.shape_cast %216 : vector<8xf32> to vector<8x1xf32>
    %218 = arith.maximumf %215, %217 : vector<8x1xf32>
    %219 = arith.subf %215, %218 : vector<8x1xf32>
    %220 = math.exp %219 : vector<8x1xf32>
    %221 = vector.broadcast %218 : vector<8x1xf32> to vector<8x16xf32>
    %222 = arith.subf %213, %221 : vector<8x16xf32>
    %223 = math.exp %222 : vector<8x16xf32>
    %cst_176 = arith.constant dense<0.000000e+00> : vector<8xf32>
    %224 = vector.multi_reduction <add>, %223, %cst_176 [1] : vector<8x16xf32> to vector<8xf32>
    %225 = vector.shape_cast %224 : vector<8xf32> to vector<8x1xf32>
    %c4_177 = arith.constant 4 : index
    %c0_178 = arith.constant 0 : index
    %c0_179 = arith.constant 0 : index
    %226 = vector.load %arg15[%c4_177, %c0_178, %c0_179] : memref<8x8x1xf32, #tpu.memory_space<vmem>>, vector<1x8x1xf32>
    %227 = vector.shape_cast %226 : vector<1x8x1xf32> to vector<8x1xf32>
    %228 = arith.mulf %220, %227 : vector<8x1xf32>
    %229 = arith.addf %228, %225 : vector<8x1xf32>
    %c4_180 = arith.constant 4 : index
    %c0_181 = arith.constant 0 : index
    %c0_182 = arith.constant 0 : index
    %230 = vector.load %arg15[%c4_180, %c0_181, %c0_182] : memref<8x8x1xf32, #tpu.memory_space<vmem>>, vector<1x8x1xf32>
    %231 = vector.shape_cast %230 : vector<1x8x1xf32> to vector<8x1xf32>
    %232 = vector.shape_cast %229 : vector<8x1xf32> to vector<1x8x1xf32>
    tpu.vector_store %arg15[%c4_180, %c0_181, %c0_182], %232 {strides = array<i32>} : memref<8x8x1xf32, #tpu.memory_space<vmem>>, vector<1x8x1xf32>,
    %c4_183 = arith.constant 4 : index
    %c0_184 = arith.constant 0 : index
    %c0_185 = arith.constant 0 : index
    %233 = vector.load %arg16[%c4_183, %c0_184, %c0_185] : memref<8x8x4xf32, #tpu.memory_space<vmem>>, vector<1x8x4xf32>
    %234 = vector.shape_cast %233 : vector<1x8x4xf32> to vector<8x4xf32>
    %235 = vector.broadcast %220 : vector<8x1xf32> to vector<8x4xf32>
    %236 = arith.mulf %235, %234 : vector<8x4xf32>
    %cst_186 = arith.constant dense<0.000000e+00> : vector<8x4xf32>
    %237 = tpu.matmul %223, %210, %cst_186 {dimension_numbers = #tpu.dot_dimension_numbers<[1], [0], [0], [1], [0, 0, 1, 1], [], []>} : vector<8x16xf32>, vector<16x4xf32>, vector<8x4xf32> -> vector<8x4xf32>
    %238 = arith.addf %236, %237 : vector<8x4xf32>
    %c4_187 = arith.constant 4 : index
    %c0_188 = arith.constant 0 : index
    %c0_189 = arith.constant 0 : index
    %239 = vector.load %arg16[%c4_187, %c0_188, %c0_189] : memref<8x8x4xf32, #tpu.memory_space<vmem>>, vector<1x8x4xf32>
    %240 = vector.shape_cast %239 : vector<1x8x4xf32> to vector<8x4xf32>
    %241 = vector.shape_cast %238 : vector<8x4xf32> to vector<1x8x4xf32>
    tpu.vector_store %arg16[%c4_187, %c0_188, %c0_189], %241 {strides = array<i32>} : memref<8x8x4xf32, #tpu.memory_space<vmem>>, vector<1x8x4xf32>,
    %c4_190 = arith.constant 4 : index
    %c0_191 = arith.constant 0 : index
    %c0_192 = arith.constant 0 : index
    %242 = vector.load %arg14[%c4_190, %c0_191, %c0_192] : memref<8x8x1xf32, #tpu.memory_space<vmem>>, vector<1x8x1xf32>
    %243 = vector.shape_cast %242 : vector<1x8x1xf32> to vector<8x1xf32>
    %244 = vector.shape_cast %218 : vector<8x1xf32> to vector<1x8x1xf32>
    tpu.vector_store %arg14[%c4_190, %c0_191, %c0_192], %244 {strides = array<i32>} : memref<8x8x1xf32, #tpu.memory_space<vmem>>, vector<1x8x1xf32>,
    %c5 = arith.constant 5 : index
    %c0_193 = arith.constant 0 : index
    %c0_194 = arith.constant 0 : index
    %245 = vector.load %arg6[%c5, %c0_193, %c0_194] : memref<8x32x4xf32, #tpu.memory_space<vmem>>, vector<1x32x4xf32>
    %246 = vector.shape_cast %245 : vector<1x32x4xf32> to vector<32x4xf32>
    %cst_195 = arith.constant dense<0.000000e+00> : vector<16x4xf32>
    %247 = tpu.matmul %4, %246, %cst_195 {dimension_numbers = #tpu.dot_dimension_numbers<[1], [0], [0], [1], [0, 0, 1, 1], [], []>} : vector<16x32xf32>, vector<32x4xf32>, vector<16x4xf32> -> vector<16x4xf32>
    %c5_196 = arith.constant 5 : index
    %c0_197 = arith.constant 0 : index
    %c0_198 = arith.constant 0 : index
    %248 = vector.load %arg7[%c5_196, %c0_197, %c0_198] : memref<8x1x4xf32, #tpu.memory_space<vmem>>, vector<1x1x4xf32>
    %249 = vector.shape_cast %248 : vector<1x1x4xf32> to vector<1x4xf32>
    %250 = vector.broadcast %249 : vector<1x4xf32> to vector<16x4xf32>
    %251 = arith.addf %247, %250 : vector<16x4xf32>
    %c5_199 = arith.constant 5 : index
    %c0_200 = arith.constant 0 : index
    %c0_201 = arith.constant 0 : index
    %252 = vector.load %arg8[%c5_199, %c0_200, %c0_201] : memref<8x32x4xf32, #tpu.memory_space<vmem>>, vector<1x32x4xf32>
    %253 = vector.shape_cast %252 : vector<1x32x4xf32> to vector<32x4xf32>
    %cst_202 = arith.constant dense<0.000000e+00> : vector<16x4xf32>
    %254 = tpu.matmul %4, %253, %cst_202 {dimension_numbers = #tpu.dot_dimension_numbers<[1], [0], [0], [1], [0, 0, 1, 1], [], []>} : vector<16x32xf32>, vector<32x4xf32>, vector<16x4xf32> -> vector<16x4xf32>
    %c5_203 = arith.constant 5 : index
    %c0_204 = arith.constant 0 : index
    %c0_205 = arith.constant 0 : index
    %255 = vector.load %arg9[%c5_203, %c0_204, %c0_205] : memref<8x1x4xf32, #tpu.memory_space<vmem>>, vector<1x1x4xf32>
    %256 = vector.shape_cast %255 : vector<1x1x4xf32> to vector<1x4xf32>
    %257 = vector.broadcast %256 : vector<1x4xf32> to vector<16x4xf32>
    %258 = arith.addf %254, %257 : vector<16x4xf32>
    %c5_206 = arith.constant 5 : index
    %c0_207 = arith.constant 0 : index
    %c0_208 = arith.constant 0 : index
    %259 = vector.load %arg13[%c5_206, %c0_207, %c0_208] : memref<8x8x4xf32, #tpu.memory_space<vmem>>, vector<1x8x4xf32>
    %260 = vector.shape_cast %259 : vector<1x8x4xf32> to vector<8x4xf32>
    "tpu.trace_start"() <{level = 10 : i32, message = "qd,kd->qk"}> : () -> ()
    %cst_209 = arith.constant dense<0.000000e+00> : vector<8x16xf32>
    %261 = tpu.matmul %260, %251, %cst_209 {dimension_numbers = #tpu.dot_dimension_numbers<[1], [1], [0], [0], [0, 0, 1, 0], [], []>} : vector<8x4xf32>, vector<16x4xf32>, vector<8x16xf32> -> vector<8x16xf32>
    "tpu.trace_stop"() : () -> ()
    %c5_210 = arith.constant 5 : index
    %c0_211 = arith.constant 0 : index
    %c0_212 = arith.constant 0 : index
    %262 = vector.load %arg14[%c5_210, %c0_211, %c0_212] : memref<8x8x1xf32, #tpu.memory_space<vmem>>, vector<1x8x1xf32>
    %263 = vector.shape_cast %262 : vector<1x8x1xf32> to vector<8x1xf32>
    %cst_213 = arith.constant dense<0xFF800000> : vector<8xf32>
    %264 = vector.multi_reduction <maximumf>, %261, %cst_213 [1] : vector<8x16xf32> to vector<8xf32>
    %265 = vector.shape_cast %264 : vector<8xf32> to vector<8x1xf32>
    %266 = arith.maximumf %263, %265 : vector<8x1xf32>
    %267 = arith.subf %263, %266 : vector<8x1xf32>
    %268 = math.exp %267 : vector<8x1xf32>
    %269 = vector.broadcast %266 : vector<8x1xf32> to vector<8x16xf32>
    %270 = arith.subf %261, %269 : vector<8x16xf32>
    %271 = math.exp %270 : vector<8x16xf32>
    %cst_214 = arith.constant dense<0.000000e+00> : vector<8xf32>
    %272 = vector.multi_reduction <add>, %271, %cst_214 [1] : vector<8x16xf32> to vector<8xf32>
    %273 = vector.shape_cast %272 : vector<8xf32> to vector<8x1xf32>
    %c5_215 = arith.constant 5 : index
    %c0_216 = arith.constant 0 : index
    %c0_217 = arith.constant 0 : index
    %274 = vector.load %arg15[%c5_215, %c0_216, %c0_217] : memref<8x8x1xf32, #tpu.memory_space<vmem>>, vector<1x8x1xf32>
    %275 = vector.shape_cast %274 : vector<1x8x1xf32> to vector<8x1xf32>
    %276 = arith.mulf %268, %275 : vector<8x1xf32>
    %277 = arith.addf %276, %273 : vector<8x1xf32>
    %c5_218 = arith.constant 5 : index
    %c0_219 = arith.constant 0 : index
    %c0_220 = arith.constant 0 : index
    %278 = vector.load %arg15[%c5_218, %c0_219, %c0_220] : memref<8x8x1xf32, #tpu.memory_space<vmem>>, vector<1x8x1xf32>
    %279 = vector.shape_cast %278 : vector<1x8x1xf32> to vector<8x1xf32>
    %280 = vector.shape_cast %277 : vector<8x1xf32> to vector<1x8x1xf32>
    tpu.vector_store %arg15[%c5_218, %c0_219, %c0_220], %280 {strides = array<i32>} : memref<8x8x1xf32, #tpu.memory_space<vmem>>, vector<1x8x1xf32>,
    %c5_221 = arith.constant 5 : index
    %c0_222 = arith.constant 0 : index
    %c0_223 = arith.constant 0 : index
    %281 = vector.load %arg16[%c5_221, %c0_222, %c0_223] : memref<8x8x4xf32, #tpu.memory_space<vmem>>, vector<1x8x4xf32>
    %282 = vector.shape_cast %281 : vector<1x8x4xf32> to vector<8x4xf32>
    %283 = vector.broadcast %268 : vector<8x1xf32> to vector<8x4xf32>
    %284 = arith.mulf %283, %282 : vector<8x4xf32>
    %cst_224 = arith.constant dense<0.000000e+00> : vector<8x4xf32>
    %285 = tpu.matmul %271, %258, %cst_224 {dimension_numbers = #tpu.dot_dimension_numbers<[1], [0], [0], [1], [0, 0, 1, 1], [], []>} : vector<8x16xf32>, vector<16x4xf32>, vector<8x4xf32> -> vector<8x4xf32>
    %286 = arith.addf %284, %285 : vector<8x4xf32>
    %c5_225 = arith.constant 5 : index
    %c0_226 = arith.constant 0 : index
    %c0_227 = arith.constant 0 : index
    %287 = vector.load %arg16[%c5_225, %c0_226, %c0_227] : memref<8x8x4xf32, #tpu.memory_space<vmem>>, vector<1x8x4xf32>
    %288 = vector.shape_cast %287 : vector<1x8x4xf32> to vector<8x4xf32>
    %289 = vector.shape_cast %286 : vector<8x4xf32> to vector<1x8x4xf32>
    tpu.vector_store %arg16[%c5_225, %c0_226, %c0_227], %289 {strides = array<i32>} : memref<8x8x4xf32, #tpu.memory_space<vmem>>, vector<1x8x4xf32>,
    %c5_228 = arith.constant 5 : index
    %c0_229 = arith.constant 0 : index
    %c0_230 = arith.constant 0 : index
    %290 = vector.load %arg14[%c5_228, %c0_229, %c0_230] : memref<8x8x1xf32, #tpu.memory_space<vmem>>, vector<1x8x1xf32>
    %291 = vector.shape_cast %290 : vector<1x8x1xf32> to vector<8x1xf32>
    %292 = vector.shape_cast %266 : vector<8x1xf32> to vector<1x8x1xf32>
    tpu.vector_store %arg14[%c5_228, %c0_229, %c0_230], %292 {strides = array<i32>} : memref<8x8x1xf32, #tpu.memory_space<vmem>>, vector<1x8x1xf32>,
    %c6 = arith.constant 6 : index
    %c0_231 = arith.constant 0 : index
    %c0_232 = arith.constant 0 : index
    %293 = vector.load %arg6[%c6, %c0_231, %c0_232] : memref<8x32x4xf32, #tpu.memory_space<vmem>>, vector<1x32x4xf32>
    %294 = vector.shape_cast %293 : vector<1x32x4xf32> to vector<32x4xf32>
    %cst_233 = arith.constant dense<0.000000e+00> : vector<16x4xf32>
    %295 = tpu.matmul %4, %294, %cst_233 {dimension_numbers = #tpu.dot_dimension_numbers<[1], [0], [0], [1], [0, 0, 1, 1], [], []>} : vector<16x32xf32>, vector<32x4xf32>, vector<16x4xf32> -> vector<16x4xf32>
    %c6_234 = arith.constant 6 : index
    %c0_235 = arith.constant 0 : index
    %c0_236 = arith.constant 0 : index
    %296 = vector.load %arg7[%c6_234, %c0_235, %c0_236] : memref<8x1x4xf32, #tpu.memory_space<vmem>>, vector<1x1x4xf32>
    %297 = vector.shape_cast %296 : vector<1x1x4xf32> to vector<1x4xf32>
    %298 = vector.broadcast %297 : vector<1x4xf32> to vector<16x4xf32>
    %299 = arith.addf %295, %298 : vector<16x4xf32>
    %c6_237 = arith.constant 6 : index
    %c0_238 = arith.constant 0 : index
    %c0_239 = arith.constant 0 : index
    %300 = vector.load %arg8[%c6_237, %c0_238, %c0_239] : memref<8x32x4xf32, #tpu.memory_space<vmem>>, vector<1x32x4xf32>
    %301 = vector.shape_cast %300 : vector<1x32x4xf32> to vector<32x4xf32>
    %cst_240 = arith.constant dense<0.000000e+00> : vector<16x4xf32>
    %302 = tpu.matmul %4, %301, %cst_240 {dimension_numbers = #tpu.dot_dimension_numbers<[1], [0], [0], [1], [0, 0, 1, 1], [], []>} : vector<16x32xf32>, vector<32x4xf32>, vector<16x4xf32> -> vector<16x4xf32>
    %c6_241 = arith.constant 6 : index
    %c0_242 = arith.constant 0 : index
    %c0_243 = arith.constant 0 : index
    %303 = vector.load %arg9[%c6_241, %c0_242, %c0_243] : memref<8x1x4xf32, #tpu.memory_space<vmem>>, vector<1x1x4xf32>
    %304 = vector.shape_cast %303 : vector<1x1x4xf32> to vector<1x4xf32>
    %305 = vector.broadcast %304 : vector<1x4xf32> to vector<16x4xf32>
    %306 = arith.addf %302, %305 : vector<16x4xf32>
    %c6_244 = arith.constant 6 : index
    %c0_245 = arith.constant 0 : index
    %c0_246 = arith.constant 0 : index
    %307 = vector.load %arg13[%c6_244, %c0_245, %c0_246] : memref<8x8x4xf32, #tpu.memory_space<vmem>>, vector<1x8x4xf32>
    %308 = vector.shape_cast %307 : vector<1x8x4xf32> to vector<8x4xf32>
    "tpu.trace_start"() <{level = 10 : i32, message = "qd,kd->qk"}> : () -> ()
    %cst_247 = arith.constant dense<0.000000e+00> : vector<8x16xf32>
    %309 = tpu.matmul %308, %299, %cst_247 {dimension_numbers = #tpu.dot_dimension_numbers<[1], [1], [0], [0], [0, 0, 1, 0], [], []>} : vector<8x4xf32>, vector<16x4xf32>, vector<8x16xf32> -> vector<8x16xf32>
    "tpu.trace_stop"() : () -> ()
    %c6_248 = arith.constant 6 : index
    %c0_249 = arith.constant 0 : index
    %c0_250 = arith.constant 0 : index
    %310 = vector.load %arg14[%c6_248, %c0_249, %c0_250] : memref<8x8x1xf32, #tpu.memory_space<vmem>>, vector<1x8x1xf32>
    %311 = vector.shape_cast %310 : vector<1x8x1xf32> to vector<8x1xf32>
    %cst_251 = arith.constant dense<0xFF800000> : vector<8xf32>
    %312 = vector.multi_reduction <maximumf>, %309, %cst_251 [1] : vector<8x16xf32> to vector<8xf32>
    %313 = vector.shape_cast %312 : vector<8xf32> to vector<8x1xf32>
    %314 = arith.maximumf %311, %313 : vector<8x1xf32>
    %315 = arith.subf %311, %314 : vector<8x1xf32>
    %316 = math.exp %315 : vector<8x1xf32>
    %317 = vector.broadcast %314 : vector<8x1xf32> to vector<8x16xf32>
    %318 = arith.subf %309, %317 : vector<8x16xf32>
    %319 = math.exp %318 : vector<8x16xf32>
    %cst_252 = arith.constant dense<0.000000e+00> : vector<8xf32>
    %320 = vector.multi_reduction <add>, %319, %cst_252 [1] : vector<8x16xf32> to vector<8xf32>
    %321 = vector.shape_cast %320 : vector<8xf32> to vector<8x1xf32>
    %c6_253 = arith.constant 6 : index
    %c0_254 = arith.constant 0 : index
    %c0_255 = arith.constant 0 : index
    %322 = vector.load %arg15[%c6_253, %c0_254, %c0_255] : memref<8x8x1xf32, #tpu.memory_space<vmem>>, vector<1x8x1xf32>
    %323 = vector.shape_cast %322 : vector<1x8x1xf32> to vector<8x1xf32>
    %324 = arith.mulf %316, %323 : vector<8x1xf32>
    %325 = arith.addf %324, %321 : vector<8x1xf32>
    %c6_256 = arith.constant 6 : index
    %c0_257 = arith.constant 0 : index
    %c0_258 = arith.constant 0 : index
    %326 = vector.load %arg15[%c6_256, %c0_257, %c0_258] : memref<8x8x1xf32, #tpu.memory_space<vmem>>, vector<1x8x1xf32>
    %327 = vector.shape_cast %326 : vector<1x8x1xf32> to vector<8x1xf32>
    %328 = vector.shape_cast %325 : vector<8x1xf32> to vector<1x8x1xf32>
    tpu.vector_store %arg15[%c6_256, %c0_257, %c0_258], %328 {strides = array<i32>} : memref<8x8x1xf32, #tpu.memory_space<vmem>>, vector<1x8x1xf32>,
    %c6_259 = arith.constant 6 : index
    %c0_260 = arith.constant 0 : index
    %c0_261 = arith.constant 0 : index
    %329 = vector.load %arg16[%c6_259, %c0_260, %c0_261] : memref<8x8x4xf32, #tpu.memory_space<vmem>>, vector<1x8x4xf32>
    %330 = vector.shape_cast %329 : vector<1x8x4xf32> to vector<8x4xf32>
    %331 = vector.broadcast %316 : vector<8x1xf32> to vector<8x4xf32>
    %332 = arith.mulf %331, %330 : vector<8x4xf32>
    %cst_262 = arith.constant dense<0.000000e+00> : vector<8x4xf32>
    %333 = tpu.matmul %319, %306, %cst_262 {dimension_numbers = #tpu.dot_dimension_numbers<[1], [0], [0], [1], [0, 0, 1, 1], [], []>} : vector<8x16xf32>, vector<16x4xf32>, vector<8x4xf32> -> vector<8x4xf32>
    %334 = arith.addf %332, %333 : vector<8x4xf32>
    %c6_263 = arith.constant 6 : index
    %c0_264 = arith.constant 0 : index
    %c0_265 = arith.constant 0 : index
    %335 = vector.load %arg16[%c6_263, %c0_264, %c0_265] : memref<8x8x4xf32, #tpu.memory_space<vmem>>, vector<1x8x4xf32>
    %336 = vector.shape_cast %335 : vector<1x8x4xf32> to vector<8x4xf32>
    %337 = vector.shape_cast %334 : vector<8x4xf32> to vector<1x8x4xf32>
    tpu.vector_store %arg16[%c6_263, %c0_264, %c0_265], %337 {strides = array<i32>} : memref<8x8x4xf32, #tpu.memory_space<vmem>>, vector<1x8x4xf32>,
    %c6_266 = arith.constant 6 : index
    %c0_267 = arith.constant 0 : index
    %c0_268 = arith.constant 0 : index
    %338 = vector.load %arg14[%c6_266, %c0_267, %c0_268] : memref<8x8x1xf32, #tpu.memory_space<vmem>>, vector<1x8x1xf32>
    %339 = vector.shape_cast %338 : vector<1x8x1xf32> to vector<8x1xf32>
    %340 = vector.shape_cast %314 : vector<8x1xf32> to vector<1x8x1xf32>
    tpu.vector_store %arg14[%c6_266, %c0_267, %c0_268], %340 {strides = array<i32>} : memref<8x8x1xf32, #tpu.memory_space<vmem>>, vector<1x8x1xf32>,
    %c7 = arith.constant 7 : index
    %c0_269 = arith.constant 0 : index
    %c0_270 = arith.constant 0 : index
    %341 = vector.load %arg6[%c7, %c0_269, %c0_270] : memref<8x32x4xf32, #tpu.memory_space<vmem>>, vector<1x32x4xf32>
    %342 = vector.shape_cast %341 : vector<1x32x4xf32> to vector<32x4xf32>
    %cst_271 = arith.constant dense<0.000000e+00> : vector<16x4xf32>
    %343 = tpu.matmul %4, %342, %cst_271 {dimension_numbers = #tpu.dot_dimension_numbers<[1], [0], [0], [1], [0, 0, 1, 1], [], []>} : vector<16x32xf32>, vector<32x4xf32>, vector<16x4xf32> -> vector<16x4xf32>
    %c7_272 = arith.constant 7 : index
    %c0_273 = arith.constant 0 : index
    %c0_274 = arith.constant 0 : index
    %344 = vector.load %arg7[%c7_272, %c0_273, %c0_274] : memref<8x1x4xf32, #tpu.memory_space<vmem>>, vector<1x1x4xf32>
    %345 = vector.shape_cast %344 : vector<1x1x4xf32> to vector<1x4xf32>
    %346 = vector.broadcast %345 : vector<1x4xf32> to vector<16x4xf32>
    %347 = arith.addf %343, %346 : vector<16x4xf32>
    %c7_275 = arith.constant 7 : index
    %c0_276 = arith.constant 0 : index
    %c0_277 = arith.constant 0 : index
    %348 = vector.load %arg8[%c7_275, %c0_276, %c0_277] : memref<8x32x4xf32, #tpu.memory_space<vmem>>, vector<1x32x4xf32>
    %349 = vector.shape_cast %348 : vector<1x32x4xf32> to vector<32x4xf32>
    %cst_278 = arith.constant dense<0.000000e+00> : vector<16x4xf32>
    %350 = tpu.matmul %4, %349, %cst_278 {dimension_numbers = #tpu.dot_dimension_numbers<[1], [0], [0], [1], [0, 0, 1, 1], [], []>} : vector<16x32xf32>, vector<32x4xf32>, vector<16x4xf32> -> vector<16x4xf32>
    %c7_279 = arith.constant 7 : index
    %c0_280 = arith.constant 0 : index
    %c0_281 = arith.constant 0 : index
    %351 = vector.load %arg9[%c7_279, %c0_280, %c0_281] : memref<8x1x4xf32, #tpu.memory_space<vmem>>, vector<1x1x4xf32>
    %352 = vector.shape_cast %351 : vector<1x1x4xf32> to vector<1x4xf32>
    %353 = vector.broadcast %352 : vector<1x4xf32> to vector<16x4xf32>
    %354 = arith.addf %350, %353 : vector<16x4xf32>
    %c7_282 = arith.constant 7 : index
    %c0_283 = arith.constant 0 : index
    %c0_284 = arith.constant 0 : index
    %355 = vector.load %arg13[%c7_282, %c0_283, %c0_284] : memref<8x8x4xf32, #tpu.memory_space<vmem>>, vector<1x8x4xf32>
    %356 = vector.shape_cast %355 : vector<1x8x4xf32> to vector<8x4xf32>
    "tpu.trace_start"() <{level = 10 : i32, message = "qd,kd->qk"}> : () -> ()
    %cst_285 = arith.constant dense<0.000000e+00> : vector<8x16xf32>
    %357 = tpu.matmul %356, %347, %cst_285 {dimension_numbers = #tpu.dot_dimension_numbers<[1], [1], [0], [0], [0, 0, 1, 0], [], []>} : vector<8x4xf32>, vector<16x4xf32>, vector<8x16xf32> -> vector<8x16xf32>
    "tpu.trace_stop"() : () -> ()
    %c7_286 = arith.constant 7 : index
    %c0_287 = arith.constant 0 : index
    %c0_288 = arith.constant 0 : index
    %358 = vector.load %arg14[%c7_286, %c0_287, %c0_288] : memref<8x8x1xf32, #tpu.memory_space<vmem>>, vector<1x8x1xf32>
    %359 = vector.shape_cast %358 : vector<1x8x1xf32> to vector<8x1xf32>
    %cst_289 = arith.constant dense<0xFF800000> : vector<8xf32>
    %360 = vector.multi_reduction <maximumf>, %357, %cst_289 [1] : vector<8x16xf32> to vector<8xf32>
    %361 = vector.shape_cast %360 : vector<8xf32> to vector<8x1xf32>
    %362 = arith.maximumf %359, %361 : vector<8x1xf32>
    %363 = arith.subf %359, %362 : vector<8x1xf32>
    %364 = math.exp %363 : vector<8x1xf32>
    %365 = vector.broadcast %362 : vector<8x1xf32> to vector<8x16xf32>
    %366 = arith.subf %357, %365 : vector<8x16xf32>
    %367 = math.exp %366 : vector<8x16xf32>
    %cst_290 = arith.constant dense<0.000000e+00> : vector<8xf32>
    %368 = vector.multi_reduction <add>, %367, %cst_290 [1] : vector<8x16xf32> to vector<8xf32>
    %369 = vector.shape_cast %368 : vector<8xf32> to vector<8x1xf32>
    %c7_291 = arith.constant 7 : index
    %c0_292 = arith.constant 0 : index
    %c0_293 = arith.constant 0 : index
    %370 = vector.load %arg15[%c7_291, %c0_292, %c0_293] : memref<8x8x1xf32, #tpu.memory_space<vmem>>, vector<1x8x1xf32>
    %371 = vector.shape_cast %370 : vector<1x8x1xf32> to vector<8x1xf32>
    %372 = arith.mulf %364, %371 : vector<8x1xf32>
    %373 = arith.addf %372, %369 : vector<8x1xf32>
    %c7_294 = arith.constant 7 : index
    %c0_295 = arith.constant 0 : index
    %c0_296 = arith.constant 0 : index
    %374 = vector.load %arg15[%c7_294, %c0_295, %c0_296] : memref<8x8x1xf32, #tpu.memory_space<vmem>>, vector<1x8x1xf32>
    %375 = vector.shape_cast %374 : vector<1x8x1xf32> to vector<8x1xf32>
    %376 = vector.shape_cast %373 : vector<8x1xf32> to vector<1x8x1xf32>
    tpu.vector_store %arg15[%c7_294, %c0_295, %c0_296], %376 {strides = array<i32>} : memref<8x8x1xf32, #tpu.memory_space<vmem>>, vector<1x8x1xf32>,
    %c7_297 = arith.constant 7 : index
    %c0_298 = arith.constant 0 : index
    %c0_299 = arith.constant 0 : index
    %377 = vector.load %arg16[%c7_297, %c0_298, %c0_299] : memref<8x8x4xf32, #tpu.memory_space<vmem>>, vector<1x8x4xf32>
    %378 = vector.shape_cast %377 : vector<1x8x4xf32> to vector<8x4xf32>
    %379 = vector.broadcast %364 : vector<8x1xf32> to vector<8x4xf32>
    %380 = arith.mulf %379, %378 : vector<8x4xf32>
    %cst_300 = arith.constant dense<0.000000e+00> : vector<8x4xf32>
    %381 = tpu.matmul %367, %354, %cst_300 {dimension_numbers = #tpu.dot_dimension_numbers<[1], [0], [0], [1], [0, 0, 1, 1], [], []>} : vector<8x16xf32>, vector<16x4xf32>, vector<8x4xf32> -> vector<8x4xf32>
    %382 = arith.addf %380, %381 : vector<8x4xf32>
    %c7_301 = arith.constant 7 : index
    %c0_302 = arith.constant 0 : index
    %c0_303 = arith.constant 0 : index
    %383 = vector.load %arg16[%c7_301, %c0_302, %c0_303] : memref<8x8x4xf32, #tpu.memory_space<vmem>>, vector<1x8x4xf32>
    %384 = vector.shape_cast %383 : vector<1x8x4xf32> to vector<8x4xf32>
    %385 = vector.shape_cast %382 : vector<8x4xf32> to vector<1x8x4xf32>
    tpu.vector_store %arg16[%c7_301, %c0_302, %c0_303], %385 {strides = array<i32>} : memref<8x8x4xf32, #tpu.memory_space<vmem>>, vector<1x8x4xf32>,
    %c7_304 = arith.constant 7 : index
    %c0_305 = arith.constant 0 : index
    %c0_306 = arith.constant 0 : index
    %386 = vector.load %arg14[%c7_304, %c0_305, %c0_306] : memref<8x8x1xf32, #tpu.memory_space<vmem>>, vector<1x8x1xf32>
    %387 = vector.shape_cast %386 : vector<1x8x1xf32> to vector<8x1xf32>
    %388 = vector.shape_cast %362 : vector<8x1xf32> to vector<1x8x1xf32>
    tpu.vector_store %arg14[%c7_304, %c0_305, %c0_306], %388 {strides = array<i32>} : memref<8x8x1xf32, #tpu.memory_space<vmem>>, vector<1x8x1xf32>,
    %c0_i32_307 = arith.constant 0 : i32
    %389 = arith.cmpi eq, %arg1, %c0_i32_307 : i32
    %390 = arith.extui %389 : i1 to i32
    %c0_i32_308 = arith.constant 0 : i32
    %391 = arith.cmpi ne, %390, %c0_i32_308 : i32
    scf.if %391 {
      %c0_309 = arith.constant 0 : index
      %c0_310 = arith.constant 0 : index
      %392 = vector.load %arg11[%c0_309, %c0_310] : memref<1x32xf32, #tpu.memory_space<vmem>>, vector<1x32xf32>
      %393 = vector.shape_cast %392 : vector<1x32xf32> to vector<1x32xf32>
      %394 = vector.broadcast %393 : vector<1x32xf32> to vector<8x32xf32>
      %c0_311 = arith.constant 0 : index
      %c0_312 = arith.constant 0 : index
      %c0_313 = arith.constant 0 : index
      %395 = vector.load %arg15[%c0_311, %c0_312, %c0_313] : memref<8x8x1xf32, #tpu.memory_space<vmem>>, vector<1x8x1xf32>
      %396 = vector.shape_cast %395 : vector<1x8x1xf32> to vector<8x1xf32>
      %397 = tpu.reciprocal %396 : vector<8x1xf32> -> vector<8x1xf32>
      %c0_314 = arith.constant 0 : index
      %c0_315 = arith.constant 0 : index
      %c0_316 = arith.constant 0 : index
      %398 = vector.load %arg16[%c0_314, %c0_315, %c0_316] : memref<8x8x4xf32, #tpu.memory_space<vmem>>, vector<1x8x4xf32>
      %399 = vector.shape_cast %398 : vector<1x8x4xf32> to vector<8x4xf32>
      %400 = vector.broadcast %397 : vector<8x1xf32> to vector<8x4xf32>
      %401 = arith.mulf %399, %400 : vector<8x4xf32>
      %c0_317 = arith.constant 0 : index
      %c0_318 = arith.constant 0 : index
      %c0_319 = arith.constant 0 : index
      %402 = vector.load %arg10[%c0_317, %c0_318, %c0_319] : memref<8x4x32xf32, #tpu.memory_space<vmem>>, vector<1x4x32xf32>
      %403 = vector.shape_cast %402 : vector<1x4x32xf32> to vector<4x32xf32>
      %cst_320 = arith.constant dense<0.000000e+00> : vector<8x32xf32>
      %404 = tpu.matmul %401, %403, %cst_320 {dimension_numbers = #tpu.dot_dimension_numbers<[1], [0], [0], [1], [0, 0, 1, 1], [], []>} : vector<8x4xf32>, vector<4x32xf32>, vector<8x32xf32> -> vector<8x32xf32>
      %405 = arith.addf %394, %404 : vector<8x32xf32>
      %c1_321 = arith.constant 1 : index
      %c0_322 = arith.constant 0 : index
      %c0_323 = arith.constant 0 : index
      %406 = vector.load %arg15[%c1_321, %c0_322, %c0_323] : memref<8x8x1xf32, #tpu.memory_space<vmem>>, vector<1x8x1xf32>
      %407 = vector.shape_cast %406 : vector<1x8x1xf32> to vector<8x1xf32>
      %408 = tpu.reciprocal %407 : vector<8x1xf32> -> vector<8x1xf32>
      %c1_324 = arith.constant 1 : index
      %c0_325 = arith.constant 0 : index
      %c0_326 = arith.constant 0 : index
      %409 = vector.load %arg16[%c1_324, %c0_325, %c0_326] : memref<8x8x4xf32, #tpu.memory_space<vmem>>, vector<1x8x4xf32>
      %410 = vector.shape_cast %409 : vector<1x8x4xf32> to vector<8x4xf32>
      %411 = vector.broadcast %408 : vector<8x1xf32> to vector<8x4xf32>
      %412 = arith.mulf %410, %411 : vector<8x4xf32>
      %c1_327 = arith.constant 1 : index
      %c0_328 = arith.constant 0 : index
      %c0_329 = arith.constant 0 : index
      %413 = vector.load %arg10[%c1_327, %c0_328, %c0_329] : memref<8x4x32xf32, #tpu.memory_space<vmem>>, vector<1x4x32xf32>
      %414 = vector.shape_cast %413 : vector<1x4x32xf32> to vector<4x32xf32>
      %cst_330 = arith.constant dense<0.000000e+00> : vector<8x32xf32>
      %415 = tpu.matmul %412, %414, %cst_330 {dimension_numbers = #tpu.dot_dimension_numbers<[1], [0], [0], [1], [0, 0, 1, 1], [], []>} : vector<8x4xf32>, vector<4x32xf32>, vector<8x32xf32> -> vector<8x32xf32>
      %416 = arith.addf %405, %415 : vector<8x32xf32>
      %c2_331 = arith.constant 2 : index
      %c0_332 = arith.constant 0 : index
      %c0_333 = arith.constant 0 : index
      %417 = vector.load %arg15[%c2_331, %c0_332, %c0_333] : memref<8x8x1xf32, #tpu.memory_space<vmem>>, vector<1x8x1xf32>
      %418 = vector.shape_cast %417 : vector<1x8x1xf32> to vector<8x1xf32>
      %419 = tpu.reciprocal %418 : vector<8x1xf32> -> vector<8x1xf32>
      %c2_334 = arith.constant 2 : index
      %c0_335 = arith.constant 0 : index
      %c0_336 = arith.constant 0 : index
      %420 = vector.load %arg16[%c2_334, %c0_335, %c0_336] : memref<8x8x4xf32, #tpu.memory_space<vmem>>, vector<1x8x4xf32>
      %421 = vector.shape_cast %420 : vector<1x8x4xf32> to vector<8x4xf32>
      %422 = vector.broadcast %419 : vector<8x1xf32> to vector<8x4xf32>
      %423 = arith.mulf %421, %422 : vector<8x4xf32>
      %c2_337 = arith.constant 2 : index
      %c0_338 = arith.constant 0 : index
      %c0_339 = arith.constant 0 : index
      %424 = vector.load %arg10[%c2_337, %c0_338, %c0_339] : memref<8x4x32xf32, #tpu.memory_space<vmem>>, vector<1x4x32xf32>
      %425 = vector.shape_cast %424 : vector<1x4x32xf32> to vector<4x32xf32>
      %cst_340 = arith.constant dense<0.000000e+00> : vector<8x32xf32>
      %426 = tpu.matmul %423, %425, %cst_340 {dimension_numbers = #tpu.dot_dimension_numbers<[1], [0], [0], [1], [0, 0, 1, 1], [], []>} : vector<8x4xf32>, vector<4x32xf32>, vector<8x32xf32> -> vector<8x32xf32>
      %427 = arith.addf %416, %426 : vector<8x32xf32>
      %c3_341 = arith.constant 3 : index
      %c0_342 = arith.constant 0 : index
      %c0_343 = arith.constant 0 : index
      %428 = vector.load %arg15[%c3_341, %c0_342, %c0_343] : memref<8x8x1xf32, #tpu.memory_space<vmem>>, vector<1x8x1xf32>
      %429 = vector.shape_cast %428 : vector<1x8x1xf32> to vector<8x1xf32>
      %430 = tpu.reciprocal %429 : vector<8x1xf32> -> vector<8x1xf32>
      %c3_344 = arith.constant 3 : index
      %c0_345 = arith.constant 0 : index
      %c0_346 = arith.constant 0 : index
      %431 = vector.load %arg16[%c3_344, %c0_345, %c0_346] : memref<8x8x4xf32, #tpu.memory_space<vmem>>, vector<1x8x4xf32>
      %432 = vector.shape_cast %431 : vector<1x8x4xf32> to vector<8x4xf32>
      %433 = vector.broadcast %430 : vector<8x1xf32> to vector<8x4xf32>
      %434 = arith.mulf %432, %433 : vector<8x4xf32>
      %c3_347 = arith.constant 3 : index
      %c0_348 = arith.constant 0 : index
      %c0_349 = arith.constant 0 : index
      %435 = vector.load %arg10[%c3_347, %c0_348, %c0_349] : memref<8x4x32xf32, #tpu.memory_space<vmem>>, vector<1x4x32xf32>
      %436 = vector.shape_cast %435 : vector<1x4x32xf32> to vector<4x32xf32>
      %cst_350 = arith.constant dense<0.000000e+00> : vector<8x32xf32>
      %437 = tpu.matmul %434, %436, %cst_350 {dimension_numbers = #tpu.dot_dimension_numbers<[1], [0], [0], [1], [0, 0, 1, 1], [], []>} : vector<8x4xf32>, vector<4x32xf32>, vector<8x32xf32> -> vector<8x32xf32>
      %438 = arith.addf %427, %437 : vector<8x32xf32>
      %c4_351 = arith.constant 4 : index
      %c0_352 = arith.constant 0 : index
      %c0_353 = arith.constant 0 : index
      %439 = vector.load %arg15[%c4_351, %c0_352, %c0_353] : memref<8x8x1xf32, #tpu.memory_space<vmem>>, vector<1x8x1xf32>
      %440 = vector.shape_cast %439 : vector<1x8x1xf32> to vector<8x1xf32>
      %441 = tpu.reciprocal %440 : vector<8x1xf32> -> vector<8x1xf32>
      %c4_354 = arith.constant 4 : index
      %c0_355 = arith.constant 0 : index
      %c0_356 = arith.constant 0 : index
      %442 = vector.load %arg16[%c4_354, %c0_355, %c0_356] : memref<8x8x4xf32, #tpu.memory_space<vmem>>, vector<1x8x4xf32>
      %443 = vector.shape_cast %442 : vector<1x8x4xf32> to vector<8x4xf32>
      %444 = vector.broadcast %441 : vector<8x1xf32> to vector<8x4xf32>
      %445 = arith.mulf %443, %444 : vector<8x4xf32>
      %c4_357 = arith.constant 4 : index
      %c0_358 = arith.constant 0 : index
      %c0_359 = arith.constant 0 : index
      %446 = vector.load %arg10[%c4_357, %c0_358, %c0_359] : memref<8x4x32xf32, #tpu.memory_space<vmem>>, vector<1x4x32xf32>
      %447 = vector.shape_cast %446 : vector<1x4x32xf32> to vector<4x32xf32>
      %cst_360 = arith.constant dense<0.000000e+00> : vector<8x32xf32>
      %448 = tpu.matmul %445, %447, %cst_360 {dimension_numbers = #tpu.dot_dimension_numbers<[1], [0], [0], [1], [0, 0, 1, 1], [], []>} : vector<8x4xf32>, vector<4x32xf32>, vector<8x32xf32> -> vector<8x32xf32>
      %449 = arith.addf %438, %448 : vector<8x32xf32>
      %c5_361 = arith.constant 5 : index
      %c0_362 = arith.constant 0 : index
      %c0_363 = arith.constant 0 : index
      %450 = vector.load %arg15[%c5_361, %c0_362, %c0_363] : memref<8x8x1xf32, #tpu.memory_space<vmem>>, vector<1x8x1xf32>
      %451 = vector.shape_cast %450 : vector<1x8x1xf32> to vector<8x1xf32>
      %452 = tpu.reciprocal %451 : vector<8x1xf32> -> vector<8x1xf32>
      %c5_364 = arith.constant 5 : index
      %c0_365 = arith.constant 0 : index
      %c0_366 = arith.constant 0 : index
      %453 = vector.load %arg16[%c5_364, %c0_365, %c0_366] : memref<8x8x4xf32, #tpu.memory_space<vmem>>, vector<1x8x4xf32>
      %454 = vector.shape_cast %453 : vector<1x8x4xf32> to vector<8x4xf32>
      %455 = vector.broadcast %452 : vector<8x1xf32> to vector<8x4xf32>
      %456 = arith.mulf %454, %455 : vector<8x4xf32>
      %c5_367 = arith.constant 5 : index
      %c0_368 = arith.constant 0 : index
      %c0_369 = arith.constant 0 : index
      %457 = vector.load %arg10[%c5_367, %c0_368, %c0_369] : memref<8x4x32xf32, #tpu.memory_space<vmem>>, vector<1x4x32xf32>
      %458 = vector.shape_cast %457 : vector<1x4x32xf32> to vector<4x32xf32>
      %cst_370 = arith.constant dense<0.000000e+00> : vector<8x32xf32>
      %459 = tpu.matmul %456, %458, %cst_370 {dimension_numbers = #tpu.dot_dimension_numbers<[1], [0], [0], [1], [0, 0, 1, 1], [], []>} : vector<8x4xf32>, vector<4x32xf32>, vector<8x32xf32> -> vector<8x32xf32>
      %460 = arith.addf %449, %459 : vector<8x32xf32>
      %c6_371 = arith.constant 6 : index
      %c0_372 = arith.constant 0 : index
      %c0_373 = arith.constant 0 : index
      %461 = vector.load %arg15[%c6_371, %c0_372, %c0_373] : memref<8x8x1xf32, #tpu.memory_space<vmem>>, vector<1x8x1xf32>
      %462 = vector.shape_cast %461 : vector<1x8x1xf32> to vector<8x1xf32>
      %463 = tpu.reciprocal %462 : vector<8x1xf32> -> vector<8x1xf32>
      %c6_374 = arith.constant 6 : index
      %c0_375 = arith.constant 0 : index
      %c0_376 = arith.constant 0 : index
      %464 = vector.load %arg16[%c6_374, %c0_375, %c0_376] : memref<8x8x4xf32, #tpu.memory_space<vmem>>, vector<1x8x4xf32>
      %465 = vector.shape_cast %464 : vector<1x8x4xf32> to vector<8x4xf32>
      %466 = vector.broadcast %463 : vector<8x1xf32> to vector<8x4xf32>
      %467 = arith.mulf %465, %466 : vector<8x4xf32>
      %c6_377 = arith.constant 6 : index
      %c0_378 = arith.constant 0 : index
      %c0_379 = arith.constant 0 : index
      %468 = vector.load %arg10[%c6_377, %c0_378, %c0_379] : memref<8x4x32xf32, #tpu.memory_space<vmem>>, vector<1x4x32xf32>
      %469 = vector.shape_cast %468 : vector<1x4x32xf32> to vector<4x32xf32>
      %cst_380 = arith.constant dense<0.000000e+00> : vector<8x32xf32>
      %470 = tpu.matmul %467, %469, %cst_380 {dimension_numbers = #tpu.dot_dimension_numbers<[1], [0], [0], [1], [0, 0, 1, 1], [], []>} : vector<8x4xf32>, vector<4x32xf32>, vector<8x32xf32> -> vector<8x32xf32>
      %471 = arith.addf %460, %470 : vector<8x32xf32>
      %c7_381 = arith.constant 7 : index
      %c0_382 = arith.constant 0 : index
      %c0_383 = arith.constant 0 : index
      %472 = vector.load %arg15[%c7_381, %c0_382, %c0_383] : memref<8x8x1xf32, #tpu.memory_space<vmem>>, vector<1x8x1xf32>
      %473 = vector.shape_cast %472 : vector<1x8x1xf32> to vector<8x1xf32>
      %474 = tpu.reciprocal %473 : vector<8x1xf32> -> vector<8x1xf32>
      %c7_384 = arith.constant 7 : index
      %c0_385 = arith.constant 0 : index
      %c0_386 = arith.constant 0 : index
      %475 = vector.load %arg16[%c7_384, %c0_385, %c0_386] : memref<8x8x4xf32, #tpu.memory_space<vmem>>, vector<1x8x4xf32>
      %476 = vector.shape_cast %475 : vector<1x8x4xf32> to vector<8x4xf32>
      %477 = vector.broadcast %474 : vector<8x1xf32> to vector<8x4xf32>
      %478 = arith.mulf %476, %477 : vector<8x4xf32>
      %c7_387 = arith.constant 7 : index
      %c0_388 = arith.constant 0 : index
      %c0_389 = arith.constant 0 : index
      %479 = vector.load %arg10[%c7_387, %c0_388, %c0_389] : memref<8x4x32xf32, #tpu.memory_space<vmem>>, vector<1x4x32xf32>
      %480 = vector.shape_cast %479 : vector<1x4x32xf32> to vector<4x32xf32>
      %cst_390 = arith.constant dense<0.000000e+00> : vector<8x32xf32>
      %481 = tpu.matmul %478, %480, %cst_390 {dimension_numbers = #tpu.dot_dimension_numbers<[1], [0], [0], [1], [0, 0, 1, 1], [], []>} : vector<8x4xf32>, vector<4x32xf32>, vector<8x32xf32> -> vector<8x32xf32>
      %482 = arith.addf %471, %481 : vector<8x32xf32>
      %c0_391 = arith.constant 0 : index
      %c0_392 = arith.constant 0 : index
      %c0_393 = arith.constant 0 : index
      %483 = vector.load %arg12[%c0_391, %c0_392, %c0_393] : memref<1x8x32xf32, #tpu.memory_space<vmem>>, vector<1x8x32xf32>
      %484 = vector.shape_cast %483 : vector<1x8x32xf32> to vector<8x32xf32>
      %485 = vector.shape_cast %482 : vector<8x32xf32> to vector<1x8x32xf32>
      tpu.vector_store %arg12[%c0_391, %c0_392, %c0_393], %485 {strides = array<i32>} : memref<1x8x32xf32, #tpu.memory_space<vmem>>, vector<1x8x32xf32>,
    } else {
    }
    return
  }
  func.func @transform_0(%arg0: i32, %arg1: i32) -> (i32, i32, i32) {
    %c0_i32 = arith.constant 0 : i32
    %c0_i32_0 = arith.constant 0 : i32
    %c0_i32_1 = arith.constant 0 : i32
    return %arg0, %c0_i32, %c0_i32_0 : i32, i32, i32
  }
  func.func @transform_1(%arg0: i32, %arg1: i32) -> (i32, i32, i32) {
    %c0_i32 = arith.constant 0 : i32
    %c0_i32_0 = arith.constant 0 : i32
    return %arg0, %arg1, %c0_i32 : i32, i32, i32
  }
  func.func @transform_2(%arg0: i32, %arg1: i32) -> (i32, i32, i32) {
    %c0_i32 = arith.constant 0 : i32
    %c0_i32_0 = arith.constant 0 : i32
    %c0_i32_1 = arith.constant 0 : i32
    %c0_i32_2 = arith.constant 0 : i32
    return %c0_i32, %c0_i32_0, %c0_i32_1 : i32, i32, i32
  }
  func.func @transform_3(%arg0: i32, %arg1: i32) -> (i32, i32, i32) {
    %c0_i32 = arith.constant 0 : i32
    %c0_i32_0 = arith.constant 0 : i32
    %c0_i32_1 = arith.constant 0 : i32
    %c0_i32_2 = arith.constant 0 : i32
    return %c0_i32, %c0_i32_0, %c0_i32_1 : i32, i32, i32
  }
  func.func @transform_4(%arg0: i32, %arg1: i32) -> (i32, i32, i32) {
    %c0_i32 = arith.constant 0 : i32
    %c0_i32_0 = arith.constant 0 : i32
    %c0_i32_1 = arith.constant 0 : i32
    %c0_i32_2 = arith.constant 0 : i32
    return %c0_i32, %c0_i32_0, %c0_i32_1 : i32, i32, i32
  }
  func.func @transform_5(%arg0: i32, %arg1: i32) -> (i32, i32, i32) {
    %c0_i32 = arith.constant 0 : i32
    %c0_i32_0 = arith.constant 0 : i32
    %c0_i32_1 = arith.constant 0 : i32
    %c0_i32_2 = arith.constant 0 : i32
    return %c0_i32, %c0_i32_0, %c0_i32_1 : i32, i32, i32
  }
  func.func @transform_6(%arg0: i32, %arg1: i32) -> (i32, i32, i32) {
    %c0_i32 = arith.constant 0 : i32
    %c0_i32_0 = arith.constant 0 : i32
    %c0_i32_1 = arith.constant 0 : i32
    %c0_i32_2 = arith.constant 0 : i32
    return %c0_i32, %c0_i32_0, %c0_i32_1 : i32, i32, i32
  }
  func.func @transform_7(%arg0: i32, %arg1: i32) -> (i32, i32, i32) {
    %c0_i32 = arith.constant 0 : i32
    %c0_i32_0 = arith.constant 0 : i32
    %c0_i32_1 = arith.constant 0 : i32
    %c0_i32_2 = arith.constant 0 : i32
    return %c0_i32, %c0_i32_0, %c0_i32_1 : i32, i32, i32
  }
  func.func @transform_8(%arg0: i32, %arg1: i32) -> (i32, i32, i32) {
    %c0_i32 = arith.constant 0 : i32
    %c0_i32_0 = arith.constant 0 : i32
    %c0_i32_1 = arith.constant 0 : i32
    %c0_i32_2 = arith.constant 0 : i32
    return %c0_i32, %c0_i32_0, %c0_i32_1 : i32, i32, i32
  }
  func.func @transform_9(%arg0: i32, %arg1: i32) -> (i32, i32) {
    %c0_i32 = arith.constant 0 : i32
    %c0_i32_0 = arith.constant 0 : i32
    %c0_i32_1 = arith.constant 0 : i32
    return %c0_i32, %c0_i32_0 : i32, i32
  }
  func.func @transform_10(%arg0: i32, %arg1: i32) -> (i32, i32, i32) {
    %c0_i32 = arith.constant 0 : i32
    %c0_i32_0 = arith.constant 0 : i32
    %c0_i32_1 = arith.constant 0 : i32
    return %arg0, %c0_i32, %c0_i32_0 : i32, i32, i32
  }
}

module attributes {stable_mosaic.version = 11 : i64} {
  func.func @_cross_attn_kernel(%arg0: i32, %arg1: i32, %arg2: memref<1x8x32xf32, #tpu.memory_space<vmem>>, %arg3: memref<1x16x32xf32, #tpu.memory_space<vmem>>, %arg4: memref<8x32x4xf32, #tpu.memory_space<vmem>>, %arg5: memref<8x1x4xf32, #tpu.memory_space<vmem>>, %arg6: memref<8x32x4xf32, #tpu.memory_space<vmem>>, %arg7: memref<8x1x4xf32, #tpu.memory_space<vmem>>, %arg8: memref<8x32x4xf32, #tpu.memory_space<vmem>>, %arg9: memref<8x1x4xf32, #tpu.memory_space<vmem>>, %arg10: memref<8x4x32xf32, #tpu.memory_space<vmem>>, %arg11: memref<1x32xf32, #tpu.memory_space<vmem>>, %arg12: memref<1x8x32xf32, #tpu.memory_space<vmem>>, %arg13: memref<8x8x4xf32, #tpu.memory_space<vmem>>, %arg14: memref<8x8x1xf32, #tpu.memory_space<vmem>>, %arg15: memref<8x8x1xf32, #tpu.memory_space<vmem>>, %arg16: memref<8x8x4xf32, #tpu.memory_space<vmem>>) attributes {dimension_semantics = [#tpu.dimension_semantics<parallel>, #tpu.dimension_semantics<arbitrary>], iteration_bounds = array<i64: 2, 1>, scalar_prefetch = 0 : i64, scratch_operands = 4 : i64, tpu.core_type = #tpu.core_type<tc>, window_params = [{transform_indices = @transform_0, window_bounds = array<i64: 1, 8, 32>}, {transform_indices = @transform_1, window_bounds = array<i64: 1, 16, 32>}, {pipeline_mode = #tpu.pipeline_mode<synchronous>, transform_indices = @transform_2, window_bounds = array<i64: 8, 32, 4>}, {pipeline_mode = #tpu.pipeline_mode<synchronous>, transform_indices = @transform_3, window_bounds = array<i64: 8, 1, 4>}, {pipeline_mode = #tpu.pipeline_mode<synchronous>, transform_indices = @transform_4, window_bounds = array<i64: 8, 32, 4>}, {pipeline_mode = #tpu.pipeline_mode<synchronous>, transform_indices = @transform_5, window_bounds = array<i64: 8, 1, 4>}, {pipeline_mode = #tpu.pipeline_mode<synchronous>, transform_indices = @transform_6, window_bounds = array<i64: 8, 32, 4>}, {pipeline_mode = #tpu.pipeline_mode<synchronous>, transform_indices = @transform_7, window_bounds = array<i64: 8, 1, 4>}, {pipeline_mode = #tpu.pipeline_mode<synchronous>, transform_indices = @transform_8, window_bounds = array<i64: 8, 4, 32>}, {pipeline_mode = #tpu.pipeline_mode<synchronous>, transform_indices = @transform_9, window_bounds = array<i64: 1, 32>}, {transform_indices = @transform_10, window_bounds = array<i64: 1, 8, 32>}]} {
    %c0_i32 = arith.constant 0 : i32
    %0 = arith.cmpi eq, %arg1, %c0_i32 : i32
    %1 = arith.extui %0 : i1 to i32
    %c0_i32_0 = arith.constant 0 : i32
    %2 = arith.cmpi ne, %1, %c0_i32_0 : i32
    scf.if %2 {
      %c0_309 = arith.constant 0 : index
      %c0_310 = arith.constant 0 : index
      %c0_311 = arith.constant 0 : index
      %392 = vector.load %arg2[%c0_309, %c0_310, %c0_311] : memref<1x8x32xf32, #tpu.memory_space<vmem>>, vector<1x8x32xf32>
      %393 = vector.shape_cast %392 : vector<1x8x32xf32> to vector<8x32xf32>
      %c0_312 = arith.constant 0 : index
      %c0_313 = arith.constant 0 : index
      %c0_314 = arith.constant 0 : index
      %394 = vector.load %arg4[%c0_312, %c0_313, %c0_314] : memref<8x32x4xf32, #tpu.memory_space<vmem>>, vector<1x32x4xf32>
      %395 = vector.shape_cast %394 : vector<1x32x4xf32> to vector<32x4xf32>
      %cst_315 = arith.constant dense<0.000000e+00> : vector<8x4xf32>
      %396 = tpu.matmul %393, %395, %cst_315 {dimension_numbers = #tpu.dot_dimension_numbers<[1], [0], [0], [1], [0, 0, 1, 1], [], []>} : vector<8x32xf32>, vector<32x4xf32>, vector<8x4xf32> -> vector<8x4xf32>
      %c0_316 = arith.constant 0 : index
      %c0_317 = arith.constant 0 : index
      %c0_318 = arith.constant 0 : index
      %397 = vector.load %arg5[%c0_316, %c0_317, %c0_318] : memref<8x1x4xf32, #tpu.memory_space<vmem>>, vector<1x1x4xf32>
      %398 = vector.shape_cast %397 : vector<1x1x4xf32> to vector<1x4xf32>
      %399 = vector.broadcast %398 : vector<1x4xf32> to vector<8x4xf32>
      %400 = arith.addf %396, %399 : vector<8x4xf32>
      %c0_319 = arith.constant 0 : index
      %c0_320 = arith.constant 0 : index
      %c0_321 = arith.constant 0 : index
      %401 = vector.load %arg13[%c0_319, %c0_320, %c0_321] : memref<8x8x4xf32, #tpu.memory_space<vmem>>, vector<1x8x4xf32>
      %402 = vector.shape_cast %401 : vector<1x8x4xf32> to vector<8x4xf32>
      %403 = vector.shape_cast %400 : vector<8x4xf32> to vector<1x8x4xf32>
      tpu.vector_store %arg13[%c0_319, %c0_320, %c0_321], %403 {strides = array<i32>} : memref<8x8x4xf32, #tpu.memory_space<vmem>>, vector<1x8x4xf32>,
      %c1_322 = arith.constant 1 : index
      %c0_323 = arith.constant 0 : index
      %c0_324 = arith.constant 0 : index
      %404 = vector.load %arg4[%c1_322, %c0_323, %c0_324] : memref<8x32x4xf32, #tpu.memory_space<vmem>>, vector<1x32x4xf32>
      %405 = vector.shape_cast %404 : vector<1x32x4xf32> to vector<32x4xf32>
      %cst_325 = arith.constant dense<0.000000e+00> : vector<8x4xf32>
      %406 = tpu.matmul %393, %405, %cst_325 {dimension_numbers = #tpu.dot_dimension_numbers<[1], [0], [0], [1], [0, 0, 1, 1], [], []>} : vector<8x32xf32>, vector<32x4xf32>, vector<8x4xf32> -> vector<8x4xf32>
      %c1_326 = arith.constant 1 : index
      %c0_327 = arith.constant 0 : index
      %c0_328 = arith.constant 0 : index
      %407 = vector.load %arg5[%c1_326, %c0_327, %c0_328] : memref<8x1x4xf32, #tpu.memory_space<vmem>>, vector<1x1x4xf32>
      %408 = vector.shape_cast %407 : vector<1x1x4xf32> to vector<1x4xf32>
      %409 = vector.broadcast %408 : vector<1x4xf32> to vector<8x4xf32>
      %410 = arith.addf %406, %409 : vector<8x4xf32>
      %c1_329 = arith.constant 1 : index
      %c0_330 = arith.constant 0 : index
      %c0_331 = arith.constant 0 : index
      %411 = vector.load %arg13[%c1_329, %c0_330, %c0_331] : memref<8x8x4xf32, #tpu.memory_space<vmem>>, vector<1x8x4xf32>
      %412 = vector.shape_cast %411 : vector<1x8x4xf32> to vector<8x4xf32>
      %413 = vector.shape_cast %410 : vector<8x4xf32> to vector<1x8x4xf32>
      tpu.vector_store %arg13[%c1_329, %c0_330, %c0_331], %413 {strides = array<i32>} : memref<8x8x4xf32, #tpu.memory_space<vmem>>, vector<1x8x4xf32>,
      %c2_332 = arith.constant 2 : index
      %c0_333 = arith.constant 0 : index
      %c0_334 = arith.constant 0 : index
      %414 = vector.load %arg4[%c2_332, %c0_333, %c0_334] : memref<8x32x4xf32, #tpu.memory_space<vmem>>, vector<1x32x4xf32>
      %415 = vector.shape_cast %414 : vector<1x32x4xf32> to vector<32x4xf32>
      %cst_335 = arith.constant dense<0.000000e+00> : vector<8x4xf32>
      %416 = tpu.matmul %393, %415, %cst_335 {dimension_numbers = #tpu.dot_dimension_numbers<[1], [0], [0], [1], [0, 0, 1, 1], [], []>} : vector<8x32xf32>, vector<32x4xf32>, vector<8x4xf32> -> vector<8x4xf32>
      %c2_336 = arith.constant 2 : index
      %c0_337 = arith.constant 0 : index
      %c0_338 = arith.constant 0 : index
      %417 = vector.load %arg5[%c2_336, %c0_337, %c0_338] : memref<8x1x4xf32, #tpu.memory_space<vmem>>, vector<1x1x4xf32>
      %418 = vector.shape_cast %417 : vector<1x1x4xf32> to vector<1x4xf32>
      %419 = vector.broadcast %418 : vector<1x4xf32> to vector<8x4xf32>
      %420 = arith.addf %416, %419 : vector<8x4xf32>
      %c2_339 = arith.constant 2 : index
      %c0_340 = arith.constant 0 : index
      %c0_341 = arith.constant 0 : index
      %421 = vector.load %arg13[%c2_339, %c0_340, %c0_341] : memref<8x8x4xf32, #tpu.memory_space<vmem>>, vector<1x8x4xf32>
      %422 = vector.shape_cast %421 : vector<1x8x4xf32> to vector<8x4xf32>
      %423 = vector.shape_cast %420 : vector<8x4xf32> to vector<1x8x4xf32>
      tpu.vector_store %arg13[%c2_339, %c0_340, %c0_341], %423 {strides = array<i32>} : memref<8x8x4xf32, #tpu.memory_space<vmem>>, vector<1x8x4xf32>,
      %c3_342 = arith.constant 3 : index
      %c0_343 = arith.constant 0 : index
      %c0_344 = arith.constant 0 : index
      %424 = vector.load %arg4[%c3_342, %c0_343, %c0_344] : memref<8x32x4xf32, #tpu.memory_space<vmem>>, vector<1x32x4xf32>
      %425 = vector.shape_cast %424 : vector<1x32x4xf32> to vector<32x4xf32>
      %cst_345 = arith.constant dense<0.000000e+00> : vector<8x4xf32>
      %426 = tpu.matmul %393, %425, %cst_345 {dimension_numbers = #tpu.dot_dimension_numbers<[1], [0], [0], [1], [0, 0, 1, 1], [], []>} : vector<8x32xf32>, vector<32x4xf32>, vector<8x4xf32> -> vector<8x4xf32>
      %c3_346 = arith.constant 3 : index
      %c0_347 = arith.constant 0 : index
      %c0_348 = arith.constant 0 : index
      %427 = vector.load %arg5[%c3_346, %c0_347, %c0_348] : memref<8x1x4xf32, #tpu.memory_space<vmem>>, vector<1x1x4xf32>
      %428 = vector.shape_cast %427 : vector<1x1x4xf32> to vector<1x4xf32>
      %429 = vector.broadcast %428 : vector<1x4xf32> to vector<8x4xf32>
      %430 = arith.addf %426, %429 : vector<8x4xf32>
      %c3_349 = arith.constant 3 : index
      %c0_350 = arith.constant 0 : index
      %c0_351 = arith.constant 0 : index
      %431 = vector.load %arg13[%c3_349, %c0_350, %c0_351] : memref<8x8x4xf32, #tpu.memory_space<vmem>>, vector<1x8x4xf32>
      %432 = vector.shape_cast %431 : vector<1x8x4xf32> to vector<8x4xf32>
      %433 = vector.shape_cast %430 : vector<8x4xf32> to vector<1x8x4xf32>
      tpu.vector_store %arg13[%c3_349, %c0_350, %c0_351], %433 {strides = array<i32>} : memref<8x8x4xf32, #tpu.memory_space<vmem>>, vector<1x8x4xf32>,
      %c4_352 = arith.constant 4 : index
      %c0_353 = arith.constant 0 : index
      %c0_354 = arith.constant 0 : index
      %434 = vector.load %arg4[%c4_352, %c0_353, %c0_354] : memref<8x32x4xf32, #tpu.memory_space<vmem>>, vector<1x32x4xf32>
      %435 = vector.shape_cast %434 : vector<1x32x4xf32> to vector<32x4xf32>
      %cst_355 = arith.constant dense<0.000000e+00> : vector<8x4xf32>
      %436 = tpu.matmul %393, %435, %cst_355 {dimension_numbers = #tpu.dot_dimension_numbers<[1], [0], [0], [1], [0, 0, 1, 1], [], []>} : vector<8x32xf32>, vector<32x4xf32>, vector<8x4xf32> -> vector<8x4xf32>
      %c4_356 = arith.constant 4 : index
      %c0_357 = arith.constant 0 : index
      %c0_358 = arith.constant 0 : index
      %437 = vector.load %arg5[%c4_356, %c0_357, %c0_358] : memref<8x1x4xf32, #tpu.memory_space<vmem>>, vector<1x1x4xf32>
      %438 = vector.shape_cast %437 : vector<1x1x4xf32> to vector<1x4xf32>
      %439 = vector.broadcast %438 : vector<1x4xf32> to vector<8x4xf32>
      %440 = arith.addf %436, %439 : vector<8x4xf32>
      %c4_359 = arith.constant 4 : index
      %c0_360 = arith.constant 0 : index
      %c0_361 = arith.constant 0 : index
      %441 = vector.load %arg13[%c4_359, %c0_360, %c0_361] : memref<8x8x4xf32, #tpu.memory_space<vmem>>, vector<1x8x4xf32>
      %442 = vector.shape_cast %441 : vector<1x8x4xf32> to vector<8x4xf32>
      %443 = vector.shape_cast %440 : vector<8x4xf32> to vector<1x8x4xf32>
      tpu.vector_store %arg13[%c4_359, %c0_360, %c0_361], %443 {strides = array<i32>} : memref<8x8x4xf32, #tpu.memory_space<vmem>>, vector<1x8x4xf32>,
      %c5_362 = arith.constant 5 : index
      %c0_363 = arith.constant 0 : index
      %c0_364 = arith.constant 0 : index
      %444 = vector.load %arg4[%c5_362, %c0_363, %c0_364] : memref<8x32x4xf32, #tpu.memory_space<vmem>>, vector<1x32x4xf32>
      %445 = vector.shape_cast %444 : vector<1x32x4xf32> to vector<32x4xf32>
      %cst_365 = arith.constant dense<0.000000e+00> : vector<8x4xf32>
      %446 = tpu.matmul %393, %445, %cst_365 {dimension_numbers = #tpu.dot_dimension_numbers<[1], [0], [0], [1], [0, 0, 1, 1], [], []>} : vector<8x32xf32>, vector<32x4xf32>, vector<8x4xf32> -> vector<8x4xf32>
      %c5_366 = arith.constant 5 : index
      %c0_367 = arith.constant 0 : index
      %c0_368 = arith.constant 0 : index
      %447 = vector.load %arg5[%c5_366, %c0_367, %c0_368] : memref<8x1x4xf32, #tpu.memory_space<vmem>>, vector<1x1x4xf32>
      %448 = vector.shape_cast %447 : vector<1x1x4xf32> to vector<1x4xf32>
      %449 = vector.broadcast %448 : vector<1x4xf32> to vector<8x4xf32>
      %450 = arith.addf %446, %449 : vector<8x4xf32>
      %c5_369 = arith.constant 5 : index
      %c0_370 = arith.constant 0 : index
      %c0_371 = arith.constant 0 : index
      %451 = vector.load %arg13[%c5_369, %c0_370, %c0_371] : memref<8x8x4xf32, #tpu.memory_space<vmem>>, vector<1x8x4xf32>
      %452 = vector.shape_cast %451 : vector<1x8x4xf32> to vector<8x4xf32>
      %453 = vector.shape_cast %450 : vector<8x4xf32> to vector<1x8x4xf32>
      tpu.vector_store %arg13[%c5_369, %c0_370, %c0_371], %453 {strides = array<i32>} : memref<8x8x4xf32, #tpu.memory_space<vmem>>, vector<1x8x4xf32>,
      %c6_372 = arith.constant 6 : index
      %c0_373 = arith.constant 0 : index
      %c0_374 = arith.constant 0 : index
      %454 = vector.load %arg4[%c6_372, %c0_373, %c0_374] : memref<8x32x4xf32, #tpu.memory_space<vmem>>, vector<1x32x4xf32>
      %455 = vector.shape_cast %454 : vector<1x32x4xf32> to vector<32x4xf32>
      %cst_375 = arith.constant dense<0.000000e+00> : vector<8x4xf32>
      %456 = tpu.matmul %393, %455, %cst_375 {dimension_numbers = #tpu.dot_dimension_numbers<[1], [0], [0], [1], [0, 0, 1, 1], [], []>} : vector<8x32xf32>, vector<32x4xf32>, vector<8x4xf32> -> vector<8x4xf32>
      %c6_376 = arith.constant 6 : index
      %c0_377 = arith.constant 0 : index
      %c0_378 = arith.constant 0 : index
      %457 = vector.load %arg5[%c6_376, %c0_377, %c0_378] : memref<8x1x4xf32, #tpu.memory_space<vmem>>, vector<1x1x4xf32>
      %458 = vector.shape_cast %457 : vector<1x1x4xf32> to vector<1x4xf32>
      %459 = vector.broadcast %458 : vector<1x4xf32> to vector<8x4xf32>
      %460 = arith.addf %456, %459 : vector<8x4xf32>
      %c6_379 = arith.constant 6 : index
      %c0_380 = arith.constant 0 : index
      %c0_381 = arith.constant 0 : index
      %461 = vector.load %arg13[%c6_379, %c0_380, %c0_381] : memref<8x8x4xf32, #tpu.memory_space<vmem>>, vector<1x8x4xf32>
      %462 = vector.shape_cast %461 : vector<1x8x4xf32> to vector<8x4xf32>
      %463 = vector.shape_cast %460 : vector<8x4xf32> to vector<1x8x4xf32>
      tpu.vector_store %arg13[%c6_379, %c0_380, %c0_381], %463 {strides = array<i32>} : memref<8x8x4xf32, #tpu.memory_space<vmem>>, vector<1x8x4xf32>,
      %c7_382 = arith.constant 7 : index
      %c0_383 = arith.constant 0 : index
      %c0_384 = arith.constant 0 : index
      %464 = vector.load %arg4[%c7_382, %c0_383, %c0_384] : memref<8x32x4xf32, #tpu.memory_space<vmem>>, vector<1x32x4xf32>
      %465 = vector.shape_cast %464 : vector<1x32x4xf32> to vector<32x4xf32>
      %cst_385 = arith.constant dense<0.000000e+00> : vector<8x4xf32>
      %466 = tpu.matmul %393, %465, %cst_385 {dimension_numbers = #tpu.dot_dimension_numbers<[1], [0], [0], [1], [0, 0, 1, 1], [], []>} : vector<8x32xf32>, vector<32x4xf32>, vector<8x4xf32> -> vector<8x4xf32>
      %c7_386 = arith.constant 7 : index
      %c0_387 = arith.constant 0 : index
      %c0_388 = arith.constant 0 : index
      %467 = vector.load %arg5[%c7_386, %c0_387, %c0_388] : memref<8x1x4xf32, #tpu.memory_space<vmem>>, vector<1x1x4xf32>
      %468 = vector.shape_cast %467 : vector<1x1x4xf32> to vector<1x4xf32>
      %469 = vector.broadcast %468 : vector<1x4xf32> to vector<8x4xf32>
      %470 = arith.addf %466, %469 : vector<8x4xf32>
      %c7_389 = arith.constant 7 : index
      %c0_390 = arith.constant 0 : index
      %c0_391 = arith.constant 0 : index
      %471 = vector.load %arg13[%c7_389, %c0_390, %c0_391] : memref<8x8x4xf32, #tpu.memory_space<vmem>>, vector<1x8x4xf32>
      %472 = vector.shape_cast %471 : vector<1x8x4xf32> to vector<8x4xf32>
      %473 = vector.shape_cast %470 : vector<8x4xf32> to vector<1x8x4xf32>
      tpu.vector_store %arg13[%c7_389, %c0_390, %c0_391], %473 {strides = array<i32>} : memref<8x8x4xf32, #tpu.memory_space<vmem>>, vector<1x8x4xf32>,
      %cst_392 = arith.constant 0xFF800000 : f32
      %474 = vector.broadcast %cst_392 : f32 to vector<8x8x1xf32>
      %c0_393 = arith.constant 0 : index
      %c0_394 = arith.constant 0 : index
      %c0_395 = arith.constant 0 : index
      %475 = vector.load %arg14[%c0_393, %c0_394, %c0_395] : memref<8x8x1xf32, #tpu.memory_space<vmem>>, vector<8x8x1xf32>
      tpu.vector_store %arg14[%c0_393, %c0_394, %c0_395], %474 {strides = array<i32>} : memref<8x8x1xf32, #tpu.memory_space<vmem>>, vector<8x8x1xf32>,
      %cst_396 = arith.constant 0.000000e+00 : f32
      %476 = vector.broadcast %cst_396 : f32 to vector<8x8x1xf32>
      %c0_397 = arith.constant 0 : index
      %c0_398 = arith.constant 0 : index
      %c0_399 = arith.constant 0 : index
      %477 = vector.load %arg15[%c0_397, %c0_398, %c0_399] : memref<8x8x1xf32, #tpu.memory_space<vmem>>, vector<8x8x1xf32>
      tpu.vector_store %arg15[%c0_397, %c0_398, %c0_399], %476 {strides = array<i32>} : memref<8x8x1xf32, #tpu.memory_space<vmem>>, vector<8x8x1xf32>,
      %cst_400 = arith.constant 0.000000e+00 : f32
      %478 = vector.broadcast %cst_400 : f32 to vector<8x8x4xf32>
      %c0_401 = arith.constant 0 : index
      %c0_402 = arith.constant 0 : index
      %c0_403 = arith.constant 0 : index
      %479 = vector.load %arg16[%c0_401, %c0_402, %c0_403] : memref<8x8x4xf32, #tpu.memory_space<vmem>>, vector<8x8x4xf32>
      tpu.vector_store %arg16[%c0_401, %c0_402, %c0_403], %478 {strides = array<i32>} : memref<8x8x4xf32, #tpu.memory_space<vmem>>, vector<8x8x4xf32>,
    } else {
    }
    %c0 = arith.constant 0 : index
    %c0_1 = arith.constant 0 : index
    %c0_2 = arith.constant 0 : index
    %3 = vector.load %arg3[%c0, %c0_1, %c0_2] : memref<1x16x32xf32, #tpu.memory_space<vmem>>, vector<1x16x32xf32>
    %4 = vector.shape_cast %3 : vector<1x16x32xf32> to vector<16x32xf32>
    %c0_3 = arith.constant 0 : index
    %c0_4 = arith.constant 0 : index
    %c0_5 = arith.constant 0 : index
    %5 = vector.load %arg6[%c0_3, %c0_4, %c0_5] : memref<8x32x4xf32, #tpu.memory_space<vmem>>, vector<1x32x4xf32>
    %6 = vector.shape_cast %5 : vector<1x32x4xf32> to vector<32x4xf32>
    %cst = arith.constant dense<0.000000e+00> : vector<16x4xf32>
    %7 = tpu.matmul %4, %6, %cst {dimension_numbers = #tpu.dot_dimension_numbers<[1], [0], [0], [1], [0, 0, 1, 1], [], []>} : vector<16x32xf32>, vector<32x4xf32>, vector<16x4xf32> -> vector<16x4xf32>
    %c0_6 = arith.constant 0 : index
    %c0_7 = arith.constant 0 : index
    %c0_8 = arith.constant 0 : index
    %8 = vector.load %arg7[%c0_6, %c0_7, %c0_8] : memref<8x1x4xf32, #tpu.memory_space<vmem>>, vector<1x1x4xf32>
    %9 = vector.shape_cast %8 : vector<1x1x4xf32> to vector<1x4xf32>
    %10 = vector.broadcast %9 : vector<1x4xf32> to vector<16x4xf32>
    %11 = arith.addf %7, %10 : vector<16x4xf32>
    %c0_9 = arith.constant 0 : index
    %c0_10 = arith.constant 0 : index
    %c0_11 = arith.constant 0 : index
    %12 = vector.load %arg8[%c0_9, %c0_10, %c0_11] : memref<8x32x4xf32, #tpu.memory_space<vmem>>, vector<1x32x4xf32>
    %13 = vector.shape_cast %12 : vector<1x32x4xf32> to vector<32x4xf32>
    %cst_12 = arith.constant dense<0.000000e+00> : vector<16x4xf32>
    %14 = tpu.matmul %4, %13, %cst_12 {dimension_numbers = #tpu.dot_dimension_numbers<[1], [0], [0], [1], [0, 0, 1, 1], [], []>} : vector<16x32xf32>, vector<32x4xf32>, vector<16x4xf32> -> vector<16x4xf32>
    %c0_13 = arith.constant 0 : index
    %c0_14 = arith.constant 0 : index
    %c0_15 = arith.constant 0 : index
    %15 = vector.load %arg9[%c0_13, %c0_14, %c0_15] : memref<8x1x4xf32, #tpu.memory_space<vmem>>, vector<1x1x4xf32>
    %16 = vector.shape_cast %15 : vector<1x1x4xf32> to vector<1x4xf32>
    %17 = vector.broadcast %16 : vector<1x4xf32> to vector<16x4xf32>
    %18 = arith.addf %14, %17 : vector<16x4xf32>
    %c0_16 = arith.constant 0 : index
    %c0_17 = arith.constant 0 : index
    %c0_18 = arith.constant 0 : index
    %19 = vector.load %arg13[%c0_16, %c0_17, %c0_18] : memref<8x8x4xf32, #tpu.memory_space<vmem>>, vector<1x8x4xf32>
    %20 = vector.shape_cast %19 : vector<1x8x4xf32> to vector<8x4xf32>
    "tpu.trace_start"() <{level = 10 : i32, message = "qd,kd->qk"}> : () -> ()
    %cst_19 = arith.constant dense<0.000000e+00> : vector<8x16xf32>
    %21 = tpu.matmul %20, %11, %cst_19 {dimension_numbers = #tpu.dot_dimension_numbers<[1], [1], [0], [0], [0, 0, 1, 0], [], []>} : vector<8x4xf32>, vector<16x4xf32>, vector<8x16xf32> -> vector<8x16xf32>
    "tpu.trace_stop"() : () -> ()
    %c0_20 = arith.constant 0 : index
    %c0_21 = arith.constant 0 : index
    %c0_22 = arith.constant 0 : index
    %22 = vector.load %arg14[%c0_20, %c0_21, %c0_22] : memref<8x8x1xf32, #tpu.memory_space<vmem>>, vector<1x8x1xf32>
    %23 = vector.shape_cast %22 : vector<1x8x1xf32> to vector<8x1xf32>
    %cst_23 = arith.constant dense<0xFF800000> : vector<8xf32>
    %24 = vector.multi_reduction <maximumf>, %21, %cst_23 [1] : vector<8x16xf32> to vector<8xf32>
    %25 = vector.shape_cast %24 : vector<8xf32> to vector<8x1xf32>
    %26 = arith.maximumf %23, %25 : vector<8x1xf32>
    %27 = arith.subf %23, %26 : vector<8x1xf32>
    %28 = math.exp %27 : vector<8x1xf32>
    %29 = vector.broadcast %26 : vector<8x1xf32> to vector<8x16xf32>
    %30 = arith.subf %21, %29 : vector<8x16xf32>
    %31 = math.exp %30 : vector<8x16xf32>
    %cst_24 = arith.constant dense<0.000000e+00> : vector<8xf32>
    %32 = vector.multi_reduction <add>, %31, %cst_24 [1] : vector<8x16xf32> to vector<8xf32>
    %33 = vector.shape_cast %32 : vector<8xf32> to vector<8x1xf32>
    %c0_25 = arith.constant 0 : index
    %c0_26 = arith.constant 0 : index
    %c0_27 = arith.constant 0 : index
    %34 = vector.load %arg15[%c0_25, %c0_26, %c0_27] : memref<8x8x1xf32, #tpu.memory_space<vmem>>, vector<1x8x1xf32>
    %35 = vector.shape_cast %34 : vector<1x8x1xf32> to vector<8x1xf32>
    %36 = arith.mulf %28, %35 : vector<8x1xf32>
    %37 = arith.addf %36, %33 : vector<8x1xf32>
    %c0_28 = arith.constant 0 : index
    %c0_29 = arith.constant 0 : index
    %c0_30 = arith.constant 0 : index
    %38 = vector.load %arg15[%c0_28, %c0_29, %c0_30] : memref<8x8x1xf32, #tpu.memory_space<vmem>>, vector<1x8x1xf32>
    %39 = vector.shape_cast %38 : vector<1x8x1xf32> to vector<8x1xf32>
    %40 = vector.shape_cast %37 : vector<8x1xf32> to vector<1x8x1xf32>
    tpu.vector_store %arg15[%c0_28, %c0_29, %c0_30], %40 {strides = array<i32>} : memref<8x8x1xf32, #tpu.memory_space<vmem>>, vector<1x8x1xf32>,
    %c0_31 = arith.constant 0 : index
    %c0_32 = arith.constant 0 : index
    %c0_33 = arith.constant 0 : index
    %41 = vector.load %arg16[%c0_31, %c0_32, %c0_33] : memref<8x8x4xf32, #tpu.memory_space<vmem>>, vector<1x8x4xf32>
    %42 = vector.shape_cast %41 : vector<1x8x4xf32> to vector<8x4xf32>
    %43 = vector.broadcast %28 : vector<8x1xf32> to vector<8x4xf32>
    %44 = arith.mulf %43, %42 : vector<8x4xf32>
    %cst_34 = arith.constant dense<0.000000e+00> : vector<8x4xf32>
    %45 = tpu.matmul %31, %18, %cst_34 {dimension_numbers = #tpu.dot_dimension_numbers<[1], [0], [0], [1], [0, 0, 1, 1], [], []>} : vector<8x16xf32>, vector<16x4xf32>, vector<8x4xf32> -> vector<8x4xf32>
    %46 = arith.addf %44, %45 : vector<8x4xf32>
    %c0_35 = arith.constant 0 : index
    %c0_36 = arith.constant 0 : index
    %c0_37 = arith.constant 0 : index
    %47 = vector.load %arg16[%c0_35, %c0_36, %c0_37] : memref<8x8x4xf32, #tpu.memory_space<vmem>>, vector<1x8x4xf32>
    %48 = vector.shape_cast %47 : vector<1x8x4xf32> to vector<8x4xf32>
    %49 = vector.shape_cast %46 : vector<8x4xf32> to vector<1x8x4xf32>
    tpu.vector_store %arg16[%c0_35, %c0_36, %c0_37], %49 {strides = array<i32>} : memref<8x8x4xf32, #tpu.memory_space<vmem>>, vector<1x8x4xf32>,
    %c0_38 = arith.constant 0 : index
    %c0_39 = arith.constant 0 : index
    %c0_40 = arith.constant 0 : index
    %50 = vector.load %arg14[%c0_38, %c0_39, %c0_40] : memref<8x8x1xf32, #tpu.memory_space<vmem>>, vector<1x8x1xf32>
    %51 = vector.shape_cast %50 : vector<1x8x1xf32> to vector<8x1xf32>
    %52 = vector.shape_cast %26 : vector<8x1xf32> to vector<1x8x1xf32>
    tpu.vector_store %arg14[%c0_38, %c0_39, %c0_40], %52 {strides = array<i32>} : memref<8x8x1xf32, #tpu.memory_space<vmem>>, vector<1x8x1xf32>,
    %c1 = arith.constant 1 : index
    %c0_41 = arith.constant 0 : index
    %c0_42 = arith.constant 0 : index
    %53 = vector.load %arg6[%c1, %c0_41, %c0_42] : memref<8x32x4xf32, #tpu.memory_space<vmem>>, vector<1x32x4xf32>
    %54 = vector.shape_cast %53 : vector<1x32x4xf32> to vector<32x4xf32>
    %cst_43 = arith.constant dense<0.000000e+00> : vector<16x4xf32>
    %55 = tpu.matmul %4, %54, %cst_43 {dimension_numbers = #tpu.dot_dimension_numbers<[1], [0], [0], [1], [0, 0, 1, 1], [], []>} : vector<16x32xf32>, vector<32x4xf32>, vector<16x4xf32> -> vector<16x4xf32>
    %c1_44 = arith.constant 1 : index
    %c0_45 = arith.constant 0 : index
    %c0_46 = arith.constant 0 : index
    %56 = vector.load %arg7[%c1_44, %c0_45, %c0_46] : memref<8x1x4xf32, #tpu.memory_space<vmem>>, vector<1x1x4xf32>
    %57 = vector.shape_cast %56 : vector<1x1x4xf32> to vector<1x4xf32>
    %58 = vector.broadcast %57 : vector<1x4xf32> to vector<16x4xf32>
    %59 = arith.addf %55, %58 : vector<16x4xf32>
    %c1_47 = arith.constant 1 : index
    %c0_48 = arith.constant 0 : index
    %c0_49 = arith.constant 0 : index
    %60 = vector.load %arg8[%c1_47, %c0_48, %c0_49] : memref<8x32x4xf32, #tpu.memory_space<vmem>>, vector<1x32x4xf32>
    %61 = vector.shape_cast %60 : vector<1x32x4xf32> to vector<32x4xf32>
    %cst_50 = arith.constant dense<0.000000e+00> : vector<16x4xf32>
    %62 = tpu.matmul %4, %61, %cst_50 {dimension_numbers = #tpu.dot_dimension_numbers<[1], [0], [0], [1], [0, 0, 1, 1], [], []>} : vector<16x32xf32>, vector<32x4xf32>, vector<16x4xf32> -> vector<16x4xf32>
    %c1_51 = arith.constant 1 : index
    %c0_52 = arith.constant 0 : index
    %c0_53 = arith.constant 0 : index
    %63 = vector.load %arg9[%c1_51, %c0_52, %c0_53] : memref<8x1x4xf32, #tpu.memory_space<vmem>>, vector<1x1x4xf32>
    %64 = vector.shape_cast %63 : vector<1x1x4xf32> to vector<1x4xf32>
    %65 = vector.broadcast %64 : vector<1x4xf32> to vector<16x4xf32>
    %66 = arith.addf %62, %65 : vector<16x4xf32>
    %c1_54 = arith.constant 1 : index
    %c0_55 = arith.constant 0 : index
    %c0_56 = arith.constant 0 : index
    %67 = vector.load %arg13[%c1_54, %c0_55, %c0_56] : memref<8x8x4xf32, #tpu.memory_space<vmem>>, vector<1x8x4xf32>
    %68 = vector.shape_cast %67 : vector<1x8x4xf32> to vector<8x4xf32>
    "tpu.trace_start"() <{level = 10 : i32, message = "qd,kd->qk"}> : () -> ()
    %cst_57 = arith.constant dense<0.000000e+00> : vector<8x16xf32>
    %69 = tpu.matmul %68, %59, %cst_57 {dimension_numbers = #tpu.dot_dimension_numbers<[1], [1], [0], [0], [0, 0, 1, 0], [], []>} : vector<8x4xf32>, vector<16x4xf32>, vector<8x16xf32> -> vector<8x16xf32>
    "tpu.trace_stop"() : () -> ()
    %c1_58 = arith.constant 1 : index
    %c0_59 = arith.constant 0 : index
    %c0_60 = arith.constant 0 : index
    %70 = vector.load %arg14[%c1_58, %c0_59, %c0_60] : memref<8x8x1xf32, #tpu.memory_space<vmem>>, vector<1x8x1xf32>
    %71 = vector.shape_cast %70 : vector<1x8x1xf32> to vector<8x1xf32>
    %cst_61 = arith.constant dense<0xFF800000> : vector<8xf32>
    %72 = vector.multi_reduction <maximumf>, %69, %cst_61 [1] : vector<8x16xf32> to vector<8xf32>
    %73 = vector.shape_cast %72 : vector<8xf32> to vector<8x1xf32>
    %74 = arith.maximumf %71, %73 : vector<8x1xf32>
    %75 = arith.subf %71, %74 : vector<8x1xf32>
    %76 = math.exp %75 : vector<8x1xf32>
    %77 = vector.broadcast %74 : vector<8x1xf32> to vector<8x16xf32>
    %78 = arith.subf %69, %77 : vector<8x16xf32>
    %79 = math.exp %78 : vector<8x16xf32>
    %cst_62 = arith.constant dense<0.000000e+00> : vector<8xf32>
    %80 = vector.multi_reduction <add>, %79, %cst_62 [1] : vector<8x16xf32> to vector<8xf32>
    %81 = vector.shape_cast %80 : vector<8xf32> to vector<8x1xf32>
    %c1_63 = arith.constant 1 : index
    %c0_64 = arith.constant 0 : index
    %c0_65 = arith.constant 0 : index
    %82 = vector.load %arg15[%c1_63, %c0_64, %c0_65] : memref<8x8x1xf32, #tpu.memory_space<vmem>>, vector<1x8x1xf32>
    %83 = vector.shape_cast %82 : vector<1x8x1xf32> to vector<8x1xf32>
    %84 = arith.mulf %76, %83 : vector<8x1xf32>
    %85 = arith.addf %84, %81 : vector<8x1xf32>
    %c1_66 = arith.constant 1 : index
    %c0_67 = arith.constant 0 : index
    %c0_68 = arith.constant 0 : index
    %86 = vector.load %arg15[%c1_66, %c0_67, %c0_68] : memref<8x8x1xf32, #tpu.memory_space<vmem>>, vector<1x8x1xf32>
    %87 = vector.shape_cast %86 : vector<1x8x1xf32> to vector<8x1xf32>
    %88 = vector.shape_cast %85 : vector<8x1xf32> to vector<1x8x1xf32>
    tpu.vector_store %arg15[%c1_66, %c0_67, %c0_68], %88 {strides = array<i32>} : memref<8x8x1xf32, #tpu.memory_space<vmem>>, vector<1x8x1xf32>,
    %c1_69 = arith.constant 1 : index
    %c0_70 = arith.constant 0 : index
    %c0_71 = arith.constant 0 : index
    %89 = vector.load %arg16[%c1_69, %c0_70, %c0_71] : memref<8x8x4xf32, #tpu.memory_space<vmem>>, vector<1x8x4xf32>
    %90 = vector.shape_cast %89 : vector<1x8x4xf32> to vector<8x4xf32>
    %91 = vector.broadcast %76 : vector<8x1xf32> to vector<8x4xf32>
    %92 = arith.mulf %91, %90 : vector<8x4xf32>
    %cst_72 = arith.constant dense<0.000000e+00> : vector<8x4xf32>
    %93 = tpu.matmul %79, %66, %cst_72 {dimension_numbers = #tpu.dot_dimension_numbers<[1], [0], [0], [1], [0, 0, 1, 1], [], []>} : vector<8x16xf32>, vector<16x4xf32>, vector<8x4xf32> -> vector<8x4xf32>
    %94 = arith.addf %92, %93 : vector<8x4xf32>
    %c1_73 = arith.constant 1 : index
    %c0_74 = arith.constant 0 : index
    %c0_75 = arith.constant 0 : index
    %95 = vector.load %arg16[%c1_73, %c0_74, %c0_75] : memref<8x8x4xf32, #tpu.memory_space<vmem>>, vector<1x8x4xf32>
    %96 = vector.shape_cast %95 : vector<1x8x4xf32> to vector<8x4xf32>
    %97 = vector.shape_cast %94 : vector<8x4xf32> to vector<1x8x4xf32>
    tpu.vector_store %arg16[%c1_73, %c0_74, %c0_75], %97 {strides = array<i32>} : memref<8x8x4xf32, #tpu.memory_space<vmem>>, vector<1x8x4xf32>,
    %c1_76 = arith.constant 1 : index
    %c0_77 = arith.constant 0 : index
    %c0_78 = arith.constant 0 : index
    %98 = vector.load %arg14[%c1_76, %c0_77, %c0_78] : memref<8x8x1xf32, #tpu.memory_space<vmem>>, vector<1x8x1xf32>
    %99 = vector.shape_cast %98 : vector<1x8x1xf32> to vector<8x1xf32>
    %100 = vector.shape_cast %74 : vector<8x1xf32> to vector<1x8x1xf32>
    tpu.vector_store %arg14[%c1_76, %c0_77, %c0_78], %100 {strides = array<i32>} : memref<8x8x1xf32, #tpu.memory_space<vmem>>, vector<1x8x1xf32>,
    %c2 = arith.constant 2 : index
    %c0_79 = arith.constant 0 : index
    %c0_80 = arith.constant 0 : index
    %101 = vector.load %arg6[%c2, %c0_79, %c0_80] : memref<8x32x4xf32, #tpu.memory_space<vmem>>, vector<1x32x4xf32>
    %102 = vector.shape_cast %101 : vector<1x32x4xf32> to vector<32x4xf32>
    %cst_81 = arith.constant dense<0.000000e+00> : vector<16x4xf32>
    %103 = tpu.matmul %4, %102, %cst_81 {dimension_numbers = #tpu.dot_dimension_numbers<[1], [0], [0], [1], [0, 0, 1, 1], [], []>} : vector<16x32xf32>, vector<32x4xf32>, vector<16x4xf32> -> vector<16x4xf32>
    %c2_82 = arith.constant 2 : index
    %c0_83 = arith.constant 0 : index
    %c0_84 = arith.constant 0 : index
    %104 = vector.load %arg7[%c2_82, %c0_83, %c0_84] : memref<8x1x4xf32, #tpu.memory_space<vmem>>, vector<1x1x4xf32>
    %105 = vector.shape_cast %104 : vector<1x1x4xf32> to vector<1x4xf32>
    %106 = vector.broadcast %105 : vector<1x4xf32> to vector<16x4xf32>
    %107 = arith.addf %103, %106 : vector<16x4xf32>
    %c2_85 = arith.constant 2 : index
    %c0_86 = arith.constant 0 : index
    %c0_87 = arith.constant 0 : index
    %108 = vector.load %arg8[%c2_85, %c0_86, %c0_87] : memref<8x32x4xf32, #tpu.memory_space<vmem>>, vector<1x32x4xf32>
    %109 = vector.shape_cast %108 : vector<1x32x4xf32> to vector<32x4xf32>
    %cst_88 = arith.constant dense<0.000000e+00> : vector<16x4xf32>
    %110 = tpu.matmul %4, %109, %cst_88 {dimension_numbers = #tpu.dot_dimension_numbers<[1], [0], [0], [1], [0, 0, 1, 1], [], []>} : vector<16x32xf32>, vector<32x4xf32>, vector<16x4xf32> -> vector<16x4xf32>
    %c2_89 = arith.constant 2 : index
    %c0_90 = arith.constant 0 : index
    %c0_91 = arith.constant 0 : index
    %111 = vector.load %arg9[%c2_89, %c0_90, %c0_91] : memref<8x1x4xf32, #tpu.memory_space<vmem>>, vector<1x1x4xf32>
    %112 = vector.shape_cast %111 : vector<1x1x4xf32> to vector<1x4xf32>
    %113 = vector.broadcast %112 : vector<1x4xf32> to vector<16x4xf32>
    %114 = arith.addf %110, %113 : vector<16x4xf32>
    %c2_92 = arith.constant 2 : index
    %c0_93 = arith.constant 0 : index
    %c0_94 = arith.constant 0 : index
    %115 = vector.load %arg13[%c2_92, %c0_93, %c0_94] : memref<8x8x4xf32, #tpu.memory_space<vmem>>, vector<1x8x4xf32>
    %116 = vector.shape_cast %115 : vector<1x8x4xf32> to vector<8x4xf32>
    "tpu.trace_start"() <{level = 10 : i32, message = "qd,kd->qk"}> : () -> ()
    %cst_95 = arith.constant dense<0.000000e+00> : vector<8x16xf32>
    %117 = tpu.matmul %116, %107, %cst_95 {dimension_numbers = #tpu.dot_dimension_numbers<[1], [1], [0], [0], [0, 0, 1, 0], [], []>} : vector<8x4xf32>, vector<16x4xf32>, vector<8x16xf32> -> vector<8x16xf32>
    "tpu.trace_stop"() : () -> ()
    %c2_96 = arith.constant 2 : index
    %c0_97 = arith.constant 0 : index
    %c0_98 = arith.constant 0 : index
    %118 = vector.load %arg14[%c2_96, %c0_97, %c0_98] : memref<8x8x1xf32, #tpu.memory_space<vmem>>, vector<1x8x1xf32>
    %119 = vector.shape_cast %118 : vector<1x8x1xf32> to vector<8x1xf32>
    %cst_99 = arith.constant dense<0xFF800000> : vector<8xf32>
    %120 = vector.multi_reduction <maximumf>, %117, %cst_99 [1] : vector<8x16xf32> to vector<8xf32>
    %121 = vector.shape_cast %120 : vector<8xf32> to vector<8x1xf32>
    %122 = arith.maximumf %119, %121 : vector<8x1xf32>
    %123 = arith.subf %119, %122 : vector<8x1xf32>
    %124 = math.exp %123 : vector<8x1xf32>
    %125 = vector.broadcast %122 : vector<8x1xf32> to vector<8x16xf32>
    %126 = arith.subf %117, %125 : vector<8x16xf32>
    %127 = math.exp %126 : vector<8x16xf32>
    %cst_100 = arith.constant dense<0.000000e+00> : vector<8xf32>
    %128 = vector.multi_reduction <add>, %127, %cst_100 [1] : vector<8x16xf32> to vector<8xf32>
    %129 = vector.shape_cast %128 : vector<8xf32> to vector<8x1xf32>
    %c2_101 = arith.constant 2 : index
    %c0_102 = arith.constant 0 : index
    %c0_103 = arith.constant 0 : index
    %130 = vector.load %arg15[%c2_101, %c0_102, %c0_103] : memref<8x8x1xf32, #tpu.memory_space<vmem>>, vector<1x8x1xf32>
    %131 = vector.shape_cast %130 : vector<1x8x1xf32> to vector<8x1xf32>
    %132 = arith.mulf %124, %131 : vector<8x1xf32>
    %133 = arith.addf %132, %129 : vector<8x1xf32>
    %c2_104 = arith.constant 2 : index
    %c0_105 = arith.constant 0 : index
    %c0_106 = arith.constant 0 : index
    %134 = vector.load %arg15[%c2_104, %c0_105, %c0_106] : memref<8x8x1xf32, #tpu.memory_space<vmem>>, vector<1x8x1xf32>
    %135 = vector.shape_cast %134 : vector<1x8x1xf32> to vector<8x1xf32>
    %136 = vector.shape_cast %133 : vector<8x1xf32> to vector<1x8x1xf32>
    tpu.vector_store %arg15[%c2_104, %c0_105, %c0_106], %136 {strides = array<i32>} : memref<8x8x1xf32, #tpu.memory_space<vmem>>, vector<1x8x1xf32>,
    %c2_107 = arith.constant 2 : index
    %c0_108 = arith.constant 0 : index
    %c0_109 = arith.constant 0 : index
    %137 = vector.load %arg16[%c2_107, %c0_108, %c0_109] : memref<8x8x4xf32, #tpu.memory_space<vmem>>, vector<1x8x4xf32>
    %138 = vector.shape_cast %137 : vector<1x8x4xf32> to vector<8x4xf32>
    %139 = vector.broadcast %124 : vector<8x1xf32> to vector<8x4xf32>
    %140 = arith.mulf %139, %138 : vector<8x4xf32>
    %cst_110 = arith.constant dense<0.000000e+00> : vector<8x4xf32>
    %141 = tpu.matmul %127, %114, %cst_110 {dimension_numbers = #tpu.dot_dimension_numbers<[1], [0], [0], [1], [0, 0, 1, 1], [], []>} : vector<8x16xf32>, vector<16x4xf32>, vector<8x4xf32> -> vector<8x4xf32>
    %142 = arith.addf %140, %141 : vector<8x4xf32>
    %c2_111 = arith.constant 2 : index
    %c0_112 = arith.constant 0 : index
    %c0_113 = arith.constant 0 : index
    %143 = vector.load %arg16[%c2_111, %c0_112, %c0_113] : memref<8x8x4xf32, #tpu.memory_space<vmem>>, vector<1x8x4xf32>
    %144 = vector.shape_cast %143 : vector<1x8x4xf32> to vector<8x4xf32>
    %145 = vector.shape_cast %142 : vector<8x4xf32> to vector<1x8x4xf32>
    tpu.vector_store %arg16[%c2_111, %c0_112, %c0_113], %145 {strides = array<i32>} : memref<8x8x4xf32, #tpu.memory_space<vmem>>, vector<1x8x4xf32>,
    %c2_114 = arith.constant 2 : index
    %c0_115 = arith.constant 0 : index
    %c0_116 = arith.constant 0 : index
    %146 = vector.load %arg14[%c2_114, %c0_115, %c0_116] : memref<8x8x1xf32, #tpu.memory_space<vmem>>, vector<1x8x1xf32>
    %147 = vector.shape_cast %146 : vector<1x8x1xf32> to vector<8x1xf32>
    %148 = vector.shape_cast %122 : vector<8x1xf32> to vector<1x8x1xf32>
    tpu.vector_store %arg14[%c2_114, %c0_115, %c0_116], %148 {strides = array<i32>} : memref<8x8x1xf32, #tpu.memory_space<vmem>>, vector<1x8x1xf32>,
    %c3 = arith.constant 3 : index
    %c0_117 = arith.constant 0 : index
    %c0_118 = arith.constant 0 : index
    %149 = vector.load %arg6[%c3, %c0_117, %c0_118] : memref<8x32x4xf32, #tpu.memory_space<vmem>>, vector<1x32x4xf32>
    %150 = vector.shape_cast %149 : vector<1x32x4xf32> to vector<32x4xf32>
    %cst_119 = arith.constant dense<0.000000e+00> : vector<16x4xf32>
    %151 = tpu.matmul %4, %150, %cst_119 {dimension_numbers = #tpu.dot_dimension_numbers<[1], [0], [0], [1], [0, 0, 1, 1], [], []>} : vector<16x32xf32>, vector<32x4xf32>, vector<16x4xf32> -> vector<16x4xf32>
    %c3_120 = arith.constant 3 : index
    %c0_121 = arith.constant 0 : index
    %c0_122 = arith.constant 0 : index
    %152 = vector.load %arg7[%c3_120, %c0_121, %c0_122] : memref<8x1x4xf32, #tpu.memory_space<vmem>>, vector<1x1x4xf32>
    %153 = vector.shape_cast %152 : vector<1x1x4xf32> to vector<1x4xf32>
    %154 = vector.broadcast %153 : vector<1x4xf32> to vector<16x4xf32>
    %155 = arith.addf %151, %154 : vector<16x4xf32>
    %c3_123 = arith.constant 3 : index
    %c0_124 = arith.constant 0 : index
    %c0_125 = arith.constant 0 : index
    %156 = vector.load %arg8[%c3_123, %c0_124, %c0_125] : memref<8x32x4xf32, #tpu.memory_space<vmem>>, vector<1x32x4xf32>
    %157 = vector.shape_cast %156 : vector<1x32x4xf32> to vector<32x4xf32>
    %cst_126 = arith.constant dense<0.000000e+00> : vector<16x4xf32>
    %158 = tpu.matmul %4, %157, %cst_126 {dimension_numbers = #tpu.dot_dimension_numbers<[1], [0], [0], [1], [0, 0, 1, 1], [], []>} : vector<16x32xf32>, vector<32x4xf32>, vector<16x4xf32> -> vector<16x4xf32>
    %c3_127 = arith.constant 3 : index
    %c0_128 = arith.constant 0 : index
    %c0_129 = arith.constant 0 : index
    %159 = vector.load %arg9[%c3_127, %c0_128, %c0_129] : memref<8x1x4xf32, #tpu.memory_space<vmem>>, vector<1x1x4xf32>
    %160 = vector.shape_cast %159 : vector<1x1x4xf32> to vector<1x4xf32>
    %161 = vector.broadcast %160 : vector<1x4xf32> to vector<16x4xf32>
    %162 = arith.addf %158, %161 : vector<16x4xf32>
    %c3_130 = arith.constant 3 : index
    %c0_131 = arith.constant 0 : index
    %c0_132 = arith.constant 0 : index
    %163 = vector.load %arg13[%c3_130, %c0_131, %c0_132] : memref<8x8x4xf32, #tpu.memory_space<vmem>>, vector<1x8x4xf32>
    %164 = vector.shape_cast %163 : vector<1x8x4xf32> to vector<8x4xf32>
    "tpu.trace_start"() <{level = 10 : i32, message = "qd,kd->qk"}> : () -> ()
    %cst_133 = arith.constant dense<0.000000e+00> : vector<8x16xf32>
    %165 = tpu.matmul %164, %155, %cst_133 {dimension_numbers = #tpu.dot_dimension_numbers<[1], [1], [0], [0], [0, 0, 1, 0], [], []>} : vector<8x4xf32>, vector<16x4xf32>, vector<8x16xf32> -> vector<8x16xf32>
    "tpu.trace_stop"() : () -> ()
    %c3_134 = arith.constant 3 : index
    %c0_135 = arith.constant 0 : index
    %c0_136 = arith.constant 0 : index
    %166 = vector.load %arg14[%c3_134, %c0_135, %c0_136] : memref<8x8x1xf32, #tpu.memory_space<vmem>>, vector<1x8x1xf32>
    %167 = vector.shape_cast %166 : vector<1x8x1xf32> to vector<8x1xf32>
    %cst_137 = arith.constant dense<0xFF800000> : vector<8xf32>
    %168 = vector.multi_reduction <maximumf>, %165, %cst_137 [1] : vector<8x16xf32> to vector<8xf32>
    %169 = vector.shape_cast %168 : vector<8xf32> to vector<8x1xf32>
    %170 = arith.maximumf %167, %169 : vector<8x1xf32>
    %171 = arith.subf %167, %170 : vector<8x1xf32>
    %172 = math.exp %171 : vector<8x1xf32>
    %173 = vector.broadcast %170 : vector<8x1xf32> to vector<8x16xf32>
    %174 = arith.subf %165, %173 : vector<8x16xf32>
    %175 = math.exp %174 : vector<8x16xf32>
    %cst_138 = arith.constant dense<0.000000e+00> : vector<8xf32>
    %176 = vector.multi_reduction <add>, %175, %cst_138 [1] : vector<8x16xf32> to vector<8xf32>
    %177 = vector.shape_cast %176 : vector<8xf32> to vector<8x1xf32>
    %c3_139 = arith.constant 3 : index
    %c0_140 = arith.constant 0 : index
    %c0_141 = arith.constant 0 : index
    %178 = vector.load %arg15[%c3_139, %c0_140, %c0_141] : memref<8x8x1xf32, #tpu.memory_space<vmem>>, vector<1x8x1xf32>
    %179 = vector.shape_cast %178 : vector<1x8x1xf32> to vector<8x1xf32>
    %180 = arith.mulf %172, %179 : vector<8x1xf32>
    %181 = arith.addf %180, %177 : vector<8x1xf32>
    %c3_142 = arith.constant 3 : index
    %c0_143 = arith.constant 0 : index
    %c0_144 = arith.constant 0 : index
    %182 = vector.load %arg15[%c3_142, %c0_143, %c0_144] : memref<8x8x1xf32, #tpu.memory_space<vmem>>, vector<1x8x1xf32>
    %183 = vector.shape_cast %182 : vector<1x8x1xf32> to vector<8x1xf32>
    %184 = vector.shape_cast %181 : vector<8x1xf32> to vector<1x8x1xf32>
    tpu.vector_store %arg15[%c3_142, %c0_143, %c0_144], %184 {strides = array<i32>} : memref<8x8x1xf32, #tpu.memory_space<vmem>>, vector<1x8x1xf32>,
    %c3_145 = arith.constant 3 : index
    %c0_146 = arith.constant 0 : index
    %c0_147 = arith.constant 0 : index
    %185 = vector.load %arg16[%c3_145, %c0_146, %c0_147] : memref<8x8x4xf32, #tpu.memory_space<vmem>>, vector<1x8x4xf32>
    %186 = vector.shape_cast %185 : vector<1x8x4xf32> to vector<8x4xf32>
    %187 = vector.broadcast %172 : vector<8x1xf32> to vector<8x4xf32>
    %188 = arith.mulf %187, %186 : vector<8x4xf32>
    %cst_148 = arith.constant dense<0.000000e+00> : vector<8x4xf32>
    %189 = tpu.matmul %175, %162, %cst_148 {dimension_numbers = #tpu.dot_dimension_numbers<[1], [0], [0], [1], [0, 0, 1, 1], [], []>} : vector<8x16xf32>, vector<16x4xf32>, vector<8x4xf32> -> vector<8x4xf32>
    %190 = arith.addf %188, %189 : vector<8x4xf32>
    %c3_149 = arith.constant 3 : index
    %c0_150 = arith.constant 0 : index
    %c0_151 = arith.constant 0 : index
    %191 = vector.load %arg16[%c3_149, %c0_150, %c0_151] : memref<8x8x4xf32, #tpu.memory_space<vmem>>, vector<1x8x4xf32>
    %192 = vector.shape_cast %191 : vector<1x8x4xf32> to vector<8x4xf32>
    %193 = vector.shape_cast %190 : vector<8x4xf32> to vector<1x8x4xf32>
    tpu.vector_store %arg16[%c3_149, %c0_150, %c0_151], %193 {strides = array<i32>} : memref<8x8x4xf32, #tpu.memory_space<vmem>>, vector<1x8x4xf32>,
    %c3_152 = arith.constant 3 : index
    %c0_153 = arith.constant 0 : index
    %c0_154 = arith.constant 0 : index
    %194 = vector.load %arg14[%c3_152, %c0_153, %c0_154] : memref<8x8x1xf32, #tpu.memory_space<vmem>>, vector<1x8x1xf32>
    %195 = vector.shape_cast %194 : vector<1x8x1xf32> to vector<8x1xf32>
    %196 = vector.shape_cast %170 : vector<8x1xf32> to vector<1x8x1xf32>
    tpu.vector_store %arg14[%c3_152, %c0_153, %c0_154], %196 {strides = array<i32>} : memref<8x8x1xf32, #tpu.memory_space<vmem>>, vector<1x8x1xf32>,
    %c4 = arith.constant 4 : index
    %c0_155 = arith.constant 0 : index
    %c0_156 = arith.constant 0 : index
    %197 = vector.load %arg6[%c4, %c0_155, %c0_156] : memref<8x32x4xf32, #tpu.memory_space<vmem>>, vector<1x32x4xf32>
    %198 = vector.shape_cast %197 : vector<1x32x4xf32> to vector<32x4xf32>
    %cst_157 = arith.constant dense<0.000000e+00> : vector<16x4xf32>
    %199 = tpu.matmul %4, %198, %cst_157 {dimension_numbers = #tpu.dot_dimension_numbers<[1], [0], [0], [1], [0, 0, 1, 1], [], []>} : vector<16x32xf32>, vector<32x4xf32>, vector<16x4xf32> -> vector<16x4xf32>
    %c4_158 = arith.constant 4 : index
    %c0_159 = arith.constant 0 : index
    %c0_160 = arith.constant 0 : index
    %200 = vector.load %arg7[%c4_158, %c0_159, %c0_160] : memref<8x1x4xf32, #tpu.memory_space<vmem>>, vector<1x1x4xf32>
    %201 = vector.shape_cast %200 : vector<1x1x4xf32> to vector<1x4xf32>
    %202 = vector.broadcast %201 : vector<1x4xf32> to vector<16x4xf32>
    %203 = arith.addf %199, %202 : vector<16x4xf32>
    %c4_161 = arith.constant 4 : index
    %c0_162 = arith.constant 0 : index
    %c0_163 = arith.constant 0 : index
    %204 = vector.load %arg8[%c4_161, %c0_162, %c0_163] : memref<8x32x4xf32, #tpu.memory_space<vmem>>, vector<1x32x4xf32>
    %205 = vector.shape_cast %204 : vector<1x32x4xf32> to vector<32x4xf32>
    %cst_164 = arith.constant dense<0.000000e+00> : vector<16x4xf32>
    %206 = tpu.matmul %4, %205, %cst_164 {dimension_numbers = #tpu.dot_dimension_numbers<[1], [0], [0], [1], [0, 0, 1, 1], [], []>} : vector<16x32xf32>, vector<32x4xf32>, vector<16x4xf32> -> vector<16x4xf32>
    %c4_165 = arith.constant 4 : index
    %c0_166 = arith.constant 0 : index
    %c0_167 = arith.constant 0 : index
    %207 = vector.load %arg9[%c4_165, %c0_166, %c0_167] : memref<8x1x4xf32, #tpu.memory_space<vmem>>, vector<1x1x4xf32>
    %208 = vector.shape_cast %207 : vector<1x1x4xf32> to vector<1x4xf32>
    %209 = vector.broadcast %208 : vector<1x4xf32> to vector<16x4xf32>
    %210 = arith.addf %206, %209 : vector<16x4xf32>
    %c4_168 = arith.constant 4 : index
    %c0_169 = arith.constant 0 : index
    %c0_170 = arith.constant 0 : index
    %211 = vector.load %arg13[%c4_168, %c0_169, %c0_170] : memref<8x8x4xf32, #tpu.memory_space<vmem>>, vector<1x8x4xf32>
    %212 = vector.shape_cast %211 : vector<1x8x4xf32> to vector<8x4xf32>
    "tpu.trace_start"() <{level = 10 : i32, message = "qd,kd->qk"}> : () -> ()
    %cst_171 = arith.constant dense<0.000000e+00> : vector<8x16xf32>
    %213 = tpu.matmul %212, %203, %cst_171 {dimension_numbers = #tpu.dot_dimension_numbers<[1], [1], [0], [0], [0, 0, 1, 0], [], []>} : vector<8x4xf32>, vector<16x4xf32>, vector<8x16xf32> -> vector<8x16xf32>
    "tpu.trace_stop"() : () -> ()
    %c4_172 = arith.constant 4 : index
    %c0_173 = arith.constant 0 : index
    %c0_174 = arith.constant 0 : index
    %214 = vector.load %arg14[%c4_172, %c0_173, %c0_174] : memref<8x8x1xf32, #tpu.memory_space<vmem>>, vector<1x8x1xf32>
    %215 = vector.shape_cast %214 : vector<1x8x1xf32> to vector<8x1xf32>
    %cst_175 = arith.constant dense<0xFF800000> : vector<8xf32>
    %216 = vector.multi_reduction <maximumf>, %213, %cst_175 [1] : vector<8x16xf32> to vector<8xf32>
    %217 = vector.shape_cast %216 : vector<8xf32> to vector<8x1xf32>
    %218 = arith.maximumf %215, %217 : vector<8x1xf32>
    %219 = arith.subf %215, %218 : vector<8x1xf32>
    %220 = math.exp %219 : vector<8x1xf32>
    %221 = vector.broadcast %218 : vector<8x1xf32> to vector<8x16xf32>
    %222 = arith.subf %213, %221 : vector<8x16xf32>
    %223 = math.exp %222 : vector<8x16xf32>
    %cst_176 = arith.constant dense<0.000000e+00> : vector<8xf32>
    %224 = vector.multi_reduction <add>, %223, %cst_176 [1] : vector<8x16xf32> to vector<8xf32>
    %225 = vector.shape_cast %224 : vector<8xf32> to vector<8x1xf32>
    %c4_177 = arith.constant 4 : index
    %c0_178 = arith.constant 0 : index
    %c0_179 = arith.constant 0 : index
    %226 = vector.load %arg15[%c4_177, %c0_178, %c0_179] : memref<8x8x1xf32, #tpu.memory_space<vmem>>, vector<1x8x1xf32>
    %227 = vector.shape_cast %226 : vector<1x8x1xf32> to vector<8x1xf32>
    %228 = arith.mulf %220, %227 : vector<8x1xf32>
    %229 = arith.addf %228, %225 : vector<8x1xf32>
    %c4_180 = arith.constant 4 : index
    %c0_181 = arith.constant 0 : index
    %c0_182 = arith.constant 0 : index
    %230 = vector.load %arg15[%c4_180, %c0_181, %c0_182] : memref<8x8x1xf32, #tpu.memory_space<vmem>>, vector<1x8x1xf32>
    %231 = vector.shape_cast %230 : vector<1x8x1xf32> to vector<8x1xf32>
    %232 = vector.shape_cast %229 : vector<8x1xf32> to vector<1x8x1xf32>
    tpu.vector_store %arg15[%c4_180, %c0_181, %c0_182], %232 {strides = array<i32>} : memref<8x8x1xf32, #tpu.memory_space<vmem>>, vector<1x8x1xf32>,
    %c4_183 = arith.constant 4 : index
    %c0_184 = arith.constant 0 : index
    %c0_185 = arith.constant 0 : index
    %233 = vector.load %arg16[%c4_183, %c0_184, %c0_185] : memref<8x8x4xf32, #tpu.memory_space<vmem>>, vector<1x8x4xf32>
    %234 = vector.shape_cast %233 : vector<1x8x4xf32> to vector<8x4xf32>
    %235 = vector.broadcast %220 : vector<8x1xf32> to vector<8x4xf32>
    %236 = arith.mulf %235, %234 : vector<8x4xf32>
    %cst_186 = arith.constant dense<0.000000e+00> : vector<8x4xf32>
    %237 = tpu.matmul %223, %210, %cst_186 {dimension_numbers = #tpu.dot_dimension_numbers<[1], [0], [0], [1], [0, 0, 1, 1], [], []>} : vector<8x16xf32>, vector<16x4xf32>, vector<8x4xf32> -> vector<8x4xf32>
    %238 = arith.addf %236, %237 : vector<8x4xf32>
    %c4_187 = arith.constant 4 : index
    %c0_188 = arith.constant 0 : index
    %c0_189 = arith.constant 0 : index
    %239 = vector.load %arg16[%c4_187, %c0_188, %c0_189] : memref<8x8x4xf32, #tpu.memory_space<vmem>>, vector<1x8x4xf32>
    %240 = vector.shape_cast %239 : vector<1x8x4xf32> to vector<8x4xf32>
    %241 = vector.shape_cast %238 : vector<8x4xf32> to vector<1x8x4xf32>
    tpu.vector_store %arg16[%c4_187, %c0_188, %c0_189], %241 {strides = array<i32>} : memref<8x8x4xf32, #tpu.memory_space<vmem>>, vector<1x8x4xf32>,
    %c4_190 = arith.constant 4 : index
    %c0_191 = arith.constant 0 : index
    %c0_192 = arith.constant 0 : index
    %242 = vector.load %arg14[%c4_190, %c0_191, %c0_192] : memref<8x8x1xf32, #tpu.memory_space<vmem>>, vector<1x8x1xf32>
    %243 = vector.shape_cast %242 : vector<1x8x1xf32> to vector<8x1xf32>
    %244 = vector.shape_cast %218 : vector<8x1xf32> to vector<1x8x1xf32>
    tpu.vector_store %arg14[%c4_190, %c0_191, %c0_192], %244 {strides = array<i32>} : memref<8x8x1xf32, #tpu.memory_space<vmem>>, vector<1x8x1xf32>,
    %c5 = arith.constant 5 : index
    %c0_193 = arith.constant 0 : index
    %c0_194 = arith.constant 0 : index
    %245 = vector.load %arg6[%c5, %c0_193, %c0_194] : memref<8x32x4xf32, #tpu.memory_space<vmem>>, vector<1x32x4xf32>
    %246 = vector.shape_cast %245 : vector<1x32x4xf32> to vector<32x4xf32>
    %cst_195 = arith.constant dense<0.000000e+00> : vector<16x4xf32>
    %247 = tpu.matmul %4, %246, %cst_195 {dimension_numbers = #tpu.dot_dimension_numbers<[1], [0], [0], [1], [0, 0, 1, 1], [], []>} : vector<16x32xf32>, vector<32x4xf32>, vector<16x4xf32> -> vector<16x4xf32>
    %c5_196 = arith.constant 5 : index
    %c0_197 = arith.constant 0 : index
    %c0_198 = arith.constant 0 : index
    %248 = vector.load %arg7[%c5_196, %c0_197, %c0_198] : memref<8x1x4xf32, #tpu.memory_space<vmem>>, vector<1x1x4xf32>
    %249 = vector.shape_cast %248 : vector<1x1x4xf32> to vector<1x4xf32>
    %250 = vector.broadcast %249 : vector<1x4xf32> to vector<16x4xf32>
    %251 = arith.addf %247, %250 : vector<16x4xf32>
    %c5_199 = arith.constant 5 : index
    %c0_200 = arith.constant 0 : index
    %c0_201 = arith.constant 0 : index
    %252 = vector.load %arg8[%c5_199, %c0_200, %c0_201] : memref<8x32x4xf32, #tpu.memory_space<vmem>>, vector<1x32x4xf32>
    %253 = vector.shape_cast %252 : vector<1x32x4xf32> to vector<32x4xf32>
    %cst_202 = arith.constant dense<0.000000e+00> : vector<16x4xf32>
    %254 = tpu.matmul %4, %253, %cst_202 {dimension_numbers = #tpu.dot_dimension_numbers<[1], [0], [0], [1], [0, 0, 1, 1], [], []>} : vector<16x32xf32>, vector<32x4xf32>, vector<16x4xf32> -> vector<16x4xf32>
    %c5_203 = arith.constant 5 : index
    %c0_204 = arith.constant 0 : index
    %c0_205 = arith.constant 0 : index
    %255 = vector.load %arg9[%c5_203, %c0_204, %c0_205] : memref<8x1x4xf32, #tpu.memory_space<vmem>>, vector<1x1x4xf32>
    %256 = vector.shape_cast %255 : vector<1x1x4xf32> to vector<1x4xf32>
    %257 = vector.broadcast %256 : vector<1x4xf32> to vector<16x4xf32>
    %258 = arith.addf %254, %257 : vector<16x4xf32>
    %c5_206 = arith.constant 5 : index
    %c0_207 = arith.constant 0 : index
    %c0_208 = arith.constant 0 : index
    %259 = vector.load %arg13[%c5_206, %c0_207, %c0_208] : memref<8x8x4xf32, #tpu.memory_space<vmem>>, vector<1x8x4xf32>
    %260 = vector.shape_cast %259 : vector<1x8x4xf32> to vector<8x4xf32>
    "tpu.trace_start"() <{level = 10 : i32, message = "qd,kd->qk"}> : () -> ()
    %cst_209 = arith.constant dense<0.000000e+00> : vector<8x16xf32>
    %261 = tpu.matmul %260, %251, %cst_209 {dimension_numbers = #tpu.dot_dimension_numbers<[1], [1], [0], [0], [0, 0, 1, 0], [], []>} : vector<8x4xf32>, vector<16x4xf32>, vector<8x16xf32> -> vector<8x16xf32>
    "tpu.trace_stop"() : () -> ()
    %c5_210 = arith.constant 5 : index
    %c0_211 = arith.constant 0 : index
    %c0_212 = arith.constant 0 : index
    %262 = vector.load %arg14[%c5_210, %c0_211, %c0_212] : memref<8x8x1xf32, #tpu.memory_space<vmem>>, vector<1x8x1xf32>
    %263 = vector.shape_cast %262 : vector<1x8x1xf32> to vector<8x1xf32>
    %cst_213 = arith.constant dense<0xFF800000> : vector<8xf32>
    %264 = vector.multi_reduction <maximumf>, %261, %cst_213 [1] : vector<8x16xf32> to vector<8xf32>
    %265 = vector.shape_cast %264 : vector<8xf32> to vector<8x1xf32>
    %266 = arith.maximumf %263, %265 : vector<8x1xf32>
    %267 = arith.subf %263, %266 : vector<8x1xf32>
    %268 = math.exp %267 : vector<8x1xf32>
    %269 = vector.broadcast %266 : vector<8x1xf32> to vector<8x16xf32>
    %270 = arith.subf %261, %269 : vector<8x16xf32>
    %271 = math.exp %270 : vector<8x16xf32>
    %cst_214 = arith.constant dense<0.000000e+00> : vector<8xf32>
    %272 = vector.multi_reduction <add>, %271, %cst_214 [1] : vector<8x16xf32> to vector<8xf32>
    %273 = vector.shape_cast %272 : vector<8xf32> to vector<8x1xf32>
    %c5_215 = arith.constant 5 : index
    %c0_216 = arith.constant 0 : index
    %c0_217 = arith.constant 0 : index
    %274 = vector.load %arg15[%c5_215, %c0_216, %c0_217] : memref<8x8x1xf32, #tpu.memory_space<vmem>>, vector<1x8x1xf32>
    %275 = vector.shape_cast %274 : vector<1x8x1xf32> to vector<8x1xf32>
    %276 = arith.mulf %268, %275 : vector<8x1xf32>
    %277 = arith.addf %276, %273 : vector<8x1xf32>
    %c5_218 = arith.constant 5 : index
    %c0_219 = arith.constant 0 : index
    %c0_220 = arith.constant 0 : index
    %278 = vector.load %arg15[%c5_218, %c0_219, %c0_220] : memref<8x8x1xf32, #tpu.memory_space<vmem>>, vector<1x8x1xf32>
    %279 = vector.shape_cast %278 : vector<1x8x1xf32> to vector<8x1xf32>
    %280 = vector.shape_cast %277 : vector<8x1xf32> to vector<1x8x1xf32>
    tpu.vector_store %arg15[%c5_218, %c0_219, %c0_220], %280 {strides = array<i32>} : memref<8x8x1xf32, #tpu.memory_space<vmem>>, vector<1x8x1xf32>,
    %c5_221 = arith.constant 5 : index
    %c0_222 = arith.constant 0 : index
    %c0_223 = arith.constant 0 : index
    %281 = vector.load %arg16[%c5_221, %c0_222, %c0_223] : memref<8x8x4xf32, #tpu.memory_space<vmem>>, vector<1x8x4xf32>
    %282 = vector.shape_cast %281 : vector<1x8x4xf32> to vector<8x4xf32>
    %283 = vector.broadcast %268 : vector<8x1xf32> to vector<8x4xf32>
    %284 = arith.mulf %283, %282 : vector<8x4xf32>
    %cst_224 = arith.constant dense<0.000000e+00> : vector<8x4xf32>
    %285 = tpu.matmul %271, %258, %cst_224 {dimension_numbers = #tpu.dot_dimension_numbers<[1], [0], [0], [1], [0, 0, 1, 1], [], []>} : vector<8x16xf32>, vector<16x4xf32>, vector<8x4xf32> -> vector<8x4xf32>
    %286 = arith.addf %284, %285 : vector<8x4xf32>
    %c5_225 = arith.constant 5 : index
    %c0_226 = arith.constant 0 : index
    %c0_227 = arith.constant 0 : index
    %287 = vector.load %arg16[%c5_225, %c0_226, %c0_227] : memref<8x8x4xf32, #tpu.memory_space<vmem>>, vector<1x8x4xf32>
    %288 = vector.shape_cast %287 : vector<1x8x4xf32> to vector<8x4xf32>
    %289 = vector.shape_cast %286 : vector<8x4xf32> to vector<1x8x4xf32>
    tpu.vector_store %arg16[%c5_225, %c0_226, %c0_227], %289 {strides = array<i32>} : memref<8x8x4xf32, #tpu.memory_space<vmem>>, vector<1x8x4xf32>,
    %c5_228 = arith.constant 5 : index
    %c0_229 = arith.constant 0 : index
    %c0_230 = arith.constant 0 : index
    %290 = vector.load %arg14[%c5_228, %c0_229, %c0_230] : memref<8x8x1xf32, #tpu.memory_space<vmem>>, vector<1x8x1xf32>
    %291 = vector.shape_cast %290 : vector<1x8x1xf32> to vector<8x1xf32>
    %292 = vector.shape_cast %266 : vector<8x1xf32> to vector<1x8x1xf32>
    tpu.vector_store %arg14[%c5_228, %c0_229, %c0_230], %292 {strides = array<i32>} : memref<8x8x1xf32, #tpu.memory_space<vmem>>, vector<1x8x1xf32>,
    %c6 = arith.constant 6 : index
    %c0_231 = arith.constant 0 : index
    %c0_232 = arith.constant 0 : index
    %293 = vector.load %arg6[%c6, %c0_231, %c0_232] : memref<8x32x4xf32, #tpu.memory_space<vmem>>, vector<1x32x4xf32>
    %294 = vector.shape_cast %293 : vector<1x32x4xf32> to vector<32x4xf32>
    %cst_233 = arith.constant dense<0.000000e+00> : vector<16x4xf32>
    %295 = tpu.matmul %4, %294, %cst_233 {dimension_numbers = #tpu.dot_dimension_numbers<[1], [0], [0], [1], [0, 0, 1, 1], [], []>} : vector<16x32xf32>, vector<32x4xf32>, vector<16x4xf32> -> vector<16x4xf32>
    %c6_234 = arith.constant 6 : index
    %c0_235 = arith.constant 0 : index
    %c0_236 = arith.constant 0 : index
    %296 = vector.load %arg7[%c6_234, %c0_235, %c0_236] : memref<8x1x4xf32, #tpu.memory_space<vmem>>, vector<1x1x4xf32>
    %297 = vector.shape_cast %296 : vector<1x1x4xf32> to vector<1x4xf32>
    %298 = vector.broadcast %297 : vector<1x4xf32> to vector<16x4xf32>
    %299 = arith.addf %295, %298 : vector<16x4xf32>
    %c6_237 = arith.constant 6 : index
    %c0_238 = arith.constant 0 : index
    %c0_239 = arith.constant 0 : index
    %300 = vector.load %arg8[%c6_237, %c0_238, %c0_239] : memref<8x32x4xf32, #tpu.memory_space<vmem>>, vector<1x32x4xf32>
    %301 = vector.shape_cast %300 : vector<1x32x4xf32> to vector<32x4xf32>
    %cst_240 = arith.constant dense<0.000000e+00> : vector<16x4xf32>
    %302 = tpu.matmul %4, %301, %cst_240 {dimension_numbers = #tpu.dot_dimension_numbers<[1], [0], [0], [1], [0, 0, 1, 1], [], []>} : vector<16x32xf32>, vector<32x4xf32>, vector<16x4xf32> -> vector<16x4xf32>
    %c6_241 = arith.constant 6 : index
    %c0_242 = arith.constant 0 : index
    %c0_243 = arith.constant 0 : index
    %303 = vector.load %arg9[%c6_241, %c0_242, %c0_243] : memref<8x1x4xf32, #tpu.memory_space<vmem>>, vector<1x1x4xf32>
    %304 = vector.shape_cast %303 : vector<1x1x4xf32> to vector<1x4xf32>
    %305 = vector.broadcast %304 : vector<1x4xf32> to vector<16x4xf32>
    %306 = arith.addf %302, %305 : vector<16x4xf32>
    %c6_244 = arith.constant 6 : index
    %c0_245 = arith.constant 0 : index
    %c0_246 = arith.constant 0 : index
    %307 = vector.load %arg13[%c6_244, %c0_245, %c0_246] : memref<8x8x4xf32, #tpu.memory_space<vmem>>, vector<1x8x4xf32>
    %308 = vector.shape_cast %307 : vector<1x8x4xf32> to vector<8x4xf32>
    "tpu.trace_start"() <{level = 10 : i32, message = "qd,kd->qk"}> : () -> ()
    %cst_247 = arith.constant dense<0.000000e+00> : vector<8x16xf32>
    %309 = tpu.matmul %308, %299, %cst_247 {dimension_numbers = #tpu.dot_dimension_numbers<[1], [1], [0], [0], [0, 0, 1, 0], [], []>} : vector<8x4xf32>, vector<16x4xf32>, vector<8x16xf32> -> vector<8x16xf32>
    "tpu.trace_stop"() : () -> ()
    %c6_248 = arith.constant 6 : index
    %c0_249 = arith.constant 0 : index
    %c0_250 = arith.constant 0 : index
    %310 = vector.load %arg14[%c6_248, %c0_249, %c0_250] : memref<8x8x1xf32, #tpu.memory_space<vmem>>, vector<1x8x1xf32>
    %311 = vector.shape_cast %310 : vector<1x8x1xf32> to vector<8x1xf32>
    %cst_251 = arith.constant dense<0xFF800000> : vector<8xf32>
    %312 = vector.multi_reduction <maximumf>, %309, %cst_251 [1] : vector<8x16xf32> to vector<8xf32>
    %313 = vector.shape_cast %312 : vector<8xf32> to vector<8x1xf32>
    %314 = arith.maximumf %311, %313 : vector<8x1xf32>
    %315 = arith.subf %311, %314 : vector<8x1xf32>
    %316 = math.exp %315 : vector<8x1xf32>
    %317 = vector.broadcast %314 : vector<8x1xf32> to vector<8x16xf32>
    %318 = arith.subf %309, %317 : vector<8x16xf32>
    %319 = math.exp %318 : vector<8x16xf32>
    %cst_252 = arith.constant dense<0.000000e+00> : vector<8xf32>
    %320 = vector.multi_reduction <add>, %319, %cst_252 [1] : vector<8x16xf32> to vector<8xf32>
    %321 = vector.shape_cast %320 : vector<8xf32> to vector<8x1xf32>
    %c6_253 = arith.constant 6 : index
    %c0_254 = arith.constant 0 : index
    %c0_255 = arith.constant 0 : index
    %322 = vector.load %arg15[%c6_253, %c0_254, %c0_255] : memref<8x8x1xf32, #tpu.memory_space<vmem>>, vector<1x8x1xf32>
    %323 = vector.shape_cast %322 : vector<1x8x1xf32> to vector<8x1xf32>
    %324 = arith.mulf %316, %323 : vector<8x1xf32>
    %325 = arith.addf %324, %321 : vector<8x1xf32>
    %c6_256 = arith.constant 6 : index
    %c0_257 = arith.constant 0 : index
    %c0_258 = arith.constant 0 : index
    %326 = vector.load %arg15[%c6_256, %c0_257, %c0_258] : memref<8x8x1xf32, #tpu.memory_space<vmem>>, vector<1x8x1xf32>
    %327 = vector.shape_cast %326 : vector<1x8x1xf32> to vector<8x1xf32>
    %328 = vector.shape_cast %325 : vector<8x1xf32> to vector<1x8x1xf32>
    tpu.vector_store %arg15[%c6_256, %c0_257, %c0_258], %328 {strides = array<i32>} : memref<8x8x1xf32, #tpu.memory_space<vmem>>, vector<1x8x1xf32>,
    %c6_259 = arith.constant 6 : index
    %c0_260 = arith.constant 0 : index
    %c0_261 = arith.constant 0 : index
    %329 = vector.load %arg16[%c6_259, %c0_260, %c0_261] : memref<8x8x4xf32, #tpu.memory_space<vmem>>, vector<1x8x4xf32>
    %330 = vector.shape_cast %329 : vector<1x8x4xf32> to vector<8x4xf32>
    %331 = vector.broadcast %316 : vector<8x1xf32> to vector<8x4xf32>
    %332 = arith.mulf %331, %330 : vector<8x4xf32>
    %cst_262 = arith.constant dense<0.000000e+00> : vector<8x4xf32>
    %333 = tpu.matmul %319, %306, %cst_262 {dimension_numbers = #tpu.dot_dimension_numbers<[1], [0], [0], [1], [0, 0, 1, 1], [], []>} : vector<8x16xf32>, vector<16x4xf32>, vector<8x4xf32> -> vector<8x4xf32>
    %334 = arith.addf %332, %333 : vector<8x4xf32>
    %c6_263 = arith.constant 6 : index
    %c0_264 = arith.constant 0 : index
    %c0_265 = arith.constant 0 : index
    %335 = vector.load %arg16[%c6_263, %c0_264, %c0_265] : memref<8x8x4xf32, #tpu.memory_space<vmem>>, vector<1x8x4xf32>
    %336 = vector.shape_cast %335 : vector<1x8x4xf32> to vector<8x4xf32>
    %337 = vector.shape_cast %334 : vector<8x4xf32> to vector<1x8x4xf32>
    tpu.vector_store %arg16[%c6_263, %c0_264, %c0_265], %337 {strides = array<i32>} : memref<8x8x4xf32, #tpu.memory_space<vmem>>, vector<1x8x4xf32>,
    %c6_266 = arith.constant 6 : index
    %c0_267 = arith.constant 0 : index
    %c0_268 = arith.constant 0 : index
    %338 = vector.load %arg14[%c6_266, %c0_267, %c0_268] : memref<8x8x1xf32, #tpu.memory_space<vmem>>, vector<1x8x1xf32>
    %339 = vector.shape_cast %338 : vector<1x8x1xf32> to vector<8x1xf32>
    %340 = vector.shape_cast %314 : vector<8x1xf32> to vector<1x8x1xf32>
    tpu.vector_store %arg14[%c6_266, %c0_267, %c0_268], %340 {strides = array<i32>} : memref<8x8x1xf32, #tpu.memory_space<vmem>>, vector<1x8x1xf32>,
    %c7 = arith.constant 7 : index
    %c0_269 = arith.constant 0 : index
    %c0_270 = arith.constant 0 : index
    %341 = vector.load %arg6[%c7, %c0_269, %c0_270] : memref<8x32x4xf32, #tpu.memory_space<vmem>>, vector<1x32x4xf32>
    %342 = vector.shape_cast %341 : vector<1x32x4xf32> to vector<32x4xf32>
    %cst_271 = arith.constant dense<0.000000e+00> : vector<16x4xf32>
    %343 = tpu.matmul %4, %342, %cst_271 {dimension_numbers = #tpu.dot_dimension_numbers<[1], [0], [0], [1], [0, 0, 1, 1], [], []>} : vector<16x32xf32>, vector<32x4xf32>, vector<16x4xf32> -> vector<16x4xf32>
    %c7_272 = arith.constant 7 : index
    %c0_273 = arith.constant 0 : index
    %c0_274 = arith.constant 0 : index
    %344 = vector.load %arg7[%c7_272, %c0_273, %c0_274] : memref<8x1x4xf32, #tpu.memory_space<vmem>>, vector<1x1x4xf32>
    %345 = vector.shape_cast %344 : vector<1x1x4xf32> to vector<1x4xf32>
    %346 = vector.broadcast %345 : vector<1x4xf32> to vector<16x4xf32>
    %347 = arith.addf %343, %346 : vector<16x4xf32>
    %c7_275 = arith.constant 7 : index
    %c0_276 = arith.constant 0 : index
    %c0_277 = arith.constant 0 : index
    %348 = vector.load %arg8[%c7_275, %c0_276, %c0_277] : memref<8x32x4xf32, #tpu.memory_space<vmem>>, vector<1x32x4xf32>
    %349 = vector.shape_cast %348 : vector<1x32x4xf32> to vector<32x4xf32>
    %cst_278 = arith.constant dense<0.000000e+00> : vector<16x4xf32>
    %350 = tpu.matmul %4, %349, %cst_278 {dimension_numbers = #tpu.dot_dimension_numbers<[1], [0], [0], [1], [0, 0, 1, 1], [], []>} : vector<16x32xf32>, vector<32x4xf32>, vector<16x4xf32> -> vector<16x4xf32>
    %c7_279 = arith.constant 7 : index
    %c0_280 = arith.constant 0 : index
    %c0_281 = arith.constant 0 : index
    %351 = vector.load %arg9[%c7_279, %c0_280, %c0_281] : memref<8x1x4xf32, #tpu.memory_space<vmem>>, vector<1x1x4xf32>
    %352 = vector.shape_cast %351 : vector<1x1x4xf32> to vector<1x4xf32>
    %353 = vector.broadcast %352 : vector<1x4xf32> to vector<16x4xf32>
    %354 = arith.addf %350, %353 : vector<16x4xf32>
    %c7_282 = arith.constant 7 : index
    %c0_283 = arith.constant 0 : index
    %c0_284 = arith.constant 0 : index
    %355 = vector.load %arg13[%c7_282, %c0_283, %c0_284] : memref<8x8x4xf32, #tpu.memory_space<vmem>>, vector<1x8x4xf32>
    %356 = vector.shape_cast %355 : vector<1x8x4xf32> to vector<8x4xf32>
    "tpu.trace_start"() <{level = 10 : i32, message = "qd,kd->qk"}> : () -> ()
    %cst_285 = arith.constant dense<0.000000e+00> : vector<8x16xf32>
    %357 = tpu.matmul %356, %347, %cst_285 {dimension_numbers = #tpu.dot_dimension_numbers<[1], [1], [0], [0], [0, 0, 1, 0], [], []>} : vector<8x4xf32>, vector<16x4xf32>, vector<8x16xf32> -> vector<8x16xf32>
    "tpu.trace_stop"() : () -> ()
    %c7_286 = arith.constant 7 : index
    %c0_287 = arith.constant 0 : index
    %c0_288 = arith.constant 0 : index
    %358 = vector.load %arg14[%c7_286, %c0_287, %c0_288] : memref<8x8x1xf32, #tpu.memory_space<vmem>>, vector<1x8x1xf32>
    %359 = vector.shape_cast %358 : vector<1x8x1xf32> to vector<8x1xf32>
    %cst_289 = arith.constant dense<0xFF800000> : vector<8xf32>
    %360 = vector.multi_reduction <maximumf>, %357, %cst_289 [1] : vector<8x16xf32> to vector<8xf32>
    %361 = vector.shape_cast %360 : vector<8xf32> to vector<8x1xf32>
    %362 = arith.maximumf %359, %361 : vector<8x1xf32>
    %363 = arith.subf %359, %362 : vector<8x1xf32>
    %364 = math.exp %363 : vector<8x1xf32>
    %365 = vector.broadcast %362 : vector<8x1xf32> to vector<8x16xf32>
    %366 = arith.subf %357, %365 : vector<8x16xf32>
    %367 = math.exp %366 : vector<8x16xf32>
    %cst_290 = arith.constant dense<0.000000e+00> : vector<8xf32>
    %368 = vector.multi_reduction <add>, %367, %cst_290 [1] : vector<8x16xf32> to vector<8xf32>
    %369 = vector.shape_cast %368 : vector<8xf32> to vector<8x1xf32>
    %c7_291 = arith.constant 7 : index
    %c0_292 = arith.constant 0 : index
    %c0_293 = arith.constant 0 : index
    %370 = vector.load %arg15[%c7_291, %c0_292, %c0_293] : memref<8x8x1xf32, #tpu.memory_space<vmem>>, vector<1x8x1xf32>
    %371 = vector.shape_cast %370 : vector<1x8x1xf32> to vector<8x1xf32>
    %372 = arith.mulf %364, %371 : vector<8x1xf32>
    %373 = arith.addf %372, %369 : vector<8x1xf32>
    %c7_294 = arith.constant 7 : index
    %c0_295 = arith.constant 0 : index
    %c0_296 = arith.constant 0 : index
    %374 = vector.load %arg15[%c7_294, %c0_295, %c0_296] : memref<8x8x1xf32, #tpu.memory_space<vmem>>, vector<1x8x1xf32>
    %375 = vector.shape_cast %374 : vector<1x8x1xf32> to vector<8x1xf32>
    %376 = vector.shape_cast %373 : vector<8x1xf32> to vector<1x8x1xf32>
    tpu.vector_store %arg15[%c7_294, %c0_295, %c0_296], %376 {strides = array<i32>} : memref<8x8x1xf32, #tpu.memory_space<vmem>>, vector<1x8x1xf32>,
    %c7_297 = arith.constant 7 : index
    %c0_298 = arith.constant 0 : index
    %c0_299 = arith.constant 0 : index
    %377 = vector.load %arg16[%c7_297, %c0_298, %c0_299] : memref<8x8x4xf32, #tpu.memory_space<vmem>>, vector<1x8x4xf32>
    %378 = vector.shape_cast %377 : vector<1x8x4xf32> to vector<8x4xf32>
    %379 = vector.broadcast %364 : vector<8x1xf32> to vector<8x4xf32>
    %380 = arith.mulf %379, %378 : vector<8x4xf32>
    %cst_300 = arith.constant dense<0.000000e+00> : vector<8x4xf32>
    %381 = tpu.matmul %367, %354, %cst_300 {dimension_numbers = #tpu.dot_dimension_numbers<[1], [0], [0], [1], [0, 0, 1, 1], [], []>} : vector<8x16xf32>, vector<16x4xf32>, vector<8x4xf32> -> vector<8x4xf32>
    %382 = arith.addf %380, %381 : vector<8x4xf32>
    %c7_301 = arith.constant 7 : index
    %c0_302 = arith.constant 0 : index
    %c0_303 = arith.constant 0 : index
    %383 = vector.load %arg16[%c7_301, %c0_302, %c0_303] : memref<8x8x4xf32, #tpu.memory_space<vmem>>, vector<1x8x4xf32>
    %384 = vector.shape_cast %383 : vector<1x8x4xf32> to vector<8x4xf32>
    %385 = vector.shape_cast %382 : vector<8x4xf32> to vector<1x8x4xf32>
    tpu.vector_store %arg16[%c7_301, %c0_302, %c0_303], %385 {strides = array<i32>} : memref<8x8x4xf32, #tpu.memory_space<vmem>>, vector<1x8x4xf32>,
    %c7_304 = arith.constant 7 : index
    %c0_305 = arith.constant 0 : index
    %c0_306 = arith.constant 0 : index
    %386 = vector.load %arg14[%c7_304, %c0_305, %c0_306] : memref<8x8x1xf32, #tpu.memory_space<vmem>>, vector<1x8x1xf32>
    %387 = vector.shape_cast %386 : vector<1x8x1xf32> to vector<8x1xf32>
    %388 = vector.shape_cast %362 : vector<8x1xf32> to vector<1x8x1xf32>
    tpu.vector_store %arg14[%c7_304, %c0_305, %c0_306], %388 {strides = array<i32>} : memref<8x8x1xf32, #tpu.memory_space<vmem>>, vector<1x8x1xf32>,
    %c0_i32_307 = arith.constant 0 : i32
    %389 = arith.cmpi eq, %arg1, %c0_i32_307 : i32
    %390 = arith.extui %389 : i1 to i32
    %c0_i32_308 = arith.constant 0 : i32
    %391 = arith.cmpi ne, %390, %c0_i32_308 : i32
    scf.if %391 {
      %c0_309 = arith.constant 0 : index
      %c0_310 = arith.constant 0 : index
      %392 = vector.load %arg11[%c0_309, %c0_310] : memref<1x32xf32, #tpu.memory_space<vmem>>, vector<1x32xf32>
      %393 = vector.shape_cast %392 : vector<1x32xf32> to vector<1x32xf32>
      %394 = vector.broadcast %393 : vector<1x32xf32> to vector<8x32xf32>
      %c0_311 = arith.constant 0 : index
      %c0_312 = arith.constant 0 : index
      %c0_313 = arith.constant 0 : index
      %395 = vector.load %arg15[%c0_311, %c0_312, %c0_313] : memref<8x8x1xf32, #tpu.memory_space<vmem>>, vector<1x8x1xf32>
      %396 = vector.shape_cast %395 : vector<1x8x1xf32> to vector<8x1xf32>
      %397 = tpu.reciprocal %396 : vector<8x1xf32> -> vector<8x1xf32>
      %c0_314 = arith.constant 0 : index
      %c0_315 = arith.constant 0 : index
      %c0_316 = arith.constant 0 : index
      %398 = vector.load %arg16[%c0_314, %c0_315, %c0_316] : memref<8x8x4xf32, #tpu.memory_space<vmem>>, vector<1x8x4xf32>
      %399 = vector.shape_cast %398 : vector<1x8x4xf32> to vector<8x4xf32>
      %400 = vector.broadcast %397 : vector<8x1xf32> to vector<8x4xf32>
      %401 = arith.mulf %399, %400 : vector<8x4xf32>
      %c0_317 = arith.constant 0 : index
      %c0_318 = arith.constant 0 : index
      %c0_319 = arith.constant 0 : index
      %402 = vector.load %arg10[%c0_317, %c0_318, %c0_319] : memref<8x4x32xf32, #tpu.memory_space<vmem>>, vector<1x4x32xf32>
      %403 = vector.shape_cast %402 : vector<1x4x32xf32> to vector<4x32xf32>
      %cst_320 = arith.constant dense<0.000000e+00> : vector<8x32xf32>
      %404 = tpu.matmul %401, %403, %cst_320 {dimension_numbers = #tpu.dot_dimension_numbers<[1], [0], [0], [1], [0, 0, 1, 1], [], []>} : vector<8x4xf32>, vector<4x32xf32>, vector<8x32xf32> -> vector<8x32xf32>
      %405 = arith.addf %394, %404 : vector<8x32xf32>
      %c1_321 = arith.constant 1 : index
      %c0_322 = arith.constant 0 : index
      %c0_323 = arith.constant 0 : index
      %406 = vector.load %arg15[%c1_321, %c0_322, %c0_323] : memref<8x8x1xf32, #tpu.memory_space<vmem>>, vector<1x8x1xf32>
      %407 = vector.shape_cast %406 : vector<1x8x1xf32> to vector<8x1xf32>
      %408 = tpu.reciprocal %407 : vector<8x1xf32> -> vector<8x1xf32>
      %c1_324 = arith.constant 1 : index
      %c0_325 = arith.constant 0 : index
      %c0_326 = arith.constant 0 : index
      %409 = vector.load %arg16[%c1_324, %c0_325, %c0_326] : memref<8x8x4xf32, #tpu.memory_space<vmem>>, vector<1x8x4xf32>
      %410 = vector.shape_cast %409 : vector<1x8x4xf32> to vector<8x4xf32>
      %411 = vector.broadcast %408 : vector<8x1xf32> to vector<8x4xf32>
      %412 = arith.mulf %410, %411 : vector<8x4xf32>
      %c1_327 = arith.constant 1 : index
      %c0_328 = arith.constant 0 : index
      %c0_329 = arith.constant 0 : index
      %413 = vector.load %arg10[%c1_327, %c0_328, %c0_329] : memref<8x4x32xf32, #tpu.memory_space<vmem>>, vector<1x4x32xf32>
      %414 = vector.shape_cast %413 : vector<1x4x32xf32> to vector<4x32xf32>
      %cst_330 = arith.constant dense<0.000000e+00> : vector<8x32xf32>
      %415 = tpu.matmul %412, %414, %cst_330 {dimension_numbers = #tpu.dot_dimension_numbers<[1], [0], [0], [1], [0, 0, 1, 1], [], []>} : vector<8x4xf32>, vector<4x32xf32>, vector<8x32xf32> -> vector<8x32xf32>
      %416 = arith.addf %405, %415 : vector<8x32xf32>
      %c2_331 = arith.constant 2 : index
      %c0_332 = arith.constant 0 : index
      %c0_333 = arith.constant 0 : index
      %417 = vector.load %arg15[%c2_331, %c0_332, %c0_333] : memref<8x8x1xf32, #tpu.memory_space<vmem>>, vector<1x8x1xf32>
      %418 = vector.shape_cast %417 : vector<1x8x1xf32> to vector<8x1xf32>
      %419 = tpu.reciprocal %418 : vector<8x1xf32> -> vector<8x1xf32>
      %c2_334 = arith.constant 2 : index
      %c0_335 = arith.constant 0 : index
      %c0_336 = arith.constant 0 : index
      %420 = vector.load %arg16[%c2_334, %c0_335, %c0_336] : memref<8x8x4xf32, #tpu.memory_space<vmem>>, vector<1x8x4xf32>
      %421 = vector.shape_cast %420 : vector<1x8x4xf32> to vector<8x4xf32>
      %422 = vector.broadcast %419 : vector<8x1xf32> to vector<8x4xf32>
      %423 = arith.mulf %421, %422 : vector<8x4xf32>
      %c2_337 = arith.constant 2 : index
      %c0_338 = arith.constant 0 : index
      %c0_339 = arith.constant 0 : index
      %424 = vector.load %arg10[%c2_337, %c0_338, %c0_339] : memref<8x4x32xf32, #tpu.memory_space<vmem>>, vector<1x4x32xf32>
      %425 = vector.shape_cast %424 : vector<1x4x32xf32> to vector<4x32xf32>
      %cst_340 = arith.constant dense<0.000000e+00> : vector<8x32xf32>
      %426 = tpu.matmul %423, %425, %cst_340 {dimension_numbers = #tpu.dot_dimension_numbers<[1], [0], [0], [1], [0, 0, 1, 1], [], []>} : vector<8x4xf32>, vector<4x32xf32>, vector<8x32xf32> -> vector<8x32xf32>
      %427 = arith.addf %416, %426 : vector<8x32xf32>
      %c3_341 = arith.constant 3 : index
      %c0_342 = arith.constant 0 : index
      %c0_343 = arith.constant 0 : index
      %428 = vector.load %arg15[%c3_341, %c0_342, %c0_343] : memref<8x8x1xf32, #tpu.memory_space<vmem>>, vector<1x8x1xf32>
      %429 = vector.shape_cast %428 : vector<1x8x1xf32> to vector<8x1xf32>
      %430 = tpu.reciprocal %429 : vector<8x1xf32> -> vector<8x1xf32>
      %c3_344 = arith.constant 3 : index
      %c0_345 = arith.constant 0 : index
      %c0_346 = arith.constant 0 : index
      %431 = vector.load %arg16[%c3_344, %c0_345, %c0_346] : memref<8x8x4xf32, #tpu.memory_space<vmem>>, vector<1x8x4xf32>
      %432 = vector.shape_cast %431 : vector<1x8x4xf32> to vector<8x4xf32>
      %433 = vector.broadcast %430 : vector<8x1xf32> to vector<8x4xf32>
      %434 = arith.mulf %432, %433 : vector<8x4xf32>
      %c3_347 = arith.constant 3 : index
      %c0_348 = arith.constant 0 : index
      %c0_349 = arith.constant 0 : index
      %435 = vector.load %arg10[%c3_347, %c0_348, %c0_349] : memref<8x4x32xf32, #tpu.memory_space<vmem>>, vector<1x4x32xf32>
      %436 = vector.shape_cast %435 : vector<1x4x32xf32> to vector<4x32xf32>
      %cst_350 = arith.constant dense<0.000000e+00> : vector<8x32xf32>
      %437 = tpu.matmul %434, %436, %cst_350 {dimension_numbers = #tpu.dot_dimension_numbers<[1], [0], [0], [1], [0, 0, 1, 1], [], []>} : vector<8x4xf32>, vector<4x32xf32>, vector<8x32xf32> -> vector<8x32xf32>
      %438 = arith.addf %427, %437 : vector<8x32xf32>
      %c4_351 = arith.constant 4 : index
      %c0_352 = arith.constant 0 : index
      %c0_353 = arith.constant 0 : index
      %439 = vector.load %arg15[%c4_351, %c0_352, %c0_353] : memref<8x8x1xf32, #tpu.memory_space<vmem>>, vector<1x8x1xf32>
      %440 = vector.shape_cast %439 : vector<1x8x1xf32> to vector<8x1xf32>
      %441 = tpu.reciprocal %440 : vector<8x1xf32> -> vector<8x1xf32>
      %c4_354 = arith.constant 4 : index
      %c0_355 = arith.constant 0 : index
      %c0_356 = arith.constant 0 : index
      %442 = vector.load %arg16[%c4_354, %c0_355, %c0_356] : memref<8x8x4xf32, #tpu.memory_space<vmem>>, vector<1x8x4xf32>
      %443 = vector.shape_cast %442 : vector<1x8x4xf32> to vector<8x4xf32>
      %444 = vector.broadcast %441 : vector<8x1xf32> to vector<8x4xf32>
      %445 = arith.mulf %443, %444 : vector<8x4xf32>
      %c4_357 = arith.constant 4 : index
      %c0_358 = arith.constant 0 : index
      %c0_359 = arith.constant 0 : index
      %446 = vector.load %arg10[%c4_357, %c0_358, %c0_359] : memref<8x4x32xf32, #tpu.memory_space<vmem>>, vector<1x4x32xf32>
      %447 = vector.shape_cast %446 : vector<1x4x32xf32> to vector<4x32xf32>
      %cst_360 = arith.constant dense<0.000000e+00> : vector<8x32xf32>
      %448 = tpu.matmul %445, %447, %cst_360 {dimension_numbers = #tpu.dot_dimension_numbers<[1], [0], [0], [1], [0, 0, 1, 1], [], []>} : vector<8x4xf32>, vector<4x32xf32>, vector<8x32xf32> -> vector<8x32xf32>
      %449 = arith.addf %438, %448 : vector<8x32xf32>
      %c5_361 = arith.constant 5 : index
      %c0_362 = arith.constant 0 : index
      %c0_363 = arith.constant 0 : index
      %450 = vector.load %arg15[%c5_361, %c0_362, %c0_363] : memref<8x8x1xf32, #tpu.memory_space<vmem>>, vector<1x8x1xf32>
      %451 = vector.shape_cast %450 : vector<1x8x1xf32> to vector<8x1xf32>
      %452 = tpu.reciprocal %451 : vector<8x1xf32> -> vector<8x1xf32>
      %c5_364 = arith.constant 5 : index
      %c0_365 = arith.constant 0 : index
      %c0_366 = arith.constant 0 : index
      %453 = vector.load %arg16[%c5_364, %c0_365, %c0_366] : memref<8x8x4xf32, #tpu.memory_space<vmem>>, vector<1x8x4xf32>
      %454 = vector.shape_cast %453 : vector<1x8x4xf32> to vector<8x4xf32>
      %455 = vector.broadcast %452 : vector<8x1xf32> to vector<8x4xf32>
      %456 = arith.mulf %454, %455 : vector<8x4xf32>
      %c5_367 = arith.constant 5 : index
      %c0_368 = arith.constant 0 : index
      %c0_369 = arith.constant 0 : index
      %457 = vector.load %arg10[%c5_367, %c0_368, %c0_369] : memref<8x4x32xf32, #tpu.memory_space<vmem>>, vector<1x4x32xf32>
      %458 = vector.shape_cast %457 : vector<1x4x32xf32> to vector<4x32xf32>
      %cst_370 = arith.constant dense<0.000000e+00> : vector<8x32xf32>
      %459 = tpu.matmul %456, %458, %cst_370 {dimension_numbers = #tpu.dot_dimension_numbers<[1], [0], [0], [1], [0, 0, 1, 1], [], []>} : vector<8x4xf32>, vector<4x32xf32>, vector<8x32xf32> -> vector<8x32xf32>
      %460 = arith.addf %449, %459 : vector<8x32xf32>
      %c6_371 = arith.constant 6 : index
      %c0_372 = arith.constant 0 : index
      %c0_373 = arith.constant 0 : index
      %461 = vector.load %arg15[%c6_371, %c0_372, %c0_373] : memref<8x8x1xf32, #tpu.memory_space<vmem>>, vector<1x8x1xf32>
      %462 = vector.shape_cast %461 : vector<1x8x1xf32> to vector<8x1xf32>
      %463 = tpu.reciprocal %462 : vector<8x1xf32> -> vector<8x1xf32>
      %c6_374 = arith.constant 6 : index
      %c0_375 = arith.constant 0 : index
      %c0_376 = arith.constant 0 : index
      %464 = vector.load %arg16[%c6_374, %c0_375, %c0_376] : memref<8x8x4xf32, #tpu.memory_space<vmem>>, vector<1x8x4xf32>
      %465 = vector.shape_cast %464 : vector<1x8x4xf32> to vector<8x4xf32>
      %466 = vector.broadcast %463 : vector<8x1xf32> to vector<8x4xf32>
      %467 = arith.mulf %465, %466 : vector<8x4xf32>
      %c6_377 = arith.constant 6 : index
      %c0_378 = arith.constant 0 : index
      %c0_379 = arith.constant 0 : index
      %468 = vector.load %arg10[%c6_377, %c0_378, %c0_379] : memref<8x4x32xf32, #tpu.memory_space<vmem>>, vector<1x4x32xf32>
      %469 = vector.shape_cast %468 : vector<1x4x32xf32> to vector<4x32xf32>
      %cst_380 = arith.constant dense<0.000000e+00> : vector<8x32xf32>
      %470 = tpu.matmul %467, %469, %cst_380 {dimension_numbers = #tpu.dot_dimension_numbers<[1], [0], [0], [1], [0, 0, 1, 1], [], []>} : vector<8x4xf32>, vector<4x32xf32>, vector<8x32xf32> -> vector<8x32xf32>
      %471 = arith.addf %460, %470 : vector<8x32xf32>
      %c7_381 = arith.constant 7 : index
      %c0_382 = arith.constant 0 : index
      %c0_383 = arith.constant 0 : index
      %472 = vector.load %arg15[%c7_381, %c0_382, %c0_383] : memref<8x8x1xf32, #tpu.memory_space<vmem>>, vector<1x8x1xf32>
      %473 = vector.shape_cast %472 : vector<1x8x1xf32> to vector<8x1xf32>
      %474 = tpu.reciprocal %473 : vector<8x1xf32> -> vector<8x1xf32>
      %c7_384 = arith.constant 7 : index
      %c0_385 = arith.constant 0 : index
      %c0_386 = arith.constant 0 : index
      %475 = vector.load %arg16[%c7_384, %c0_385, %c0_386] : memref<8x8x4xf32, #tpu.memory_space<vmem>>, vector<1x8x4xf32>
      %476 = vector.shape_cast %475 : vector<1x8x4xf32> to vector<8x4xf32>
      %477 = vector.broadcast %474 : vector<8x1xf32> to vector<8x4xf32>
      %478 = arith.mulf %476, %477 : vector<8x4xf32>
      %c7_387 = arith.constant 7 : index
      %c0_388 = arith.constant 0 : index
      %c0_389 = arith.constant 0 : index
      %479 = vector.load %arg10[%c7_387, %c0_388, %c0_389] : memref<8x4x32xf32, #tpu.memory_space<vmem>>, vector<1x4x32xf32>
      %480 = vector.shape_cast %479 : vector<1x4x32xf32> to vector<4x32xf32>
      %cst_390 = arith.constant dense<0.000000e+00> : vector<8x32xf32>
      %481 = tpu.matmul %478, %480, %cst_390 {dimension_numbers = #tpu.dot_dimension_numbers<[1], [0], [0], [1], [0, 0, 1, 1], [], []>} : vector<8x4xf32>, vector<4x32xf32>, vector<8x32xf32> -> vector<8x32xf32>
      %482 = arith.addf %471, %481 : vector<8x32xf32>
      %c0_391 = arith.constant 0 : index
      %c0_392 = arith.constant 0 : index
      %c0_393 = arith.constant 0 : index
      %483 = vector.load %arg12[%c0_391, %c0_392, %c0_393] : memref<1x8x32xf32, #tpu.memory_space<vmem>>, vector<1x8x32xf32>
      %484 = vector.shape_cast %483 : vector<1x8x32xf32> to vector<8x32xf32>
      %485 = vector.shape_cast %482 : vector<8x32xf32> to vector<1x8x32xf32>
      tpu.vector_store %arg12[%c0_391, %c0_392, %c0_393], %485 {strides = array<i32>} : memref<1x8x32xf32, #tpu.memory_space<vmem>>, vector<1x8x32xf32>,
    } else {
    }
    return
  }
  func.func @transform_0(%arg0: i32, %arg1: i32) -> (i32, i32, i32) {
    %c0_i32 = arith.constant 0 : i32
    %c0_i32_0 = arith.constant 0 : i32
    %c0_i32_1 = arith.constant 0 : i32
    return %arg0, %c0_i32, %c0_i32_0 : i32, i32, i32
  }
  func.func @transform_1(%arg0: i32, %arg1: i32) -> (i32, i32, i32) {
    %c0_i32 = arith.constant 0 : i32
    %c0_i32_0 = arith.constant 0 : i32
    return %arg0, %arg1, %c0_i32 : i32, i32, i32
  }
  func.func @transform_2(%arg0: i32, %arg1: i32) -> (i32, i32, i32) {
    %c0_i32 = arith.constant 0 : i32
    %c0_i32_0 = arith.constant 0 : i32
    %c0_i32_1 = arith.constant 0 : i32
    %c0_i32_2 = arith.constant 0 : i32
    return %c0_i32, %c0_i32_0, %c0_i32_1 : i32, i32, i32
  }
  func.func @transform_3(%arg0: i32, %arg1: i32) -> (i32, i32, i32) {
    %c0_i32 = arith.constant 0 : i32
    %c0_i32_0 = arith.constant 0 : i32
    %c0_i32_1 = arith.constant 0 : i32
    %c0_i32_2 = arith.constant 0 : i32
    return %c0_i32, %c0_i32_0, %c0_i32_1 : i32, i32, i32
  }
  func.func @transform_4(%arg0: i32, %arg1: i32) -> (i32, i32, i32) {
    %c0_i32 = arith.constant 0 : i32
    %c0_i32_0 = arith.constant 0 : i32
    %c0_i32_1 = arith.constant 0 : i32
    %c0_i32_2 = arith.constant 0 : i32
    return %c0_i32, %c0_i32_0, %c0_i32_1 : i32, i32, i32
  }
  func.func @transform_5(%arg0: i32, %arg1: i32) -> (i32, i32, i32) {
    %c0_i32 = arith.constant 0 : i32
    %c0_i32_0 = arith.constant 0 : i32
    %c0_i32_1 = arith.constant 0 : i32
    %c0_i32_2 = arith.constant 0 : i32
    return %c0_i32, %c0_i32_0, %c0_i32_1 : i32, i32, i32
  }
  func.func @transform_6(%arg0: i32, %arg1: i32) -> (i32, i32, i32) {
    %c0_i32 = arith.constant 0 : i32
    %c0_i32_0 = arith.constant 0 : i32
    %c0_i32_1 = arith.constant 0 : i32
    %c0_i32_2 = arith.constant 0 : i32
    return %c0_i32, %c0_i32_0, %c0_i32_1 : i32, i32, i32
  }
  func.func @transform_7(%arg0: i32, %arg1: i32) -> (i32, i32, i32) {
    %c0_i32 = arith.constant 0 : i32
    %c0_i32_0 = arith.constant 0 : i32
    %c0_i32_1 = arith.constant 0 : i32
    %c0_i32_2 = arith.constant 0 : i32
    return %c0_i32, %c0_i32_0, %c0_i32_1 : i32, i32, i32
  }
  func.func @transform_8(%arg0: i32, %arg1: i32) -> (i32, i32, i32) {
    %c0_i32 = arith.constant 0 : i32
    %c0_i32_0 = arith.constant 0 : i32
    %c0_i32_1 = arith.constant 0 : i32
    %c0_i32_2 = arith.constant 0 : i32
    return %c0_i32, %c0_i32_0, %c0_i32_1 : i32, i32, i32
  }
  func.func @transform_9(%arg0: i32, %arg1: i32) -> (i32, i32) {
    %c0_i32 = arith.constant 0 : i32
    %c0_i32_0 = arith.constant 0 : i32
    %c0_i32_1 = arith.constant 0 : i32
    return %c0_i32, %c0_i32_0 : i32, i32
  }
  func.func @transform_10(%arg0: i32, %arg1: i32) -> (i32, i32, i32) {
    %c0_i32 = arith.constant 0 : i32
    %c0_i32_0 = arith.constant 0 : i32
    %c0_i32_1 = arith.constant 0 : i32
    return %arg0, %c0_i32, %c0_i32_0 : i32, i32, i32
  }
}

</mosaic_0001>

<bundles_post_ra>
// kernel: tpu_custom_call.1
= control target key start
LH: loop header
LB: loop body
LE: loop exit
PB: predicated region body
PF: predicated region fallthrough
CT: control target
= control target key end

     0   :  { %15 = vsyncpa [#allocation7], 0  ;;  %s7227_s0 = inlined_call_operand.vmem [shape: f32[2,8,32], index: 0, kind: input, shape index: {}]   ;;  %s7228_s1 = inlined_call_operand.vmem [shape: f32[2,16,32], index: 1, kind: input, shape index: {}]   ;;  %s7229_s2 = inlined_call_operand.vmem [shape: f32[8,32,4], index: 2, kind: input, shape index: {}]   ;;  %s7230_s3 = inlined_call_operand.vmem [shape: f32[8,1,4], index: 3, kind: input, shape index: {}]   ;;  %s7231_s4 = inlined_call_operand.vmem [shape: f32[8,32,4], index: 4, kind: input, shape index: {}]   ;;  %s7232_s5 = inlined_call_operand.vmem [shape: f32[8,1,4], index: 5, kind: input, shape index: {}]   ;;  %s7233_s6 = inlined_call_operand.vmem [shape: f32[8,32,4], index: 6, kind: input, shape index: {}]   ;;  %s7234_s7 = inlined_call_operand.vmem [shape: f32[8,1,4], index: 7, kind: input, shape index: {}]   ;;  %s7235_s8 = inlined_call_operand.vmem [shape: f32[8,4,32], index: 8, kind: input, shape index: {}]   ;;  %s7236_s9 = inlined_call_operand.vmem [shape: f32[1,32], index: 9, kind: input, shape index: {}]   ;;  %s7237_s10 = inlined_call_operand.hbm [shape: f32[2,8,32], index: 10, kind: output, shape index: {}]  }
   0x1   :  { %17 = vsyncpa [#allocation7 + $0x1], 0  ;;  %s6216_s13 = smov 0   ;;  %s6218_s14 = smov 0  }
   0x2   :  { %s6220_s15 = smov 0   ;;  %s6222_s16 = smov 0  }
   0x3   :  { %s6224_s17 = smov 0   ;;  %s6226_s18 = smov 0  }
   0x4 LB: > { %7240 = sst [smem:[#allocation9_spill]] %s6149_s17  ;;  %s4861_s19 = sadd.s32 4294967295, %s6153_s18   ;;  %s6153_s18 = sphi %s6226_s18, %s23_s18   ;;  %s6149_s17 = sphi %s6224_s17, %s7247_s17   ;;  %s6145_s16 = sphi %s6222_s16, %s7246_s16   ;;  %s6141_s15 = sphi %s6220_s15, %s7250_s15   ;;  %s6137_s14 = sphi %s6218_s14, %s7249_s14   ;;  %s6133_s13 = sphi %s6216_s13, %s7248_s13  }
   0x5   : > { %s4862_s20 = sadd.s32 4294967294, %s6153_s18   ;;  %s35_s21 = sadd.s32 1, %s6149_s17 }
   0x6   : > { %s264_s22 = sadd.s32 1, %s6141_s15  ;;  %p37_p0 = scmp.ge.s32.totalorder %s35_s21, 2 }
   0x7   : > { %p274_p1 = scmp.ne.s32.totalorder %s6141_s15, %s6137_s14  ;;  %p275_p2 = scmp.eq.s32.totalorder %s4861_s19, 1 }
   0x8   : > { %p280_p3 = scmp.ne.s32.totalorder %s6137_s14, %s6133_s13  ;;  %s7252_s21 = smov (%p37_p0, %s35_s21), 0 }
   0x9   : > { %7241 = sst [smem:[#allocation10_spill]] %s7252_s21  ;;  %p6256_p4 = por %p275_p2, %p274_p1 }
   0xa   : > { %p281_p5 = scmp.eq.s32.totalorder %s4862_s20, 1  ;;  %s261_s24 = ssub.s32 %s6149_s17, %s7252_s21 }
   0xb   : > { %p4865_p6 = scmp.ge.s32.totalorder %s6153_s18, 1  ;;  %p262_p7 = scmp.eq.s32.totalorder %s261_s24, 0 }
   0xc   : > { %p6263_p8 = por %p281_p5, %p280_p3  ;;  %p343_p9 = scmp.lt.s32.totalorder %s6153_s18, 3 }
   0xd   : > { %s6269_s26 = scalar_select %p262_p7, %s6141_s15, %s264_s22  }
   0xe   : > { %p344_p10 = pnand %p4865_p6, %p343_p9 }
   0xf   : > { %v4893_v0 = vld [vmem:[%s7229_s2 + $0x80] sm:$0xff] (!%p344_p10)  ;;  %v4894_v1 = vld [vmem:[%s7229_s2 + $0x88] sm:$0xff] (!%p344_p10)  ;;  %v4895_v2 = vld [vmem:[%s7229_s2 + $0x90] sm:$0xff] (!%p344_p10)  ;;  %v6155_v3 = vmov (!%p344_p10), 0.0|0.0   ;;  %vm6156_vm0 = vmmov (!%p344_p10), 0   ;;  %v6157_v6 = vmov (!%p344_p10), 0.0  }
  0x10   : > { %347 = sbr.rel (%p344_p10) target bundleno = 6414 (0x190e), region = 60  ;;  %5740 = vmatprep.subr.bf16.mxu0 (!%p344_p10), %v6155_v3  ;;  %v5741_v4 = vpack.c.bf16 (!%p344_p10), %v4894_v1, %v4893_v0  ;;  %v4896_v5 = vld [vmem:[%s7229_s2 + $0x98] sm:$0xff] (!%p344_p10)  ;;  %5352 = vmatprep.mubr.msk.f32.mxu0 (!%p344_p10), %vm6156_vm0, %v6157_v6  ;;  %p389_p11 = scmp.lt.s32.totalorder (!%p344_p10), %s6145_s16, 1  ;;  %vm493_vm1 = vcmask (!%p344_p10), 31744   ;;  %v408_v8 = vld [vmem:[%s7229_s2] sm:$0xff] (!%p344_p10)  ;;  %v409_v9 = vld [vmem:[%s7229_s2 + $0x8] sm:$0xff] (!%p344_p10) }
  0x11   : > { %5716 = vmatprep.subr.bf16.mxu1 (!%p344_p10), %v6155_v3  ;;  %5308 = vmatprep.mubr.msk.f32.mxu1 (!%p344_p10), %vm6156_vm0, %v6157_v6  ;;  %1107 = vst.msk [vmem:[#allocation5] sm:$0xff] (!%p344_p10), %vm493_vm1, %v6157_v6  ;;  %1108 = vst.msk [vmem:[#allocation5 + $0x8] sm:$0xff] (!%p344_p10), %vm493_vm1, %v6157_v6  ;;  %v5744_v7 = vpack.c.bf16 (!%p344_p10), %v4896_v5, %v4895_v2  ;;  %v4907_v10 = vld [vmem:[%s7229_s2 + $0xc0] sm:$0xff] (!%p344_p10)  ;;  %v4908_v11 = vld [vmem:[%s7229_s2 + $0xc8] sm:$0xff] (!%p344_p10)  ;;  %v5717_v12 = vpack.c.bf16 (!%p344_p10), %v409_v9, %v408_v8  ;;  %vm419_vm2 = vcmask (!%p344_p10), 261120   ;;  %vm1090_vm4 = vcmask (!%p344_p10), 7168  }
  0x12   : > { %1109 = vst.msk [vmem:[#allocation5 + $0x10] sm:$0xff] (!%p344_p10), %vm493_vm1, %v6157_v6  ;;  %1110 = vst.msk [vmem:[#allocation5 + $0x18] sm:$0xff] (!%p344_p10), %vm493_vm1, %v6157_v6  ;;  %5742 = vmatpush3.bf16.msra.mxu0 (!%p344_p10), %v5741_v4  ;;  %v410_v13 = vld [vmem:[%s7229_s2 + $0x10] sm:$0xff] (!%p344_p10)  ;;  %v411_v14 = vld [vmem:[%s7229_s2 + $0x18] sm:$0xff] (!%p344_p10)  ;;  %v5753_v17 = vpack.c.bf16 (!%p344_p10), %v4908_v11, %v4907_v10  ;;  %v6158_v54 = vmov (!%p344_p10), -inf   ;;  %vm1378_vm5 = vcmask (!%p344_p10), 130048  }
  0x13   : > { %1111 = vst.msk [vmem:[#allocation5 + $0x20] sm:$0xff] (!%p344_p10), %vm493_vm1, %v6157_v6  ;;  %1112 = vst.msk [vmem:[#allocation5 + $0x28] sm:$0xff] (!%p344_p10), %vm493_vm1, %v6157_v6  ;;  %5743 = vmatprep.subr.bf16.mxu0 (!%p344_p10), %v6155_v3  ;;  %5718 = vmatpush3.bf16.msra.mxu1 (!%p344_p10), %v5717_v12  ;;  %v5720_v15 = vpack.c.bf16 (!%p344_p10), %v411_v14, %v410_v13  ;;  %v4909_v18 = vld [vmem:[%s7229_s2 + $0xd0] sm:$0xff] (!%p344_p10)  ;;  %v4910_v19 = vld [vmem:[%s7229_s2 + $0xd8] sm:$0xff] (!%p344_p10)  ;;  %vm4070_vm6 = vcmask (!%p344_p10), 1043456   ;;  %s386_s17 = sand.u32 (!%p344_p10), 1, %s6137_s14  }
  0x14   : > { %1113 = vst.msk [vmem:[#allocation5 + $0x30] sm:$0xff] (!%p344_p10), %vm493_vm1, %v6157_v6  ;;  %1114 = vst.msk [vmem:[#allocation5 + $0x38] sm:$0xff] (!%p344_p10), %vm493_vm1, %v6157_v6  ;;  %5719 = vmatprep.subr.bf16.mxu1 (!%p344_p10), %v6155_v3  ;;  %v1117_v20 = vld [vmem:[%s7231_s4] sm:$0xff] (!%p344_p10)  ;;  %v1118_v21 = vld [vmem:[%s7231_s4 + $0x8] sm:$0xff] (!%p344_p10)  ;;  %v5756_v22 = vpack.c.bf16 (!%p344_p10), %v4910_v19, %v4909_v18  ;;  %s4866_s20 = sshll.u32 (!%p344_p10), %s386_s17, 3 }
  0x15   : > { %v5764_v23 = vpack.c.bf16 (!%p344_p10), %v1118_v21, %v1117_v20  ;;  %v1119_v24 = vld [vmem:[%s7231_s4 + $0x10] sm:$0xff] (!%p344_p10)  ;;  %v1120_v25 = vld [vmem:[%s7231_s4 + $0x18] sm:$0xff] (!%p344_p10)  ;;  %v4898_v29 = vld [vmem:[%s7230_s3 + $0x4] ss:$0 sm:$0xff] (!%p344_p10)  ;;  %1091 = vst.msk [vmem:[#allocation3] sm:$0xff] (!%p344_p10), %vm1090_vm4, %v6158_v54  ;;  %s388_s29 = scalar_lea.vmem (!%p344_p10), [#allocation6], %s4866_s20 }
  0x16   : > { %5745 = vmatpush3.bf16.msra.mxu0 (!%p344_p10), %v5744_v7  ;;  %v5768_v27 = vpack.c.bf16 (!%p344_p10), %v1120_v25, %v1119_v24  ;;  %v4870_v33 = vld [vmem:[%s7230_s3] ss:$0 sm:$0xff] (!%p344_p10)  ;;  %v4912_v37 = vld [vmem:[%s7230_s3 + $0x6] ss:$0 sm:$0xff] (!%p344_p10)  ;;  %vm6404_vm3 = vmpackc.low (!%p344_p10), %vm493_vm1, %vm493_vm1  ;;  %1092 = vst.msk [vmem:[#allocation3 + $0x8] sm:$0xff] (!%p344_p10), %vm1090_vm4, %v6158_v54 }
  0x17   : > { %s6309_s22 = scalar_select %p389_p11, %s6145_s16, 1  ;;  %5752 = vmatprep.subr.bf16.mxu0 %v6155_v3  ;;  %5721 = vmatpush3.bf16.msra.mxu1 %v5720_v15  ;;  %v4921_v41 = vld [vmem:[%s7232_s5] ss:$0 sm:$0xff]  ;;  %v4873_v50 = vld [vmem:[%s7229_s2 + $0x28] sm:$0xff]  ;;  %v4874_v51 = vld [vmem:[%s7229_s2 + $0x30] sm:$0xff]  ;;  %1093 = vst.msk [vmem:[#allocation3 + $0x10] sm:$0xff] %vm1090_vm4, %v6158_v54 }
  0x18   : > { %5722 = vmatprep.subr.bf16.mxu1 %v6155_v3  ;;  %v4872_v49 = vld [vmem:[%s7229_s2 + $0x20] sm:$0xff]  ;;  %v4875_v53 = vld [vmem:[%s7229_s2 + $0x38] sm:$0xff]  ;;  %1094 = vst.msk [vmem:[#allocation3 + $0x18] sm:$0xff] %vm1090_vm4, %v6158_v54  ;;  %1095 = vst.msk [vmem:[#allocation3 + $0x20] sm:$0xff] %vm1090_vm4, %v6158_v54 }
  0x19   : > { %s4867_s24 = sshll.u32 %s6309_s22, 3  ;;  %s5099_s28 = sshll.u32 %s6309_s22, 4  ;;  %v5723_v52 = vpack.c.bf16 %v4873_v50, %v4872_v49  ;;  %1096 = vst.msk [vmem:[#allocation3 + $0x28] sm:$0xff] %vm1090_vm4, %v6158_v54  ;;  %1097 = vst.msk [vmem:[#allocation3 + $0x30] sm:$0xff] %vm1090_vm4, %v6158_v54  ;;  %v5726_v55 = vpack.c.bf16 %v4875_v53, %v4874_v51  ;;  %v4879_v56 = vld [vmem:[%s7229_s2 + $0x40] sm:$0xff]  ;;  %v4880_v57 = vld [vmem:[%s7229_s2 + $0x48] sm:$0xff] }
  0x1a   : > { %s392_s30 = scalar_lea.vmem %s7227_s0, %s4867_s24  ;;  %s6360_s21 = scalar_lea.vmem %s7228_s1, %s5099_s28  ;;  %1098 = vst.msk [vmem:[#allocation3 + $0x38] sm:$0xff] %vm1090_vm4, %v6158_v54  ;;  %1099 = vst.msk [vmem:[#allocation4] sm:$0xff] %vm1090_vm4, %v6157_v6  ;;  %v5729_v58 = vpack.c.bf16 %v4880_v57, %v4879_v56  ;;  %v4881_v59 = vld [vmem:[%s7229_s2 + $0x50] sm:$0xff]  ;;  %v4882_v60 = vld [vmem:[%s7229_s2 + $0x58] sm:$0xff] }
  0x1b   : > { %v6334_v16 = vld [vmem:[%s392_s30] sm:$0xff]  ;;  %v6380_v28 = vld [vmem:[%s6360_s21 + $0x8] sm:$0xff]  ;;  %1100 = vst.msk [vmem:[#allocation4 + $0x8] sm:$0xff] %vm1090_vm4, %v6157_v6  ;;  %1101 = vst.msk [vmem:[#allocation4 + $0x10] sm:$0xff] %vm1090_vm4, %v6157_v6  ;;  %v5732_v61 = vpack.c.bf16 %v4882_v60, %v4881_v59  ;;  %s5096_s28 = sshll.u32 %s6145_s16, 7  ;;  %s4776_s30 = sshll.u32 %s388_s29, 4  ;;  %s7181_s30 = int_to_ptr.vmem [resolvable:$true] %s4776_s30 }
  0x1c   : > { %5353 = vmatmul.mubr.msk.f32.vlgmr.msra.gmra.mrb[0].mxu0 %vm419_vm2, %v6334_v16  ;;  %5309 = vmatmul.mubr.msk.f32.vlgmr.msra.gmra.mrb[0].mxu1 %vm419_vm2, %v6334_v16  ;;  %v6373_v26 = vld [vmem:[%s6360_s21] sm:$0xff]  ;;  %1102 = vst.msk [vmem:[#allocation4 + $0x18] sm:$0xff] %vm1090_vm4, %v6157_v6  ;;  %1103 = vst.msk [vmem:[#allocation4 + $0x20] sm:$0xff] %vm1090_vm4, %v6157_v6  ;;  %v4887_v63 = vld [vmem:[%s7229_s2 + $0x68] sm:$0xff]  ;;  %s7179_s12 = scalar_lea.hbm %s7237_s10, %s5096_s28  ;;  %s6075_s19 = scalar_lea.vmem %s7181_s30, 128 }
  0x1d   : > { %5754 = vmatpush3.bf16.msra.mxu0 %v5753_v17  ;;  %5374 = vmatprep.mubr.msk.f32.mxu0 %vm6156_vm0, %v6157_v6  ;;  %1104 = vst.msk [vmem:[#allocation4 + $0x28] sm:$0xff] %vm1090_vm4, %v6157_v6  ;;  %1105 = vst.msk [vmem:[#allocation4 + $0x30] sm:$0xff] %vm1090_vm4, %v6157_v6  ;;  %v4886_v62 = vld [vmem:[%s7229_s2 + $0x60] sm:$0xff]  ;;  %v4888_v1 = vld [vmem:[%s7229_s2 + $0x70] sm:$0xff]  ;;  %p6076_p12 = scmp.ne.s32.totalorder %s7181_s30, %s6075_s19  ;;  %s6160_s16 = smov [#allocation6]  }
  0x1e   : > { %5755 = vmatprep.subr.bf16.mxu0 %v6155_v3  ;;  %5319 = vmatprep.mubr.msk.f32.mxu1 %vm6156_vm0, %v6157_v6  ;;  %1106 = vst.msk [vmem:[#allocation4 + $0x38] sm:$0xff] %vm1090_vm4, %v6157_v6  ;;  %v5735_v0 = vpack.c.bf16 %v4887_v63, %v4886_v62  ;;  %v4889_v2 = vld [vmem:[%s7229_s2 + $0x78] sm:$0xff]  ;;  %v4900_v5 = vld [vmem:[%s7229_s2 + $0xa0] sm:$0xff]  ;;  %v4901_v7 = vld [vmem:[%s7229_s2 + $0xa8] sm:$0xff]  ;;  %s6079_s20 = sshll.u32 %s6160_s16, 4  ;;  %s6080_s20 = int_to_ptr.vmem [resolvable:$false] %s6079_s20 }
  0x1f   : > { %5724 = vmatpush3.bf16.msra.mxu1 %v5723_v52  ;;  %v5738_v4 = vpack.c.bf16 %v4889_v2, %v4888_v1  ;;  %v5747_v8 = vpack.c.bf16 %v4901_v7, %v4900_v5  ;;  %v4902_v9 = vld [vmem:[%s7229_s2 + $0xb0] sm:$0xff]  ;;  %v4903_v10 = vld [vmem:[%s7229_s2 + $0xb8] sm:$0xff]  ;;  %v4914_v12 = vld [vmem:[%s7229_s2 + $0xe0] sm:$0xff]  ;;  %p6077_p13 = pnand %p6076_p12, %p6256_p4  ;;  %s6081_s24 = scalar_lea.vmem %s6080_s20, 256 }
  0x20   : > { %5725 = vmatprep.subr.bf16.mxu1 %v6155_v3  ;;  %v5750_v11 = vpack.c.bf16 %v4903_v10, %v4902_v9  ;;  %v4915_v13 = vld [vmem:[%s7229_s2 + $0xe8] sm:$0xff]  ;;  %v4916_v15 = vld [vmem:[%s7229_s2 + $0xf0] sm:$0xff]  ;;  %v4917_v17 = vld [vmem:[%s7229_s2 + $0xf8] sm:$0xff]  ;;  %p6082_p1 = scmp.lt.s32.totalorder %s7181_s30, %s6080_s20  ;;  %p6083_p2 = scmp.lt.s32.totalorder %s6081_s24, %s6075_s19 }
  0x21   : > { %5757 = vmatpush3.bf16.msra.mxu0 %v5756_v22  ;;  %v5759_v14 = vpack.c.bf16 %v4915_v13, %v4914_v12  ;;  %v1210_v18 = vld [vmem:[%s7233_s6] sm:$0xff]  ;;  %v1211_v19 = vld [vmem:[%s7233_s6 + $0x8] sm:$0xff]  ;;  %v5762_v20 = vpack.c.bf16 %v4917_v17, %v4916_v15  ;;  %v1212_v22 = vld [vmem:[%s7233_s6 + $0x10] sm:$0xff]  ;;  %p6078_p0 = pneg %p6077_p13 }
  0x22   : > { %5765 = vmatprep.subr.bf16.mxu0 %v5764_v23  ;;  %v5772_v21 = vpack.c.bf16 %v1211_v19, %v1210_v18  ;;  %v6564_v51 = vld [vmem:[#allocation3] sm:$0xff]  ;;  %v4934_v5 = vld [vmem:[%s7231_s4 + $0x38] sm:$0xff]  ;;  %p6084_p3 = por %p6083_p2, %p6082_p1 }
  0x23   : > { %5727 = vmatpush3.bf16.msra.mxu1 %v5726_v55  ;;  %v4924_v56 = vld [vmem:[%s7234_s7] ss:$0 sm:$0xff]  ;;  %v5062_v46 = vld [vmem:[%s7233_s6 + $0xf8] sm:$0xff] }
  0x24   : > { %5375 = vmatmul.mubr.msk.f32.vlgmr.msra.gmra.mrb[2].mxu0 %vm419_vm2, %v6334_v16  ;;  %5728 = vmatprep.subr.bf16.mxu1 %v6155_v3  ;;  %v4931_v57 = vld [vmem:[%s7231_s4 + $0x20] sm:$0xff]  ;;  %p6085_p5 = pnand %p6084_p3, %p6078_p0 }
  0x25   : > { %5767 = vmatpush3.bf16.msra.mxu0 %v5764_v23  ;;  %5396 = vmatprep.mubr.msk.f32.mxu0 %vm419_vm2, %v6373_v26  ;;  %v1213_v23 = vld [vmem:[%s7233_s6 + $0x18] sm:$0xff]  ;;  %v4939_v19 = vld [vmem:[%s7233_s6 + $0x20] sm:$0xff] }
  0x26   : > { %5769 = vmatprep.subr.bf16.mxu0 %v5768_v27  ;;  %5320 = vmatmul.mubr.msk.f32.vlgmr.msra.gmra.mrb[2].mxu1 %vm419_vm2, %v6334_v16  ;;  %v5776_v24 = vpack.c.bf16 %v1213_v23, %v1212_v22  ;;  %v4942_v23 = vld [vmem:[%s7233_s6 + $0x38] sm:$0xff] }
  0x27   : > { %5730 = vmatpush3.bf16.msra.mxu1 %v5729_v58  ;;  %5330 = vmatprep.mubr.msk.f32.mxu1 %vm6156_vm0, %v6157_v6  ;;  %v4932_v58 = vld [vmem:[%s7231_s4 + $0x28] sm:$0xff] }
  0x28   : > { %5731 = vmatprep.subr.bf16.mxu1 %v6155_v3  ;;  %v5787_v62 = vpack.c.bf16 %v4932_v58, %v4931_v57 }
  0x29   : > { %5771 = vmatpush3.bf16.msra.mxu0 %v5768_v27 }
  0x2a   : > { %5780 = vmatprep.subr.bf16.mxu0 %v6155_v3 }
  0x2b   : > { %5733 = vmatpush3.bf16.msra.mxu1 %v5732_v61 }
  0x2c   : > { %5397 = vmatmul.mubr.msk.f32.vlgmr.msra.gmra.mrb[4].mxu0 %vm419_vm2, %v6380_v28  ;;  %5734 = vmatprep.subr.bf16.mxu1 %v6155_v3 }
  0x2d   : > { %5414 = vmatprep.mubr.msk.f32.mxu0 %vm6156_vm0, %v6157_v6 }
  0x2e   : > { %5331 = vmatmul.mubr.msk.f32.vlgmr.msra.gmra.mrb[4].mxu1 %vm419_vm2, %v6334_v16 }
  0x2f   : > { %5736 = vmatpush3.bf16.msra.mxu1 %v5735_v0  ;;  %5341 = vmatprep.mubr.msk.f32.mxu1 %vm6156_vm0, %v6157_v6 }
  0x30   : > { %5737 = vmatprep.subr.bf16.mxu1 %v6155_v3 }
  0x33   : > { %5739 = vmatpush3.bf16.msra.mxu1 %v5738_v4  ;;  %v4933_v4 = vld [vmem:[%s7231_s4 + $0x30] sm:$0xff] }
  0x34   : > { %5746 = vmatprep.subr.bf16.mxu1 %v6155_v3  ;;  %v5791_v7 = vpack.c.bf16 %v4934_v5, %v4933_v4 }
  0x36   : > { %5342 = vmatmul.mubr.msk.f32.vlgmr.msra.gmra.mrb[6].mxu1 %vm419_vm2, %v6334_v16 }
  0x37   : > { %5748 = vmatpush3.bf16.msra.mxu1 %v5747_v8  ;;  %5363 = vmatprep.mubr.msk.f32.mxu1 %vm6156_vm0, %v6157_v6 }
  0x38   : > { %5749 = vmatprep.subr.bf16.mxu1 %v6155_v3 }
  0x3b   : > { %5751 = vmatpush3.bf16.msra.mxu1 %v5750_v11  ;;  %v4936_v11 = vld [vmem:[%s7232_s5 + $0x1] ss:$0 sm:$0xff] }
  0x3c   : > { %5758 = vmatprep.subr.bf16.mxu1 %v6155_v3 }
  0x3e   : > { %5364 = vmatmul.mubr.msk.f32.vlgmr.msra.gmra.mrb[8].mxu1 %vm419_vm2, %v6334_v16 }
  0x3f   : > { %5760 = vmatpush3.bf16.msra.mxu1 %v5759_v14  ;;  %5385 = vmatprep.mubr.msk.f32.mxu1 %vm6156_vm0, %v6157_v6 }
  0x40   : > { %5761 = vmatprep.subr.bf16.mxu1 %v6155_v3 }
  0x43   : > { %5763 = vmatpush3.bf16.msra.mxu1 %v5762_v20  ;;  %v4940_v20 = vld [vmem:[%s7233_s6 + $0x28] sm:$0xff] }
  0x44   : > { %5773 = vmatprep.subr.bf16.mxu1 %v5772_v21  ;;  %v5795_v22 = vpack.c.bf16 %v4940_v20, %v4939_v19  ;;  %v4972_v19 = vld [vmem:[%s7231_s4 + $0x68] sm:$0xff] }
  0x46   : > { %5386 = vmatmul.mubr.msk.f32.vlgmr.msra.gmra.mrb[10].mxu1 %vm419_vm2, %v6334_v16  ;;  %v6159_v16 = vmov 0  }
  0x47   : > { %5775 = vmatpush3.bf16.msra.mxu1 %v5772_v21  ;;  %5407 = vmatprep.mubr.msk.f32.mxu1 %vm419_vm2, %v6373_v26  ;;  %v4941_v21 = vld [vmem:[%s7233_s6 + $0x30] sm:$0xff] }
  0x48   : > { %5777 = vmatprep.subr.bf16.mxu1 %v5776_v24  ;;  %6023 = vset.pattern.permute.xlu0 %v6159_v16 }
  0x49   : > { %6024 = vset.pattern.permute.xlu1 %v6159_v16  ;;  %v6628_v16 = vld [vmem:[#allocation3 + $0x8] sm:$0xff] }
  0x4b   : > { %5779 = vmatpush3.bf16.msra.mxu1 %v5776_v24  ;;  %v5799_v24 = vpack.c.bf16 %v4942_v23, %v4941_v21 }
  0x4c   : > { %5784 = vmatprep.subr.bf16.mxu1 %v6155_v3 }
  0x4e   : > { %5408 = vmatmul.mubr.msk.f32.vlgmr.msra.gmra.mrb[12].mxu1 %vm419_vm2, %v6380_v28 }
  0x4f   : > { %5421 = vmatprep.mubr.msk.f32.mxu1 %vm6156_vm0, %v6157_v6 }
  0xef   : > { %v829_v30 = vpop.f32.mrb[0].mxu0  ;;  %v489_v34 = vpop.f32.mrb[0].mxu1 }
  0xf0   : > { %v830_v31 = vadd.f32 %v4898_v29, %v829_v30  ;;  %v5354_v32 = vpop.f32.mrb[1].mxu0  ;;  %v490_v35 = vadd.f32 %v4870_v33, %v489_v34  ;;  %v5310_v36 = vpop.f32.mrb[1].mxu1  ;;  %v4877_v30 = vld [vmem:[%s7230_s3 + $0x1] ss:$0 sm:$0xff]  ;;  %v4884_v34 = vld [vmem:[%s7230_s3 + $0x2] ss:$0 sm:$0xff] }
  0xf2   : > { %834 = vst.msk [vmem:[#allocation2 + $0x20] sm:$0xff] %vm493_vm1, %v830_v31  ;;  %494 = vst.msk [vmem:[#allocation2] sm:$0xff] %vm493_vm1, %v490_v35 }
  0xf7   : > { %v999_v38 = vpop.f32.mrb[2].mxu0 }
  0xf8   : > { %v1000_v39 = vadd.f32 %v4912_v37, %v999_v38  ;;  %v5376_v40 = vpop.f32.mrb[3].mxu0  ;;  %v4891_v38 = vld [vmem:[%s7230_s3 + $0x3] ss:$0 sm:$0xff] }
  0xf9   : > { %v1296_v48 = vld [vmem:[#allocation2] sm:$0xff]  ;;  %v574_v31 = vpop.f32.mrb[2].mxu1 }
  0xfa   : > { %1004 = vst.msk [vmem:[#allocation2 + $0x30] sm:$0xff] %vm493_vm1, %v1000_v39  ;;  %v575_v32 = vadd.f32 %v4877_v30, %v574_v31  ;;  %v5321_v33 = vpop.f32.mrb[3].mxu1 }
  0xfc   : > { %579 = vst.msk [vmem:[#allocation2 + $0x8] sm:$0xff] %vm493_vm1, %v575_v32 }
  0xff   : > { %v5398_v42 = vpop.f32.mrb[4].mxu0 }
 0x100   : > { %v1207_v43 = vadd.f32 %v5398_v42, %v4921_v41  ;;  %v1201_v44 = vpop.f32.mrb[5].mxu0  ;;  %v4905_v42 = vld [vmem:[%s7230_s3 + $0x5] ss:$0 sm:$0xff] }
 0x101   : > { %v1202_v45 = vadd.f32 %v4921_v41, %v1201_v44  ;;  %v659_v35 = vpop.f32.mrb[4].mxu1 }
 0x102   : > { %v660_v36 = vadd.f32 %v4884_v34, %v659_v35  ;;  %v5332_v37 = vpop.f32.mrb[5].mxu1  ;;  %v4944_v34 = vld [vmem:[%s7234_s7 + $0x1] ss:$0 sm:$0xff] }
 0x103   : > { %v5781_v47 = vpack.c.bf16 %v1207_v43, %v1202_v45  ;;  %v1662_v18 = vld [vmem:[#allocation2 + $0x8] sm:$0xff]  ;;  %v4951_v35 = vld [vmem:[%s7231_s4 + $0x40] sm:$0xff] }
 0x104   : > { %664 = vst.msk [vmem:[#allocation2 + $0x10] sm:$0xff] %vm493_vm1, %v660_v36  ;;  %v4952_v36 = vld [vmem:[%s7231_s4 + $0x48] sm:$0xff] }
 0x105   : > { %5783 = vmatpush3.bf16.xpose.msk.msra.mxu0 %vm6404_vm3, %v5781_v47  ;;  %v4919_v47 = vld [vmem:[%s7230_s3 + $0x7] ss:$0 sm:$0xff] }
 0x106   : > { %5796 = vmatprep.subr.bf16.mxu0 %v5795_v22 }
 0x109   : > { %v744_v39 = vpop.f32.mrb[6].mxu1 }
 0x10a   : > { %v745_v40 = vadd.f32 %v4891_v38, %v744_v39  ;;  %v5343_v41 = vpop.f32.mrb[7].mxu1 }
 0x10c   : > { %5415 = vmatmul.mubr.msk.f32.vlgmr.msra.gmra.mrb[6].mxu0 %vm493_vm1, %v1296_v48  ;;  %749 = vst.msk [vmem:[#allocation2 + $0x18] sm:$0xff] %vm493_vm1, %v745_v40  ;;  %v5810_v40 = vpack.c.bf16 %v4952_v36, %v4951_v35 }
 0x10d   : > { %5443 = vmatprep.mubr.msk.f32.mxu0 %vm419_vm2, %v6373_v26  ;;  %5798 = vmatpush3.bf16.msra.mxu0 %v5795_v22 }
 0x10e   : > { %5800 = vmatprep.subr.bf16.mxu0 %v5799_v24 }
 0x111   : > { %v914_v43 = vpop.f32.mrb[8].mxu1  ;;  %5802 = vmatpush3.bf16.msra.mxu0 %v5799_v24 }
 0x112   : > { %v915_v44 = vadd.f32 %v4905_v42, %v914_v43  ;;  %v5365_v45 = vpop.f32.mrb[9].mxu1  ;;  %5807 = vmatprep.subr.bf16.mxu0 %v6155_v3 }
 0x113   : > { %v4953_v45 = vld [vmem:[%s7231_s4 + $0x50] sm:$0xff] }
 0x114   : > { %919 = vst.msk [vmem:[#allocation2 + $0x28] sm:$0xff] %vm493_vm1, %v915_v44  ;;  %5444 = vmatmul.mubr.msk.f32.vlgmr.msra.gmra.mrb[8].mxu0 %vm419_vm2, %v6380_v28 }
 0x115   : > { %5457 = vmatprep.mubr.msk.f32.mxu0 %vm6156_vm0, %v6157_v6 }
 0x119   : > { %v1084_v48 = vpop.f32.mrb[10].mxu1 }
 0x11a   : > { %v1085_v49 = vadd.f32 %v4919_v47, %v1084_v48  ;;  %v5387_v50 = vpop.f32.mrb[11].mxu1  ;;  %v4954_v47 = vld [vmem:[%s7231_s4 + $0x58] sm:$0xff] }
 0x11b   : > { %v5814_v48 = vpack.c.bf16 %v4954_v47, %v4953_v45  ;;  %v4979_v45 = vld [vmem:[%s7233_s6 + $0x60] sm:$0xff]  ;;  %v4980_v47 = vld [vmem:[%s7233_s6 + $0x68] sm:$0xff] }
 0x11c   : > { %1089 = vst.msk [vmem:[#allocation2 + $0x38] sm:$0xff] %vm493_vm1, %v1085_v49 }
 0x121   : > { %v5409_v55 = vpop.f32.mrb[12].mxu1 }
 0x122   : > { %v1293_v59 = vadd.f32 %v5409_v55, %v4924_v56  ;;  %v1287_v60 = vpop.f32.mrb[13].mxu1  ;;  %v4956_v55 = vld [vmem:[%s7232_s5 + $0x2] ss:$0 sm:$0xff] }
 0x123   : > { %v1288_v61 = vadd.f32 %v4924_v56, %v1287_v60 }
 0x125   : > { %v5785_v63 = vpack.c.bf16 %v1293_v59, %v1288_v61  ;;  %v2028_v61 = vld [vmem:[#allocation2 + $0x10] sm:$0xff] }
 0x127   : > { %5786 = vmatpush3.bf16.msra.mxu1 %v5785_v63  ;;  %v4960_v63 = vld [vmem:[%s7233_s6 + $0x48] sm:$0xff] }
 0x128   : > { %5788 = vmatprep.subr.bf16.mxu1 %v5787_v62 }
 0x1df   : > { %v1373_v25 = vpop.f32.mrb[6].mxu0 }
 0x1e0   : > { %v5416_v27 = vpop.f32.mrb[7].mxu0  ;;  %v1379_v29 = vsel %vm1378_vm5, %v1373_v25, -inf }
 0x1e1   : > { %1380 = vmax.xlane.f32.xlu0 %v1379_v29 }
 0x1e7   : > { %v5445_v33 = vpop.f32.mrb[8].mxu0 }
 0x1e8   : > { %v1658_v37 = vadd.f32 %v5445_v33, %v4944_v34  ;;  %v1652_v38 = vpop.f32.mrb[9].mxu0  ;;  %v4974_v33 = vld [vmem:[%s7231_s4 + $0x78] sm:$0xff] }
 0x1e9   : > { %v1653_v39 = vadd.f32 %v4944_v34, %v1652_v38  ;;  %v4976_v38 = vld [vmem:[%s7232_s5 + $0x3] ss:$0 sm:$0xff] }
 0x1eb   : > { %v5808_v41 = vpack.c.bf16 %v1658_v37, %v1653_v39 }
 0x1ed   : > { %5809 = vmatpush3.bf16.msra.mxu0 %v5808_v41 }
 0x1ee   : > { %5811 = vmatprep.subr.bf16.mxu0 %v5810_v40 }
 0x26e   : > { %v1381_v52 = vpop.xlane.xlu0 %1380 }
 0x26f   : > { %v6567_v53 = vmax.f32 %v6564_v51, %v1381_v52 }
 0x271   : > { %v1383_v54 = vsub.f32 %v6564_v51, %v6567_v53  ;;  %1484 = vst.msk [vmem:[#allocation3] sm:$0xff] %vm1090_vm4, %v6567_v53  ;;  %1388 = vperm.xlu0 %6023, %v6567_v53  }
 0x2f0   : > { %v1389_v0 = vpop.permute.xlu0 %1388 }
 0x2f1   : > { %v1391_v1 = vsub.f32 %v1373_v25, %v1389_v0  ;;  %v4961_v0 = vld [vmem:[%s7233_s6 + $0x50] sm:$0xff] }
 0x2f3   : > { %v1392_v2 = vmul.f32 1.442695, %v1391_v1 }
 0x2f5   : > { %6025 = vpow2.f32 %v1392_v2  ;;  %v4962_v2 = vld [vmem:[%s7233_s6 + $0x58] sm:$0xff] }
 0x2f6   : > { %v5822_v4 = vpack.c.bf16 %v4962_v2, %v4961_v0  ;;  %v4991_v2 = vld [vmem:[%s7231_s4 + $0x80] sm:$0xff] }
 0x2ff   : > { %v6589_v8 = vpop.eup %6025 }
 0x300   : > { %5422 = vmatmul.mubr.msk.f32.vlgmr.msra.gmra.mrb[14].mxu1 %vm1378_vm5, %v6589_v8 }
 0x301   : > { %5790 = vmatpush3.bf16.msra.mxu1 %v5787_v62  ;;  %5432 = vmatprep.mubr.msk.f32.mxu1 %vm419_vm2, %v6373_v26  ;;  %v4959_v62 = vld [vmem:[%s7233_s6 + $0x40] sm:$0xff] }
 0x302   : > { %5792 = vmatprep.subr.bf16.mxu1 %v5791_v7  ;;  %v5818_v1 = vpack.c.bf16 %v4960_v63, %v4959_v62 }
 0x305   : > { %5794 = vmatpush3.bf16.msra.mxu1 %v5791_v7 }
 0x306   : > { %5803 = vmatprep.subr.bf16.mxu1 %v6155_v3 }
 0x308   : > { %5433 = vmatmul.mubr.msk.f32.vlgmr.msra.gmra.mrb[16].mxu1 %vm419_vm2, %v6380_v28 }
 0x309   : > { %5450 = vmatprep.mubr.msk.f32.mxu1 %vm6156_vm0, %v6157_v6 }
 0x3d3   : > { %v6600_v9 = vpop.f32.mrb[14].mxu1 }
 0x3d4   : > { %v5423_v10 = vpop.f32.mrb[15].mxu1 }
 0x3db   : > { %v5434_v12 = vpop.f32.mrb[16].mxu1 }
 0x3dc   : > { %v1570_v13 = vadd.f32 %v5434_v12, %v4936_v11  ;;  %v1564_v14 = vpop.f32.mrb[17].mxu1 }
 0x3dd   : > { %v1565_v15 = vadd.f32 %v4936_v11, %v1564_v14  ;;  %v6692_v11 = vld [vmem:[#allocation3 + $0x10] sm:$0xff] }
 0x3df   : > { %v5804_v17 = vpack.c.bf16 %v1570_v13, %v1565_v15 }
 0x3e1   : > { %5806 = vmatpush3.bf16.xpose.msk.msra.mxu1 %vm6404_vm3, %v5804_v17  ;;  %v4964_v17 = vld [vmem:[%s7234_s7 + $0x2] ss:$0 sm:$0xff] }
 0x3e2   : > { %5819 = vmatprep.subr.bf16.mxu1 %v5818_v1 }
 0x3e8   : > { %5451 = vmatmul.mubr.msk.f32.vlgmr.msra.gmra.mrb[18].mxu1 %vm493_vm1, %v1662_v18  ;;  %v4971_v18 = vld [vmem:[%s7231_s4 + $0x60] sm:$0xff] }
 0x3e9   : > { %5479 = vmatprep.mubr.msk.f32.mxu1 %vm419_vm2, %v6373_v26  ;;  %5821 = vmatpush3.bf16.msra.mxu1 %v5818_v1  ;;  %v5833_v23 = vpack.c.bf16 %v4972_v19, %v4971_v18  ;;  %v4984_v1 = vld [vmem:[%s7234_s7 + $0x3] ss:$0 sm:$0xff] }
 0x3ea   : > { %5823 = vmatprep.subr.bf16.mxu1 %v5822_v4 }
 0x3ed   : > { %5825 = vmatpush3.bf16.msra.mxu1 %v5822_v4  ;;  %v4992_v4 = vld [vmem:[%s7231_s4 + $0x88] sm:$0xff] }
 0x3ee   : > { %5830 = vmatprep.subr.bf16.mxu1 %v6155_v3 }
 0x3f0   : > { %5480 = vmatmul.mubr.msk.f32.vlgmr.msra.gmra.mrb[20].mxu1 %vm419_vm2, %v6380_v28 }
 0x3f1   : > { %5493 = vmatprep.mubr.msk.f32.mxu1 %vm6156_vm0, %v6157_v6 }
 0x4bb   : > { %v1738_v25 = vpop.f32.mrb[18].mxu1 }
 0x4bc   : > { %v5452_v27 = vpop.f32.mrb[19].mxu1  ;;  %v1744_v29 = vsel %vm1378_vm5, %v1738_v25, -inf }
 0x4bd   : > { %1745 = vmax.xlane.f32.xlu1 %v1744_v29 }
 0x4c3   : > { %v5481_v15 = vpop.f32.mrb[20].mxu1 }
 0x4c4   : > { %v2024_v20 = vadd.f32 %v5481_v15, %v4964_v17  ;;  %v2018_v21 = vpop.f32.mrb[21].mxu1 }
 0x4c5   : > { %v2019_v22 = vadd.f32 %v4964_v17, %v2018_v21  ;;  %v4994_v21 = vld [vmem:[%s7231_s4 + $0x98] sm:$0xff] }
 0x4c7   : > { %v5831_v24 = vpack.c.bf16 %v2024_v20, %v2019_v22  ;;  %v4993_v20 = vld [vmem:[%s7231_s4 + $0x90] sm:$0xff] }
 0x4c8   : > { %v5860_v22 = vpack.c.bf16 %v4994_v21, %v4993_v20 }
 0x4c9   : > { %5832 = vmatpush3.bf16.msra.mxu1 %v5831_v24 }
 0x4ca   : > { %5834 = vmatprep.subr.bf16.mxu1 %v5833_v23 }
 0x54a   : > { %v1746_v30 = vpop.xlane.xlu1 %1745 }
 0x54b   : > { %v6631_v31 = vmax.f32 %v6628_v16, %v1746_v30  ;;  %v4973_v30 = vld [vmem:[%s7231_s4 + $0x70] sm:$0xff] }
 0x54c   : > { %v5837_v34 = vpack.c.bf16 %v4974_v33, %v4973_v30 }
 0x54d   : > { %v1748_v32 = vsub.f32 %v6628_v16, %v6631_v31  ;;  %1850 = vst.msk [vmem:[#allocation3 + $0x8] sm:$0xff] %vm1090_vm4, %v6631_v31  ;;  %1753 = vperm.xlu1 %6024, %v6631_v31   ;;  %v1763_v31 = vld [vmem:[#allocation4 + $0x8] sm:$0xff] }
 0x5cc   : > { %v1754_v42 = vpop.permute.xlu1 %1753 }
 0x5cd   : > { %v1756_v43 = vsub.f32 %v1738_v25, %v1754_v42 }
 0x5cf   : > { %v1757_v44 = vmul.f32 1.442695, %v1756_v43 }
 0x5d1   : > { %6027 = vpow2.f32 %v1757_v44  ;;  %v2394_v44 = vld [vmem:[#allocation2 + $0x18] sm:$0xff] }
 0x5db   : > { %v6653_v49 = vpop.eup %6027 }
 0x5dc   : > { %5458 = vmatmul.mubr.msk.f32.vlgmr.msra.gmra.mrb[10].mxu0 %vm1378_vm5, %v6653_v49 }
 0x5dd   : > { %5813 = vmatpush3.bf16.msra.mxu0 %v5810_v40  ;;  %5468 = vmatprep.mubr.msk.f32.mxu0 %vm419_vm2, %v6373_v26 }
 0x5de   : > { %5815 = vmatprep.subr.bf16.mxu0 %v5814_v48 }
 0x5e1   : > { %5817 = vmatpush3.bf16.msra.mxu0 %v5814_v48  ;;  %v4981_v48 = vld [vmem:[%s7233_s6 + $0x70] sm:$0xff] }
 0x5e2   : > { %5826 = vmatprep.subr.bf16.mxu0 %v6155_v3 }
 0x5e4   : > { %5469 = vmatmul.mubr.msk.f32.vlgmr.msra.gmra.mrb[12].mxu0 %vm419_vm2, %v6380_v28 }
 0x5e5   : > { %5486 = vmatprep.mubr.msk.f32.mxu0 %vm6156_vm0, %v6157_v6 }
 0x6af   : > { %v6664_v50 = vpop.f32.mrb[10].mxu0 }
 0x6b0   : > { %v5459_v52 = vpop.f32.mrb[11].mxu0 }
 0x6b1   : > { %v5841_v52 = vpack.c.bf16 %v4980_v47, %v4979_v45 }
 0x6b7   : > { %v5470_v56 = vpop.f32.mrb[12].mxu0 }
 0x6b8   : > { %v1936_v57 = vadd.f32 %v5470_v56, %v4956_v55  ;;  %v1930_v58 = vpop.f32.mrb[13].mxu0 }
 0x6b9   : > { %v1931_v59 = vadd.f32 %v4956_v55, %v1930_v58  ;;  %v4982_v55 = vld [vmem:[%s7233_s6 + $0x78] sm:$0xff] }
 0x6ba   : > { %v5845_v56 = vpack.c.bf16 %v4982_v55, %v4981_v48 }
 0x6bb   : > { %v5827_v60 = vpack.c.bf16 %v1936_v57, %v1931_v59 }
 0x6bd   : > { %5829 = vmatpush3.bf16.xpose.msk.msra.mxu0 %vm6404_vm3, %v5827_v60  ;;  %v6756_v60 = vld [vmem:[#allocation3 + $0x18] sm:$0xff] }
 0x6be   : > { %5842 = vmatprep.subr.bf16.mxu0 %v5841_v52 }
 0x6c4   : > { %5487 = vmatmul.mubr.msk.f32.vlgmr.msra.gmra.mrb[14].mxu0 %vm493_vm1, %v2028_v61 }
 0x6c5   : > { %5515 = vmatprep.mubr.msk.f32.mxu0 %vm419_vm2, %v6373_v26  ;;  %5844 = vmatpush3.bf16.msra.mxu0 %v5841_v52  ;;  %v6820_v52 = vld [vmem:[#allocation3 + $0x20] sm:$0xff] }
 0x6c6   : > { %5846 = vmatprep.subr.bf16.mxu0 %v5845_v56 }
 0x6c9   : > { %5848 = vmatpush3.bf16.msra.mxu0 %v5845_v56 }
 0x6ca   : > { %5853 = vmatprep.subr.bf16.mxu0 %v6155_v3 }
 0x6cc   : > { %5516 = vmatmul.mubr.msk.f32.vlgmr.msra.gmra.mrb[16].mxu0 %vm419_vm2, %v6380_v28 }
 0x6cd   : > { %5529 = vmatprep.mubr.msk.f32.mxu0 %vm6156_vm0, %v6157_v6 }
 0x797   : > { %v2104_v5 = vpop.f32.mrb[14].mxu0 }
 0x798   : > { %v5488_v7 = vpop.f32.mrb[15].mxu0  ;;  %v2110_v10 = vsel %vm1378_vm5, %v2104_v5, -inf }
 0x799   : > { %2111 = vmax.xlane.f32.xlu1 %v2110_v10 }
 0x79f   : > { %v5517_v0 = vpop.f32.mrb[16].mxu0 }
 0x7a0   : > { %v2384_v7 = vpop.f32.mrb[17].mxu0 }
 0x7a1   : > { %v2385_v10 = vadd.f32 %v4984_v1, %v2384_v7 }
 0x826   : > { %v2112_v12 = vpop.xlane.xlu1 %2111 }
 0x827   : > { %v6695_v13 = vmax.f32 %v6692_v11, %v2112_v12  ;;  %v5856_v12 = vpack.c.bf16 %v4992_v4, %v4991_v2 }
 0x829   : > { %v2114_v14 = vsub.f32 %v6692_v11, %v6695_v13  ;;  %2216 = vst.msk [vmem:[#allocation3 + $0x10] sm:$0xff] %vm1090_vm4, %v6695_v13  ;;  %2119 = vperm.xlu0 %6023, %v6695_v13  }
 0x8a8   : > { %v2120_v25 = vpop.permute.xlu0 %2119 }
 0x8a9   : > { %v2122_v27 = vsub.f32 %v2104_v5, %v2120_v25  ;;  %v2390_v5 = vadd.f32 %v5517_v0, %v4984_v1  ;;  %v5012_v0 = vld [vmem:[%s7231_s4 + $0xa8] sm:$0xff] }
 0x8ab   : > { %v2123_v29 = vmul.f32 1.442695, %v2122_v27  ;;  %v5854_v15 = vpack.c.bf16 %v2390_v5, %v2385_v10  ;;  %v4996_v27 = vld [vmem:[%s7232_s5 + $0x4] ss:$0 sm:$0xff] }
 0x8ad   : > { %6029 = vpow2.f32 %v2123_v29  ;;  %5855 = vmatpush3.bf16.msra.mxu0 %v5854_v15 }
 0x8ae   : > { %5857 = vmatprep.subr.bf16.mxu0 %v5856_v12 }
 0x8b7   : > { %v6717_v35 = vpop.eup %6029 }
 0x8b8   : > { %5494 = vmatmul.mubr.msk.f32.vlgmr.msra.gmra.mrb[22].mxu1 %vm1378_vm5, %v6717_v35 }
 0x8b9   : > { %5836 = vmatpush3.bf16.msra.mxu1 %v5833_v23  ;;  %5504 = vmatprep.mubr.msk.f32.mxu1 %vm419_vm2, %v6373_v26 }
 0x8ba   : > { %5838 = vmatprep.subr.bf16.mxu1 %v5837_v34 }
 0x8bd   : > { %5840 = vmatpush3.bf16.msra.mxu1 %v5837_v34 }
 0x8be   : > { %5849 = vmatprep.subr.bf16.mxu1 %v6155_v3 }
 0x8c0   : > { %5505 = vmatmul.mubr.msk.f32.vlgmr.msra.gmra.mrb[24].mxu1 %vm419_vm2, %v6380_v28 }
 0x8c1   : > { %5522 = vmatprep.mubr.msk.f32.mxu1 %vm6156_vm0, %v6157_v6 }
 0x98b   : > { %v6728_v36 = vpop.f32.mrb[22].mxu1 }
 0x98c   : > { %v5495_v37 = vpop.f32.mrb[23].mxu1 }
 0x993   : > { %v5506_v39 = vpop.f32.mrb[24].mxu1 }
 0x994   : > { %v2302_v40 = vadd.f32 %v5506_v39, %v4976_v38  ;;  %v2296_v41 = vpop.f32.mrb[25].mxu1  ;;  %v4999_v39 = vld [vmem:[%s7233_s6 + $0x80] sm:$0xff] }
 0x995   : > { %v2297_v42 = vadd.f32 %v4976_v38, %v2296_v41  ;;  %v2760_v38 = vld [vmem:[#allocation2 + $0x20] sm:$0xff]  ;;  %v5001_v41 = vld [vmem:[%s7233_s6 + $0x90] sm:$0xff] }
 0x997   : > { %v5850_v43 = vpack.c.bf16 %v2302_v40, %v2297_v42  ;;  %v5000_v40 = vld [vmem:[%s7233_s6 + $0x88] sm:$0xff] }
 0x998   : > { %v5864_v42 = vpack.c.bf16 %v5000_v40, %v4999_v39  ;;  %v5020_v39 = vld [vmem:[%s7233_s6 + $0xa8] sm:$0xff]  ;;  %v5021_v40 = vld [vmem:[%s7233_s6 + $0xb0] sm:$0xff] }
 0x999   : > { %5852 = vmatpush3.bf16.xpose.msk.msra.mxu1 %vm6404_vm3, %v5850_v43  ;;  %v5002_v43 = vld [vmem:[%s7233_s6 + $0x98] sm:$0xff] }
 0x99a   : > { %5865 = vmatprep.subr.bf16.mxu1 %v5864_v42 }
 0x9a0   : > { %5523 = vmatmul.mubr.msk.f32.vlgmr.msra.gmra.mrb[26].mxu1 %vm493_vm1, %v2394_v44  ;;  %v5868_v44 = vpack.c.bf16 %v5002_v43, %v5001_v41 }
 0x9a1   : > { %5551 = vmatprep.mubr.msk.f32.mxu1 %vm419_vm2, %v6373_v26  ;;  %5867 = vmatpush3.bf16.msra.mxu1 %v5864_v42  ;;  %v5022_v42 = vld [vmem:[%s7233_s6 + $0xb8] sm:$0xff] }
 0x9a2   : > { %5869 = vmatprep.subr.bf16.mxu1 %v5868_v44  ;;  %v5891_v43 = vpack.c.bf16 %v5022_v42, %v5021_v40  ;;  %v6073_v40 = vld [vmem:[%s6360_s21] sm:$0xff]  ;;  %v5040_v42 = vld [vmem:[%s7233_s6 + $0xc8] sm:$0xff] }
 0x9a5   : > { %5871 = vmatpush3.bf16.msra.mxu1 %v5868_v44 }
 0x9a6   : > { %5876 = vmatprep.subr.bf16.mxu1 %v6155_v3 }
 0x9a8   : > { %5552 = vmatmul.mubr.msk.f32.vlgmr.msra.gmra.mrb[28].mxu1 %vm419_vm2, %v6380_v28 }
 0x9a9   : > { %5565 = vmatprep.mubr.msk.f32.mxu1 %vm6156_vm0, %v6157_v6 }
 0xa73   : > { %v2470_v57 = vpop.f32.mrb[26].mxu1 }
 0xa74   : > { %v5524_v58 = vpop.f32.mrb[27].mxu1  ;;  %v2476_v59 = vsel %vm1378_vm5, %v2470_v57, -inf }
 0xa75   : > { %2477 = vmax.xlane.f32.xlu0 %v2476_v59  ;;  %v5004_v59 = vld [vmem:[%s7234_s7 + $0x4] ss:$0 sm:$0xff] }
 0xa7b   : > { %v5553_v58 = vpop.f32.mrb[28].mxu1 }
 0xa7c   : > { %v2756_v1 = vadd.f32 %v5553_v58, %v5004_v59  ;;  %v2750_v2 = vpop.f32.mrb[29].mxu1 }
 0xa7d   : > { %v2751_v4 = vadd.f32 %v5004_v59, %v2750_v2  ;;  %v5032_v2 = vld [vmem:[%s7231_s4 + $0xc8] sm:$0xff] }
 0xa7f   : > { %v5877_v7 = vpack.c.bf16 %v2756_v1, %v2751_v4  ;;  %v5031_v1 = vld [vmem:[%s7231_s4 + $0xc0] sm:$0xff] }
 0xa81   : > { %5878 = vmatpush3.bf16.msra.mxu1 %v5877_v7 }
 0xb02   : > { %v2478_v61 = vpop.xlane.xlu0 %2477 }
 0xb03   : > { %v6759_v62 = vmax.f32 %v6756_v60, %v2478_v61  ;;  %v5011_v61 = vld [vmem:[%s7231_s4 + $0xa0] sm:$0xff] }
 0xb04   : > { %v5879_v5 = vpack.c.bf16 %v5012_v0, %v5011_v61  ;;  %v5024_v0 = vld [vmem:[%s7234_s7 + $0x5] ss:$0 sm:$0xff] }
 0xb05   : > { %v2480_v63 = vsub.f32 %v6756_v60, %v6759_v62  ;;  %2582 = vst.msk [vmem:[#allocation3 + $0x18] sm:$0xff] %vm1090_vm4, %v6759_v62  ;;  %2485 = vperm.xlu1 %6024, %v6759_v62  }
 0xb06   : > { %5880 = vmatprep.subr.bf16.mxu1 %v5879_v5 }
 0xb84   : > { %v2486_v17 = vpop.permute.xlu1 %2485 }
 0xb85   : > { %v2488_v18 = vsub.f32 %v2470_v57, %v2486_v17  ;;  %v5013_v17 = vld [vmem:[%s7231_s4 + $0xb0] sm:$0xff] }
 0xb87   : > { %v2489_v19 = vmul.f32 1.442695, %v2488_v18  ;;  %v5014_v18 = vld [vmem:[%s7231_s4 + $0xb8] sm:$0xff] }
 0xb89   : > { %6031 = vpow2.f32 %v2489_v19  ;;  %v5883_v19 = vpack.c.bf16 %v5014_v18, %v5013_v17 }
 0xb93   : > { %v6781_v23 = vpop.eup %6031 }
 0xb94   : > { %5530 = vmatmul.mubr.msk.f32.vlgmr.msra.gmra.mrb[18].mxu0 %vm1378_vm5, %v6781_v23 }
 0xb95   : > { %5859 = vmatpush3.bf16.msra.mxu0 %v5856_v12  ;;  %5540 = vmatprep.mubr.msk.f32.mxu0 %vm419_vm2, %v6373_v26 }
 0xb96   : > { %5861 = vmatprep.subr.bf16.mxu0 %v5860_v22 }
 0xb99   : > { %5863 = vmatpush3.bf16.msra.mxu0 %v5860_v22 }
 0xb9a   : > { %5872 = vmatprep.subr.bf16.mxu0 %v6155_v3 }
 0xb9c   : > { %5541 = vmatmul.mubr.msk.f32.vlgmr.msra.gmra.mrb[20].mxu0 %vm419_vm2, %v6380_v28 }
 0xb9d   : > { %5558 = vmatprep.mubr.msk.f32.mxu0 %vm6156_vm0, %v6157_v6 }
 0xc67   : > { %v6792_v24 = vpop.f32.mrb[18].mxu0 }
 0xc68   : > { %v5531_v25 = vpop.f32.mrb[19].mxu0 }
 0xc69   : > { %v5016_v25 = vld [vmem:[%s7232_s5 + $0x5] ss:$0 sm:$0xff] }
 0xc6f   : > { %v5542_v29 = vpop.f32.mrb[20].mxu0 }
 0xc70   : > { %v2668_v30 = vadd.f32 %v5542_v29, %v4996_v27  ;;  %v2662_v33 = vpop.f32.mrb[21].mxu0 }
 0xc71   : > { %v2663_v34 = vadd.f32 %v4996_v27, %v2662_v33 }
 0xc73   : > { %v5873_v37 = vpack.c.bf16 %v2668_v30, %v2663_v34 }
 0xc75   : > { %5875 = vmatpush3.bf16.xpose.msk.msra.mxu0 %vm6404_vm3, %v5873_v37  ;;  %v3126_v37 = vld [vmem:[#allocation2 + $0x28] sm:$0xff] }
 0xc7c   : > { %5559 = vmatmul.mubr.msk.f32.vlgmr.msra.gmra.mrb[22].mxu0 %vm493_vm1, %v2760_v38  ;;  %v5019_v38 = vld [vmem:[%s7233_s6 + $0xa0] sm:$0xff] }
 0xc7d   : > { %5587 = vmatprep.mubr.msk.f32.mxu0 %vm419_vm2, %v6373_v26  ;;  %v5887_v41 = vpack.c.bf16 %v5020_v39, %v5019_v38 }
 0xc7f   : > { %5888 = vmatprep.subr.bf16.mxu0 %v5887_v41 }
 0xc80   : > { %5890 = vmatpush3.bf16.msra.mxu0 %v5887_v41  ;;  %v5039_v41 = vld [vmem:[%s7233_s6 + $0xc0] sm:$0xff] }
 0xc81   : > { %5892 = vmatprep.subr.bf16.mxu0 %v5891_v43 }
 0xc84   : > { %5894 = vmatpush3.bf16.msra.mxu0 %v5891_v43  ;;  %v5041_v43 = vld [vmem:[%s7233_s6 + $0xd0] sm:$0xff] }
 0xc85   : > { %5899 = vmatprep.subr.bf16.mxu0 %v6155_v3 }
 0xc87   : > { %5588 = vmatmul.mubr.msk.f32.vlgmr.msra.gmra.mrb[24].mxu0 %vm419_vm2, %v6380_v28 }
 0xc88   : > { %5601 = vmatprep.mubr.msk.f32.mxu0 %vm6156_vm0, %v6157_v6 }
 0xd4f   : > { %v2836_v45 = vpop.f32.mrb[22].mxu0 }
 0xd50   : > { %v5560_v47 = vpop.f32.mrb[23].mxu0  ;;  %v2842_v48 = vsel %vm1378_vm5, %v2836_v45, -inf }
 0xd51   : > { %2843 = vmax.xlane.f32.xlu1 %v2842_v48  ;;  %v6884_v48 = vld [vmem:[#allocation3 + $0x28] sm:$0xff] }
 0xd5a   : > { %v5589_v61 = vpop.f32.mrb[24].mxu0 }
 0xd5b   : > { %v3122_v4 = vadd.f32 %v5589_v61, %v5024_v0 }
 0xdde   : > { %v2844_v55 = vpop.xlane.xlu1 %2843 }
 0xddf   : > { %v6823_v56 = vmax.f32 %v6820_v52, %v2844_v55 }
 0xde1   : > { %v2846_v57 = vsub.f32 %v6820_v52, %v6823_v56  ;;  %2948 = vst.msk [vmem:[#allocation3 + $0x20] sm:$0xff] %vm1090_vm4, %v6823_v56  ;;  %2851 = vperm.xlu0 %6023, %v6823_v56  }
 0xe60   : > { %v2852_v10 = vpop.permute.xlu0 %2851 }
 0xe61   : > { %v2854_v12 = vsub.f32 %v2836_v45, %v2852_v10  ;;  %v5902_v10 = vpack.c.bf16 %v5032_v2, %v5031_v1  ;;  %v6948_v2 = vld [vmem:[#allocation3 + $0x30] sm:$0xff] }
 0xe63   : > { %v2855_v15 = vmul.f32 1.442695, %v2854_v12 }
 0xe65   : > { %6033 = vpow2.f32 %v2855_v15 }
 0xe6f   : > { %v6845_v20 = vpop.eup %6033 }
 0xe70   : > { %5566 = vmatmul.mubr.msk.f32.vlgmr.msra.gmra.mrb[30].mxu1 %vm1378_vm5, %v6845_v20 }
 0xe71   : > { %5882 = vmatpush3.bf16.msra.mxu1 %v5879_v5  ;;  %5576 = vmatprep.mubr.msk.f32.mxu1 %vm419_vm2, %v6373_v26  ;;  %v3116_v5 = vpop.f32.mrb[25].mxu0 }
 0xe72   : > { %5884 = vmatprep.subr.bf16.mxu1 %v5883_v19  ;;  %v3117_v7 = vadd.f32 %v5024_v0, %v3116_v5 }
 0xe74   : > { %v5900_v12 = vpack.c.bf16 %v3122_v4, %v3117_v7 }
 0xe75   : > { %5886 = vmatpush3.bf16.msra.mxu1 %v5883_v19  ;;  %v5033_v19 = vld [vmem:[%s7231_s4 + $0xd0] sm:$0xff] }
 0xe76   : > { %5895 = vmatprep.subr.bf16.mxu1 %v6155_v3  ;;  %5901 = vmatpush3.bf16.msra.mxu0 %v5900_v12  ;;  %v5044_v12 = vld [vmem:[%s7234_s7 + $0x6] ss:$0 sm:$0xff] }
 0xe77   : > { %5903 = vmatprep.subr.bf16.mxu0 %v5902_v10 }
 0xe78   : > { %5577 = vmatmul.mubr.msk.f32.vlgmr.msra.gmra.mrb[32].mxu1 %vm419_vm2, %v6380_v28 }
 0xe79   : > { %5594 = vmatprep.mubr.msk.f32.mxu1 %vm6156_vm0, %v6157_v6 }
 0xf43   : > { %v6856_v21 = vpop.f32.mrb[30].mxu1 }
 0xf44   : > { %v5567_v22 = vpop.f32.mrb[31].mxu1 }
 0xf45   : > { %v5034_v22 = vld [vmem:[%s7231_s4 + $0xd8] sm:$0xff] }
 0xf4b   : > { %v5578_v27 = vpop.f32.mrb[32].mxu1 }
 0xf4c   : > { %v3034_v29 = vadd.f32 %v5578_v27, %v5016_v25  ;;  %v3028_v30 = vpop.f32.mrb[33].mxu1 }
 0xf4d   : > { %v3029_v33 = vadd.f32 %v5016_v25, %v3028_v30  ;;  %v5906_v25 = vpack.c.bf16 %v5034_v22, %v5033_v19 }
 0xf4f   : > { %v5896_v34 = vpack.c.bf16 %v3034_v29, %v3029_v33  ;;  %v5036_v33 = vld [vmem:[%s7232_s5 + $0x6] ss:$0 sm:$0xff] }
 0xf51   : > { %5898 = vmatpush3.bf16.xpose.msk.msra.mxu1 %vm6404_vm3, %v5896_v34 }
 0xf58   : > { %5595 = vmatmul.mubr.msk.f32.vlgmr.msra.gmra.mrb[34].mxu1 %vm493_vm1, %v3126_v37 }
 0xf59   : > { %5623 = vmatprep.mubr.msk.f32.mxu1 %vm419_vm2, %v6373_v26 }
0x102b   : > { %v3202_v44 = vpop.f32.mrb[34].mxu1 }
0x102c   : > { %v5596_v45 = vpop.f32.mrb[35].mxu1  ;;  %v3208_v47 = vsel %vm1378_vm5, %v3202_v44, -inf }
0x102d   : > { %3209 = vmax.xlane.f32.xlu0 %v3208_v47  ;;  %v5042_v45 = vld [vmem:[%s7233_s6 + $0xd8] sm:$0xff] }
0x102e   : > { %v5914_v47 = vpack.c.bf16 %v5042_v45, %v5041_v43  ;;  %v5056_v43 = vld [vmem:[%s7232_s5 + $0x7] ss:$0 sm:$0xff] }
0x10ba   : > { %v3210_v55 = vpop.xlane.xlu0 %3209 }
0x10bb   : > { %v6887_v58 = vmax.f32 %v6884_v48, %v3210_v55  ;;  %v6074_v55 = vld [vmem:[%s6360_s21 + $0x8] sm:$0xff]  ;;  %s4763_s21 = scalar_lea.sflag [#allocation7], %s386_s17 }
0x10bd   : > { %v3212_v59 = vsub.f32 %v6884_v48, %v6887_v58  ;;  %3314 = vst.msk [vmem:[#allocation3 + $0x28] sm:$0xff] %vm1090_vm4, %v6887_v58  ;;  %3217 = vperm.xlu1 %6024, %v6887_v58   ;;  %v5064_v58 = vld [vmem:[%s7234_s7 + $0x7] ss:$0 sm:$0xff] }
0x10bf   : > { %v3213_v11 = vmul.f32 1.442695, %v3212_v59 }
0x113c   : > { %v3218_v15 = vpop.permute.xlu1 %3217 }
0x113d   : > { %v3220_v17 = vsub.f32 %v3202_v44, %v3218_v15  ;;  %v5910_v44 = vpack.c.bf16 %v5040_v42, %v5039_v41  ;;  %v5051_v15 = vld [vmem:[%s7231_s4 + $0xe0] sm:$0xff] }
0x113f   : > { %v3221_v18 = vmul.f32 1.442695, %v3220_v17  ;;  %5911 = vmatprep.subr.bf16.mxu1 %v5910_v44  ;;  %v5052_v17 = vld [vmem:[%s7231_s4 + $0xe8] sm:$0xff] }
0x1140   : > { %5913 = vmatpush3.bf16.msra.mxu1 %v5910_v44 }
0x1141   : > { %6035 = vpow2.f32 %v3221_v18  ;;  %5915 = vmatprep.subr.bf16.mxu1 %v5914_v47 }
0x1144   : > { %5917 = vmatpush3.bf16.msra.mxu1 %v5914_v47 }
0x1145   : > { %5922 = vmatprep.subr.bf16.mxu1 %v6155_v3 }
0x1147   : > { %5624 = vmatmul.mubr.msk.f32.vlgmr.msra.gmra.mrb[36].mxu1 %vm419_vm2, %v6074_v55 }
0x1148   : > { %5637 = vmatprep.mubr.msk.f32.mxu1 %vm6156_vm0, %v6157_v6 }
0x114b   : > { %v6909_v27 = vpop.eup %6035 }
0x114c   : > { %5602 = vmatmul.mubr.msk.f32.vlgmr.msra.gmra.mrb[26].mxu0 %vm1378_vm5, %v6909_v27 }
0x114d   : > { %5905 = vmatpush3.bf16.msra.mxu0 %v5902_v10  ;;  %5612 = vmatprep.mubr.msk.f32.mxu0 %vm419_vm2, %v6373_v26 }
0x114e   : > { %5907 = vmatprep.subr.bf16.mxu0 %v5906_v25 }
0x1151   : > { %5909 = vmatpush3.bf16.msra.mxu0 %v5906_v25  ;;  %v5925_v25 = vpack.c.bf16 %v5052_v17, %v5051_v15 }
0x1152   : > { %5918 = vmatprep.subr.bf16.mxu0 %v6155_v3 }
0x1154   : > { %5613 = vmatmul.mubr.msk.f32.vlgmr.msra.gmra.mrb[28].mxu0 %vm419_vm2, %v6380_v28  ;;  %v3492_v28 = vld [vmem:[#allocation2 + $0x30] sm:$0xff] }
0x1155   : > { %5630 = vmatprep.mubr.msk.f32.mxu0 %vm6156_vm0, %v6157_v6 }
0x121a   : > { %v5625_v10 = vpop.f32.mrb[36].mxu1 }
0x121b   : > { %v3488_v18 = vadd.f32 %v5625_v10, %v5044_v12  ;;  %v3482_v19 = vpop.f32.mrb[37].mxu1  ;;  %v5061_v10 = vld [vmem:[%s7233_s6 + $0xf0] sm:$0xff] }
0x121c   : > { %v3483_v22 = vadd.f32 %v5044_v12, %v3482_v19  ;;  %v5937_v15 = vpack.c.bf16 %v5062_v46, %v5061_v10  ;;  %v3593_v46 = vld [vmem:[#allocation4 + $0x30] sm:$0xff] }
0x121f   : > { %v6920_v29 = vpop.f32.mrb[26].mxu0 }
0x1220   : > { %v5603_v30 = vpop.f32.mrb[27].mxu0 }
0x1221   : > { %v5923_v30 = vpack.c.bf16 %v3488_v18, %v3483_v22  ;;  %v1759_v22 = vsel %vm1378_vm5, %v6653_v49, 0.0  ;;  %v1749_v49 = vmul.f32 1.442695, %v1748_v32 }
0x1223   : > { %5924 = vmatpush3.bf16.msra.mxu1 %v5923_v30  ;;  %v3223_v30 = vsel %vm1378_vm5, %v6909_v27, 0.0  ;;  %v7030_v27 = vld [vmem:[#allocation3 + $0x38] sm:$0xff] }
0x1224   : > { %5926 = vmatprep.subr.bf16.mxu1 %v5925_v25 }
0x1227   : > { %v5614_v34 = vpop.f32.mrb[28].mxu0 }
0x1228   : > { %v3400_v26 = vadd.f32 %v5614_v34, %v5036_v33  ;;  %v3394_v37 = vpop.f32.mrb[29].mxu0 }
0x1229   : > { %v3395_v38 = vadd.f32 %v5036_v33, %v3394_v37  ;;  %v5053_v37 = vld [vmem:[%s7231_s4 + $0xf0] sm:$0xff] }
0x122b   : > { %v5919_v39 = vpack.c.bf16 %v3400_v26, %v3395_v38  ;;  %v5054_v38 = vld [vmem:[%s7231_s4 + $0xf8] sm:$0xff] }
0x122d   : > { %5921 = vmatpush3.bf16.xpose.msk.msra.mxu0 %vm6404_vm3, %v5919_v39  ;;  %v5929_v39 = vpack.c.bf16 %v5054_v38, %v5053_v37  ;;  %v2495_v37 = vld [vmem:[#allocation4 + $0x18] sm:$0xff] }
0x1234   : > { %5631 = vmatmul.mubr.msk.f32.vlgmr.msra.gmra.mrb[30].mxu0 %vm493_vm1, %v3492_v28 }
0x1235   : > { %5659 = vmatprep.mubr.msk.f32.mxu0 %vm419_vm2, %v6073_v40 }
0x1307   : > { %v3568_v61 = vpop.f32.mrb[30].mxu0 }
0x1308   : > { %v5632_v0 = vpop.f32.mrb[31].mxu0  ;;  %v3574_v1 = vsel %vm1378_vm5, %v3568_v61, -inf }
0x1309   : > { %3575 = vmax.xlane.f32.xlu1 %v3574_v1  ;;  %v3858_v0 = vld [vmem:[#allocation2 + $0x38] sm:$0xff]  ;;  %v5059_v1 = vld [vmem:[%s7233_s6 + $0xe0] sm:$0xff] }
0x1396   : > { %v3576_v4 = vpop.xlane.xlu1 %3575 }
0x1397   : > { %v6951_v5 = vmax.f32 %v6948_v2, %v3576_v4  ;;  %v5060_v4 = vld [vmem:[%s7233_s6 + $0xe8] sm:$0xff] }
0x1398   : > { %v5933_v12 = vpack.c.bf16 %v5060_v4, %v5059_v1 }
0x1399   : > { %v3578_v7 = vsub.f32 %v6948_v2, %v6951_v5  ;;  %3680 = vst.msk [vmem:[#allocation3 + $0x30] sm:$0xff] %vm1090_vm4, %v6951_v5  ;;  %3583 = vperm.xlu0 %6023, %v6951_v5  }
0x139a   : > { %5934 = vmatprep.subr.bf16.mxu0 %v5933_v12 }
0x139b   : > { %5936 = vmatpush3.bf16.msra.mxu0 %v5933_v12  ;;  %v3579_v56 = vmul.f32 1.442695, %v3578_v7 }
0x139c   : > { %5938 = vmatprep.subr.bf16.mxu0 %v5937_v15 }
0x139f   : > { %5940 = vmatpush3.bf16.msra.mxu0 %v5937_v15 }
0x13a0   : > { %5945 = vmatprep.subr.bf16.mxu0 %v6155_v3 }
0x13a2   : > { %5660 = vmatmul.mubr.msk.f32.vlgmr.msra.gmra.mrb[32].mxu0 %vm419_vm2, %v6074_v55 }
0x13a3   : > { %5673 = vmatprep.mubr.msk.f32.mxu0 %vm6156_vm0, %v6157_v6 }
0x1418   : > { %v3584_v33 = vpop.permute.xlu0 %3583 }
0x1419   : > { %v3586_v34 = vsub.f32 %v3568_v61, %v3584_v33 }
0x141b   : > { %v3587_v26 = vmul.f32 1.442695, %v3586_v34 }
0x141d   : > { %6037 = vpow2.f32 %v3587_v26 }
0x141e   : > { %6039 = vpow2.f32 %v1749_v49 }
0x1427   : > { %v6038_v28 = vpop.eup %6037 }
0x1428   : > { %5638 = vmatmul.mubr.msk.f32.vlgmr.msra.gmra.mrb[38].mxu1 %vm1378_vm5, %v6038_v28  ;;  %v3589_v33 = vsel %vm1378_vm5, %v6038_v28, 0.0  ;;  %v7032_v34 = vpop.eup %6039 }
0x1429   : > { %5928 = vmatpush3.bf16.msra.mxu1 %v5925_v25  ;;  %5648 = vmatprep.mubr.msk.f32.mxu1 %vm419_vm2, %v6073_v40  ;;  %v2125_v25 = vsel %vm1378_vm5, %v6717_v35, 0.0  ;;  %v2115_v35 = vmul.f32 1.442695, %v2114_v14  ;;  %v1764_v14 = vmul.f32 %v7032_v34, %v1763_v31  ;;  %v1397_v31 = vld [vmem:[#allocation4] sm:$0xff] }
0x142a   : > { %5930 = vmatprep.subr.bf16.mxu1 %v5929_v39 }
0x142b   : > { %6041 = vpow2.f32 %v2115_v35 }
0x142d   : > { %5932 = vmatpush3.bf16.msra.mxu1 %v5929_v39 }
0x142e   : > { %5941 = vmatprep.subr.bf16.mxu1 %v6155_v3  ;;  %v2491_v3 = vsel %vm1378_vm5, %v6781_v23, 0.0  ;;  %v2481_v23 = vmul.f32 1.442695, %v2480_v63  ;;  %v2129_v63 = vld [vmem:[#allocation4 + $0x10] sm:$0xff] }
0x1430   : > { %5649 = vmatmul.mubr.msk.f32.vlgmr.msra.gmra.mrb[40].mxu1 %vm419_vm2, %v6074_v55  ;;  %v2857_v55 = vsel %vm1378_vm5, %v6845_v20, 0.0  ;;  %6043 = vpow2.f32 %v2481_v23  ;;  %v2847_v20 = vmul.f32 1.442695, %v2846_v57 }
0x1431   : > { %5666 = vmatprep.mubr.msk.f32.mxu1 %vm6156_vm0, %v6157_v6 }
0x1432   : > { %6045 = vpow2.f32 %v2847_v20 }
0x1433   : > { %6047 = vpow2.f32 %v3213_v11 }
0x1434   : > { %6049 = vpow2.f32 %v3579_v56  ;;  %v1402_v56 = vld [vmem:[#allocation5] sm:$0xff] }
0x1435   : > { %v7046_v60 = vpop.eup %6041 }
0x1436   : > { %v2130_v57 = vmul.f32 %v7046_v60, %v2129_v63 }
0x143a   : > { %v7056_v59 = vpop.eup %6043 }
0x143b   : > { %v2496_v2 = vmul.f32 %v7056_v59, %v2495_v37 }
0x143c   : > { %v7060_v7 = vpop.eup %6045 }
0x1475   : > { %v5661_v48 = vpop.f32.mrb[32].mxu0 }
0x1476   : > { %v3854_v38 = vadd.f32 %v5661_v48, %v5064_v58  ;;  %v3848_v39 = vpop.f32.mrb[33].mxu0 }
0x14fb   : > { %v6979_v41 = vpop.f32.mrb[38].mxu1 }
0x14fc   : > { %v5639_v42 = vpop.f32.mrb[39].mxu1 }
0x14fd   : > { %v3849_v42 = vadd.f32 %v5064_v58, %v3848_v39 }
0x14ff   : > { %v5946_v5 = vpack.c.bf16 %v3854_v38, %v3849_v42 }
0x1501   : > { %5947 = vmatpush3.bf16.msra.mxu0 %v5946_v5 }
0x1502   : > { %5676 = vmatprep.subr.mxu0 %v6157_v6 }
0x1503   : > { %v5650_v44 = vpop.f32.mrb[40].mxu1 }
0x1504   : > { %v3766_v45 = vadd.f32 %v5650_v44, %v5056_v43  ;;  %v3760_v47 = vpop.f32.mrb[41].mxu1  ;;  %v2861_v44 = vld [vmem:[#allocation4 + $0x20] sm:$0xff] }
0x1505   : > { %v3761_v40 = vadd.f32 %v5056_v43, %v3760_v47  ;;  %v2862_v47 = vmul.f32 %v7060_v7, %v2861_v44 }
0x1507   : > { %v5942_v61 = vpack.c.bf16 %v3766_v45, %v3761_v40  ;;  %v7065_v40 = vpop.eup %6047 }
0x1508   : > { %v7069_v10 = vpop.eup %6049 }
0x1509   : > { %5944 = vmatpush3.bf16.xpose.msk.msra.mxu1 %vm6404_vm3, %v5942_v61 }
0x1510   : > { %5667 = vmatmul.mubr.msk.f32.vlgmr.msra.gmra.mrb[42].mxu1 %vm493_vm1, %v3858_v0  ;;  %v3227_v0 = vld [vmem:[#allocation4 + $0x28] sm:$0xff] }
0x1511   : > { %v3228_v4 = vmul.f32 %v7065_v40, %v3227_v0  ;;  %v2134_v0 = vld [vmem:[#allocation5 + $0x10] sm:$0xff] }
0x15e3   : > { %v7003_v17 = vpop.f32.mrb[42].mxu1 }
0x15e4   : > { %v5668_v18 = vpop.f32.mrb[43].mxu1  ;;  %v3940_v19 = vsel %vm1378_vm5, %v7003_v17, -inf }
0x15e5   : > { %3941 = vmax.xlane.f32.xlu0 %v3940_v19  ;;  %v3594_v18 = vmul.f32 %v7069_v10, %v3593_v46 }
0x15e9   : > { %1760 = vadd.xlane.f32.xlu0 %v1759_v22 }
0x15ed   : > { %2126 = vadd.xlane.f32.xlu0 %v2125_v25  ;;  %v1394_v25 = vsel %vm1378_vm5, %v6589_v8, 0.0 }
0x15f1   : > { %2492 = vadd.xlane.f32.xlu0 %v2491_v3  ;;  %v1384_v3 = vmul.f32 1.442695, %v1383_v54 }
0x15f3   : > { %6051 = vpow2.f32 %v1384_v3 }
0x15f5   : > { %2858 = vadd.xlane.f32.xlu0 %v2857_v55 }
0x15f9   : > { %3224 = vadd.xlane.f32.xlu0 %v3223_v30 }
0x15fd   : > { %3590 = vadd.xlane.f32.xlu0 %v3589_v33  ;;  %v6052_v55 = vpop.eup %6051 }
0x15fe   : > { %v1398_v11 = vmul.f32 %v6052_v55, %v1397_v31 }
0x1672   : > { %v3942_v16 = vpop.xlane.xlu0 %3941 }
0x1673   : > { %v7035_v32 = vmax.f32 %v7030_v27, %v3942_v16 }
0x1675   : > { %v3944_v13 = vsub.f32 %v7030_v27, %v7035_v32  ;;  %4046 = vst.msk [vmem:[#allocation3 + $0x38] sm:$0xff] %vm1090_vm4, %v7035_v32  ;;  %3949 = vperm.xlu1 %6024, %v7035_v32  }
0x1676   : > { %v1761_v62 = vpop.xlane.xlu0 %1760 }
0x1677   : > { %v1765_v52 = vadd.f32 %v1764_v14, %v1761_v62 }
0x1679   : > { %1766 = vst.msk [vmem:[#allocation4 + $0x8] sm:$0xff] %vm1090_vm4, %v1765_v52 }
0x167a   : > { %v2127_v26 = vpop.xlane.xlu0 %2126 }
0x167b   : > { %v2131_v28 = vadd.f32 %v2130_v57, %v2127_v26 }
0x167d   : > { %2132 = vst.msk [vmem:[#allocation4 + $0x10] sm:$0xff] %vm1090_vm4, %v2131_v28  ;;  %v4066_v28 = vld [vmem:[%s7235_s8] sm:$0xf] }
0x167e   : > { %v2493_v43 = vpop.xlane.xlu0 %2492 }
0x167f   : > { %v2497_v45 = vadd.f32 %v2496_v2, %v2493_v43  ;;  %v3959_v2 = vld [vmem:[#allocation4 + $0x38] sm:$0xff] }
0x1680   : > { %v4145_v8 = vld [vmem:[#allocation4 + $0x8] sm:$0xff] }
0x1681   : > { %2498 = vst.msk [vmem:[#allocation4 + $0x18] sm:$0xff] %vm1090_vm4, %v2497_v45 }
0x1682   : > { %v2859_v61 = vpop.xlane.xlu0 %2858 }
0x1683   : > { %v2863_v1 = vadd.f32 %v2862_v47, %v2859_v61  ;;  %v5074_v61 = vld [vmem:[%s7235_s8 + $0x4] sm:$0xf] }
0x1684   : > { %v4233_v51 = vld [vmem:[#allocation4 + $0x10] sm:$0xff] }
0x1685   : > { %2864 = vst.msk [vmem:[#allocation4 + $0x20] sm:$0xff] %vm1090_vm4, %v2863_v1 }
0x1686   : > { %v3225_v12 = vpop.xlane.xlu0 %3224 }
0x1687   : > { %v3229_v15 = vadd.f32 %v3228_v4, %v3225_v12 }
0x1688   : > { %v4321_v53 = vld [vmem:[#allocation4 + $0x18] sm:$0xff] }
0x1689   : > { %3230 = vst.msk [vmem:[#allocation4 + $0x28] sm:$0xff] %vm1090_vm4, %v3229_v15 }
0x168a   : > { %v3591_v19 = vpop.xlane.xlu0 %3590 }
0x168b   : > { %v3595_v22 = vadd.f32 %v3594_v18, %v3591_v19 }
0x168c   : > { %v4409_v54 = vld [vmem:[#allocation4 + $0x20] sm:$0xff] }
0x168d   : > { %3596 = vst.msk [vmem:[#allocation4 + $0x30] sm:$0xff] %vm1090_vm4, %v3595_v22  ;;  %v5077_v22 = vld [vmem:[%s7235_s8 + $0x8] sm:$0xf] }
0x1690   : > { %v4497_v20 = vld [vmem:[#allocation4 + $0x28] sm:$0xff] }
0x1694   : > { %v4585_v14 = vld [vmem:[#allocation4 + $0x30] sm:$0xff] }
0x1699   : > { %1395 = vadd.xlane.f32.xlu1 %v1394_v25  ;;  %v2866_v25 = vld [vmem:[#allocation5 + $0x20] sm:$0xff] }
0x16aa   : > { %1405 = vperm.xlu1 %6024, %v6052_v55  }
0x16f4   : > { %v3950_v30 = vpop.permute.xlu1 %3949 }
0x16f5   : > { %v3952_v33 = vsub.f32 %v7003_v17, %v3950_v30  ;;  %v3232_v30 = vld [vmem:[#allocation5 + $0x28] sm:$0xff] }
0x16f7   : > { %v3953_v49 = vmul.f32 1.442695, %v3952_v33 }
0x16f9   : > { %6053 = vpow2.f32 %v3953_v49 }
0x16fa   : > { %6055 = vrcp.f32 %v4145_v8 }
0x16fb   : > { %6057 = vrcp.f32 %v4233_v51  ;;  %v5080_v51 = vld [vmem:[%s7235_s8 + $0xc] sm:$0xf] }
0x16fc   : > { %6059 = vrcp.f32 %v4321_v53  ;;  %v3598_v53 = vld [vmem:[#allocation5 + $0x30] sm:$0xff] }
0x16fd   : > { %6061 = vrcp.f32 %v4409_v54 }
0x16fe   : > { %6063 = vrcp.f32 %v4497_v20 }
0x16ff   : > { %6065 = vrcp.f32 %v4585_v14 }
0x1703   : > { %v6054_v35 = vpop.eup %6053 }
0x1704   : > { %5674 = vmatmul.mubr.msk.f32.vlgmr.msra.gmra.mrb[34].mxu0 %vm1378_vm5, %v6054_v35  ;;  %v3955_v23 = vsel %vm1378_vm5, %v6054_v35, 0.0  ;;  %v6056_v17 = vpop.eup %6055 }
0x1705   : > { %3956 = vadd.xlane.f32.xlu0 %v3955_v23  ;;  %5678 = vmatprep.mubr.msk.f32.mxu0 %vm6156_vm0, %v6157_v6  ;;  %v6058_v16 = vpop.eup %6057 }
0x1706   : > { %v6060_v62 = vpop.eup %6059  ;;  %5677 = vmatpush3.msk.msra.mxu0 %vm4070_vm6, %v4066_v28 }
0x1707   : > { %5681 = vmatprep.subr.mxu0 %v6157_v6 }
0x171b   : > { %1771 = vperm.xlu0 %6023, %v7032_v34   ;;  %v6062_v34 = vpop.eup %6061 }
0x171c   : > { %v6064_v26 = vpop.eup %6063 }
0x171d   : > { %v6066_v38 = vpop.eup %6065 }
0x171f   : > { %4150 = vperm.xlu0 %6023, %v6056_v17  }
0x1723   : > { %4238 = vperm.xlu0 %6023, %v6058_v16  }
0x1726   : > { %v1396_v63 = vpop.xlane.xlu1 %1395 }
0x1727   : > { %v1399_v52 = vadd.f32 %v1398_v11, %v1396_v63  ;;  %4326 = vperm.xlu0 %6023, %v6060_v62   ;;  %v3964_v11 = vld [vmem:[#allocation5 + $0x38] sm:$0xff]  ;;  %v5083_v62 = vld [vmem:[%s7235_s8 + $0x10] sm:$0xf] }
0x1729   : > { %1401 = vst.msk [vmem:[#allocation4] sm:$0xff] %vm1090_vm4, %v1399_v52 }
0x172a   : > { %v1406_v57 = vpop.permute.xlu1 %1405 }
0x172b   : > { %v1408_v48 = vmul.f32 %v1406_v57, %v1402_v56  ;;  %4414 = vperm.xlu0 %6023, %v6062_v34  }
0x172d   : > { %v1482_v58 = vadd.f32 %v6600_v9, %v1408_v48  ;;  %v3945_v9 = vmul.f32 1.442695, %v3944_v13 }
0x172f   : > { %1483 = vst.msk [vmem:[#allocation5] sm:$0xff] %vm493_vm1, %v1482_v58  ;;  %4502 = vperm.xlu0 %6023, %v6064_v26   ;;  %v5086_v58 = vld [vmem:[%s7235_s8 + $0x14] sm:$0xf] }
0x1730   : > { %v4057_v37 = vld [vmem:[#allocation4] sm:$0xff] }
0x1731   : > { %6067 = vrcp.f32 %v4057_v37 }
0x1732   : > { %6069 = vpow2.f32 %v3945_v9 }
0x1733   : > { %4590 = vperm.xlu0 %6023, %v6066_v38  }
0x173b   : > { %v6068_v39 = vpop.eup %6067 }
0x173c   : > { %4062 = vperm.xlu1 %6024, %v6068_v39   ;;  %v6070_v42 = vpop.eup %6069  ;;  %v5089_v39 = vld [vmem:[%s7235_s8 + $0x18] sm:$0xf] }
0x173d   : > { %v3960_v5 = vmul.f32 %v6070_v42, %v3959_v2  ;;  %v5092_v2 = vld [vmem:[%s7235_s8 + $0x1c] sm:$0xf] }
0x1740   : > { %2137 = vperm.xlu1 %6024, %v7046_v60   ;;  %v1768_v60 = vld [vmem:[#allocation5 + $0x8] sm:$0xff] }
0x1744   : > { %2503 = vperm.xlu1 %6024, %v7056_v59  }
0x1748   : > { %2869 = vperm.xlu1 %6024, %v7060_v7   ;;  %v4059_v7 = vld [vmem:[#allocation5] sm:$0xff] }
0x174c   : > { %3235 = vperm.xlu1 %6024, %v7065_v40  }
0x1750   : > { %3601 = vperm.xlu1 %6024, %v7069_v10   ;;  %v2500_v10 = vld [vmem:[#allocation5 + $0x18] sm:$0xff] }
0x1754   : > { %3967 = vperm.xlu1 %6024, %v6070_v42  }
0x1792   : > { %v3957_v43 = vpop.xlane.xlu0 %3956 }
0x1793   : > { %v3961_v44 = vadd.f32 %v3960_v5, %v3957_v43 }
0x1795   : > { %3962 = vst.msk [vmem:[#allocation4 + $0x38] sm:$0xff] %vm1090_vm4, %v3961_v44 }
0x179a   : > { %v1772_v59 = vpop.permute.xlu0 %1771 }
0x179b   : > { %v1774_v45 = vmul.f32 %v1772_v59, %v1768_v60  ;;  %v5071_v60 = vld [vmem:[%s7236_s9] ss:$0 sm:$0xff] }
0x179c   : > { %v4673_v27 = vld [vmem:[#allocation4 + $0x38] sm:$0xff] }
0x179d   : > { %v1848_v32 = vadd.f32 %v6664_v50, %v1774_v45  ;;  %6071 = vrcp.f32 %v4673_v27 }
0x179e   : > { %v4151_v46 = vpop.permute.xlu0 %4150 }
0x179f   : > { %1849 = vst.msk [vmem:[#allocation5 + $0x8] sm:$0xff] %vm493_vm1, %v1848_v32 }
0x17a2   : > { %v4239_v49 = vpop.permute.xlu0 %4238 }
0x17a6   : > { %v4147_v4 = vld [vmem:[#allocation5 + $0x8] sm:$0xff]  ;;  %v4327_v31 = vpop.permute.xlu0 %4326 }
0x17a7   : > { %v6072_v13 = vpop.eup %6071  ;;  %v4153_v18 = vmul.f32 %v4151_v46, %v4147_v4 }
0x17a8   : > { %4678 = vperm.xlu1 %6024, %v6072_v13  }
0x17aa   : > { %v4415_v57 = vpop.permute.xlu0 %4414 }
0x17ae   : > { %v4503_v37 = vpop.permute.xlu0 %4502 }
0x17b2   : > { %v4591_v9 = vpop.permute.xlu0 %4590 }
0x17bb   : > { %v4063_v47 = vpop.permute.xlu1 %4062 }
0x17bc   : > { %v4065_v40 = vmul.f32 %v4063_v47, %v4059_v7 }
0x17be   : > { %5679 = vmatmul.mubr.msk.f32.vlgmr.msra.gmra.mrb[36].mxu0 %vm493_vm1, %v4065_v40 }
0x17bf   : > { %v2138_v1 = vpop.permute.xlu1 %2137  ;;  %5682 = vmatpush3.msk.msra.mxu0 %vm4070_vm6, %v5074_v61  ;;  %5683 = vmatprep.mubr.msk.f32.mxu0 %vm6156_vm0, %v6157_v6 }
0x17c0   : > { %v2140_v50 = vmul.f32 %v2138_v1, %v2134_v0  ;;  %5686 = vmatprep.subr.mxu0 %v6157_v6 }
0x17c2   : > { %v2214_v12 = vadd.f32 %v6728_v36, %v2140_v50 }
0x17c3   : > { %v2504_v15 = vpop.permute.xlu1 %2503 }
0x17c4   : > { %2215 = vst.msk [vmem:[#allocation5 + $0x10] sm:$0xff] %vm493_vm1, %v2214_v12  ;;  %v2506_v19 = vmul.f32 %v2504_v15, %v2500_v10 }
0x17c6   : > { %v2580_v3 = vadd.f32 %v6792_v24, %v2506_v19  ;;  %5684 = vmatmul.mubr.msk.f32.vlgmr.msra.gmra.mrb[36].mxu0 %vm493_vm1, %v4153_v18 }
0x17c7   : > { %v2870_v55 = vpop.permute.xlu1 %2869  ;;  %5687 = vmatpush3.msk.msra.mxu0 %vm4070_vm6, %v5077_v22  ;;  %5688 = vmatprep.mubr.msk.f32.mxu0 %vm6156_vm0, %v6157_v6 }
0x17c8   : > { %2581 = vst.msk [vmem:[#allocation5 + $0x18] sm:$0xff] %vm493_vm1, %v2580_v3  ;;  %v2872_v36 = vmul.f32 %v2870_v55, %v2866_v25  ;;  %5691 = vmatprep.subr.mxu0 %v6157_v6 }
0x17ca   : > { %v2946_v33 = vadd.f32 %v6856_v21, %v2872_v36 }
0x17cb   : > { %v3236_v35 = vpop.permute.xlu1 %3235  ;;  %v4235_v23 = vld [vmem:[#allocation5 + $0x10] sm:$0xff] }
0x17cc   : > { %2947 = vst.msk [vmem:[#allocation5 + $0x20] sm:$0xff] %vm493_vm1, %v2946_v33  ;;  %v3238_v24 = vmul.f32 %v3236_v35, %v3232_v30  ;;  %v4241_v8 = vmul.f32 %v4239_v49, %v4235_v23 }
0x17ce   : > { %v3312_v54 = vadd.f32 %v6920_v29, %v3238_v24  ;;  %5689 = vmatmul.mubr.msk.f32.vlgmr.msra.gmra.mrb[36].mxu0 %vm493_vm1, %v4241_v8 }
0x17cf   : > { %v3602_v17 = vpop.permute.xlu1 %3601  ;;  %5692 = vmatpush3.msk.msra.mxu0 %vm4070_vm6, %v5080_v51  ;;  %5693 = vmatprep.mubr.msk.f32.mxu0 %vm6156_vm0, %v6157_v6  ;;  %v4323_v20 = vld [vmem:[#allocation5 + $0x18] sm:$0xff] }
0x17d0   : > { %3313 = vst.msk [vmem:[#allocation5 + $0x28] sm:$0xff] %vm493_vm1, %v3312_v54  ;;  %v3604_v21 = vmul.f32 %v3602_v17, %v3598_v53  ;;  %5696 = vmatprep.subr.mxu0 %v6157_v6  ;;  %v4329_v29 = vmul.f32 %v4327_v31, %v4323_v20 }
0x17d2   : > { %v3678_v16 = vadd.f32 %v6979_v41, %v3604_v21 }
0x17d3   : > { %v3968_v14 = vpop.permute.xlu1 %3967  ;;  %v4411_v34 = vld [vmem:[#allocation5 + $0x20] sm:$0xff] }
0x17d4   : > { %3679 = vst.msk [vmem:[#allocation5 + $0x30] sm:$0xff] %vm493_vm1, %v3678_v16  ;;  %v3970_v63 = vmul.f32 %v3968_v14, %v3964_v11  ;;  %v4417_v48 = vmul.f32 %v4415_v57, %v4411_v34 }
0x17d6   : > { %5694 = vmatmul.mubr.msk.f32.vlgmr.msra.gmra.mrb[36].mxu0 %vm493_vm1, %v4329_v29 }
0x17d7   : > { %v4040_v52 = vpop.f32.mrb[34].mxu0  ;;  %5697 = vmatpush3.msk.msra.mxu0 %vm4070_vm6, %v5083_v62  ;;  %5698 = vmatprep.mubr.msk.f32.mxu0 %vm6156_vm0, %v6157_v6  ;;  %v4499_v26 = vld [vmem:[#allocation5 + $0x28] sm:$0xff] }
0x17d8   : > { %v4044_v41 = vadd.f32 %v4040_v52, %v3970_v63  ;;  %v5675_v56 = vpop.f32.mrb[35].mxu0  ;;  %5701 = vmatprep.subr.mxu0 %v6157_v6  ;;  %v4505_v38 = vmul.f32 %v4503_v37, %v4499_v26 }
0x17da   : > { %4045 = vst.msk [vmem:[#allocation5 + $0x38] sm:$0xff] %vm493_vm1, %v4044_v41 }
0x17db   : > { %v4587_v28 = vld [vmem:[#allocation5 + $0x30] sm:$0xff] }
0x17dc   : > { %v4593_v42 = vmul.f32 %v4591_v9, %v4587_v28 }
0x17de   : > { %5699 = vmatmul.mubr.msk.f32.vlgmr.msra.gmra.mrb[36].mxu0 %vm493_vm1, %v4417_v48 }
0x17df   : > { %5702 = vmatpush3.msk.msra.mxu0 %vm4070_vm6, %v5086_v58  ;;  %5703 = vmatprep.mubr.msk.f32.mxu0 %vm6156_vm0, %v6157_v6 }
0x17e0   : > { %5706 = vmatprep.subr.mxu0 %v6157_v6 }
0x17e1   : > { %v4675_v5 = vld [vmem:[#allocation5 + $0x38] sm:$0xff] }
0x17e6   : > { %5704 = vmatmul.mubr.msk.f32.vlgmr.msra.gmra.mrb[36].mxu0 %vm493_vm1, %v4505_v38 }
0x17e7   : > { %5707 = vmatpush3.msk.msra.mxu0 %vm4070_vm6, %v5089_v39  ;;  %5708 = vmatprep.mubr.msk.f32.mxu0 %vm6156_vm0, %v6157_v6 }
0x17e8   : > { %5711 = vmatprep.subr.mxu0 %v6157_v6 }
0x17ee   : > { %5709 = vmatmul.mubr.msk.f32.vlgmr.msra.gmra.mrb[36].mxu0 %vm493_vm1, %v4593_v42 }
0x17ef   : > { %5712 = vmatpush3.msk.msra.mxu0 %vm4070_vm6, %v5092_v2  ;;  %5713 = vmatprep.mubr.msk.f32.mxu0 %vm6156_vm0, %v6157_v6 }
0x1827   : > { %v4679_v43 = vpop.permute.xlu1 %4678 }
0x1828   : > { %v4681_v44 = vmul.f32 %v4679_v43, %v4675_v5 }
0x182a   : > { %5714 = vmatmul.mubr.msk.f32.vlgmr.msra.gmra.mrb[36].mxu0 %vm493_vm1, %v4681_v44 }
0x18fd   : > { %v4756_v59 = vpop.f32.mrb[36].mxu0 }
0x18fe   : > { %v5948_v45 = vadd.f32 %v5071_v60, %v4756_v59  ;;  %v5715_v27 = vpop.f32.mrb[37].mxu0 }
0x1900   : > { %4761 = vst.msk [vmem:[%s388_s29] sm:$0xff] %vm419_vm2, %v5948_v45 }
0x1901   : > { %6088 = shalt.err (!%p6085_p5)
}
0x1902   : > { %s6089_s17 = scalar_lea.hbm %s7179_s12, 128  ;;  %s6093_s29 = scalar_lea.hbm %s7237_s10, 256 }
0x1903   : > { %p6090_p6 = scmp.ne.s32.totalorder %s7179_s12, %s6089_s17  ;;  %p6094_p10 = scmp.lt.u32.totalorder %s7179_s12, %s7237_s10 }
0x1904   : > { %p6095_p11 = scmp.lt.u32.totalorder %s6093_s29, %s6089_s17  ;;  %p6097_p13 = scmp.lt.u32.totalorder %s6089_s17, %s7179_s12 }
0x1905   : > { %p6091_p7 = pnand %p6090_p6, %p6256_p4 }
0x1906   : > { %p6096_p12 = por %p6095_p11, %p6094_p10 }
0x1907   : > { %p6092_p9 = pneg %p6091_p7 }
0x1908   : > { %p6098_p0 = por %p6097_p13, %p6096_p12 }
0x190a   : > { %p6099_p1 = pnand %p6098_p0, %p6092_p9 }
0x190c   : > { %6102 = shalt.err (!%p6099_p1)
}
0x190d   : > { %5963 = dma.vmem_to_hbm [thread:$0]  (%p6256_p4), %s7181_s30, 128, %s7179_s12, %s4763_s21  }
0x190e PF: > { %p5969_p2 = scmp.ge.s32.totalorder %s6153_s18, 2  ;;  %s4788_s19 = sand.u32 1, %s6133_s13  }
0x190f   : > { %s4789_s16 = scalar_lea.sflag [#allocation7], %s4788_s19 }
0x1910   : > { %p5966_p3 = pnand %p5969_p2, %p6263_p8 }
0x1912   : > { %6128 = dma.done.wait (!%p5966_p3), %s4789_s16, 128  }
0x1913   : > { %6130 = vsyncadd (!%p5966_p3), %s4789_s16, 4294967168  ;;  %s23_s18 = sadd.s32 1, %s6153_s18   ;;  %s7246_s16 = sld [smem:[#allocation9_spill]] }
0x1914   : > { %p20_p5 = scmp.ge.s32.totalorder %s23_s18, 4   ;;  %s7247_s17 = sld [smem:[#allocation10_spill]] }
0x1915   : > { %s7248_s13 = smov %s6137_s14  ;;  %s7249_s14 = smov %s6141_s15 }
0x1916   : > { %s7250_s15 = smov %s6269_s26  ;;  %22 = sbr.rel (!%p20_p5) target bundleno = 4 (0x4), region = 190 }
0x191d   :  { %4794 = vsyncpa [#allocation7], 1 }
0x191e   :  { %4796 = vsyncpa [#allocation7 + $0x1], 1 }

// kernel: tpu_custom_call.1
= control target key start
LH: loop header
LB: loop body
LE: loop exit
PB: predicated region body
PF: predicated region fallthrough
CT: control target
= control target key end

     0   :  { %15 = vsyncpa [#allocation7], 0  ;;  %s7227_s0 = inlined_call_operand.vmem [shape: f32[2,8,32], index: 0, kind: input, shape index: {}]   ;;  %s7228_s1 = inlined_call_operand.vmem [shape: f32[2,16,32], index: 1, kind: input, shape index: {}]   ;;  %s7229_s2 = inlined_call_operand.vmem [shape: f32[8,32,4], index: 2, kind: input, shape index: {}]   ;;  %s7230_s3 = inlined_call_operand.vmem [shape: f32[8,1,4], index: 3, kind: input, shape index: {}]   ;;  %s7231_s4 = inlined_call_operand.vmem [shape: f32[8,32,4], index: 4, kind: input, shape index: {}]   ;;  %s7232_s5 = inlined_call_operand.vmem [shape: f32[8,1,4], index: 5, kind: input, shape index: {}]   ;;  %s7233_s6 = inlined_call_operand.vmem [shape: f32[8,32,4], index: 6, kind: input, shape index: {}]   ;;  %s7234_s7 = inlined_call_operand.vmem [shape: f32[8,1,4], index: 7, kind: input, shape index: {}]   ;;  %s7235_s8 = inlined_call_operand.vmem [shape: f32[8,4,32], index: 8, kind: input, shape index: {}]   ;;  %s7236_s9 = inlined_call_operand.vmem [shape: f32[1,32], index: 9, kind: input, shape index: {}]   ;;  %s7237_s10 = inlined_call_operand.hbm [shape: f32[2,8,32], index: 10, kind: output, shape index: {}]  }
   0x1   :  { %17 = vsyncpa [#allocation7 + $0x1], 0  ;;  %s6216_s13 = smov 0   ;;  %s6218_s14 = smov 0  }
   0x2   :  { %s6220_s15 = smov 0   ;;  %s6222_s16 = smov 0  }
   0x3   :  { %s6224_s17 = smov 0   ;;  %s6226_s18 = smov 0  }
   0x4 LB: > { %7240 = sst [smem:[#allocation9_spill]] %s6149_s17  ;;  %s4861_s19 = sadd.s32 4294967295, %s6153_s18   ;;  %s6153_s18 = sphi %s6226_s18, %s23_s18   ;;  %s6149_s17 = sphi %s6224_s17, %s7247_s17   ;;  %s6145_s16 = sphi %s6222_s16, %s7246_s16   ;;  %s6141_s15 = sphi %s6220_s15, %s7250_s15   ;;  %s6137_s14 = sphi %s6218_s14, %s7249_s14   ;;  %s6133_s13 = sphi %s6216_s13, %s7248_s13  }
   0x5   : > { %s4862_s20 = sadd.s32 4294967294, %s6153_s18   ;;  %s35_s21 = sadd.s32 1, %s6149_s17 }
   0x6   : > { %s264_s22 = sadd.s32 1, %s6141_s15  ;;  %p37_p0 = scmp.ge.s32.totalorder %s35_s21, 2 }
   0x7   : > { %p274_p1 = scmp.ne.s32.totalorder %s6141_s15, %s6137_s14  ;;  %p275_p2 = scmp.eq.s32.totalorder %s4861_s19, 1 }
   0x8   : > { %p280_p3 = scmp.ne.s32.totalorder %s6137_s14, %s6133_s13  ;;  %s7252_s21 = smov (%p37_p0, %s35_s21), 0 }
   0x9   : > { %7241 = sst [smem:[#allocation10_spill]] %s7252_s21  ;;  %p6256_p4 = por %p275_p2, %p274_p1 }
   0xa   : > { %p281_p5 = scmp.eq.s32.totalorder %s4862_s20, 1  ;;  %s261_s24 = ssub.s32 %s6149_s17, %s7252_s21 }
   0xb   : > { %p4865_p6 = scmp.ge.s32.totalorder %s6153_s18, 1  ;;  %p262_p7 = scmp.eq.s32.totalorder %s261_s24, 0 }
   0xc   : > { %p6263_p8 = por %p281_p5, %p280_p3  ;;  %p343_p9 = scmp.lt.s32.totalorder %s6153_s18, 3 }
   0xd   : > { %s6269_s26 = scalar_select %p262_p7, %s6141_s15, %s264_s22  }
   0xe   : > { %p344_p10 = pnand %p4865_p6, %p343_p9 }
   0xf   : > { %v4893_v0 = vld [vmem:[%s7229_s2 + $0x80] sm:$0xff] (!%p344_p10)  ;;  %v4894_v1 = vld [vmem:[%s7229_s2 + $0x88] sm:$0xff] (!%p344_p10)  ;;  %v4895_v2 = vld [vmem:[%s7229_s2 + $0x90] sm:$0xff] (!%p344_p10)  ;;  %v6155_v3 = vmov (!%p344_p10), 0.0|0.0   ;;  %vm6156_vm0 = vmmov (!%p344_p10), 0   ;;  %v6157_v6 = vmov (!%p344_p10), 0.0  }
  0x10   : > { %347 = sbr.rel (%p344_p10) target bundleno = 6414 (0x190e), region = 60  ;;  %5740 = vmatprep.subr.bf16.mxu0 (!%p344_p10), %v6155_v3  ;;  %v5741_v4 = vpack.c.bf16 (!%p344_p10), %v4894_v1, %v4893_v0  ;;  %v4896_v5 = vld [vmem:[%s7229_s2 + $0x98] sm:$0xff] (!%p344_p10)  ;;  %5352 = vmatprep.mubr.msk.f32.mxu0 (!%p344_p10), %vm6156_vm0, %v6157_v6  ;;  %p389_p11 = scmp.lt.s32.totalorder (!%p344_p10), %s6145_s16, 1  ;;  %vm493_vm1 = vcmask (!%p344_p10), 31744   ;;  %v408_v8 = vld [vmem:[%s7229_s2] sm:$0xff] (!%p344_p10)  ;;  %v409_v9 = vld [vmem:[%s7229_s2 + $0x8] sm:$0xff] (!%p344_p10) }
  0x11   : > { %5716 = vmatprep.subr.bf16.mxu1 (!%p344_p10), %v6155_v3  ;;  %5308 = vmatprep.mubr.msk.f32.mxu1 (!%p344_p10), %vm6156_vm0, %v6157_v6  ;;  %1107 = vst.msk [vmem:[#allocation5] sm:$0xff] (!%p344_p10), %vm493_vm1, %v6157_v6  ;;  %1108 = vst.msk [vmem:[#allocation5 + $0x8] sm:$0xff] (!%p344_p10), %vm493_vm1, %v6157_v6  ;;  %v5744_v7 = vpack.c.bf16 (!%p344_p10), %v4896_v5, %v4895_v2  ;;  %v4907_v10 = vld [vmem:[%s7229_s2 + $0xc0] sm:$0xff] (!%p344_p10)  ;;  %v4908_v11 = vld [vmem:[%s7229_s2 + $0xc8] sm:$0xff] (!%p344_p10)  ;;  %v5717_v12 = vpack.c.bf16 (!%p344_p10), %v409_v9, %v408_v8  ;;  %vm419_vm2 = vcmask (!%p344_p10), 261120   ;;  %vm1090_vm4 = vcmask (!%p344_p10), 7168  }
  0x12   : > { %1109 = vst.msk [vmem:[#allocation5 + $0x10] sm:$0xff] (!%p344_p10), %vm493_vm1, %v6157_v6  ;;  %1110 = vst.msk [vmem:[#allocation5 + $0x18] sm:$0xff] (!%p344_p10), %vm493_vm1, %v6157_v6  ;;  %5742 = vmatpush3.bf16.msra.mxu0 (!%p344_p10), %v5741_v4  ;;  %v410_v13 = vld [vmem:[%s7229_s2 + $0x10] sm:$0xff] (!%p344_p10)  ;;  %v411_v14 = vld [vmem:[%s7229_s2 + $0x18] sm:$0xff] (!%p344_p10)  ;;  %v5753_v17 = vpack.c.bf16 (!%p344_p10), %v4908_v11, %v4907_v10  ;;  %v6158_v54 = vmov (!%p344_p10), -inf   ;;  %vm1378_vm5 = vcmask (!%p344_p10), 130048  }
  0x13   : > { %1111 = vst.msk [vmem:[#allocation5 + $0x20] sm:$0xff] (!%p344_p10), %vm493_vm1, %v6157_v6  ;;  %1112 = vst.msk [vmem:[#allocation5 + $0x28] sm:$0xff] (!%p344_p10), %vm493_vm1, %v6157_v6  ;;  %5743 = vmatprep.subr.bf16.mxu0 (!%p344_p10), %v6155_v3  ;;  %5718 = vmatpush3.bf16.msra.mxu1 (!%p344_p10), %v5717_v12  ;;  %v5720_v15 = vpack.c.bf16 (!%p344_p10), %v411_v14, %v410_v13  ;;  %v4909_v18 = vld [vmem:[%s7229_s2 + $0xd0] sm:$0xff] (!%p344_p10)  ;;  %v4910_v19 = vld [vmem:[%s7229_s2 + $0xd8] sm:$0xff] (!%p344_p10)  ;;  %vm4070_vm6 = vcmask (!%p344_p10), 1043456   ;;  %s386_s17 = sand.u32 (!%p344_p10), 1, %s6137_s14  }
  0x14   : > { %1113 = vst.msk [vmem:[#allocation5 + $0x30] sm:$0xff] (!%p344_p10), %vm493_vm1, %v6157_v6  ;;  %1114 = vst.msk [vmem:[#allocation5 + $0x38] sm:$0xff] (!%p344_p10), %vm493_vm1, %v6157_v6  ;;  %5719 = vmatprep.subr.bf16.mxu1 (!%p344_p10), %v6155_v3  ;;  %v1117_v20 = vld [vmem:[%s7231_s4] sm:$0xff] (!%p344_p10)  ;;  %v1118_v21 = vld [vmem:[%s7231_s4 + $0x8] sm:$0xff] (!%p344_p10)  ;;  %v5756_v22 = vpack.c.bf16 (!%p344_p10), %v4910_v19, %v4909_v18  ;;  %s4866_s20 = sshll.u32 (!%p344_p10), %s386_s17, 3 }
  0x15   : > { %v5764_v23 = vpack.c.bf16 (!%p344_p10), %v1118_v21, %v1117_v20  ;;  %v1119_v24 = vld [vmem:[%s7231_s4 + $0x10] sm:$0xff] (!%p344_p10)  ;;  %v1120_v25 = vld [vmem:[%s7231_s4 + $0x18] sm:$0xff] (!%p344_p10)  ;;  %v4898_v29 = vld [vmem:[%s7230_s3 + $0x4] ss:$0 sm:$0xff] (!%p344_p10)  ;;  %1091 = vst.msk [vmem:[#allocation3] sm:$0xff] (!%p344_p10), %vm1090_vm4, %v6158_v54  ;;  %s388_s29 = scalar_lea.vmem (!%p344_p10), [#allocation6], %s4866_s20 }
  0x16   : > { %5745 = vmatpush3.bf16.msra.mxu0 (!%p344_p10), %v5744_v7  ;;  %v5768_v27 = vpack.c.bf16 (!%p344_p10), %v1120_v25, %v1119_v24  ;;  %v4870_v33 = vld [vmem:[%s7230_s3] ss:$0 sm:$0xff] (!%p344_p10)  ;;  %v4912_v37 = vld [vmem:[%s7230_s3 + $0x6] ss:$0 sm:$0xff] (!%p344_p10)  ;;  %vm6404_vm3 = vmpackc.low (!%p344_p10), %vm493_vm1, %vm493_vm1  ;;  %1092 = vst.msk [vmem:[#allocation3 + $0x8] sm:$0xff] (!%p344_p10), %vm1090_vm4, %v6158_v54 }
  0x17   : > { %s6309_s22 = scalar_select %p389_p11, %s6145_s16, 1  ;;  %5752 = vmatprep.subr.bf16.mxu0 %v6155_v3  ;;  %5721 = vmatpush3.bf16.msra.mxu1 %v5720_v15  ;;  %v4921_v41 = vld [vmem:[%s7232_s5] ss:$0 sm:$0xff]  ;;  %v4873_v50 = vld [vmem:[%s7229_s2 + $0x28] sm:$0xff]  ;;  %v4874_v51 = vld [vmem:[%s7229_s2 + $0x30] sm:$0xff]  ;;  %1093 = vst.msk [vmem:[#allocation3 + $0x10] sm:$0xff] %vm1090_vm4, %v6158_v54 }
  0x18   : > { %5722 = vmatprep.subr.bf16.mxu1 %v6155_v3  ;;  %v4872_v49 = vld [vmem:[%s7229_s2 + $0x20] sm:$0xff]  ;;  %v4875_v53 = vld [vmem:[%s7229_s2 + $0x38] sm:$0xff]  ;;  %1094 = vst.msk [vmem:[#allocation3 + $0x18] sm:$0xff] %vm1090_vm4, %v6158_v54  ;;  %1095 = vst.msk [vmem:[#allocation3 + $0x20] sm:$0xff] %vm1090_vm4, %v6158_v54 }
  0x19   : > { %s4867_s24 = sshll.u32 %s6309_s22, 3  ;;  %s5099_s28 = sshll.u32 %s6309_s22, 4  ;;  %v5723_v52 = vpack.c.bf16 %v4873_v50, %v4872_v49  ;;  %1096 = vst.msk [vmem:[#allocation3 + $0x28] sm:$0xff] %vm1090_vm4, %v6158_v54  ;;  %1097 = vst.msk [vmem:[#allocation3 + $0x30] sm:$0xff] %vm1090_vm4, %v6158_v54  ;;  %v5726_v55 = vpack.c.bf16 %v4875_v53, %v4874_v51  ;;  %v4879_v56 = vld [vmem:[%s7229_s2 + $0x40] sm:$0xff]  ;;  %v4880_v57 = vld [vmem:[%s7229_s2 + $0x48] sm:$0xff] }
  0x1a   : > { %s392_s30 = scalar_lea.vmem %s7227_s0, %s4867_s24  ;;  %s6360_s21 = scalar_lea.vmem %s7228_s1, %s5099_s28  ;;  %1098 = vst.msk [vmem:[#allocation3 + $0x38] sm:$0xff] %vm1090_vm4, %v6158_v54  ;;  %1099 = vst.msk [vmem:[#allocation4] sm:$0xff] %vm1090_vm4, %v6157_v6  ;;  %v5729_v58 = vpack.c.bf16 %v4880_v57, %v4879_v56  ;;  %v4881_v59 = vld [vmem:[%s7229_s2 + $0x50] sm:$0xff]  ;;  %v4882_v60 = vld [vmem:[%s7229_s2 + $0x58] sm:$0xff] }
  0x1b   : > { %v6334_v16 = vld [vmem:[%s392_s30] sm:$0xff]  ;;  %v6380_v28 = vld [vmem:[%s6360_s21 + $0x8] sm:$0xff]  ;;  %1100 = vst.msk [vmem:[#allocation4 + $0x8] sm:$0xff] %vm1090_vm4, %v6157_v6  ;;  %1101 = vst.msk [vmem:[#allocation4 + $0x10] sm:$0xff] %vm1090_vm4, %v6157_v6  ;;  %v5732_v61 = vpack.c.bf16 %v4882_v60, %v4881_v59  ;;  %s5096_s28 = sshll.u32 %s6145_s16, 7  ;;  %s4776_s30 = sshll.u32 %s388_s29, 4  ;;  %s7181_s30 = int_to_ptr.vmem [resolvable:$true] %s4776_s30 }
  0x1c   : > { %5353 = vmatmul.mubr.msk.f32.vlgmr.msra.gmra.mrb[0].mxu0 %vm419_vm2, %v6334_v16  ;;  %5309 = vmatmul.mubr.msk.f32.vlgmr.msra.gmra.mrb[0].mxu1 %vm419_vm2, %v6334_v16  ;;  %v6373_v26 = vld [vmem:[%s6360_s21] sm:$0xff]  ;;  %1102 = vst.msk [vmem:[#allocation4 + $0x18] sm:$0xff] %vm1090_vm4, %v6157_v6  ;;  %1103 = vst.msk [vmem:[#allocation4 + $0x20] sm:$0xff] %vm1090_vm4, %v6157_v6  ;;  %v4887_v63 = vld [vmem:[%s7229_s2 + $0x68] sm:$0xff]  ;;  %s7179_s12 = scalar_lea.hbm %s7237_s10, %s5096_s28  ;;  %s6075_s19 = scalar_lea.vmem %s7181_s30, 128 }
  0x1d   : > { %5754 = vmatpush3.bf16.msra.mxu0 %v5753_v17  ;;  %5374 = vmatprep.mubr.msk.f32.mxu0 %vm6156_vm0, %v6157_v6  ;;  %1104 = vst.msk [vmem:[#allocation4 + $0x28] sm:$0xff] %vm1090_vm4, %v6157_v6  ;;  %1105 = vst.msk [vmem:[#allocation4 + $0x30] sm:$0xff] %vm1090_vm4, %v6157_v6  ;;  %v4886_v62 = vld [vmem:[%s7229_s2 + $0x60] sm:$0xff]  ;;  %v4888_v1 = vld [vmem:[%s7229_s2 + $0x70] sm:$0xff]  ;;  %p6076_p12 = scmp.ne.s32.totalorder %s7181_s30, %s6075_s19  ;;  %s6160_s16 = smov [#allocation6]  }
  0x1e   : > { %5755 = vmatprep.subr.bf16.mxu0 %v6155_v3  ;;  %5319 = vmatprep.mubr.msk.f32.mxu1 %vm6156_vm0, %v6157_v6  ;;  %1106 = vst.msk [vmem:[#allocation4 + $0x38] sm:$0xff] %vm1090_vm4, %v6157_v6  ;;  %v5735_v0 = vpack.c.bf16 %v4887_v63, %v4886_v62  ;;  %v4889_v2 = vld [vmem:[%s7229_s2 + $0x78] sm:$0xff]  ;;  %v4900_v5 = vld [vmem:[%s7229_s2 + $0xa0] sm:$0xff]  ;;  %v4901_v7 = vld [vmem:[%s7229_s2 + $0xa8] sm:$0xff]  ;;  %s6079_s20 = sshll.u32 %s6160_s16, 4  ;;  %s6080_s20 = int_to_ptr.vmem [resolvable:$false] %s6079_s20 }
  0x1f   : > { %5724 = vmatpush3.bf16.msra.mxu1 %v5723_v52  ;;  %v5738_v4 = vpack.c.bf16 %v4889_v2, %v4888_v1  ;;  %v5747_v8 = vpack.c.bf16 %v4901_v7, %v4900_v5  ;;  %v4902_v9 = vld [vmem:[%s7229_s2 + $0xb0] sm:$0xff]  ;;  %v4903_v10 = vld [vmem:[%s7229_s2 + $0xb8] sm:$0xff]  ;;  %v4914_v12 = vld [vmem:[%s7229_s2 + $0xe0] sm:$0xff]  ;;  %p6077_p13 = pnand %p6076_p12, %p6256_p4  ;;  %s6081_s24 = scalar_lea.vmem %s6080_s20, 256 }
  0x20   : > { %5725 = vmatprep.subr.bf16.mxu1 %v6155_v3  ;;  %v5750_v11 = vpack.c.bf16 %v4903_v10, %v4902_v9  ;;  %v4915_v13 = vld [vmem:[%s7229_s2 + $0xe8] sm:$0xff]  ;;  %v4916_v15 = vld [vmem:[%s7229_s2 + $0xf0] sm:$0xff]  ;;  %v4917_v17 = vld [vmem:[%s7229_s2 + $0xf8] sm:$0xff]  ;;  %p6082_p1 = scmp.lt.s32.totalorder %s7181_s30, %s6080_s20  ;;  %p6083_p2 = scmp.lt.s32.totalorder %s6081_s24, %s6075_s19 }
  0x21   : > { %5757 = vmatpush3.bf16.msra.mxu0 %v5756_v22  ;;  %v5759_v14 = vpack.c.bf16 %v4915_v13, %v4914_v12  ;;  %v1210_v18 = vld [vmem:[%s7233_s6] sm:$0xff]  ;;  %v1211_v19 = vld [vmem:[%s7233_s6 + $0x8] sm:$0xff]  ;;  %v5762_v20 = vpack.c.bf16 %v4917_v17, %v4916_v15  ;;  %v1212_v22 = vld [vmem:[%s7233_s6 + $0x10] sm:$0xff]  ;;  %p6078_p0 = pneg %p6077_p13 }
  0x22   : > { %5765 = vmatprep.subr.bf16.mxu0 %v5764_v23  ;;  %v5772_v21 = vpack.c.bf16 %v1211_v19, %v1210_v18  ;;  %v6564_v51 = vld [vmem:[#allocation3] sm:$0xff]  ;;  %v4934_v5 = vld [vmem:[%s7231_s4 + $0x38] sm:$0xff]  ;;  %p6084_p3 = por %p6083_p2, %p6082_p1 }
  0x23   : > { %5727 = vmatpush3.bf16.msra.mxu1 %v5726_v55  ;;  %v4924_v56 = vld [vmem:[%s7234_s7] ss:$0 sm:$0xff]  ;;  %v5062_v46 = vld [vmem:[%s7233_s6 + $0xf8] sm:$0xff] }
  0x24   : > { %5375 = vmatmul.mubr.msk.f32.vlgmr.msra.gmra.mrb[2].mxu0 %vm419_vm2, %v6334_v16  ;;  %5728 = vmatprep.subr.bf16.mxu1 %v6155_v3  ;;  %v4931_v57 = vld [vmem:[%s7231_s4 + $0x20] sm:$0xff]  ;;  %p6085_p5 = pnand %p6084_p3, %p6078_p0 }
  0x25   : > { %5767 = vmatpush3.bf16.msra.mxu0 %v5764_v23  ;;  %5396 = vmatprep.mubr.msk.f32.mxu0 %vm419_vm2, %v6373_v26  ;;  %v1213_v23 = vld [vmem:[%s7233_s6 + $0x18] sm:$0xff]  ;;  %v4939_v19 = vld [vmem:[%s7233_s6 + $0x20] sm:$0xff] }
  0x26   : > { %5769 = vmatprep.subr.bf16.mxu0 %v5768_v27  ;;  %5320 = vmatmul.mubr.msk.f32.vlgmr.msra.gmra.mrb[2].mxu1 %vm419_vm2, %v6334_v16  ;;  %v5776_v24 = vpack.c.bf16 %v1213_v23, %v1212_v22  ;;  %v4942_v23 = vld [vmem:[%s7233_s6 + $0x38] sm:$0xff] }
  0x27   : > { %5730 = vmatpush3.bf16.msra.mxu1 %v5729_v58  ;;  %5330 = vmatprep.mubr.msk.f32.mxu1 %vm6156_vm0, %v6157_v6  ;;  %v4932_v58 = vld [vmem:[%s7231_s4 + $0x28] sm:$0xff] }
  0x28   : > { %5731 = vmatprep.subr.bf16.mxu1 %v6155_v3  ;;  %v5787_v62 = vpack.c.bf16 %v4932_v58, %v4931_v57 }
  0x29   : > { %5771 = vmatpush3.bf16.msra.mxu0 %v5768_v27 }
  0x2a   : > { %5780 = vmatprep.subr.bf16.mxu0 %v6155_v3 }
  0x2b   : > { %5733 = vmatpush3.bf16.msra.mxu1 %v5732_v61 }
  0x2c   : > { %5397 = vmatmul.mubr.msk.f32.vlgmr.msra.gmra.mrb[4].mxu0 %vm419_vm2, %v6380_v28  ;;  %5734 = vmatprep.subr.bf16.mxu1 %v6155_v3 }
  0x2d   : > { %5414 = vmatprep.mubr.msk.f32.mxu0 %vm6156_vm0, %v6157_v6 }
  0x2e   : > { %5331 = vmatmul.mubr.msk.f32.vlgmr.msra.gmra.mrb[4].mxu1 %vm419_vm2, %v6334_v16 }
  0x2f   : > { %5736 = vmatpush3.bf16.msra.mxu1 %v5735_v0  ;;  %5341 = vmatprep.mubr.msk.f32.mxu1 %vm6156_vm0, %v6157_v6 }
  0x30   : > { %5737 = vmatprep.subr.bf16.mxu1 %v6155_v3 }
  0x33   : > { %5739 = vmatpush3.bf16.msra.mxu1 %v5738_v4  ;;  %v4933_v4 = vld [vmem:[%s7231_s4 + $0x30] sm:$0xff] }
  0x34   : > { %5746 = vmatprep.subr.bf16.mxu1 %v6155_v3  ;;  %v5791_v7 = vpack.c.bf16 %v4934_v5, %v4933_v4 }
  0x36   : > { %5342 = vmatmul.mubr.msk.f32.vlgmr.msra.gmra.mrb[6].mxu1 %vm419_vm2, %v6334_v16 }
  0x37   : > { %5748 = vmatpush3.bf16.msra.mxu1 %v5747_v8  ;;  %5363 = vmatprep.mubr.msk.f32.mxu1 %vm6156_vm0, %v6157_v6 }
  0x38   : > { %5749 = vmatprep.subr.bf16.mxu1 %v6155_v3 }
  0x3b   : > { %5751 = vmatpush3.bf16.msra.mxu1 %v5750_v11  ;;  %v4936_v11 = vld [vmem:[%s7232_s5 + $0x1] ss:$0 sm:$0xff] }
  0x3c   : > { %5758 = vmatprep.subr.bf16.mxu1 %v6155_v3 }
  0x3e   : > { %5364 = vmatmul.mubr.msk.f32.vlgmr.msra.gmra.mrb[8].mxu1 %vm419_vm2, %v6334_v16 }
  0x3f   : > { %5760 = vmatpush3.bf16.msra.mxu1 %v5759_v14  ;;  %5385 = vmatprep.mubr.msk.f32.mxu1 %vm6156_vm0, %v6157_v6 }
  0x40   : > { %5761 = vmatprep.subr.bf16.mxu1 %v6155_v3 }
  0x43   : > { %5763 = vmatpush3.bf16.msra.mxu1 %v5762_v20  ;;  %v4940_v20 = vld [vmem:[%s7233_s6 + $0x28] sm:$0xff] }
  0x44   : > { %5773 = vmatprep.subr.bf16.mxu1 %v5772_v21  ;;  %v5795_v22 = vpack.c.bf16 %v4940_v20, %v4939_v19  ;;  %v4972_v19 = vld [vmem:[%s7231_s4 + $0x68] sm:$0xff] }
  0x46   : > { %5386 = vmatmul.mubr.msk.f32.vlgmr.msra.gmra.mrb[10].mxu1 %vm419_vm2, %v6334_v16  ;;  %v6159_v16 = vmov 0  }
  0x47   : > { %5775 = vmatpush3.bf16.msra.mxu1 %v5772_v21  ;;  %5407 = vmatprep.mubr.msk.f32.mxu1 %vm419_vm2, %v6373_v26  ;;  %v4941_v21 = vld [vmem:[%s7233_s6 + $0x30] sm:$0xff] }
  0x48   : > { %5777 = vmatprep.subr.bf16.mxu1 %v5776_v24  ;;  %6023 = vset.pattern.permute.xlu0 %v6159_v16 }
  0x49   : > { %6024 = vset.pattern.permute.xlu1 %v6159_v16  ;;  %v6628_v16 = vld [vmem:[#allocation3 + $0x8] sm:$0xff] }
  0x4b   : > { %5779 = vmatpush3.bf16.msra.mxu1 %v5776_v24  ;;  %v5799_v24 = vpack.c.bf16 %v4942_v23, %v4941_v21 }
  0x4c   : > { %5784 = vmatprep.subr.bf16.mxu1 %v6155_v3 }
  0x4e   : > { %5408 = vmatmul.mubr.msk.f32.vlgmr.msra.gmra.mrb[12].mxu1 %vm419_vm2, %v6380_v28 }
  0x4f   : > { %5421 = vmatprep.mubr.msk.f32.mxu1 %vm6156_vm0, %v6157_v6 }
  0xef   : > { %v829_v30 = vpop.f32.mrb[0].mxu0  ;;  %v489_v34 = vpop.f32.mrb[0].mxu1 }
  0xf0   : > { %v830_v31 = vadd.f32 %v4898_v29, %v829_v30  ;;  %v5354_v32 = vpop.f32.mrb[1].mxu0  ;;  %v490_v35 = vadd.f32 %v4870_v33, %v489_v34  ;;  %v5310_v36 = vpop.f32.mrb[1].mxu1  ;;  %v4877_v30 = vld [vmem:[%s7230_s3 + $0x1] ss:$0 sm:$0xff]  ;;  %v4884_v34 = vld [vmem:[%s7230_s3 + $0x2] ss:$0 sm:$0xff] }
  0xf2   : > { %834 = vst.msk [vmem:[#allocation2 + $0x20] sm:$0xff] %vm493_vm1, %v830_v31  ;;  %494 = vst.msk [vmem:[#allocation2] sm:$0xff] %vm493_vm1, %v490_v35 }
  0xf7   : > { %v999_v38 = vpop.f32.mrb[2].mxu0 }
  0xf8   : > { %v1000_v39 = vadd.f32 %v4912_v37, %v999_v38  ;;  %v5376_v40 = vpop.f32.mrb[3].mxu0  ;;  %v4891_v38 = vld [vmem:[%s7230_s3 + $0x3] ss:$0 sm:$0xff] }
  0xf9   : > { %v1296_v48 = vld [vmem:[#allocation2] sm:$0xff]  ;;  %v574_v31 = vpop.f32.mrb[2].mxu1 }
  0xfa   : > { %1004 = vst.msk [vmem:[#allocation2 + $0x30] sm:$0xff] %vm493_vm1, %v1000_v39  ;;  %v575_v32 = vadd.f32 %v4877_v30, %v574_v31  ;;  %v5321_v33 = vpop.f32.mrb[3].mxu1 }
  0xfc   : > { %579 = vst.msk [vmem:[#allocation2 + $0x8] sm:$0xff] %vm493_vm1, %v575_v32 }
  0xff   : > { %v5398_v42 = vpop.f32.mrb[4].mxu0 }
 0x100   : > { %v1207_v43 = vadd.f32 %v5398_v42, %v4921_v41  ;;  %v1201_v44 = vpop.f32.mrb[5].mxu0  ;;  %v4905_v42 = vld [vmem:[%s7230_s3 + $0x5] ss:$0 sm:$0xff] }
 0x101   : > { %v1202_v45 = vadd.f32 %v4921_v41, %v1201_v44  ;;  %v659_v35 = vpop.f32.mrb[4].mxu1 }
 0x102   : > { %v660_v36 = vadd.f32 %v4884_v34, %v659_v35  ;;  %v5332_v37 = vpop.f32.mrb[5].mxu1  ;;  %v4944_v34 = vld [vmem:[%s7234_s7 + $0x1] ss:$0 sm:$0xff] }
 0x103   : > { %v5781_v47 = vpack.c.bf16 %v1207_v43, %v1202_v45  ;;  %v1662_v18 = vld [vmem:[#allocation2 + $0x8] sm:$0xff]  ;;  %v4951_v35 = vld [vmem:[%s7231_s4 + $0x40] sm:$0xff] }
 0x104   : > { %664 = vst.msk [vmem:[#allocation2 + $0x10] sm:$0xff] %vm493_vm1, %v660_v36  ;;  %v4952_v36 = vld [vmem:[%s7231_s4 + $0x48] sm:$0xff] }
 0x105   : > { %5783 = vmatpush3.bf16.xpose.msk.msra.mxu0 %vm6404_vm3, %v5781_v47  ;;  %v4919_v47 = vld [vmem:[%s7230_s3 + $0x7] ss:$0 sm:$0xff] }
 0x106   : > { %5796 = vmatprep.subr.bf16.mxu0 %v5795_v22 }
 0x109   : > { %v744_v39 = vpop.f32.mrb[6].mxu1 }
 0x10a   : > { %v745_v40 = vadd.f32 %v4891_v38, %v744_v39  ;;  %v5343_v41 = vpop.f32.mrb[7].mxu1 }
 0x10c   : > { %5415 = vmatmul.mubr.msk.f32.vlgmr.msra.gmra.mrb[6].mxu0 %vm493_vm1, %v1296_v48  ;;  %749 = vst.msk [vmem:[#allocation2 + $0x18] sm:$0xff] %vm493_vm1, %v745_v40  ;;  %v5810_v40 = vpack.c.bf16 %v4952_v36, %v4951_v35 }
 0x10d   : > { %5443 = vmatprep.mubr.msk.f32.mxu0 %vm419_vm2, %v6373_v26  ;;  %5798 = vmatpush3.bf16.msra.mxu0 %v5795_v22 }
 0x10e   : > { %5800 = vmatprep.subr.bf16.mxu0 %v5799_v24 }
 0x111   : > { %v914_v43 = vpop.f32.mrb[8].mxu1  ;;  %5802 = vmatpush3.bf16.msra.mxu0 %v5799_v24 }
 0x112   : > { %v915_v44 = vadd.f32 %v4905_v42, %v914_v43  ;;  %v5365_v45 = vpop.f32.mrb[9].mxu1  ;;  %5807 = vmatprep.subr.bf16.mxu0 %v6155_v3 }
 0x113   : > { %v4953_v45 = vld [vmem:[%s7231_s4 + $0x50] sm:$0xff] }
 0x114   : > { %919 = vst.msk [vmem:[#allocation2 + $0x28] sm:$0xff] %vm493_vm1, %v915_v44  ;;  %5444 = vmatmul.mubr.msk.f32.vlgmr.msra.gmra.mrb[8].mxu0 %vm419_vm2, %v6380_v28 }
 0x115   : > { %5457 = vmatprep.mubr.msk.f32.mxu0 %vm6156_vm0, %v6157_v6 }
 0x119   : > { %v1084_v48 = vpop.f32.mrb[10].mxu1 }
 0x11a   : > { %v1085_v49 = vadd.f32 %v4919_v47, %v1084_v48  ;;  %v5387_v50 = vpop.f32.mrb[11].mxu1  ;;  %v4954_v47 = vld [vmem:[%s7231_s4 + $0x58] sm:$0xff] }
 0x11b   : > { %v5814_v48 = vpack.c.bf16 %v4954_v47, %v4953_v45  ;;  %v4979_v45 = vld [vmem:[%s7233_s6 + $0x60] sm:$0xff]  ;;  %v4980_v47 = vld [vmem:[%s7233_s6 + $0x68] sm:$0xff] }
 0x11c   : > { %1089 = vst.msk [vmem:[#allocation2 + $0x38] sm:$0xff] %vm493_vm1, %v1085_v49 }
 0x121   : > { %v5409_v55 = vpop.f32.mrb[12].mxu1 }
 0x122   : > { %v1293_v59 = vadd.f32 %v5409_v55, %v4924_v56  ;;  %v1287_v60 = vpop.f32.mrb[13].mxu1  ;;  %v4956_v55 = vld [vmem:[%s7232_s5 + $0x2] ss:$0 sm:$0xff] }
 0x123   : > { %v1288_v61 = vadd.f32 %v4924_v56, %v1287_v60 }
 0x125   : > { %v5785_v63 = vpack.c.bf16 %v1293_v59, %v1288_v61  ;;  %v2028_v61 = vld [vmem:[#allocation2 + $0x10] sm:$0xff] }
 0x127   : > { %5786 = vmatpush3.bf16.msra.mxu1 %v5785_v63  ;;  %v4960_v63 = vld [vmem:[%s7233_s6 + $0x48] sm:$0xff] }
 0x128   : > { %5788 = vmatprep.subr.bf16.mxu1 %v5787_v62 }
 0x1df   : > { %v1373_v25 = vpop.f32.mrb[6].mxu0 }
 0x1e0   : > { %v5416_v27 = vpop.f32.mrb[7].mxu0  ;;  %v1379_v29 = vsel %vm1378_vm5, %v1373_v25, -inf }
 0x1e1   : > { %1380 = vmax.xlane.f32.xlu0 %v1379_v29 }
 0x1e7   : > { %v5445_v33 = vpop.f32.mrb[8].mxu0 }
 0x1e8   : > { %v1658_v37 = vadd.f32 %v5445_v33, %v4944_v34  ;;  %v1652_v38 = vpop.f32.mrb[9].mxu0  ;;  %v4974_v33 = vld [vmem:[%s7231_s4 + $0x78] sm:$0xff] }
 0x1e9   : > { %v1653_v39 = vadd.f32 %v4944_v34, %v1652_v38  ;;  %v4976_v38 = vld [vmem:[%s7232_s5 + $0x3] ss:$0 sm:$0xff] }
 0x1eb   : > { %v5808_v41 = vpack.c.bf16 %v1658_v37, %v1653_v39 }
 0x1ed   : > { %5809 = vmatpush3.bf16.msra.mxu0 %v5808_v41 }
 0x1ee   : > { %5811 = vmatprep.subr.bf16.mxu0 %v5810_v40 }
 0x26e   : > { %v1381_v52 = vpop.xlane.xlu0 %1380 }
 0x26f   : > { %v6567_v53 = vmax.f32 %v6564_v51, %v1381_v52 }
 0x271   : > { %v1383_v54 = vsub.f32 %v6564_v51, %v6567_v53  ;;  %1484 = vst.msk [vmem:[#allocation3] sm:$0xff] %vm1090_vm4, %v6567_v53  ;;  %1388 = vperm.xlu0 %6023, %v6567_v53  }
 0x2f0   : > { %v1389_v0 = vpop.permute.xlu0 %1388 }
 0x2f1   : > { %v1391_v1 = vsub.f32 %v1373_v25, %v1389_v0  ;;  %v4961_v0 = vld [vmem:[%s7233_s6 + $0x50] sm:$0xff] }
 0x2f3   : > { %v1392_v2 = vmul.f32 1.442695, %v1391_v1 }
 0x2f5   : > { %6025 = vpow2.f32 %v1392_v2  ;;  %v4962_v2 = vld [vmem:[%s7233_s6 + $0x58] sm:$0xff] }
 0x2f6   : > { %v5822_v4 = vpack.c.bf16 %v4962_v2, %v4961_v0  ;;  %v4991_v2 = vld [vmem:[%s7231_s4 + $0x80] sm:$0xff] }
 0x2ff   : > { %v6589_v8 = vpop.eup %6025 }
 0x300   : > { %5422 = vmatmul.mubr.msk.f32.vlgmr.msra.gmra.mrb[14].mxu1 %vm1378_vm5, %v6589_v8 }
 0x301   : > { %5790 = vmatpush3.bf16.msra.mxu1 %v5787_v62  ;;  %5432 = vmatprep.mubr.msk.f32.mxu1 %vm419_vm2, %v6373_v26  ;;  %v4959_v62 = vld [vmem:[%s7233_s6 + $0x40] sm:$0xff] }
 0x302   : > { %5792 = vmatprep.subr.bf16.mxu1 %v5791_v7  ;;  %v5818_v1 = vpack.c.bf16 %v4960_v63, %v4959_v62 }
 0x305   : > { %5794 = vmatpush3.bf16.msra.mxu1 %v5791_v7 }
 0x306   : > { %5803 = vmatprep.subr.bf16.mxu1 %v6155_v3 }
 0x308   : > { %5433 = vmatmul.mubr.msk.f32.vlgmr.msra.gmra.mrb[16].mxu1 %vm419_vm2, %v6380_v28 }
 0x309   : > { %5450 = vmatprep.mubr.msk.f32.mxu1 %vm6156_vm0, %v6157_v6 }
 0x3d3   : > { %v6600_v9 = vpop.f32.mrb[14].mxu1 }
 0x3d4   : > { %v5423_v10 = vpop.f32.mrb[15].mxu1 }
 0x3db   : > { %v5434_v12 = vpop.f32.mrb[16].mxu1 }
 0x3dc   : > { %v1570_v13 = vadd.f32 %v5434_v12, %v4936_v11  ;;  %v1564_v14 = vpop.f32.mrb[17].mxu1 }
 0x3dd   : > { %v1565_v15 = vadd.f32 %v4936_v11, %v1564_v14  ;;  %v6692_v11 = vld [vmem:[#allocation3 + $0x10] sm:$0xff] }
 0x3df   : > { %v5804_v17 = vpack.c.bf16 %v1570_v13, %v1565_v15 }
 0x3e1   : > { %5806 = vmatpush3.bf16.xpose.msk.msra.mxu1 %vm6404_vm3, %v5804_v17  ;;  %v4964_v17 = vld [vmem:[%s7234_s7 + $0x2] ss:$0 sm:$0xff] }
 0x3e2   : > { %5819 = vmatprep.subr.bf16.mxu1 %v5818_v1 }
 0x3e8   : > { %5451 = vmatmul.mubr.msk.f32.vlgmr.msra.gmra.mrb[18].mxu1 %vm493_vm1, %v1662_v18  ;;  %v4971_v18 = vld [vmem:[%s7231_s4 + $0x60] sm:$0xff] }
 0x3e9   : > { %5479 = vmatprep.mubr.msk.f32.mxu1 %vm419_vm2, %v6373_v26  ;;  %5821 = vmatpush3.bf16.msra.mxu1 %v5818_v1  ;;  %v5833_v23 = vpack.c.bf16 %v4972_v19, %v4971_v18  ;;  %v4984_v1 = vld [vmem:[%s7234_s7 + $0x3] ss:$0 sm:$0xff] }
 0x3ea   : > { %5823 = vmatprep.subr.bf16.mxu1 %v5822_v4 }
 0x3ed   : > { %5825 = vmatpush3.bf16.msra.mxu1 %v5822_v4  ;;  %v4992_v4 = vld [vmem:[%s7231_s4 + $0x88] sm:$0xff] }
 0x3ee   : > { %5830 = vmatprep.subr.bf16.mxu1 %v6155_v3 }
 0x3f0   : > { %5480 = vmatmul.mubr.msk.f32.vlgmr.msra.gmra.mrb[20].mxu1 %vm419_vm2, %v6380_v28 }
 0x3f1   : > { %5493 = vmatprep.mubr.msk.f32.mxu1 %vm6156_vm0, %v6157_v6 }
 0x4bb   : > { %v1738_v25 = vpop.f32.mrb[18].mxu1 }
 0x4bc   : > { %v5452_v27 = vpop.f32.mrb[19].mxu1  ;;  %v1744_v29 = vsel %vm1378_vm5, %v1738_v25, -inf }
 0x4bd   : > { %1745 = vmax.xlane.f32.xlu1 %v1744_v29 }
 0x4c3   : > { %v5481_v15 = vpop.f32.mrb[20].mxu1 }
 0x4c4   : > { %v2024_v20 = vadd.f32 %v5481_v15, %v4964_v17  ;;  %v2018_v21 = vpop.f32.mrb[21].mxu1 }
 0x4c5   : > { %v2019_v22 = vadd.f32 %v4964_v17, %v2018_v21  ;;  %v4994_v21 = vld [vmem:[%s7231_s4 + $0x98] sm:$0xff] }
 0x4c7   : > { %v5831_v24 = vpack.c.bf16 %v2024_v20, %v2019_v22  ;;  %v4993_v20 = vld [vmem:[%s7231_s4 + $0x90] sm:$0xff] }
 0x4c8   : > { %v5860_v22 = vpack.c.bf16 %v4994_v21, %v4993_v20 }
 0x4c9   : > { %5832 = vmatpush3.bf16.msra.mxu1 %v5831_v24 }
 0x4ca   : > { %5834 = vmatprep.subr.bf16.mxu1 %v5833_v23 }
 0x54a   : > { %v1746_v30 = vpop.xlane.xlu1 %1745 }
 0x54b   : > { %v6631_v31 = vmax.f32 %v6628_v16, %v1746_v30  ;;  %v4973_v30 = vld [vmem:[%s7231_s4 + $0x70] sm:$0xff] }
 0x54c   : > { %v5837_v34 = vpack.c.bf16 %v4974_v33, %v4973_v30 }
 0x54d   : > { %v1748_v32 = vsub.f32 %v6628_v16, %v6631_v31  ;;  %1850 = vst.msk [vmem:[#allocation3 + $0x8] sm:$0xff] %vm1090_vm4, %v6631_v31  ;;  %1753 = vperm.xlu1 %6024, %v6631_v31   ;;  %v1763_v31 = vld [vmem:[#allocation4 + $0x8] sm:$0xff] }
 0x5cc   : > { %v1754_v42 = vpop.permute.xlu1 %1753 }
 0x5cd   : > { %v1756_v43 = vsub.f32 %v1738_v25, %v1754_v42 }
 0x5cf   : > { %v1757_v44 = vmul.f32 1.442695, %v1756_v43 }
 0x5d1   : > { %6027 = vpow2.f32 %v1757_v44  ;;  %v2394_v44 = vld [vmem:[#allocation2 + $0x18] sm:$0xff] }
 0x5db   : > { %v6653_v49 = vpop.eup %6027 }
 0x5dc   : > { %5458 = vmatmul.mubr.msk.f32.vlgmr.msra.gmra.mrb[10].mxu0 %vm1378_vm5, %v6653_v49 }
 0x5dd   : > { %5813 = vmatpush3.bf16.msra.mxu0 %v5810_v40  ;;  %5468 = vmatprep.mubr.msk.f32.mxu0 %vm419_vm2, %v6373_v26 }
 0x5de   : > { %5815 = vmatprep.subr.bf16.mxu0 %v5814_v48 }
 0x5e1   : > { %5817 = vmatpush3.bf16.msra.mxu0 %v5814_v48  ;;  %v4981_v48 = vld [vmem:[%s7233_s6 + $0x70] sm:$0xff] }
 0x5e2   : > { %5826 = vmatprep.subr.bf16.mxu0 %v6155_v3 }
 0x5e4   : > { %5469 = vmatmul.mubr.msk.f32.vlgmr.msra.gmra.mrb[12].mxu0 %vm419_vm2, %v6380_v28 }
 0x5e5   : > { %5486 = vmatprep.mubr.msk.f32.mxu0 %vm6156_vm0, %v6157_v6 }
 0x6af   : > { %v6664_v50 = vpop.f32.mrb[10].mxu0 }
 0x6b0   : > { %v5459_v52 = vpop.f32.mrb[11].mxu0 }
 0x6b1   : > { %v5841_v52 = vpack.c.bf16 %v4980_v47, %v4979_v45 }
 0x6b7   : > { %v5470_v56 = vpop.f32.mrb[12].mxu0 }
 0x6b8   : > { %v1936_v57 = vadd.f32 %v5470_v56, %v4956_v55  ;;  %v1930_v58 = vpop.f32.mrb[13].mxu0 }
 0x6b9   : > { %v1931_v59 = vadd.f32 %v4956_v55, %v1930_v58  ;;  %v4982_v55 = vld [vmem:[%s7233_s6 + $0x78] sm:$0xff] }
 0x6ba   : > { %v5845_v56 = vpack.c.bf16 %v4982_v55, %v4981_v48 }
 0x6bb   : > { %v5827_v60 = vpack.c.bf16 %v1936_v57, %v1931_v59 }
 0x6bd   : > { %5829 = vmatpush3.bf16.xpose.msk.msra.mxu0 %vm6404_vm3, %v5827_v60  ;;  %v6756_v60 = vld [vmem:[#allocation3 + $0x18] sm:$0xff] }
 0x6be   : > { %5842 = vmatprep.subr.bf16.mxu0 %v5841_v52 }
 0x6c4   : > { %5487 = vmatmul.mubr.msk.f32.vlgmr.msra.gmra.mrb[14].mxu0 %vm493_vm1, %v2028_v61 }
 0x6c5   : > { %5515 = vmatprep.mubr.msk.f32.mxu0 %vm419_vm2, %v6373_v26  ;;  %5844 = vmatpush3.bf16.msra.mxu0 %v5841_v52  ;;  %v6820_v52 = vld [vmem:[#allocation3 + $0x20] sm:$0xff] }
 0x6c6   : > { %5846 = vmatprep.subr.bf16.mxu0 %v5845_v56 }
 0x6c9   : > { %5848 = vmatpush3.bf16.msra.mxu0 %v5845_v56 }
 0x6ca   : > { %5853 = vmatprep.subr.bf16.mxu0 %v6155_v3 }
 0x6cc   : > { %5516 = vmatmul.mubr.msk.f32.vlgmr.msra.gmra.mrb[16].mxu0 %vm419_vm2, %v6380_v28 }
 0x6cd   : > { %5529 = vmatprep.mubr.msk.f32.mxu0 %vm6156_vm0, %v6157_v6 }
 0x797   : > { %v2104_v5 = vpop.f32.mrb[14].mxu0 }
 0x798   : > { %v5488_v7 = vpop.f32.mrb[15].mxu0  ;;  %v2110_v10 = vsel %vm1378_vm5, %v2104_v5, -inf }
 0x799   : > { %2111 = vmax.xlane.f32.xlu1 %v2110_v10 }
 0x79f   : > { %v5517_v0 = vpop.f32.mrb[16].mxu0 }
 0x7a0   : > { %v2384_v7 = vpop.f32.mrb[17].mxu0 }
 0x7a1   : > { %v2385_v10 = vadd.f32 %v4984_v1, %v2384_v7 }
 0x826   : > { %v2112_v12 = vpop.xlane.xlu1 %2111 }
 0x827   : > { %v6695_v13 = vmax.f32 %v6692_v11, %v2112_v12  ;;  %v5856_v12 = vpack.c.bf16 %v4992_v4, %v4991_v2 }
 0x829   : > { %v2114_v14 = vsub.f32 %v6692_v11, %v6695_v13  ;;  %2216 = vst.msk [vmem:[#allocation3 + $0x10] sm:$0xff] %vm1090_vm4, %v6695_v13  ;;  %2119 = vperm.xlu0 %6023, %v6695_v13  }
 0x8a8   : > { %v2120_v25 = vpop.permute.xlu0 %2119 }
 0x8a9   : > { %v2122_v27 = vsub.f32 %v2104_v5, %v2120_v25  ;;  %v2390_v5 = vadd.f32 %v5517_v0, %v4984_v1  ;;  %v5012_v0 = vld [vmem:[%s7231_s4 + $0xa8] sm:$0xff] }
 0x8ab   : > { %v2123_v29 = vmul.f32 1.442695, %v2122_v27  ;;  %v5854_v15 = vpack.c.bf16 %v2390_v5, %v2385_v10  ;;  %v4996_v27 = vld [vmem:[%s7232_s5 + $0x4] ss:$0 sm:$0xff] }
 0x8ad   : > { %6029 = vpow2.f32 %v2123_v29  ;;  %5855 = vmatpush3.bf16.msra.mxu0 %v5854_v15 }
 0x8ae   : > { %5857 = vmatprep.subr.bf16.mxu0 %v5856_v12 }
 0x8b7   : > { %v6717_v35 = vpop.eup %6029 }
 0x8b8   : > { %5494 = vmatmul.mubr.msk.f32.vlgmr.msra.gmra.mrb[22].mxu1 %vm1378_vm5, %v6717_v35 }
 0x8b9   : > { %5836 = vmatpush3.bf16.msra.mxu1 %v5833_v23  ;;  %5504 = vmatprep.mubr.msk.f32.mxu1 %vm419_vm2, %v6373_v26 }
 0x8ba   : > { %5838 = vmatprep.subr.bf16.mxu1 %v5837_v34 }
 0x8bd   : > { %5840 = vmatpush3.bf16.msra.mxu1 %v5837_v34 }
 0x8be   : > { %5849 = vmatprep.subr.bf16.mxu1 %v6155_v3 }
 0x8c0   : > { %5505 = vmatmul.mubr.msk.f32.vlgmr.msra.gmra.mrb[24].mxu1 %vm419_vm2, %v6380_v28 }
 0x8c1   : > { %5522 = vmatprep.mubr.msk.f32.mxu1 %vm6156_vm0, %v6157_v6 }
 0x98b   : > { %v6728_v36 = vpop.f32.mrb[22].mxu1 }
 0x98c   : > { %v5495_v37 = vpop.f32.mrb[23].mxu1 }
 0x993   : > { %v5506_v39 = vpop.f32.mrb[24].mxu1 }
 0x994   : > { %v2302_v40 = vadd.f32 %v5506_v39, %v4976_v38  ;;  %v2296_v41 = vpop.f32.mrb[25].mxu1  ;;  %v4999_v39 = vld [vmem:[%s7233_s6 + $0x80] sm:$0xff] }
 0x995   : > { %v2297_v42 = vadd.f32 %v4976_v38, %v2296_v41  ;;  %v2760_v38 = vld [vmem:[#allocation2 + $0x20] sm:$0xff]  ;;  %v5001_v41 = vld [vmem:[%s7233_s6 + $0x90] sm:$0xff] }
 0x997   : > { %v5850_v43 = vpack.c.bf16 %v2302_v40, %v2297_v42  ;;  %v5000_v40 = vld [vmem:[%s7233_s6 + $0x88] sm:$0xff] }
 0x998   : > { %v5864_v42 = vpack.c.bf16 %v5000_v40, %v4999_v39  ;;  %v5020_v39 = vld [vmem:[%s7233_s6 + $0xa8] sm:$0xff]  ;;  %v5021_v40 = vld [vmem:[%s7233_s6 + $0xb0] sm:$0xff] }
 0x999   : > { %5852 = vmatpush3.bf16.xpose.msk.msra.mxu1 %vm6404_vm3, %v5850_v43  ;;  %v5002_v43 = vld [vmem:[%s7233_s6 + $0x98] sm:$0xff] }
 0x99a   : > { %5865 = vmatprep.subr.bf16.mxu1 %v5864_v42 }
 0x9a0   : > { %5523 = vmatmul.mubr.msk.f32.vlgmr.msra.gmra.mrb[26].mxu1 %vm493_vm1, %v2394_v44  ;;  %v5868_v44 = vpack.c.bf16 %v5002_v43, %v5001_v41 }
 0x9a1   : > { %5551 = vmatprep.mubr.msk.f32.mxu1 %vm419_vm2, %v6373_v26  ;;  %5867 = vmatpush3.bf16.msra.mxu1 %v5864_v42  ;;  %v5022_v42 = vld [vmem:[%s7233_s6 + $0xb8] sm:$0xff] }
 0x9a2   : > { %5869 = vmatprep.subr.bf16.mxu1 %v5868_v44  ;;  %v5891_v43 = vpack.c.bf16 %v5022_v42, %v5021_v40  ;;  %v6073_v40 = vld [vmem:[%s6360_s21] sm:$0xff]  ;;  %v5040_v42 = vld [vmem:[%s7233_s6 + $0xc8] sm:$0xff] }
 0x9a5   : > { %5871 = vmatpush3.bf16.msra.mxu1 %v5868_v44 }
 0x9a6   : > { %5876 = vmatprep.subr.bf16.mxu1 %v6155_v3 }
 0x9a8   : > { %5552 = vmatmul.mubr.msk.f32.vlgmr.msra.gmra.mrb[28].mxu1 %vm419_vm2, %v6380_v28 }
 0x9a9   : > { %5565 = vmatprep.mubr.msk.f32.mxu1 %vm6156_vm0, %v6157_v6 }
 0xa73   : > { %v2470_v57 = vpop.f32.mrb[26].mxu1 }
 0xa74   : > { %v5524_v58 = vpop.f32.mrb[27].mxu1  ;;  %v2476_v59 = vsel %vm1378_vm5, %v2470_v57, -inf }
 0xa75   : > { %2477 = vmax.xlane.f32.xlu0 %v2476_v59  ;;  %v5004_v59 = vld [vmem:[%s7234_s7 + $0x4] ss:$0 sm:$0xff] }
 0xa7b   : > { %v5553_v58 = vpop.f32.mrb[28].mxu1 }
 0xa7c   : > { %v2756_v1 = vadd.f32 %v5553_v58, %v5004_v59  ;;  %v2750_v2 = vpop.f32.mrb[29].mxu1 }
 0xa7d   : > { %v2751_v4 = vadd.f32 %v5004_v59, %v2750_v2  ;;  %v5032_v2 = vld [vmem:[%s7231_s4 + $0xc8] sm:$0xff] }
 0xa7f   : > { %v5877_v7 = vpack.c.bf16 %v2756_v1, %v2751_v4  ;;  %v5031_v1 = vld [vmem:[%s7231_s4 + $0xc0] sm:$0xff] }
 0xa81   : > { %5878 = vmatpush3.bf16.msra.mxu1 %v5877_v7 }
 0xb02   : > { %v2478_v61 = vpop.xlane.xlu0 %2477 }
 0xb03   : > { %v6759_v62 = vmax.f32 %v6756_v60, %v2478_v61  ;;  %v5011_v61 = vld [vmem:[%s7231_s4 + $0xa0] sm:$0xff] }
 0xb04   : > { %v5879_v5 = vpack.c.bf16 %v5012_v0, %v5011_v61  ;;  %v5024_v0 = vld [vmem:[%s7234_s7 + $0x5] ss:$0 sm:$0xff] }
 0xb05   : > { %v2480_v63 = vsub.f32 %v6756_v60, %v6759_v62  ;;  %2582 = vst.msk [vmem:[#allocation3 + $0x18] sm:$0xff] %vm1090_vm4, %v6759_v62  ;;  %2485 = vperm.xlu1 %6024, %v6759_v62  }
 0xb06   : > { %5880 = vmatprep.subr.bf16.mxu1 %v5879_v5 }
 0xb84   : > { %v2486_v17 = vpop.permute.xlu1 %2485 }
 0xb85   : > { %v2488_v18 = vsub.f32 %v2470_v57, %v2486_v17  ;;  %v5013_v17 = vld [vmem:[%s7231_s4 + $0xb0] sm:$0xff] }
 0xb87   : > { %v2489_v19 = vmul.f32 1.442695, %v2488_v18  ;;  %v5014_v18 = vld [vmem:[%s7231_s4 + $0xb8] sm:$0xff] }
 0xb89   : > { %6031 = vpow2.f32 %v2489_v19  ;;  %v5883_v19 = vpack.c.bf16 %v5014_v18, %v5013_v17 }
 0xb93   : > { %v6781_v23 = vpop.eup %6031 }
 0xb94   : > { %5530 = vmatmul.mubr.msk.f32.vlgmr.msra.gmra.mrb[18].mxu0 %vm1378_vm5, %v6781_v23 }
 0xb95   : > { %5859 = vmatpush3.bf16.msra.mxu0 %v5856_v12  ;;  %5540 = vmatprep.mubr.msk.f32.mxu0 %vm419_vm2, %v6373_v26 }
 0xb96   : > { %5861 = vmatprep.subr.bf16.mxu0 %v5860_v22 }
 0xb99   : > { %5863 = vmatpush3.bf16.msra.mxu0 %v5860_v22 }
 0xb9a   : > { %5872 = vmatprep.subr.bf16.mxu0 %v6155_v3 }
 0xb9c   : > { %5541 = vmatmul.mubr.msk.f32.vlgmr.msra.gmra.mrb[20].mxu0 %vm419_vm2, %v6380_v28 }
 0xb9d   : > { %5558 = vmatprep.mubr.msk.f32.mxu0 %vm6156_vm0, %v6157_v6 }
 0xc67   : > { %v6792_v24 = vpop.f32.mrb[18].mxu0 }
 0xc68   : > { %v5531_v25 = vpop.f32.mrb[19].mxu0 }
 0xc69   : > { %v5016_v25 = vld [vmem:[%s7232_s5 + $0x5] ss:$0 sm:$0xff] }
 0xc6f   : > { %v5542_v29 = vpop.f32.mrb[20].mxu0 }
 0xc70   : > { %v2668_v30 = vadd.f32 %v5542_v29, %v4996_v27  ;;  %v2662_v33 = vpop.f32.mrb[21].mxu0 }
 0xc71   : > { %v2663_v34 = vadd.f32 %v4996_v27, %v2662_v33 }
 0xc73   : > { %v5873_v37 = vpack.c.bf16 %v2668_v30, %v2663_v34 }
 0xc75   : > { %5875 = vmatpush3.bf16.xpose.msk.msra.mxu0 %vm6404_vm3, %v5873_v37  ;;  %v3126_v37 = vld [vmem:[#allocation2 + $0x28] sm:$0xff] }
 0xc7c   : > { %5559 = vmatmul.mubr.msk.f32.vlgmr.msra.gmra.mrb[22].mxu0 %vm493_vm1, %v2760_v38  ;;  %v5019_v38 = vld [vmem:[%s7233_s6 + $0xa0] sm:$0xff] }
 0xc7d   : > { %5587 = vmatprep.mubr.msk.f32.mxu0 %vm419_vm2, %v6373_v26  ;;  %v5887_v41 = vpack.c.bf16 %v5020_v39, %v5019_v38 }
 0xc7f   : > { %5888 = vmatprep.subr.bf16.mxu0 %v5887_v41 }
 0xc80   : > { %5890 = vmatpush3.bf16.msra.mxu0 %v5887_v41  ;;  %v5039_v41 = vld [vmem:[%s7233_s6 + $0xc0] sm:$0xff] }
 0xc81   : > { %5892 = vmatprep.subr.bf16.mxu0 %v5891_v43 }
 0xc84   : > { %5894 = vmatpush3.bf16.msra.mxu0 %v5891_v43  ;;  %v5041_v43 = vld [vmem:[%s7233_s6 + $0xd0] sm:$0xff] }
 0xc85   : > { %5899 = vmatprep.subr.bf16.mxu0 %v6155_v3 }
 0xc87   : > { %5588 = vmatmul.mubr.msk.f32.vlgmr.msra.gmra.mrb[24].mxu0 %vm419_vm2, %v6380_v28 }
 0xc88   : > { %5601 = vmatprep.mubr.msk.f32.mxu0 %vm6156_vm0, %v6157_v6 }
 0xd4f   : > { %v2836_v45 = vpop.f32.mrb[22].mxu0 }
 0xd50   : > { %v5560_v47 = vpop.f32.mrb[23].mxu0  ;;  %v2842_v48 = vsel %vm1378_vm5, %v2836_v45, -inf }
 0xd51   : > { %2843 = vmax.xlane.f32.xlu1 %v2842_v48  ;;  %v6884_v48 = vld [vmem:[#allocation3 + $0x28] sm:$0xff] }
 0xd5a   : > { %v5589_v61 = vpop.f32.mrb[24].mxu0 }
 0xd5b   : > { %v3122_v4 = vadd.f32 %v5589_v61, %v5024_v0 }
 0xdde   : > { %v2844_v55 = vpop.xlane.xlu1 %2843 }
 0xddf   : > { %v6823_v56 = vmax.f32 %v6820_v52, %v2844_v55 }
 0xde1   : > { %v2846_v57 = vsub.f32 %v6820_v52, %v6823_v56  ;;  %2948 = vst.msk [vmem:[#allocation3 + $0x20] sm:$0xff] %vm1090_vm4, %v6823_v56  ;;  %2851 = vperm.xlu0 %6023, %v6823_v56  }
 0xe60   : > { %v2852_v10 = vpop.permute.xlu0 %2851 }
 0xe61   : > { %v2854_v12 = vsub.f32 %v2836_v45, %v2852_v10  ;;  %v5902_v10 = vpack.c.bf16 %v5032_v2, %v5031_v1  ;;  %v6948_v2 = vld [vmem:[#allocation3 + $0x30] sm:$0xff] }
 0xe63   : > { %v2855_v15 = vmul.f32 1.442695, %v2854_v12 }
 0xe65   : > { %6033 = vpow2.f32 %v2855_v15 }
 0xe6f   : > { %v6845_v20 = vpop.eup %6033 }
 0xe70   : > { %5566 = vmatmul.mubr.msk.f32.vlgmr.msra.gmra.mrb[30].mxu1 %vm1378_vm5, %v6845_v20 }
 0xe71   : > { %5882 = vmatpush3.bf16.msra.mxu1 %v5879_v5  ;;  %5576 = vmatprep.mubr.msk.f32.mxu1 %vm419_vm2, %v6373_v26  ;;  %v3116_v5 = vpop.f32.mrb[25].mxu0 }
 0xe72   : > { %5884 = vmatprep.subr.bf16.mxu1 %v5883_v19  ;;  %v3117_v7 = vadd.f32 %v5024_v0, %v3116_v5 }
 0xe74   : > { %v5900_v12 = vpack.c.bf16 %v3122_v4, %v3117_v7 }
 0xe75   : > { %5886 = vmatpush3.bf16.msra.mxu1 %v5883_v19  ;;  %v5033_v19 = vld [vmem:[%s7231_s4 + $0xd0] sm:$0xff] }
 0xe76   : > { %5895 = vmatprep.subr.bf16.mxu1 %v6155_v3  ;;  %5901 = vmatpush3.bf16.msra.mxu0 %v5900_v12  ;;  %v5044_v12 = vld [vmem:[%s7234_s7 + $0x6] ss:$0 sm:$0xff] }
 0xe77   : > { %5903 = vmatprep.subr.bf16.mxu0 %v5902_v10 }
 0xe78   : > { %5577 = vmatmul.mubr.msk.f32.vlgmr.msra.gmra.mrb[32].mxu1 %vm419_vm2, %v6380_v28 }
 0xe79   : > { %5594 = vmatprep.mubr.msk.f32.mxu1 %vm6156_vm0, %v6157_v6 }
 0xf43   : > { %v6856_v21 = vpop.f32.mrb[30].mxu1 }
 0xf44   : > { %v5567_v22 = vpop.f32.mrb[31].mxu1 }
 0xf45   : > { %v5034_v22 = vld [vmem:[%s7231_s4 + $0xd8] sm:$0xff] }
 0xf4b   : > { %v5578_v27 = vpop.f32.mrb[32].mxu1 }
 0xf4c   : > { %v3034_v29 = vadd.f32 %v5578_v27, %v5016_v25  ;;  %v3028_v30 = vpop.f32.mrb[33].mxu1 }
 0xf4d   : > { %v3029_v33 = vadd.f32 %v5016_v25, %v3028_v30  ;;  %v5906_v25 = vpack.c.bf16 %v5034_v22, %v5033_v19 }
 0xf4f   : > { %v5896_v34 = vpack.c.bf16 %v3034_v29, %v3029_v33  ;;  %v5036_v33 = vld [vmem:[%s7232_s5 + $0x6] ss:$0 sm:$0xff] }
 0xf51   : > { %5898 = vmatpush3.bf16.xpose.msk.msra.mxu1 %vm6404_vm3, %v5896_v34 }
 0xf58   : > { %5595 = vmatmul.mubr.msk.f32.vlgmr.msra.gmra.mrb[34].mxu1 %vm493_vm1, %v3126_v37 }
 0xf59   : > { %5623 = vmatprep.mubr.msk.f32.mxu1 %vm419_vm2, %v6373_v26 }
0x102b   : > { %v3202_v44 = vpop.f32.mrb[34].mxu1 }
0x102c   : > { %v5596_v45 = vpop.f32.mrb[35].mxu1  ;;  %v3208_v47 = vsel %vm1378_vm5, %v3202_v44, -inf }
0x102d   : > { %3209 = vmax.xlane.f32.xlu0 %v3208_v47  ;;  %v5042_v45 = vld [vmem:[%s7233_s6 + $0xd8] sm:$0xff] }
0x102e   : > { %v5914_v47 = vpack.c.bf16 %v5042_v45, %v5041_v43  ;;  %v5056_v43 = vld [vmem:[%s7232_s5 + $0x7] ss:$0 sm:$0xff] }
0x10ba   : > { %v3210_v55 = vpop.xlane.xlu0 %3209 }
0x10bb   : > { %v6887_v58 = vmax.f32 %v6884_v48, %v3210_v55  ;;  %v6074_v55 = vld [vmem:[%s6360_s21 + $0x8] sm:$0xff]  ;;  %s4763_s21 = scalar_lea.sflag [#allocation7], %s386_s17 }
0x10bd   : > { %v3212_v59 = vsub.f32 %v6884_v48, %v6887_v58  ;;  %3314 = vst.msk [vmem:[#allocation3 + $0x28] sm:$0xff] %vm1090_vm4, %v6887_v58  ;;  %3217 = vperm.xlu1 %6024, %v6887_v58   ;;  %v5064_v58 = vld [vmem:[%s7234_s7 + $0x7] ss:$0 sm:$0xff] }
0x10bf   : > { %v3213_v11 = vmul.f32 1.442695, %v3212_v59 }
0x113c   : > { %v3218_v15 = vpop.permute.xlu1 %3217 }
0x113d   : > { %v3220_v17 = vsub.f32 %v3202_v44, %v3218_v15  ;;  %v5910_v44 = vpack.c.bf16 %v5040_v42, %v5039_v41  ;;  %v5051_v15 = vld [vmem:[%s7231_s4 + $0xe0] sm:$0xff] }
0x113f   : > { %v3221_v18 = vmul.f32 1.442695, %v3220_v17  ;;  %5911 = vmatprep.subr.bf16.mxu1 %v5910_v44  ;;  %v5052_v17 = vld [vmem:[%s7231_s4 + $0xe8] sm:$0xff] }
0x1140   : > { %5913 = vmatpush3.bf16.msra.mxu1 %v5910_v44 }
0x1141   : > { %6035 = vpow2.f32 %v3221_v18  ;;  %5915 = vmatprep.subr.bf16.mxu1 %v5914_v47 }
0x1144   : > { %5917 = vmatpush3.bf16.msra.mxu1 %v5914_v47 }
0x1145   : > { %5922 = vmatprep.subr.bf16.mxu1 %v6155_v3 }
0x1147   : > { %5624 = vmatmul.mubr.msk.f32.vlgmr.msra.gmra.mrb[36].mxu1 %vm419_vm2, %v6074_v55 }
0x1148   : > { %5637 = vmatprep.mubr.msk.f32.mxu1 %vm6156_vm0, %v6157_v6 }
0x114b   : > { %v6909_v27 = vpop.eup %6035 }
0x114c   : > { %5602 = vmatmul.mubr.msk.f32.vlgmr.msra.gmra.mrb[26].mxu0 %vm1378_vm5, %v6909_v27 }
0x114d   : > { %5905 = vmatpush3.bf16.msra.mxu0 %v5902_v10  ;;  %5612 = vmatprep.mubr.msk.f32.mxu0 %vm419_vm2, %v6373_v26 }
0x114e   : > { %5907 = vmatprep.subr.bf16.mxu0 %v5906_v25 }
0x1151   : > { %5909 = vmatpush3.bf16.msra.mxu0 %v5906_v25  ;;  %v5925_v25 = vpack.c.bf16 %v5052_v17, %v5051_v15 }
0x1152   : > { %5918 = vmatprep.subr.bf16.mxu0 %v6155_v3 }
0x1154   : > { %5613 = vmatmul.mubr.msk.f32.vlgmr.msra.gmra.mrb[28].mxu0 %vm419_vm2, %v6380_v28  ;;  %v3492_v28 = vld [vmem:[#allocation2 + $0x30] sm:$0xff] }
0x1155   : > { %5630 = vmatprep.mubr.msk.f32.mxu0 %vm6156_vm0, %v6157_v6 }
0x121a   : > { %v5625_v10 = vpop.f32.mrb[36].mxu1 }
0x121b   : > { %v3488_v18 = vadd.f32 %v5625_v10, %v5044_v12  ;;  %v3482_v19 = vpop.f32.mrb[37].mxu1  ;;  %v5061_v10 = vld [vmem:[%s7233_s6 + $0xf0] sm:$0xff] }
0x121c   : > { %v3483_v22 = vadd.f32 %v5044_v12, %v3482_v19  ;;  %v5937_v15 = vpack.c.bf16 %v5062_v46, %v5061_v10  ;;  %v3593_v46 = vld [vmem:[#allocation4 + $0x30] sm:$0xff] }
0x121f   : > { %v6920_v29 = vpop.f32.mrb[26].mxu0 }
0x1220   : > { %v5603_v30 = vpop.f32.mrb[27].mxu0 }
0x1221   : > { %v5923_v30 = vpack.c.bf16 %v3488_v18, %v3483_v22  ;;  %v1759_v22 = vsel %vm1378_vm5, %v6653_v49, 0.0  ;;  %v1749_v49 = vmul.f32 1.442695, %v1748_v32 }
0x1223   : > { %5924 = vmatpush3.bf16.msra.mxu1 %v5923_v30  ;;  %v3223_v30 = vsel %vm1378_vm5, %v6909_v27, 0.0  ;;  %v7030_v27 = vld [vmem:[#allocation3 + $0x38] sm:$0xff] }
0x1224   : > { %5926 = vmatprep.subr.bf16.mxu1 %v5925_v25 }
0x1227   : > { %v5614_v34 = vpop.f32.mrb[28].mxu0 }
0x1228   : > { %v3400_v26 = vadd.f32 %v5614_v34, %v5036_v33  ;;  %v3394_v37 = vpop.f32.mrb[29].mxu0 }
0x1229   : > { %v3395_v38 = vadd.f32 %v5036_v33, %v3394_v37  ;;  %v5053_v37 = vld [vmem:[%s7231_s4 + $0xf0] sm:$0xff] }
0x122b   : > { %v5919_v39 = vpack.c.bf16 %v3400_v26, %v3395_v38  ;;  %v5054_v38 = vld [vmem:[%s7231_s4 + $0xf8] sm:$0xff] }
0x122d   : > { %5921 = vmatpush3.bf16.xpose.msk.msra.mxu0 %vm6404_vm3, %v5919_v39  ;;  %v5929_v39 = vpack.c.bf16 %v5054_v38, %v5053_v37  ;;  %v2495_v37 = vld [vmem:[#allocation4 + $0x18] sm:$0xff] }
0x1234   : > { %5631 = vmatmul.mubr.msk.f32.vlgmr.msra.gmra.mrb[30].mxu0 %vm493_vm1, %v3492_v28 }
0x1235   : > { %5659 = vmatprep.mubr.msk.f32.mxu0 %vm419_vm2, %v6073_v40 }
0x1307   : > { %v3568_v61 = vpop.f32.mrb[30].mxu0 }
0x1308   : > { %v5632_v0 = vpop.f32.mrb[31].mxu0  ;;  %v3574_v1 = vsel %vm1378_vm5, %v3568_v61, -inf }
0x1309   : > { %3575 = vmax.xlane.f32.xlu1 %v3574_v1  ;;  %v3858_v0 = vld [vmem:[#allocation2 + $0x38] sm:$0xff]  ;;  %v5059_v1 = vld [vmem:[%s7233_s6 + $0xe0] sm:$0xff] }
0x1396   : > { %v3576_v4 = vpop.xlane.xlu1 %3575 }
0x1397   : > { %v6951_v5 = vmax.f32 %v6948_v2, %v3576_v4  ;;  %v5060_v4 = vld [vmem:[%s7233_s6 + $0xe8] sm:$0xff] }
0x1398   : > { %v5933_v12 = vpack.c.bf16 %v5060_v4, %v5059_v1 }
0x1399   : > { %v3578_v7 = vsub.f32 %v6948_v2, %v6951_v5  ;;  %3680 = vst.msk [vmem:[#allocation3 + $0x30] sm:$0xff] %vm1090_vm4, %v6951_v5  ;;  %3583 = vperm.xlu0 %6023, %v6951_v5  }
0x139a   : > { %5934 = vmatprep.subr.bf16.mxu0 %v5933_v12 }
0x139b   : > { %5936 = vmatpush3.bf16.msra.mxu0 %v5933_v12  ;;  %v3579_v56 = vmul.f32 1.442695, %v3578_v7 }
0x139c   : > { %5938 = vmatprep.subr.bf16.mxu0 %v5937_v15 }
0x139f   : > { %5940 = vmatpush3.bf16.msra.mxu0 %v5937_v15 }
0x13a0   : > { %5945 = vmatprep.subr.bf16.mxu0 %v6155_v3 }
0x13a2   : > { %5660 = vmatmul.mubr.msk.f32.vlgmr.msra.gmra.mrb[32].mxu0 %vm419_vm2, %v6074_v55 }
0x13a3   : > { %5673 = vmatprep.mubr.msk.f32.mxu0 %vm6156_vm0, %v6157_v6 }
0x1418   : > { %v3584_v33 = vpop.permute.xlu0 %3583 }
0x1419   : > { %v3586_v34 = vsub.f32 %v3568_v61, %v3584_v33 }
0x141b   : > { %v3587_v26 = vmul.f32 1.442695, %v3586_v34 }
0x141d   : > { %6037 = vpow2.f32 %v3587_v26 }
0x141e   : > { %6039 = vpow2.f32 %v1749_v49 }
0x1427   : > { %v6038_v28 = vpop.eup %6037 }
0x1428   : > { %5638 = vmatmul.mubr.msk.f32.vlgmr.msra.gmra.mrb[38].mxu1 %vm1378_vm5, %v6038_v28  ;;  %v3589_v33 = vsel %vm1378_vm5, %v6038_v28, 0.0  ;;  %v7032_v34 = vpop.eup %6039 }
0x1429   : > { %5928 = vmatpush3.bf16.msra.mxu1 %v5925_v25  ;;  %5648 = vmatprep.mubr.msk.f32.mxu1 %vm419_vm2, %v6073_v40  ;;  %v2125_v25 = vsel %vm1378_vm5, %v6717_v35, 0.0  ;;  %v2115_v35 = vmul.f32 1.442695, %v2114_v14  ;;  %v1764_v14 = vmul.f32 %v7032_v34, %v1763_v31  ;;  %v1397_v31 = vld [vmem:[#allocation4] sm:$0xff] }
0x142a   : > { %5930 = vmatprep.subr.bf16.mxu1 %v5929_v39 }
0x142b   : > { %6041 = vpow2.f32 %v2115_v35 }
0x142d   : > { %5932 = vmatpush3.bf16.msra.mxu1 %v5929_v39 }
0x142e   : > { %5941 = vmatprep.subr.bf16.mxu1 %v6155_v3  ;;  %v2491_v3 = vsel %vm1378_vm5, %v6781_v23, 0.0  ;;  %v2481_v23 = vmul.f32 1.442695, %v2480_v63  ;;  %v2129_v63 = vld [vmem:[#allocation4 + $0x10] sm:$0xff] }
0x1430   : > { %5649 = vmatmul.mubr.msk.f32.vlgmr.msra.gmra.mrb[40].mxu1 %vm419_vm2, %v6074_v55  ;;  %v2857_v55 = vsel %vm1378_vm5, %v6845_v20, 0.0  ;;  %6043 = vpow2.f32 %v2481_v23  ;;  %v2847_v20 = vmul.f32 1.442695, %v2846_v57 }
0x1431   : > { %5666 = vmatprep.mubr.msk.f32.mxu1 %vm6156_vm0, %v6157_v6 }
0x1432   : > { %6045 = vpow2.f32 %v2847_v20 }
0x1433   : > { %6047 = vpow2.f32 %v3213_v11 }
0x1434   : > { %6049 = vpow2.f32 %v3579_v56  ;;  %v1402_v56 = vld [vmem:[#allocation5] sm:$0xff] }
0x1435   : > { %v7046_v60 = vpop.eup %6041 }
0x1436   : > { %v2130_v57 = vmul.f32 %v7046_v60, %v2129_v63 }
0x143a   : > { %v7056_v59 = vpop.eup %6043 }
0x143b   : > { %v2496_v2 = vmul.f32 %v7056_v59, %v2495_v37 }
0x143c   : > { %v7060_v7 = vpop.eup %6045 }
0x1475   : > { %v5661_v48 = vpop.f32.mrb[32].mxu0 }
0x1476   : > { %v3854_v38 = vadd.f32 %v5661_v48, %v5064_v58  ;;  %v3848_v39 = vpop.f32.mrb[33].mxu0 }
0x14fb   : > { %v6979_v41 = vpop.f32.mrb[38].mxu1 }
0x14fc   : > { %v5639_v42 = vpop.f32.mrb[39].mxu1 }
0x14fd   : > { %v3849_v42 = vadd.f32 %v5064_v58, %v3848_v39 }
0x14ff   : > { %v5946_v5 = vpack.c.bf16 %v3854_v38, %v3849_v42 }
0x1501   : > { %5947 = vmatpush3.bf16.msra.mxu0 %v5946_v5 }
0x1502   : > { %5676 = vmatprep.subr.mxu0 %v6157_v6 }
0x1503   : > { %v5650_v44 = vpop.f32.mrb[40].mxu1 }
0x1504   : > { %v3766_v45 = vadd.f32 %v5650_v44, %v5056_v43  ;;  %v3760_v47 = vpop.f32.mrb[41].mxu1  ;;  %v2861_v44 = vld [vmem:[#allocation4 + $0x20] sm:$0xff] }
0x1505   : > { %v3761_v40 = vadd.f32 %v5056_v43, %v3760_v47  ;;  %v2862_v47 = vmul.f32 %v7060_v7, %v2861_v44 }
0x1507   : > { %v5942_v61 = vpack.c.bf16 %v3766_v45, %v3761_v40  ;;  %v7065_v40 = vpop.eup %6047 }
0x1508   : > { %v7069_v10 = vpop.eup %6049 }
0x1509   : > { %5944 = vmatpush3.bf16.xpose.msk.msra.mxu1 %vm6404_vm3, %v5942_v61 }
0x1510   : > { %5667 = vmatmul.mubr.msk.f32.vlgmr.msra.gmra.mrb[42].mxu1 %vm493_vm1, %v3858_v0  ;;  %v3227_v0 = vld [vmem:[#allocation4 + $0x28] sm:$0xff] }
0x1511   : > { %v3228_v4 = vmul.f32 %v7065_v40, %v3227_v0  ;;  %v2134_v0 = vld [vmem:[#allocation5 + $0x10] sm:$0xff] }
0x15e3   : > { %v7003_v17 = vpop.f32.mrb[42].mxu1 }
0x15e4   : > { %v5668_v18 = vpop.f32.mrb[43].mxu1  ;;  %v3940_v19 = vsel %vm1378_vm5, %v7003_v17, -inf }
0x15e5   : > { %3941 = vmax.xlane.f32.xlu0 %v3940_v19  ;;  %v3594_v18 = vmul.f32 %v7069_v10, %v3593_v46 }
0x15e9   : > { %1760 = vadd.xlane.f32.xlu0 %v1759_v22 }
0x15ed   : > { %2126 = vadd.xlane.f32.xlu0 %v2125_v25  ;;  %v1394_v25 = vsel %vm1378_vm5, %v6589_v8, 0.0 }
0x15f1   : > { %2492 = vadd.xlane.f32.xlu0 %v2491_v3  ;;  %v1384_v3 = vmul.f32 1.442695, %v1383_v54 }
0x15f3   : > { %6051 = vpow2.f32 %v1384_v3 }
0x15f5   : > { %2858 = vadd.xlane.f32.xlu0 %v2857_v55 }
0x15f9   : > { %3224 = vadd.xlane.f32.xlu0 %v3223_v30 }
0x15fd   : > { %3590 = vadd.xlane.f32.xlu0 %v3589_v33  ;;  %v6052_v55 = vpop.eup %6051 }
0x15fe   : > { %v1398_v11 = vmul.f32 %v6052_v55, %v1397_v31 }
0x1672   : > { %v3942_v16 = vpop.xlane.xlu0 %3941 }
0x1673   : > { %v7035_v32 = vmax.f32 %v7030_v27, %v3942_v16 }
0x1675   : > { %v3944_v13 = vsub.f32 %v7030_v27, %v7035_v32  ;;  %4046 = vst.msk [vmem:[#allocation3 + $0x38] sm:$0xff] %vm1090_vm4, %v7035_v32  ;;  %3949 = vperm.xlu1 %6024, %v7035_v32  }
0x1676   : > { %v1761_v62 = vpop.xlane.xlu0 %1760 }
0x1677   : > { %v1765_v52 = vadd.f32 %v1764_v14, %v1761_v62 }
0x1679   : > { %1766 = vst.msk [vmem:[#allocation4 + $0x8] sm:$0xff] %vm1090_vm4, %v1765_v52 }
0x167a   : > { %v2127_v26 = vpop.xlane.xlu0 %2126 }
0x167b   : > { %v2131_v28 = vadd.f32 %v2130_v57, %v2127_v26 }
0x167d   : > { %2132 = vst.msk [vmem:[#allocation4 + $0x10] sm:$0xff] %vm1090_vm4, %v2131_v28  ;;  %v4066_v28 = vld [vmem:[%s7235_s8] sm:$0xf] }
0x167e   : > { %v2493_v43 = vpop.xlane.xlu0 %2492 }
0x167f   : > { %v2497_v45 = vadd.f32 %v2496_v2, %v2493_v43  ;;  %v3959_v2 = vld [vmem:[#allocation4 + $0x38] sm:$0xff] }
0x1680   : > { %v4145_v8 = vld [vmem:[#allocation4 + $0x8] sm:$0xff] }
0x1681   : > { %2498 = vst.msk [vmem:[#allocation4 + $0x18] sm:$0xff] %vm1090_vm4, %v2497_v45 }
0x1682   : > { %v2859_v61 = vpop.xlane.xlu0 %2858 }
0x1683   : > { %v2863_v1 = vadd.f32 %v2862_v47, %v2859_v61  ;;  %v5074_v61 = vld [vmem:[%s7235_s8 + $0x4] sm:$0xf] }
0x1684   : > { %v4233_v51 = vld [vmem:[#allocation4 + $0x10] sm:$0xff] }
0x1685   : > { %2864 = vst.msk [vmem:[#allocation4 + $0x20] sm:$0xff] %vm1090_vm4, %v2863_v1 }
0x1686   : > { %v3225_v12 = vpop.xlane.xlu0 %3224 }
0x1687   : > { %v3229_v15 = vadd.f32 %v3228_v4, %v3225_v12 }
0x1688   : > { %v4321_v53 = vld [vmem:[#allocation4 + $0x18] sm:$0xff] }
0x1689   : > { %3230 = vst.msk [vmem:[#allocation4 + $0x28] sm:$0xff] %vm1090_vm4, %v3229_v15 }
0x168a   : > { %v3591_v19 = vpop.xlane.xlu0 %3590 }
0x168b   : > { %v3595_v22 = vadd.f32 %v3594_v18, %v3591_v19 }
0x168c   : > { %v4409_v54 = vld [vmem:[#allocation4 + $0x20] sm:$0xff] }
0x168d   : > { %3596 = vst.msk [vmem:[#allocation4 + $0x30] sm:$0xff] %vm1090_vm4, %v3595_v22  ;;  %v5077_v22 = vld [vmem:[%s7235_s8 + $0x8] sm:$0xf] }
0x1690   : > { %v4497_v20 = vld [vmem:[#allocation4 + $0x28] sm:$0xff] }
0x1694   : > { %v4585_v14 = vld [vmem:[#allocation4 + $0x30] sm:$0xff] }
0x1699   : > { %1395 = vadd.xlane.f32.xlu1 %v1394_v25  ;;  %v2866_v25 = vld [vmem:[#allocation5 + $0x20] sm:$0xff] }
0x16aa   : > { %1405 = vperm.xlu1 %6024, %v6052_v55  }
0x16f4   : > { %v3950_v30 = vpop.permute.xlu1 %3949 }
0x16f5   : > { %v3952_v33 = vsub.f32 %v7003_v17, %v3950_v30  ;;  %v3232_v30 = vld [vmem:[#allocation5 + $0x28] sm:$0xff] }
0x16f7   : > { %v3953_v49 = vmul.f32 1.442695, %v3952_v33 }
0x16f9   : > { %6053 = vpow2.f32 %v3953_v49 }
0x16fa   : > { %6055 = vrcp.f32 %v4145_v8 }
0x16fb   : > { %6057 = vrcp.f32 %v4233_v51  ;;  %v5080_v51 = vld [vmem:[%s7235_s8 + $0xc] sm:$0xf] }
0x16fc   : > { %6059 = vrcp.f32 %v4321_v53  ;;  %v3598_v53 = vld [vmem:[#allocation5 + $0x30] sm:$0xff] }
0x16fd   : > { %6061 = vrcp.f32 %v4409_v54 }
0x16fe   : > { %6063 = vrcp.f32 %v4497_v20 }
0x16ff   : > { %6065 = vrcp.f32 %v4585_v14 }
0x1703   : > { %v6054_v35 = vpop.eup %6053 }
0x1704   : > { %5674 = vmatmul.mubr.msk.f32.vlgmr.msra.gmra.mrb[34].mxu0 %vm1378_vm5, %v6054_v35  ;;  %v3955_v23 = vsel %vm1378_vm5, %v6054_v35, 0.0  ;;  %v6056_v17 = vpop.eup %6055 }
0x1705   : > { %3956 = vadd.xlane.f32.xlu0 %v3955_v23  ;;  %5678 = vmatprep.mubr.msk.f32.mxu0 %vm6156_vm0, %v6157_v6  ;;  %v6058_v16 = vpop.eup %6057 }
0x1706   : > { %v6060_v62 = vpop.eup %6059  ;;  %5677 = vmatpush3.msk.msra.mxu0 %vm4070_vm6, %v4066_v28 }
0x1707   : > { %5681 = vmatprep.subr.mxu0 %v6157_v6 }
0x171b   : > { %1771 = vperm.xlu0 %6023, %v7032_v34   ;;  %v6062_v34 = vpop.eup %6061 }
0x171c   : > { %v6064_v26 = vpop.eup %6063 }
0x171d   : > { %v6066_v38 = vpop.eup %6065 }
0x171f   : > { %4150 = vperm.xlu0 %6023, %v6056_v17  }
0x1723   : > { %4238 = vperm.xlu0 %6023, %v6058_v16  }
0x1726   : > { %v1396_v63 = vpop.xlane.xlu1 %1395 }
0x1727   : > { %v1399_v52 = vadd.f32 %v1398_v11, %v1396_v63  ;;  %4326 = vperm.xlu0 %6023, %v6060_v62   ;;  %v3964_v11 = vld [vmem:[#allocation5 + $0x38] sm:$0xff]  ;;  %v5083_v62 = vld [vmem:[%s7235_s8 + $0x10] sm:$0xf] }
0x1729   : > { %1401 = vst.msk [vmem:[#allocation4] sm:$0xff] %vm1090_vm4, %v1399_v52 }
0x172a   : > { %v1406_v57 = vpop.permute.xlu1 %1405 }
0x172b   : > { %v1408_v48 = vmul.f32 %v1406_v57, %v1402_v56  ;;  %4414 = vperm.xlu0 %6023, %v6062_v34  }
0x172d   : > { %v1482_v58 = vadd.f32 %v6600_v9, %v1408_v48  ;;  %v3945_v9 = vmul.f32 1.442695, %v3944_v13 }
0x172f   : > { %1483 = vst.msk [vmem:[#allocation5] sm:$0xff] %vm493_vm1, %v1482_v58  ;;  %4502 = vperm.xlu0 %6023, %v6064_v26   ;;  %v5086_v58 = vld [vmem:[%s7235_s8 + $0x14] sm:$0xf] }
0x1730   : > { %v4057_v37 = vld [vmem:[#allocation4] sm:$0xff] }
0x1731   : > { %6067 = vrcp.f32 %v4057_v37 }
0x1732   : > { %6069 = vpow2.f32 %v3945_v9 }
0x1733   : > { %4590 = vperm.xlu0 %6023, %v6066_v38  }
0x173b   : > { %v6068_v39 = vpop.eup %6067 }
0x173c   : > { %4062 = vperm.xlu1 %6024, %v6068_v39   ;;  %v6070_v42 = vpop.eup %6069  ;;  %v5089_v39 = vld [vmem:[%s7235_s8 + $0x18] sm:$0xf] }
0x173d   : > { %v3960_v5 = vmul.f32 %v6070_v42, %v3959_v2  ;;  %v5092_v2 = vld [vmem:[%s7235_s8 + $0x1c] sm:$0xf] }
0x1740   : > { %2137 = vperm.xlu1 %6024, %v7046_v60   ;;  %v1768_v60 = vld [vmem:[#allocation5 + $0x8] sm:$0xff] }
0x1744   : > { %2503 = vperm.xlu1 %6024, %v7056_v59  }
0x1748   : > { %2869 = vperm.xlu1 %6024, %v7060_v7   ;;  %v4059_v7 = vld [vmem:[#allocation5] sm:$0xff] }
0x174c   : > { %3235 = vperm.xlu1 %6024, %v7065_v40  }
0x1750   : > { %3601 = vperm.xlu1 %6024, %v7069_v10   ;;  %v2500_v10 = vld [vmem:[#allocation5 + $0x18] sm:$0xff] }
0x1754   : > { %3967 = vperm.xlu1 %6024, %v6070_v42  }
0x1792   : > { %v3957_v43 = vpop.xlane.xlu0 %3956 }
0x1793   : > { %v3961_v44 = vadd.f32 %v3960_v5, %v3957_v43 }
0x1795   : > { %3962 = vst.msk [vmem:[#allocation4 + $0x38] sm:$0xff] %vm1090_vm4, %v3961_v44 }
0x179a   : > { %v1772_v59 = vpop.permute.xlu0 %1771 }
0x179b   : > { %v1774_v45 = vmul.f32 %v1772_v59, %v1768_v60  ;;  %v5071_v60 = vld [vmem:[%s7236_s9] ss:$0 sm:$0xff] }
0x179c   : > { %v4673_v27 = vld [vmem:[#allocation4 + $0x38] sm:$0xff] }
0x179d   : > { %v1848_v32 = vadd.f32 %v6664_v50, %v1774_v45  ;;  %6071 = vrcp.f32 %v4673_v27 }
0x179e   : > { %v4151_v46 = vpop.permute.xlu0 %4150 }
0x179f   : > { %1849 = vst.msk [vmem:[#allocation5 + $0x8] sm:$0xff] %vm493_vm1, %v1848_v32 }
0x17a2   : > { %v4239_v49 = vpop.permute.xlu0 %4238 }
0x17a6   : > { %v4147_v4 = vld [vmem:[#allocation5 + $0x8] sm:$0xff]  ;;  %v4327_v31 = vpop.permute.xlu0 %4326 }
0x17a7   : > { %v6072_v13 = vpop.eup %6071  ;;  %v4153_v18 = vmul.f32 %v4151_v46, %v4147_v4 }
0x17a8   : > { %4678 = vperm.xlu1 %6024, %v6072_v13  }
0x17aa   : > { %v4415_v57 = vpop.permute.xlu0 %4414 }
0x17ae   : > { %v4503_v37 = vpop.permute.xlu0 %4502 }
0x17b2   : > { %v4591_v9 = vpop.permute.xlu0 %4590 }
0x17bb   : > { %v4063_v47 = vpop.permute.xlu1 %4062 }
0x17bc   : > { %v4065_v40 = vmul.f32 %v4063_v47, %v4059_v7 }
0x17be   : > { %5679 = vmatmul.mubr.msk.f32.vlgmr.msra.gmra.mrb[36].mxu0 %vm493_vm1, %v4065_v40 }
0x17bf   : > { %v2138_v1 = vpop.permute.xlu1 %2137  ;;  %5682 = vmatpush3.msk.msra.mxu0 %vm4070_vm6, %v5074_v61  ;;  %5683 = vmatprep.mubr.msk.f32.mxu0 %vm6156_vm0, %v6157_v6 }
0x17c0   : > { %v2140_v50 = vmul.f32 %v2138_v1, %v2134_v0  ;;  %5686 = vmatprep.subr.mxu0 %v6157_v6 }
0x17c2   : > { %v2214_v12 = vadd.f32 %v6728_v36, %v2140_v50 }
0x17c3   : > { %v2504_v15 = vpop.permute.xlu1 %2503 }
0x17c4   : > { %2215 = vst.msk [vmem:[#allocation5 + $0x10] sm:$0xff] %vm493_vm1, %v2214_v12  ;;  %v2506_v19 = vmul.f32 %v2504_v15, %v2500_v10 }
0x17c6   : > { %v2580_v3 = vadd.f32 %v6792_v24, %v2506_v19  ;;  %5684 = vmatmul.mubr.msk.f32.vlgmr.msra.gmra.mrb[36].mxu0 %vm493_vm1, %v4153_v18 }
0x17c7   : > { %v2870_v55 = vpop.permute.xlu1 %2869  ;;  %5687 = vmatpush3.msk.msra.mxu0 %vm4070_vm6, %v5077_v22  ;;  %5688 = vmatprep.mubr.msk.f32.mxu0 %vm6156_vm0, %v6157_v6 }
0x17c8   : > { %2581 = vst.msk [vmem:[#allocation5 + $0x18] sm:$0xff] %vm493_vm1, %v2580_v3  ;;  %v2872_v36 = vmul.f32 %v2870_v55, %v2866_v25  ;;  %5691 = vmatprep.subr.mxu0 %v6157_v6 }
0x17ca   : > { %v2946_v33 = vadd.f32 %v6856_v21, %v2872_v36 }
0x17cb   : > { %v3236_v35 = vpop.permute.xlu1 %3235  ;;  %v4235_v23 = vld [vmem:[#allocation5 + $0x10] sm:$0xff] }
0x17cc   : > { %2947 = vst.msk [vmem:[#allocation5 + $0x20] sm:$0xff] %vm493_vm1, %v2946_v33  ;;  %v3238_v24 = vmul.f32 %v3236_v35, %v3232_v30  ;;  %v4241_v8 = vmul.f32 %v4239_v49, %v4235_v23 }
0x17ce   : > { %v3312_v54 = vadd.f32 %v6920_v29, %v3238_v24  ;;  %5689 = vmatmul.mubr.msk.f32.vlgmr.msra.gmra.mrb[36].mxu0 %vm493_vm1, %v4241_v8 }
0x17cf   : > { %v3602_v17 = vpop.permute.xlu1 %3601  ;;  %5692 = vmatpush3.msk.msra.mxu0 %vm4070_vm6, %v5080_v51  ;;  %5693 = vmatprep.mubr.msk.f32.mxu0 %vm6156_vm0, %v6157_v6  ;;  %v4323_v20 = vld [vmem:[#allocation5 + $0x18] sm:$0xff] }
0x17d0   : > { %3313 = vst.msk [vmem:[#allocation5 + $0x28] sm:$0xff] %vm493_vm1, %v3312_v54  ;;  %v3604_v21 = vmul.f32 %v3602_v17, %v3598_v53  ;;  %5696 = vmatprep.subr.mxu0 %v6157_v6  ;;  %v4329_v29 = vmul.f32 %v4327_v31, %v4323_v20 }
0x17d2   : > { %v3678_v16 = vadd.f32 %v6979_v41, %v3604_v21 }
0x17d3   : > { %v3968_v14 = vpop.permute.xlu1 %3967  ;;  %v4411_v34 = vld [vmem:[#allocation5 + $0x20] sm:$0xff] }
0x17d4   : > { %3679 = vst.msk [vmem:[#allocation5 + $0x30] sm:$0xff] %vm493_vm1, %v3678_v16  ;;  %v3970_v63 = vmul.f32 %v3968_v14, %v3964_v11  ;;  %v4417_v48 = vmul.f32 %v4415_v57, %v4411_v34 }
0x17d6   : > { %5694 = vmatmul.mubr.msk.f32.vlgmr.msra.gmra.mrb[36].mxu0 %vm493_vm1, %v4329_v29 }
0x17d7   : > { %v4040_v52 = vpop.f32.mrb[34].mxu0  ;;  %5697 = vmatpush3.msk.msra.mxu0 %vm4070_vm6, %v5083_v62  ;;  %5698 = vmatprep.mubr.msk.f32.mxu0 %vm6156_vm0, %v6157_v6  ;;  %v4499_v26 = vld [vmem:[#allocation5 + $0x28] sm:$0xff] }
0x17d8   : > { %v4044_v41 = vadd.f32 %v4040_v52, %v3970_v63  ;;  %v5675_v56 = vpop.f32.mrb[35].mxu0  ;;  %5701 = vmatprep.subr.mxu0 %v6157_v6  ;;  %v4505_v38 = vmul.f32 %v4503_v37, %v4499_v26 }
0x17da   : > { %4045 = vst.msk [vmem:[#allocation5 + $0x38] sm:$0xff] %vm493_vm1, %v4044_v41 }
0x17db   : > { %v4587_v28 = vld [vmem:[#allocation5 + $0x30] sm:$0xff] }
0x17dc   : > { %v4593_v42 = vmul.f32 %v4591_v9, %v4587_v28 }
0x17de   : > { %5699 = vmatmul.mubr.msk.f32.vlgmr.msra.gmra.mrb[36].mxu0 %vm493_vm1, %v4417_v48 }
0x17df   : > { %5702 = vmatpush3.msk.msra.mxu0 %vm4070_vm6, %v5086_v58  ;;  %5703 = vmatprep.mubr.msk.f32.mxu0 %vm6156_vm0, %v6157_v6 }
0x17e0   : > { %5706 = vmatprep.subr.mxu0 %v6157_v6 }
0x17e1   : > { %v4675_v5 = vld [vmem:[#allocation5 + $0x38] sm:$0xff] }
0x17e6   : > { %5704 = vmatmul.mubr.msk.f32.vlgmr.msra.gmra.mrb[36].mxu0 %vm493_vm1, %v4505_v38 }
0x17e7   : > { %5707 = vmatpush3.msk.msra.mxu0 %vm4070_vm6, %v5089_v39  ;;  %5708 = vmatprep.mubr.msk.f32.mxu0 %vm6156_vm0, %v6157_v6 }
0x17e8   : > { %5711 = vmatprep.subr.mxu0 %v6157_v6 }
0x17ee   : > { %5709 = vmatmul.mubr.msk.f32.vlgmr.msra.gmra.mrb[36].mxu0 %vm493_vm1, %v4593_v42 }
0x17ef   : > { %5712 = vmatpush3.msk.msra.mxu0 %vm4070_vm6, %v5092_v2  ;;  %5713 = vmatprep.mubr.msk.f32.mxu0 %vm6156_vm0, %v6157_v6 }
0x1827   : > { %v4679_v43 = vpop.permute.xlu1 %4678 }
0x1828   : > { %v4681_v44 = vmul.f32 %v4679_v43, %v4675_v5 }
0x182a   : > { %5714 = vmatmul.mubr.msk.f32.vlgmr.msra.gmra.mrb[36].mxu0 %vm493_vm1, %v4681_v44 }
0x18fd   : > { %v4756_v59 = vpop.f32.mrb[36].mxu0 }
0x18fe   : > { %v5948_v45 = vadd.f32 %v5071_v60, %v4756_v59  ;;  %v5715_v27 = vpop.f32.mrb[37].mxu0 }
0x1900   : > { %4761 = vst.msk [vmem:[%s388_s29] sm:$0xff] %vm419_vm2, %v5948_v45 }
0x1901   : > { %6088 = shalt.err (!%p6085_p5)
}
0x1902   : > { %s6089_s17 = scalar_lea.hbm %s7179_s12, 128  ;;  %s6093_s29 = scalar_lea.hbm %s7237_s10, 256 }
0x1903   : > { %p6090_p6 = scmp.ne.s32.totalorder %s7179_s12, %s6089_s17  ;;  %p6094_p10 = scmp.lt.u32.totalorder %s7179_s12, %s7237_s10 }
0x1904   : > { %p6095_p11 = scmp.lt.u32.totalorder %s6093_s29, %s6089_s17  ;;  %p6097_p13 = scmp.lt.u32.totalorder %s6089_s17, %s7179_s12 }
0x1905   : > { %p6091_p7 = pnand %p6090_p6, %p6256_p4 }
0x1906   : > { %p6096_p12 = por %p6095_p11, %p6094_p10 }
0x1907   : > { %p6092_p9 = pneg %p6091_p7 }
0x1908   : > { %p6098_p0 = por %p6097_p13, %p6096_p12 }
0x190a   : > { %p6099_p1 = pnand %p6098_p0, %p6092_p9 }
0x190c   : > { %6102 = shalt.err (!%p6099_p1)
}
0x190d   : > { %5963 = dma.vmem_to_hbm [thread:$0]  (%p6256_p4), %s7181_s30, 128, %s7179_s12, %s4763_s21  }
0x190e PF: > { %p5969_p2 = scmp.ge.s32.totalorder %s6153_s18, 2  ;;  %s4788_s19 = sand.u32 1, %s6133_s13  }
0x190f   : > { %s4789_s16 = scalar_lea.sflag [#allocation7], %s4788_s19 }
0x1910   : > { %p5966_p3 = pnand %p5969_p2, %p6263_p8 }
0x1912   : > { %6128 = dma.done.wait (!%p5966_p3), %s4789_s16, 128  }
0x1913   : > { %6130 = vsyncadd (!%p5966_p3), %s4789_s16, 4294967168  ;;  %s23_s18 = sadd.s32 1, %s6153_s18   ;;  %s7246_s16 = sld [smem:[#allocation9_spill]] }
0x1914   : > { %p20_p5 = scmp.ge.s32.totalorder %s23_s18, 4   ;;  %s7247_s17 = sld [smem:[#allocation10_spill]] }
0x1915   : > { %s7248_s13 = smov %s6137_s14  ;;  %s7249_s14 = smov %s6141_s15 }
0x1916   : > { %s7250_s15 = smov %s6269_s26  ;;  %22 = sbr.rel (!%p20_p5) target bundleno = 4 (0x4), region = 190 }
0x191d   :  { %4794 = vsyncpa [#allocation7], 1 }
0x191e   :  { %4796 = vsyncpa [#allocation7 + $0x1], 1 }

</bundles_post_ra>
